<compile_context>
chip_gen: v7x
topology: tpu7x:2x2x1
jax: 0.10.0
libtpu: 0.0.40
codegen_flags: <defaults>
</compile_context>

<pallas_src>
import functools

import numpy as np
import jax
import jax.numpy as jnp
from jax.experimental import pallas as pl
from jax.experimental.pallas import tpu as pltpu


G_CHUNK = 8      # gt boxes per inner chunk (one sublane group)
SUB = 128        # lane-dense roi sub-tile (one vreg wide)
N_SUB = 2        # roi sub-tiles per grid step -> 256 rois per grid step
R_BLOCK = SUB * N_SUB


# --------------------------------------------------------------------------- #
# Padded Sutherland-Hodgman clipping helpers (trace-time Python; every array
# is a (G_CHUNK, SUB) f32 tile == exactly one vreg).
# --------------------------------------------------------------------------- #
def _clip_edge(cx, cy, dc, nx, ny, dn, proj_fn):
    """Clip one polygon edge against a half-plane, padded to 2 emitted points.

    dc / dn are signed distances of the current / next vertex (inside >= 0).
    Duplicate or boundary-projected points are emitted so the output count is
    fixed; they are collinear with the clip line, so the shoelace area of the
    final polygon is unchanged.
    """
    cur_in = dc >= 0.0
    nxt_in = dn >= 0.0
    crossed = cur_in != nxt_in
    denom = dc - dn
    # sign-preserving guard against a zero denominator (never flips the sign,
    # so t stays in [0, 1] when `crossed`, up to the approx-recip error).
    denom = denom + jnp.where(denom >= 0.0, 1e-9, -1e-9)
    t = jnp.minimum(dc * pl.reciprocal(denom, approx=True), 1.0)
    ix = cx + t * (nx - cx)
    iy = cy + t * (ny - cy)
    prx, pry = proj_fn(nx, ny)
    p1x = jnp.where(crossed, ix, jnp.where(nxt_in, nx, prx))
    p1y = jnp.where(crossed, iy, jnp.where(nxt_in, ny, pry))
    p2x = jnp.where(nxt_in, nx, jnp.where(cur_in, ix, prx))
    p2y = jnp.where(nxt_in, ny, jnp.where(cur_in, iy, pry))
    return p1x, p1y, p2x, p2y


class _StreamClipStage:
    """Streaming clip stage: consumes polygon vertices one at a time and emits
    the (padded) clipped vertices into `sink` without materializing the
    intermediate polygon."""

    def __init__(self, dist_fn, proj_fn, sink):
        self.dist_fn, self.proj_fn, self.sink = dist_fn, proj_fn, sink
        self.first = None
        self.prev = None

    def push(self, x, y):
        d = self.dist_fn(x, y)
        if self.prev is None:
            self.first = (x, y, d)
        else:
            cx, cy, dc = self.prev
            p1x, p1y, p2x, p2y = _clip_edge(cx, cy, dc, x, y, d, self.proj_fn)
            self.sink.push(p1x, p1y)
            self.sink.push(p2x, p2y)
        self.prev = (x, y, d)

    def close(self):
        cx, cy, dc = self.prev
        fx, fy, fd = self.first
        p1x, p1y, p2x, p2y = _clip_edge(cx, cy, dc, fx, fy, fd, self.proj_fn)
        self.sink.push(p1x, p1y)
        self.sink.push(p2x, p2y)
        self.sink.close()


class _ShoelaceSink:
    """Accumulates twice the signed area of the streamed polygon."""

    def __init__(self):
        self.first = None
        self.prev = None
        self.area2 = 0.0

    def push(self, x, y):
        if self.prev is None:
            self.first = (x, y)
        else:
            px, py = self.prev
            self.area2 = self.area2 + (px * y - x * py)
        self.prev = (x, y)

    def close(self):
        px, py = self.prev
        fx, fy = self.first
        self.area2 = self.area2 + (px * fy - fx * py)


# --------------------------------------------------------------------------- #
# Pallas kernel: rotated 3D IoU (gt x roi) + class-aware max / argmax over gt.
# rois block: (1, 1, N_SUB, 10, SUB), gt block: (1, G_pad, 13).
# --------------------------------------------------------------------------- #
def _iou_assign_kernel(rois_ref, gt_ref, max_ref, assign_ref, *,
                       by_class, n_gchunks):
    g_total = n_gchunks * G_CHUNK

    @pl.loop(0, N_SUB)
    def _sub_tile(st):
        rois = rois_ref[0, 0, st, :, :]            # (10, SUB)
        rx, ry = rois[0:1], rois[1:2]              # (1, SUB) rows
        hx, hy = rois[2:3], rois[3:4]
        rz_min, rz_max = rois[4:5], rois[5:6]
        vol_a = rois[6:7]
        cos_r, sin_r = rois[7:8], rois[8:9]
        rlab = rois[9:10]

        shape = (G_CHUNK, SUB)
        # hoisted sublane broadcasts of values reused many times inside the
        # gt-chunk loop (JAX does not CSE broadcast_in_dim)
        rx_b = jnp.broadcast_to(rx, shape)
        ry_b = jnp.broadcast_to(ry, shape)
        cos_b = jnp.broadcast_to(cos_r, shape)
        sin_b = jnp.broadcast_to(sin_r, shape)
        hx_b = jnp.broadcast_to(hx, shape)
        hy_b = jnp.broadcast_to(hy, shape)
        neg_hx_b = -hx_b
        neg_hy_b = -hy_b

        # clip half-planes of the roi box in its local (axis-aligned) frame
        dist1 = lambda x, y: hx_b - x              # x <= +hx
        proj1 = lambda x, y: (hx_b, y)
        dist2 = lambda x, y: x + hx_b              # x >= -hx
        proj2 = lambda x, y: (neg_hx_b, y)
        dist3 = lambda x, y: hy_b - y              # y <= +hy
        proj3 = lambda x, y: (x, hy_b)
        dist4 = lambda x, y: y + hy_b              # y >= -hy
        proj4 = lambda x, y: (x, neg_hy_b)

        def chunk_body(c, carry):
            best_iou, best_idx = carry
            goff = c * G_CHUNK
            if not isinstance(c, int):
                goff = pl.multiple_of(goff, G_CHUNK)
            gt = gt_ref[0, pl.ds(goff, G_CHUNK), :]          # (G_CHUNK, 13)

            # gt BEV corners (precomputed world frame, CCW) -> roi local frame
            corners = []
            for k in range(4):
                px = gt[:, 2 * k:2 * k + 1] - rx_b
                py = gt[:, 2 * k + 1:2 * k + 2] - ry_b
                corners.append((cos_b * px + sin_b * py,
                                cos_b * py - sin_b * px))

            # pass 1 (x <= +hx): materialize the 8-vertex polygon; the signed
            # distance of the shared vertex is carried between edges
            poly = []
            cx, cy = corners[0]
            dc = d_first = dist1(cx, cy)
            for i in range(1, 5):
                nx, ny = corners[i % 4]
                dn = d_first if i == 4 else dist1(nx, ny)
                p1x, p1y, p2x, p2y = _clip_edge(cx, cy, dc, nx, ny, dn, proj1)
                poly += [(p1x, p1y), (p2x, p2y)]
                cx, cy, dc = nx, ny, dn

            # passes 2..4 streamed and fused with the shoelace accumulation
            shoe = _ShoelaceSink()
            stage4 = _StreamClipStage(dist4, proj4, shoe)
            stage3 = _StreamClipStage(dist3, proj3, stage4)
            cx, cy = poly[0]
            dc = d_first = dist2(cx, cy)
            for i in range(1, 9):
                nx, ny = poly[i % 8]
                dn = d_first if i == 8 else dist2(nx, ny)
                p1x, p1y, p2x, p2y = _clip_edge(cx, cy, dc, nx, ny, dn, proj2)
                stage3.push(p1x, p1y)
                stage3.push(p2x, p2y)
                cx, cy, dc = nx, ny, dn
            stage3.close()
            overlap_bev = jnp.maximum(0.5 * shoe.area2, 0.0)   # (G_CHUNK, SUB)

            # height overlap + exact 3D IoU (feeds hard fg/bg thresholds)
            gz_min, gz_max = gt[:, 8:9], gt[:, 9:10]
            vol_b, glab, gvalid = gt[:, 10:11], gt[:, 11:12], gt[:, 12:13]
            h_ov = jnp.maximum(
                jnp.minimum(rz_max, gz_max) - jnp.maximum(rz_min, gz_min), 0.0)
            inter3d = overlap_bev * h_ov
            union = jnp.maximum(vol_a + vol_b - inter3d, 1e-6)
            iou3d = inter3d / union                # exact divide, not approx

            valid = gvalid > 0.5
            if by_class:
                valid = valid & (glab == rlab)
            masked = jnp.where(valid, iou3d, -1.0)

            # running class-aware max / lowest-index argmax over gt chunks
            chunk_max = jnp.max(masked, axis=0, keepdims=True)        # (1, SUB)
            gidx = jax.lax.broadcasted_iota(jnp.int32, masked.shape, 0) + goff
            chunk_arg = jnp.min(
                jnp.where(masked >= chunk_max, gidx, g_total),
                axis=0, keepdims=True).astype(jnp.int32)
            take = chunk_max > best_iou
            return (jnp.maximum(chunk_max, best_iou),
                    jnp.where(take, chunk_arg, best_idx))

        init = (jnp.full((1, SUB), -1.0, jnp.float32),
                jnp.zeros((1, SUB), jnp.int32))
        if n_gchunks == 1:
            best_iou, best_idx = chunk_body(0, init)
        else:
            best_iou, best_idx = jax.lax.fori_loop(0, n_gchunks, chunk_body, init)

        max_ref[0, 0, st, :, :] = jnp.maximum(best_iou, 0.0)
        assign_ref[0, 0, st, :, :] = best_idx


def compute_max_iou_assign(rois, roi_labels, gt_boxes, cfg):
    B, R, _ = rois.shape
    G = gt_boxes.shape[1]
    n_rblk = -(-R // R_BLOCK)
    R_pad = n_rblk * R_BLOCK
    n_gchunks = -(-G // G_CHUNK)
    G_pad = n_gchunks * G_CHUNK

    # per-roi derived features, laid out (B, n_rblk, N_SUB, 10, SUB)
    b7 = rois[..., :7].astype(jnp.float32)
    x, y, z = b7[..., 0], b7[..., 1], b7[..., 2]
    dx, dy, dz, ang = b7[..., 3], b7[..., 4], b7[..., 5], b7[..., 6]
    roi_feat = jnp.stack(
        [x, y, 0.5 * dx, 0.5 * dy, z - 0.5 * dz, z + 0.5 * dz,
         dx * dy * dz, jnp.cos(ang), jnp.sin(ang),
         roi_labels.astype(jnp.float32)], axis=1)               # (B, 10, R)
    if R_pad != R:
        roi_feat = jnp.pad(roi_feat, ((0, 0), (0, 0), (0, R_pad - R)))
    roi_feat = roi_feat.reshape(B, 10, n_rblk, N_SUB, SUB).transpose(0, 2, 3, 1, 4)

    # per-gt derived features: (B, G_pad, 13)
    g = gt_boxes.astype(jnp.float32)
    gx, gy, gz = g[..., 0], g[..., 1], g[..., 2]
    gdx, gdy, gdz, gang = g[..., 3], g[..., 4], g[..., 5], g[..., 6]
    glab = g[..., -1]
    cos_g, sin_g = jnp.cos(gang), jnp.sin(gang)
    cols = []
    for sx, sy in ((1.0, 1.0), (-1.0, 1.0), (-1.0, -1.0), (1.0, -1.0)):  # CCW
        ox = sx * 0.5 * gdx
        oy = sy * 0.5 * gdy
        cols.append(gx + ox * cos_g - oy * sin_g)
        cols.append(gy + ox * sin_g + oy * cos_g)
    # TODO(synk): torch trims only *trailing* all-zero gt rows; here any all-zero
    # row is treated as padding (identical behaviour for normally padded inputs).
    cols += [gz - 0.5 * gdz, gz + 0.5 * gdz, gdx * gdy * gdz, glab,
             (jnp.sum(jnp.abs(g), axis=-1) > 0.0).astype(jnp.float32)]
    gt_feat = jnp.stack(cols, axis=-1)                          # (B, G, 13)
    if G_pad != G:
        gt_feat = jnp.pad(gt_feat, ((0, 0), (0, G_pad - G), (0, 0)))

    kernel = functools.partial(
        _iou_assign_kernel,
        by_class=bool(cfg['SAMPLE_ROI_BY_EACH_CLASS']),
        n_gchunks=n_gchunks)

    # grid order: b outer, r inner -> the gt block (b, 0, 0) is constant across
    # the inner axis and its DMA is skipped on revisits.
    max_o, assign = pl.pallas_call(
        kernel,
        grid=(B, n_rblk),
        in_specs=[
            pl.BlockSpec((1, 1, N_SUB, 10, SUB), lambda b, r: (b, r, 0, 0, 0)),
            pl.BlockSpec((1, G_pad, 13), lambda b, r: (b, 0, 0)),
        ],
        out_specs=[
            pl.BlockSpec((1, 1, N_SUB, 1, SUB), lambda b, r: (b, r, 0, 0, 0)),
            pl.BlockSpec((1, 1, N_SUB, 1, SUB), lambda b, r: (b, r, 0, 0, 0)),
        ],
        out_shape=[
            jax.ShapeDtypeStruct((B, n_rblk, N_SUB, 1, SUB), jnp.float32),
            jax.ShapeDtypeStruct((B, n_rblk, N_SUB, 1, SUB), jnp.int32),
        ],
        compiler_params=pltpu.CompilerParams(
            dimension_semantics=("parallel", "parallel")),
    )(roi_feat, gt_feat)

    max_o = max_o.reshape(B, R_pad)[:, :R]
    assign = assign.reshape(B, R_pad)[:, :R]
    return max_o, assign


# --------------------------------------------------------------------------- #
# reg_valid_mask + rcnn_cls_labels: tiny elementwise work on (B, M) -> plain JAX
# (a pallas_call launch would cost more than the compute).
# --------------------------------------------------------------------------- #
def compute_labels(batch_roi_ious, cfg):
    iou = batch_roi_ious
    reg_valid_mask = (iou > cfg['REG_FG_THRESH']).astype(jnp.int32)
    score_type = cfg['CLS_SCORE_TYPE']
    if score_type == 'cls':
        lab = (iou > cfg['CLS_FG_THRESH']).astype(jnp.int32)
        ignore = (iou > cfg['CLS_BG_THRESH']) & (iou < cfg['CLS_FG_THRESH'])
        cls_labels = jnp.where(ignore, -1, lab)
    elif score_type == 'roi_iou':
        fg = iou > cfg['CLS_FG_THRESH']
        bg = iou < cfg['CLS_BG_THRESH']
        interval = (~fg) & (~bg)
        cls_labels = jnp.where(
            interval,
            (iou - cfg['CLS_BG_THRESH']) / (cfg['CLS_FG_THRESH'] - cfg['CLS_BG_THRESH']),
            fg.astype(jnp.float32))
    elif score_type == 'raw_roi_iou':
        cls_labels = iou
    else:
        raise NotImplementedError(score_type)
    return reg_valid_mask, cls_labels


# --------------------------------------------------------------------------- #
# Subsampling glue (plain JAX, static shapes, vmapped over batch).
# --------------------------------------------------------------------------- #
def _subsample_rois(max_overlaps, key, cfg):
    # TODO(synk): torch uses data-dependent nonzero()/np.random permutations; this
    # reproduces it with static shapes via masked random sorting + modulo sampling
    # (same distribution family, not bit-exact RNG).
    R = max_overlaps.shape[0]
    M = cfg['ROI_PER_IMAGE']
    assert M <= R
    fg_per_image = int(np.round(cfg['FG_RATIO'] * M))
    fg_thresh = min(cfg['REG_FG_THRESH'], cfg['CLS_FG_THRESH'])

    fg_mask = max_overlaps >= fg_thresh
    easy_mask = max_overlaps < cfg['CLS_BG_THRESH_LO']
    hard_mask = (max_overlaps < cfg['REG_FG_THRESH']) & \
                (max_overlaps >= cfg['CLS_BG_THRESH_LO'])

    k_perm, k_fg, k_hard, k_easy = jax.random.split(key, 4)
    rand = jax.random.uniform(k_perm, (R,))

    def ordered(mask):
        return jnp.argsort(jnp.where(mask, rand, 2.0 + rand))

    fg_order, hard_order, easy_order = ordered(fg_mask), ordered(hard_mask), ordered(easy_mask)
    fg_num = jnp.sum(fg_mask.astype(jnp.int32))
    hard_num = jnp.sum(hard_mask.astype(jnp.int32))
    easy_num = jnp.sum(easy_mask.astype(jnp.int32))
    bg_num = hard_num + easy_num

    has_fg = fg_num > 0
    has_bg = bg_num > 0
    pos = jnp.arange(M, dtype=jnp.int32)

    fg_cnt = jnp.where(has_fg & has_bg,
                       jnp.minimum(fg_per_image, fg_num),
                       jnp.where(has_fg, M, 0)).astype(jnp.int32)

    fg_rand = jax.random.randint(k_fg, (M,), 0, 1 << 30) % jnp.maximum(fg_num, 1)
    fg_pick = jnp.where(has_bg, fg_order[pos], fg_order[fg_rand])

    bg_needed = M - fg_cnt
    hard_target = jnp.where(
        (hard_num > 0) & (easy_num > 0),
        jnp.minimum((bg_needed.astype(jnp.float32) * cfg['HARD_BG_RATIO']).astype(jnp.int32),
                    hard_num),
        jnp.where(hard_num > 0, bg_needed, 0))
    hard_rand = jax.random.randint(k_hard, (M,), 0, 1 << 30) % jnp.maximum(hard_num, 1)
    easy_rand = jax.random.randint(k_easy, (M,), 0, 1 << 30) % jnp.maximum(easy_num, 1)
    bg_pos = pos - fg_cnt
    bg_pick = jnp.where(bg_pos < hard_target, hard_order[hard_rand], easy_order[easy_rand])

    return jnp.where(pos < fg_cnt, fg_pick, bg_pick).astype(jnp.int32)


# --------------------------------------------------------------------------- #
# Full forward (ProposalTargetLayer.forward equivalent)
# --------------------------------------------------------------------------- #
def proposal_target_layer_forward(batch_dict, key, cfg):
    rois = batch_dict['rois']                 # (B, R, 7 + C)
    roi_scores = batch_dict['roi_scores']     # (B, R)
    roi_labels = batch_dict['roi_labels']     # (B, R) int
    gt_boxes = batch_dict['gt_boxes']         # (B, N, 7 + C + 1)
    B = batch_dict['batch_size']

    max_overlaps, gt_assignment = compute_max_iou_assign(rois, roi_labels, gt_boxes, cfg)

    keys = jax.random.split(key, B)
    sampled = jax.vmap(lambda mo, k: _subsample_rois(mo, k, cfg))(max_overlaps, keys)

    batch_rois = jnp.take_along_axis(rois, sampled[..., None], axis=1)
    batch_roi_labels = jnp.take_along_axis(roi_labels, sampled, axis=1)
    batch_roi_ious = jnp.take_along_axis(max_overlaps, sampled, axis=1)
    batch_roi_scores = jnp.take_along_axis(roi_scores, sampled, axis=1)
    ga = jnp.take_along_axis(gt_assignment, sampled, axis=1)
    batch_gt_of_rois = jnp.take_along_axis(gt_boxes, ga[..., None], axis=1)

    reg_valid_mask, rcnn_cls_labels = compute_labels(batch_roi_ious, cfg)

    return {
        'rois': batch_rois,
        'gt_of_rois': batch_gt_of_rois,
        'gt_iou_of_rois': batch_roi_ious,
        'roi_scores': batch_roi_scores,
        'roi_labels': batch_roi_labels,
        'reg_valid_mask': reg_valid_mask,
        'rcnn_cls_labels': rcnn_cls_labels,
    }


# --------------------------------------------------------------------------- #
if __name__ == "__main__":
    CFG = dict(ROI_PER_IMAGE=16, FG_RATIO=0.5,
               REG_FG_THRESH=0.55, CLS_FG_THRESH=0.75,
               CLS_BG_THRESH=0.25, CLS_BG_THRESH_LO=0.1,
               HARD_BG_RATIO=0.8, CLS_SCORE_TYPE='roi_iou',
               SAMPLE_ROI_BY_EACH_CLASS=True)

    B, R, G = 2, 32, 8   # batch, num_rois, num_gt ; code_size = 7
    key = jax.random.PRNGKey(0)
    ks = jax.random.split(key, 8)

    # deterministic synthetic gt boxes: [x, y, z, dx, dy, dz, heading, label]
    gcent = jax.random.uniform(ks[0], (B, G, 3), minval=0.0, maxval=20.0)
    gdims = jax.random.uniform(ks[1], (B, G, 3), minval=1.0, maxval=4.0)
    gang = jax.random.uniform(ks[2], (B, G, 1), minval=-3.14, maxval=3.14)
    glab = jax.random.randint(ks[3], (B, G, 1), 1, 4).astype(jnp.float32)
    gt_boxes = jnp.concatenate([gcent, gdims, gang, glab], axis=-1)
    # zero-pad trailing gt rows of batch 0 (invalid / padding gt)
    valid_counts = jnp.array([6, 8])
    row_mask = (jnp.arange(G)[None, :] < valid_counts[:, None])[..., None].astype(jnp.float32)
    gt_boxes = gt_boxes * row_mask

    # rois: jittered copies of the gt boxes (so fg/bg categories are exercised)
    base = jnp.tile(gt_boxes[:, :, :7], (1, R // G, 1))
    noise = 0.3 * jax.random.normal(ks[4], (B, R, 7))
    rois = base + noise
    rois = rois.at[..., 3:6].set(jnp.abs(rois[..., 3:6]) + 0.5)
    # roi 0 is an exact copy of gt 0 -> its IoU must be ~1 with assignment 0
    rois = rois.at[:, 0, :].set(gt_boxes[:, 0, :7])

    roi_labels = jnp.tile(gt_boxes[:, :, 7].astype(jnp.int32), (1, R // G))
    roi_labels = jnp.where(roi_labels == 0, 1, roi_labels)
    roi_scores = jax.random.uniform(ks[5], (B, R))

    # IoU-kernel smoke test against the analytically known value
    mo, gt_assign = compute_max_iou_assign(rois, roi_labels, gt_boxes, CFG)
    jax.block_until_ready(mo)
    assert np.asarray(jnp.isfinite(mo)).all()
    assert np.allclose(np.asarray(mo[:, 0]), 1.0, atol=2e-3), np.asarray(mo[:, 0])
    assert np.asarray(gt_assign[:, 0]).tolist() == [0, 0], np.asarray(gt_assign[:, 0])

    batch_dict = dict(batch_size=B, rois=rois, roi_scores=roi_scores,
                      roi_labels=roi_labels, gt_boxes=gt_boxes)

    out = proposal_target_layer_forward(batch_dict, jax.random.PRNGKey(42), CFG)
    for v in out.values():
        jax.block_until_ready(v)

    M = CFG['ROI_PER_IMAGE']
    assert out['rois'].shape == (B, M, 7)
    assert out['gt_of_rois'].shape == (B, M, 8)
    assert out['gt_iou_of_rois'].shape == (B, M)
    assert out['reg_valid_mask'].shape == (B, M)
    assert out['rcnn_cls_labels'].shape == (B, M)
    print("KERNEL_OK")
</pallas_src>

<mosaic_0001>
module attributes {stable_mosaic.version = 11 : i64} {
  func.func @_iou_assign_kernel(%arg0: i32, %arg1: i32, %arg2: memref<1x1x2x10x128xf32, #tpu.memory_space<vmem>>, %arg3: memref<1x8x13xf32, #tpu.memory_space<vmem>>, %arg4: memref<1x1x2x1x128xf32, #tpu.memory_space<vmem>>, %arg5: memref<1x1x2x1x128xi32, #tpu.memory_space<vmem>>) attributes {dimension_semantics = [#tpu.dimension_semantics<parallel>, #tpu.dimension_semantics<parallel>], iteration_bounds = array<i64: 2, 1>, scalar_prefetch = 0 : i64, scratch_operands = 0 : i64, tpu.core_type = #tpu.core_type<tc>, window_params = [{transform_indices = @transform_0, window_bounds = array<i64: 1, 1, 2, 10, 128>}, {transform_indices = @transform_1, window_bounds = array<i64: 1, 8, 13>}, {transform_indices = @transform_2, window_bounds = array<i64: 1, 1, 2, 1, 128>}, {transform_indices = @transform_3, window_bounds = array<i64: 1, 1, 2, 1, 128>}]} {
    %c0_i32 = arith.constant 0 : i32
    %c2_i32 = arith.constant 2 : i32
    %0 = arith.addi %c0_i32, %c2_i32 : i32
    %c1_i32 = arith.constant 1 : i32
    scf.for %arg6 = %c0_i32 to %0 step %c1_i32  : i32 {
      %c1_i32_1 = arith.constant 1 : i32
      %1 = arith.muli %arg6, %c1_i32_1 : i32
      %c0_i32_2 = arith.constant 0 : i32
      %2 = arith.addi %c0_i32_2, %1 : i32
      %c0 = arith.constant 0 : index
      %c0_3 = arith.constant 0 : index
      %3 = arith.index_cast %2 : i32 to index
      %c0_4 = arith.constant 0 : index
      %c0_5 = arith.constant 0 : index
      %4 = vector.load %arg2[%c0, %c0_3, %3, %c0_4, %c0_5] : memref<1x1x2x10x128xf32, #tpu.memory_space<vmem>>, vector<1x1x1x10x128xf32>
      %5 = vector.shape_cast %4 : vector<1x1x1x10x128xf32> to vector<10x128xf32>
      %6 = vector.extract_strided_slice %5 {offsets = [0, 0], sizes = [1, 128], strides = [1, 1]} : vector<10x128xf32> to vector<1x128xf32>
      %7 = vector.extract_strided_slice %5 {offsets = [1, 0], sizes = [1, 128], strides = [1, 1]} : vector<10x128xf32> to vector<1x128xf32>
      %8 = vector.extract_strided_slice %5 {offsets = [2, 0], sizes = [1, 128], strides = [1, 1]} : vector<10x128xf32> to vector<1x128xf32>
      %9 = vector.extract_strided_slice %5 {offsets = [3, 0], sizes = [1, 128], strides = [1, 1]} : vector<10x128xf32> to vector<1x128xf32>
      %10 = vector.extract_strided_slice %5 {offsets = [4, 0], sizes = [1, 128], strides = [1, 1]} : vector<10x128xf32> to vector<1x128xf32>
      %11 = vector.extract_strided_slice %5 {offsets = [5, 0], sizes = [1, 128], strides = [1, 1]} : vector<10x128xf32> to vector<1x128xf32>
      %12 = vector.extract_strided_slice %5 {offsets = [6, 0], sizes = [1, 128], strides = [1, 1]} : vector<10x128xf32> to vector<1x128xf32>
      %13 = vector.extract_strided_slice %5 {offsets = [7, 0], sizes = [1, 128], strides = [1, 1]} : vector<10x128xf32> to vector<1x128xf32>
      %14 = vector.extract_strided_slice %5 {offsets = [8, 0], sizes = [1, 128], strides = [1, 1]} : vector<10x128xf32> to vector<1x128xf32>
      %15 = vector.extract_strided_slice %5 {offsets = [9, 0], sizes = [1, 128], strides = [1, 1]} : vector<10x128xf32> to vector<1x128xf32>
      %16 = vector.shape_cast %6 : vector<1x128xf32> to vector<1x128xf32>
      %17 = vector.broadcast %16 : vector<1x128xf32> to vector<8x128xf32>
      %18 = vector.shape_cast %7 : vector<1x128xf32> to vector<1x128xf32>
      %19 = vector.broadcast %18 : vector<1x128xf32> to vector<8x128xf32>
      %20 = vector.shape_cast %13 : vector<1x128xf32> to vector<1x128xf32>
      %21 = vector.broadcast %20 : vector<1x128xf32> to vector<8x128xf32>
      %22 = vector.shape_cast %14 : vector<1x128xf32> to vector<1x128xf32>
      %23 = vector.broadcast %22 : vector<1x128xf32> to vector<8x128xf32>
      %24 = vector.shape_cast %8 : vector<1x128xf32> to vector<1x128xf32>
      %25 = vector.broadcast %24 : vector<1x128xf32> to vector<8x128xf32>
      %26 = vector.shape_cast %9 : vector<1x128xf32> to vector<1x128xf32>
      %27 = vector.broadcast %26 : vector<1x128xf32> to vector<8x128xf32>
      %cst = arith.constant 0.000000e+00 : f32
      %28 = vector.broadcast %cst : f32 to vector<8x128xf32>
      %29 = arith.subf %28, %25 : vector<8x128xf32>
      %cst_6 = arith.constant 0.000000e+00 : f32
      %30 = vector.broadcast %cst_6 : f32 to vector<8x128xf32>
      %31 = arith.subf %30, %27 : vector<8x128xf32>
      %cst_7 = arith.constant -1.000000e+00 : f32
      %32 = vector.broadcast %cst_7 : f32 to vector<1x128xf32>
      %c0_i32_8 = arith.constant 0 : i32
      %33 = vector.broadcast %c0_i32_8 : i32 to vector<1x128xi32>
      %c0_9 = arith.constant 0 : index
      %c0_10 = arith.constant 0 : index
      %c0_11 = arith.constant 0 : index
      %34 = vector.load %arg3[%c0_9, %c0_10, %c0_11] : memref<1x8x13xf32, #tpu.memory_space<vmem>>, vector<1x8x13xf32>
      %35 = vector.shape_cast %34 : vector<1x8x13xf32> to vector<8x13xf32>
      %36 = vector.extract_strided_slice %35 {offsets = [0, 0], sizes = [8, 1], strides = [1, 1]} : vector<8x13xf32> to vector<8x1xf32>
      %37 = vector.broadcast %36 : vector<8x1xf32> to vector<8x128xf32>
      %38 = arith.subf %37, %17 : vector<8x128xf32>
      %39 = vector.extract_strided_slice %35 {offsets = [0, 1], sizes = [8, 1], strides = [1, 1]} : vector<8x13xf32> to vector<8x1xf32>
      %40 = vector.broadcast %39 : vector<8x1xf32> to vector<8x128xf32>
      %41 = arith.subf %40, %19 : vector<8x128xf32>
      %42 = arith.mulf %21, %38 : vector<8x128xf32>
      %43 = arith.mulf %23, %41 : vector<8x128xf32>
      %44 = arith.addf %42, %43 : vector<8x128xf32>
      %45 = arith.mulf %21, %41 : vector<8x128xf32>
      %46 = arith.mulf %23, %38 : vector<8x128xf32>
      %47 = arith.subf %45, %46 : vector<8x128xf32>
      %48 = vector.extract_strided_slice %35 {offsets = [0, 2], sizes = [8, 1], strides = [1, 1]} : vector<8x13xf32> to vector<8x1xf32>
      %49 = vector.broadcast %48 : vector<8x1xf32> to vector<8x128xf32>
      %50 = arith.subf %49, %17 : vector<8x128xf32>
      %51 = vector.extract_strided_slice %35 {offsets = [0, 3], sizes = [8, 1], strides = [1, 1]} : vector<8x13xf32> to vector<8x1xf32>
      %52 = vector.broadcast %51 : vector<8x1xf32> to vector<8x128xf32>
      %53 = arith.subf %52, %19 : vector<8x128xf32>
      %54 = arith.mulf %21, %50 : vector<8x128xf32>
      %55 = arith.mulf %23, %53 : vector<8x128xf32>
      %56 = arith.addf %54, %55 : vector<8x128xf32>
      %57 = arith.mulf %21, %53 : vector<8x128xf32>
      %58 = arith.mulf %23, %50 : vector<8x128xf32>
      %59 = arith.subf %57, %58 : vector<8x128xf32>
      %60 = vector.extract_strided_slice %35 {offsets = [0, 4], sizes = [8, 1], strides = [1, 1]} : vector<8x13xf32> to vector<8x1xf32>
      %61 = vector.broadcast %60 : vector<8x1xf32> to vector<8x128xf32>
      %62 = arith.subf %61, %17 : vector<8x128xf32>
      %63 = vector.extract_strided_slice %35 {offsets = [0, 5], sizes = [8, 1], strides = [1, 1]} : vector<8x13xf32> to vector<8x1xf32>
      %64 = vector.broadcast %63 : vector<8x1xf32> to vector<8x128xf32>
      %65 = arith.subf %64, %19 : vector<8x128xf32>
      %66 = arith.mulf %21, %62 : vector<8x128xf32>
      %67 = arith.mulf %23, %65 : vector<8x128xf32>
      %68 = arith.addf %66, %67 : vector<8x128xf32>
      %69 = arith.mulf %21, %65 : vector<8x128xf32>
      %70 = arith.mulf %23, %62 : vector<8x128xf32>
      %71 = arith.subf %69, %70 : vector<8x128xf32>
      %72 = vector.extract_strided_slice %35 {offsets = [0, 6], sizes = [8, 1], strides = [1, 1]} : vector<8x13xf32> to vector<8x1xf32>
      %73 = vector.broadcast %72 : vector<8x1xf32> to vector<8x128xf32>
      %74 = arith.subf %73, %17 : vector<8x128xf32>
      %75 = vector.extract_strided_slice %35 {offsets = [0, 7], sizes = [8, 1], strides = [1, 1]} : vector<8x13xf32> to vector<8x1xf32>
      %76 = vector.broadcast %75 : vector<8x1xf32> to vector<8x128xf32>
      %77 = arith.subf %76, %19 : vector<8x128xf32>
      %78 = arith.mulf %21, %74 : vector<8x128xf32>
      %79 = arith.mulf %23, %77 : vector<8x128xf32>
      %80 = arith.addf %78, %79 : vector<8x128xf32>
      %81 = arith.mulf %21, %77 : vector<8x128xf32>
      %82 = arith.mulf %23, %74 : vector<8x128xf32>
      %83 = arith.subf %81, %82 : vector<8x128xf32>
      %84 = arith.subf %25, %44 : vector<8x128xf32>
      %85 = arith.subf %25, %56 : vector<8x128xf32>
      %cst_12 = arith.constant 0.000000e+00 : f32
      %86 = vector.broadcast %cst_12 : f32 to vector<8x128xf32>
      %87 = arith.cmpf oge, %84, %86 : vector<8x128xf32>
      %cst_13 = arith.constant 0.000000e+00 : f32
      %88 = vector.broadcast %cst_13 : f32 to vector<8x128xf32>
      %89 = arith.cmpf oge, %85, %88 : vector<8x128xf32>
      %90 = arith.xori %87, %89 : vector<8x128xi1>
      %91 = arith.subf %84, %85 : vector<8x128xf32>
      %cst_14 = arith.constant 0.000000e+00 : f32
      %92 = vector.broadcast %cst_14 : f32 to vector<8x128xf32>
      %93 = arith.cmpf oge, %91, %92 : vector<8x128xf32>
      %cst_15 = arith.constant 9.99999971E-10 : f32
      %cst_16 = arith.constant -9.99999971E-10 : f32
      %94 = vector.broadcast %cst_15 : f32 to vector<8x128xf32>
      %95 = vector.broadcast %cst_16 : f32 to vector<8x128xf32>
      %96 = arith.select %93, %94, %95 : vector<8x128xi1>, vector<8x128xf32>
      %97 = arith.addf %91, %96 : vector<8x128xf32>
      %98 = tpu.reciprocal %97 {approx = true} : vector<8x128xf32> -> vector<8x128xf32>
      %99 = arith.mulf %84, %98 : vector<8x128xf32>
      %cst_17 = arith.constant 1.000000e+00 : f32
      %100 = vector.broadcast %cst_17 : f32 to vector<8x128xf32>
      %101 = arith.minimumf %99, %100 : vector<8x128xf32>
      %102 = arith.subf %56, %44 : vector<8x128xf32>
      %103 = arith.mulf %101, %102 : vector<8x128xf32>
      %104 = arith.addf %44, %103 : vector<8x128xf32>
      %105 = arith.subf %59, %47 : vector<8x128xf32>
      %106 = arith.mulf %101, %105 : vector<8x128xf32>
      %107 = arith.addf %47, %106 : vector<8x128xf32>
      %108 = arith.select %89, %56, %25 : vector<8x128xi1>, vector<8x128xf32>
      %109 = arith.select %90, %104, %108 : vector<8x128xi1>, vector<8x128xf32>
      %110 = arith.select %89, %59, %59 : vector<8x128xi1>, vector<8x128xf32>
      %111 = arith.select %90, %107, %110 : vector<8x128xi1>, vector<8x128xf32>
      %112 = arith.select %87, %104, %25 : vector<8x128xi1>, vector<8x128xf32>
      %113 = arith.select %89, %56, %112 : vector<8x128xi1>, vector<8x128xf32>
      %114 = arith.select %87, %107, %59 : vector<8x128xi1>, vector<8x128xf32>
      %115 = arith.select %89, %59, %114 : vector<8x128xi1>, vector<8x128xf32>
      %116 = arith.subf %25, %68 : vector<8x128xf32>
      %cst_18 = arith.constant 0.000000e+00 : f32
      %117 = vector.broadcast %cst_18 : f32 to vector<8x128xf32>
      %118 = arith.cmpf oge, %85, %117 : vector<8x128xf32>
      %cst_19 = arith.constant 0.000000e+00 : f32
      %119 = vector.broadcast %cst_19 : f32 to vector<8x128xf32>
      %120 = arith.cmpf oge, %116, %119 : vector<8x128xf32>
      %121 = arith.xori %118, %120 : vector<8x128xi1>
      %122 = arith.subf %85, %116 : vector<8x128xf32>
      %cst_20 = arith.constant 0.000000e+00 : f32
      %123 = vector.broadcast %cst_20 : f32 to vector<8x128xf32>
      %124 = arith.cmpf oge, %122, %123 : vector<8x128xf32>
      %cst_21 = arith.constant 9.99999971E-10 : f32
      %cst_22 = arith.constant -9.99999971E-10 : f32
      %125 = vector.broadcast %cst_21 : f32 to vector<8x128xf32>
      %126 = vector.broadcast %cst_22 : f32 to vector<8x128xf32>
      %127 = arith.select %124, %125, %126 : vector<8x128xi1>, vector<8x128xf32>
      %128 = arith.addf %122, %127 : vector<8x128xf32>
      %129 = tpu.reciprocal %128 {approx = true} : vector<8x128xf32> -> vector<8x128xf32>
      %130 = arith.mulf %85, %129 : vector<8x128xf32>
      %cst_23 = arith.constant 1.000000e+00 : f32
      %131 = vector.broadcast %cst_23 : f32 to vector<8x128xf32>
      %132 = arith.minimumf %130, %131 : vector<8x128xf32>
      %133 = arith.subf %68, %56 : vector<8x128xf32>
      %134 = arith.mulf %132, %133 : vector<8x128xf32>
      %135 = arith.addf %56, %134 : vector<8x128xf32>
      %136 = arith.subf %71, %59 : vector<8x128xf32>
      %137 = arith.mulf %132, %136 : vector<8x128xf32>
      %138 = arith.addf %59, %137 : vector<8x128xf32>
      %139 = arith.select %120, %68, %25 : vector<8x128xi1>, vector<8x128xf32>
      %140 = arith.select %121, %135, %139 : vector<8x128xi1>, vector<8x128xf32>
      %141 = arith.select %120, %71, %71 : vector<8x128xi1>, vector<8x128xf32>
      %142 = arith.select %121, %138, %141 : vector<8x128xi1>, vector<8x128xf32>
      %143 = arith.select %118, %135, %25 : vector<8x128xi1>, vector<8x128xf32>
      %144 = arith.select %120, %68, %143 : vector<8x128xi1>, vector<8x128xf32>
      %145 = arith.select %118, %138, %71 : vector<8x128xi1>, vector<8x128xf32>
      %146 = arith.select %120, %71, %145 : vector<8x128xi1>, vector<8x128xf32>
      %147 = arith.subf %25, %80 : vector<8x128xf32>
      %cst_24 = arith.constant 0.000000e+00 : f32
      %148 = vector.broadcast %cst_24 : f32 to vector<8x128xf32>
      %149 = arith.cmpf oge, %116, %148 : vector<8x128xf32>
      %cst_25 = arith.constant 0.000000e+00 : f32
      %150 = vector.broadcast %cst_25 : f32 to vector<8x128xf32>
      %151 = arith.cmpf oge, %147, %150 : vector<8x128xf32>
      %152 = arith.xori %149, %151 : vector<8x128xi1>
      %153 = arith.subf %116, %147 : vector<8x128xf32>
      %cst_26 = arith.constant 0.000000e+00 : f32
      %154 = vector.broadcast %cst_26 : f32 to vector<8x128xf32>
      %155 = arith.cmpf oge, %153, %154 : vector<8x128xf32>
      %cst_27 = arith.constant 9.99999971E-10 : f32
      %cst_28 = arith.constant -9.99999971E-10 : f32
      %156 = vector.broadcast %cst_27 : f32 to vector<8x128xf32>
      %157 = vector.broadcast %cst_28 : f32 to vector<8x128xf32>
      %158 = arith.select %155, %156, %157 : vector<8x128xi1>, vector<8x128xf32>
      %159 = arith.addf %153, %158 : vector<8x128xf32>
      %160 = tpu.reciprocal %159 {approx = true} : vector<8x128xf32> -> vector<8x128xf32>
      %161 = arith.mulf %116, %160 : vector<8x128xf32>
      %cst_29 = arith.constant 1.000000e+00 : f32
      %162 = vector.broadcast %cst_29 : f32 to vector<8x128xf32>
      %163 = arith.minimumf %161, %162 : vector<8x128xf32>
      %164 = arith.subf %80, %68 : vector<8x128xf32>
      %165 = arith.mulf %163, %164 : vector<8x128xf32>
      %166 = arith.addf %68, %165 : vector<8x128xf32>
      %167 = arith.subf %83, %71 : vector<8x128xf32>
      %168 = arith.mulf %163, %167 : vector<8x128xf32>
      %169 = arith.addf %71, %168 : vector<8x128xf32>
      %170 = arith.select %151, %80, %25 : vector<8x128xi1>, vector<8x128xf32>
      %171 = arith.select %152, %166, %170 : vector<8x128xi1>, vector<8x128xf32>
      %172 = arith.select %151, %83, %83 : vector<8x128xi1>, vector<8x128xf32>
      %173 = arith.select %152, %169, %172 : vector<8x128xi1>, vector<8x128xf32>
      %174 = arith.select %149, %166, %25 : vector<8x128xi1>, vector<8x128xf32>
      %175 = arith.select %151, %80, %174 : vector<8x128xi1>, vector<8x128xf32>
      %176 = arith.select %149, %169, %83 : vector<8x128xi1>, vector<8x128xf32>
      %177 = arith.select %151, %83, %176 : vector<8x128xi1>, vector<8x128xf32>
      %cst_30 = arith.constant 0.000000e+00 : f32
      %178 = vector.broadcast %cst_30 : f32 to vector<8x128xf32>
      %179 = arith.cmpf oge, %147, %178 : vector<8x128xf32>
      %cst_31 = arith.constant 0.000000e+00 : f32
      %180 = vector.broadcast %cst_31 : f32 to vector<8x128xf32>
      %181 = arith.cmpf oge, %84, %180 : vector<8x128xf32>
      %182 = arith.xori %179, %181 : vector<8x128xi1>
      %183 = arith.subf %147, %84 : vector<8x128xf32>
      %cst_32 = arith.constant 0.000000e+00 : f32
      %184 = vector.broadcast %cst_32 : f32 to vector<8x128xf32>
      %185 = arith.cmpf oge, %183, %184 : vector<8x128xf32>
      %cst_33 = arith.constant 9.99999971E-10 : f32
      %cst_34 = arith.constant -9.99999971E-10 : f32
      %186 = vector.broadcast %cst_33 : f32 to vector<8x128xf32>
      %187 = vector.broadcast %cst_34 : f32 to vector<8x128xf32>
      %188 = arith.select %185, %186, %187 : vector<8x128xi1>, vector<8x128xf32>
      %189 = arith.addf %183, %188 : vector<8x128xf32>
      %190 = tpu.reciprocal %189 {approx = true} : vector<8x128xf32> -> vector<8x128xf32>
      %191 = arith.mulf %147, %190 : vector<8x128xf32>
      %cst_35 = arith.constant 1.000000e+00 : f32
      %192 = vector.broadcast %cst_35 : f32 to vector<8x128xf32>
      %193 = arith.minimumf %191, %192 : vector<8x128xf32>
      %194 = arith.subf %44, %80 : vector<8x128xf32>
      %195 = arith.mulf %193, %194 : vector<8x128xf32>
      %196 = arith.addf %80, %195 : vector<8x128xf32>
      %197 = arith.subf %47, %83 : vector<8x128xf32>
      %198 = arith.mulf %193, %197 : vector<8x128xf32>
      %199 = arith.addf %83, %198 : vector<8x128xf32>
      %200 = arith.select %181, %44, %25 : vector<8x128xi1>, vector<8x128xf32>
      %201 = arith.select %182, %196, %200 : vector<8x128xi1>, vector<8x128xf32>
      %202 = arith.select %181, %47, %47 : vector<8x128xi1>, vector<8x128xf32>
      %203 = arith.select %182, %199, %202 : vector<8x128xi1>, vector<8x128xf32>
      %204 = arith.select %179, %196, %25 : vector<8x128xi1>, vector<8x128xf32>
      %205 = arith.select %181, %44, %204 : vector<8x128xi1>, vector<8x128xf32>
      %206 = arith.select %179, %199, %47 : vector<8x128xi1>, vector<8x128xf32>
      %207 = arith.select %181, %47, %206 : vector<8x128xi1>, vector<8x128xf32>
      %208 = arith.addf %109, %25 : vector<8x128xf32>
      %209 = arith.addf %113, %25 : vector<8x128xf32>
      %cst_36 = arith.constant 0.000000e+00 : f32
      %210 = vector.broadcast %cst_36 : f32 to vector<8x128xf32>
      %211 = arith.cmpf oge, %208, %210 : vector<8x128xf32>
      %cst_37 = arith.constant 0.000000e+00 : f32
      %212 = vector.broadcast %cst_37 : f32 to vector<8x128xf32>
      %213 = arith.cmpf oge, %209, %212 : vector<8x128xf32>
      %214 = arith.xori %211, %213 : vector<8x128xi1>
      %215 = arith.subf %208, %209 : vector<8x128xf32>
      %cst_38 = arith.constant 0.000000e+00 : f32
      %216 = vector.broadcast %cst_38 : f32 to vector<8x128xf32>
      %217 = arith.cmpf oge, %215, %216 : vector<8x128xf32>
      %cst_39 = arith.constant 9.99999971E-10 : f32
      %cst_40 = arith.constant -9.99999971E-10 : f32
      %218 = vector.broadcast %cst_39 : f32 to vector<8x128xf32>
      %219 = vector.broadcast %cst_40 : f32 to vector<8x128xf32>
      %220 = arith.select %217, %218, %219 : vector<8x128xi1>, vector<8x128xf32>
      %221 = arith.addf %215, %220 : vector<8x128xf32>
      %222 = tpu.reciprocal %221 {approx = true} : vector<8x128xf32> -> vector<8x128xf32>
      %223 = arith.mulf %208, %222 : vector<8x128xf32>
      %cst_41 = arith.constant 1.000000e+00 : f32
      %224 = vector.broadcast %cst_41 : f32 to vector<8x128xf32>
      %225 = arith.minimumf %223, %224 : vector<8x128xf32>
      %226 = arith.subf %113, %109 : vector<8x128xf32>
      %227 = arith.mulf %225, %226 : vector<8x128xf32>
      %228 = arith.addf %109, %227 : vector<8x128xf32>
      %229 = arith.subf %115, %111 : vector<8x128xf32>
      %230 = arith.mulf %225, %229 : vector<8x128xf32>
      %231 = arith.addf %111, %230 : vector<8x128xf32>
      %232 = arith.select %213, %113, %29 : vector<8x128xi1>, vector<8x128xf32>
      %233 = arith.select %214, %228, %232 : vector<8x128xi1>, vector<8x128xf32>
      %234 = arith.select %213, %115, %115 : vector<8x128xi1>, vector<8x128xf32>
      %235 = arith.select %214, %231, %234 : vector<8x128xi1>, vector<8x128xf32>
      %236 = arith.select %211, %228, %29 : vector<8x128xi1>, vector<8x128xf32>
      %237 = arith.select %213, %113, %236 : vector<8x128xi1>, vector<8x128xf32>
      %238 = arith.select %211, %231, %115 : vector<8x128xi1>, vector<8x128xf32>
      %239 = arith.select %213, %115, %238 : vector<8x128xi1>, vector<8x128xf32>
      %240 = arith.subf %27, %235 : vector<8x128xf32>
      %241 = arith.subf %27, %239 : vector<8x128xf32>
      %cst_42 = arith.constant 0.000000e+00 : f32
      %242 = vector.broadcast %cst_42 : f32 to vector<8x128xf32>
      %243 = arith.cmpf oge, %240, %242 : vector<8x128xf32>
      %cst_43 = arith.constant 0.000000e+00 : f32
      %244 = vector.broadcast %cst_43 : f32 to vector<8x128xf32>
      %245 = arith.cmpf oge, %241, %244 : vector<8x128xf32>
      %246 = arith.xori %243, %245 : vector<8x128xi1>
      %247 = arith.subf %240, %241 : vector<8x128xf32>
      %cst_44 = arith.constant 0.000000e+00 : f32
      %248 = vector.broadcast %cst_44 : f32 to vector<8x128xf32>
      %249 = arith.cmpf oge, %247, %248 : vector<8x128xf32>
      %cst_45 = arith.constant 9.99999971E-10 : f32
      %cst_46 = arith.constant -9.99999971E-10 : f32
      %250 = vector.broadcast %cst_45 : f32 to vector<8x128xf32>
      %251 = vector.broadcast %cst_46 : f32 to vector<8x128xf32>
      %252 = arith.select %249, %250, %251 : vector<8x128xi1>, vector<8x128xf32>
      %253 = arith.addf %247, %252 : vector<8x128xf32>
      %254 = tpu.reciprocal %253 {approx = true} : vector<8x128xf32> -> vector<8x128xf32>
      %255 = arith.mulf %240, %254 : vector<8x128xf32>
      %cst_47 = arith.constant 1.000000e+00 : f32
      %256 = vector.broadcast %cst_47 : f32 to vector<8x128xf32>
      %257 = arith.minimumf %255, %256 : vector<8x128xf32>
      %258 = arith.subf %237, %233 : vector<8x128xf32>
      %259 = arith.mulf %257, %258 : vector<8x128xf32>
      %260 = arith.addf %233, %259 : vector<8x128xf32>
      %261 = arith.subf %239, %235 : vector<8x128xf32>
      %262 = arith.mulf %257, %261 : vector<8x128xf32>
      %263 = arith.addf %235, %262 : vector<8x128xf32>
      %264 = arith.select %245, %237, %237 : vector<8x128xi1>, vector<8x128xf32>
      %265 = arith.select %246, %260, %264 : vector<8x128xi1>, vector<8x128xf32>
      %266 = arith.select %245, %239, %27 : vector<8x128xi1>, vector<8x128xf32>
      %267 = arith.select %246, %263, %266 : vector<8x128xi1>, vector<8x128xf32>
      %268 = arith.select %243, %260, %237 : vector<8x128xi1>, vector<8x128xf32>
      %269 = arith.select %245, %237, %268 : vector<8x128xi1>, vector<8x128xf32>
      %270 = arith.select %243, %263, %27 : vector<8x128xi1>, vector<8x128xf32>
      %271 = arith.select %245, %239, %270 : vector<8x128xi1>, vector<8x128xf32>
      %272 = arith.addf %267, %27 : vector<8x128xf32>
      %273 = arith.addf %271, %27 : vector<8x128xf32>
      %cst_48 = arith.constant 0.000000e+00 : f32
      %274 = vector.broadcast %cst_48 : f32 to vector<8x128xf32>
      %275 = arith.cmpf oge, %272, %274 : vector<8x128xf32>
      %cst_49 = arith.constant 0.000000e+00 : f32
      %276 = vector.broadcast %cst_49 : f32 to vector<8x128xf32>
      %277 = arith.cmpf oge, %273, %276 : vector<8x128xf32>
      %278 = arith.xori %275, %277 : vector<8x128xi1>
      %279 = arith.subf %272, %273 : vector<8x128xf32>
      %cst_50 = arith.constant 0.000000e+00 : f32
      %280 = vector.broadcast %cst_50 : f32 to vector<8x128xf32>
      %281 = arith.cmpf oge, %279, %280 : vector<8x128xf32>
      %cst_51 = arith.constant 9.99999971E-10 : f32
      %cst_52 = arith.constant -9.99999971E-10 : f32
      %282 = vector.broadcast %cst_51 : f32 to vector<8x128xf32>
      %283 = vector.broadcast %cst_52 : f32 to vector<8x128xf32>
      %284 = arith.select %281, %282, %283 : vector<8x128xi1>, vector<8x128xf32>
      %285 = arith.addf %279, %284 : vector<8x128xf32>
      %286 = tpu.reciprocal %285 {approx = true} : vector<8x128xf32> -> vector<8x128xf32>
      %287 = arith.mulf %272, %286 : vector<8x128xf32>
      %cst_53 = arith.constant 1.000000e+00 : f32
      %288 = vector.broadcast %cst_53 : f32 to vector<8x128xf32>
      %289 = arith.minimumf %287, %288 : vector<8x128xf32>
      %290 = arith.subf %269, %265 : vector<8x128xf32>
      %291 = arith.mulf %289, %290 : vector<8x128xf32>
      %292 = arith.addf %265, %291 : vector<8x128xf32>
      %293 = arith.subf %271, %267 : vector<8x128xf32>
      %294 = arith.mulf %289, %293 : vector<8x128xf32>
      %295 = arith.addf %267, %294 : vector<8x128xf32>
      %296 = arith.select %277, %269, %269 : vector<8x128xi1>, vector<8x128xf32>
      %297 = arith.select %278, %292, %296 : vector<8x128xi1>, vector<8x128xf32>
      %298 = arith.select %277, %271, %31 : vector<8x128xi1>, vector<8x128xf32>
      %299 = arith.select %278, %295, %298 : vector<8x128xi1>, vector<8x128xf32>
      %300 = arith.select %275, %292, %269 : vector<8x128xi1>, vector<8x128xf32>
      %301 = arith.select %277, %269, %300 : vector<8x128xi1>, vector<8x128xf32>
      %302 = arith.select %275, %295, %31 : vector<8x128xi1>, vector<8x128xf32>
      %303 = arith.select %277, %271, %302 : vector<8x128xi1>, vector<8x128xf32>
      %304 = arith.mulf %297, %303 : vector<8x128xf32>
      %305 = arith.mulf %301, %299 : vector<8x128xf32>
      %306 = arith.subf %304, %305 : vector<8x128xf32>
      %cst_54 = arith.constant 0.000000e+00 : f32
      %307 = vector.broadcast %cst_54 : f32 to vector<8x128xf32>
      %308 = arith.addf %307, %306 : vector<8x128xf32>
      %309 = arith.addf %140, %25 : vector<8x128xf32>
      %cst_55 = arith.constant 0.000000e+00 : f32
      %310 = vector.broadcast %cst_55 : f32 to vector<8x128xf32>
      %311 = arith.cmpf oge, %209, %310 : vector<8x128xf32>
      %cst_56 = arith.constant 0.000000e+00 : f32
      %312 = vector.broadcast %cst_56 : f32 to vector<8x128xf32>
      %313 = arith.cmpf oge, %309, %312 : vector<8x128xf32>
      %314 = arith.xori %311, %313 : vector<8x128xi1>
      %315 = arith.subf %209, %309 : vector<8x128xf32>
      %cst_57 = arith.constant 0.000000e+00 : f32
      %316 = vector.broadcast %cst_57 : f32 to vector<8x128xf32>
      %317 = arith.cmpf oge, %315, %316 : vector<8x128xf32>
      %cst_58 = arith.constant 9.99999971E-10 : f32
      %cst_59 = arith.constant -9.99999971E-10 : f32
      %318 = vector.broadcast %cst_58 : f32 to vector<8x128xf32>
      %319 = vector.broadcast %cst_59 : f32 to vector<8x128xf32>
      %320 = arith.select %317, %318, %319 : vector<8x128xi1>, vector<8x128xf32>
      %321 = arith.addf %315, %320 : vector<8x128xf32>
      %322 = tpu.reciprocal %321 {approx = true} : vector<8x128xf32> -> vector<8x128xf32>
      %323 = arith.mulf %209, %322 : vector<8x128xf32>
      %cst_60 = arith.constant 1.000000e+00 : f32
      %324 = vector.broadcast %cst_60 : f32 to vector<8x128xf32>
      %325 = arith.minimumf %323, %324 : vector<8x128xf32>
      %326 = arith.subf %140, %113 : vector<8x128xf32>
      %327 = arith.mulf %325, %326 : vector<8x128xf32>
      %328 = arith.addf %113, %327 : vector<8x128xf32>
      %329 = arith.subf %142, %115 : vector<8x128xf32>
      %330 = arith.mulf %325, %329 : vector<8x128xf32>
      %331 = arith.addf %115, %330 : vector<8x128xf32>
      %332 = arith.select %313, %140, %29 : vector<8x128xi1>, vector<8x128xf32>
      %333 = arith.select %314, %328, %332 : vector<8x128xi1>, vector<8x128xf32>
      %334 = arith.select %313, %142, %142 : vector<8x128xi1>, vector<8x128xf32>
      %335 = arith.select %314, %331, %334 : vector<8x128xi1>, vector<8x128xf32>
      %336 = arith.select %311, %328, %29 : vector<8x128xi1>, vector<8x128xf32>
      %337 = arith.select %313, %140, %336 : vector<8x128xi1>, vector<8x128xf32>
      %338 = arith.select %311, %331, %142 : vector<8x128xi1>, vector<8x128xf32>
      %339 = arith.select %313, %142, %338 : vector<8x128xi1>, vector<8x128xf32>
      %340 = arith.subf %27, %335 : vector<8x128xf32>
      %cst_61 = arith.constant 0.000000e+00 : f32
      %341 = vector.broadcast %cst_61 : f32 to vector<8x128xf32>
      %342 = arith.cmpf oge, %241, %341 : vector<8x128xf32>
      %cst_62 = arith.constant 0.000000e+00 : f32
      %343 = vector.broadcast %cst_62 : f32 to vector<8x128xf32>
      %344 = arith.cmpf oge, %340, %343 : vector<8x128xf32>
      %345 = arith.xori %342, %344 : vector<8x128xi1>
      %346 = arith.subf %241, %340 : vector<8x128xf32>
      %cst_63 = arith.constant 0.000000e+00 : f32
      %347 = vector.broadcast %cst_63 : f32 to vector<8x128xf32>
      %348 = arith.cmpf oge, %346, %347 : vector<8x128xf32>
      %cst_64 = arith.constant 9.99999971E-10 : f32
      %cst_65 = arith.constant -9.99999971E-10 : f32
      %349 = vector.broadcast %cst_64 : f32 to vector<8x128xf32>
      %350 = vector.broadcast %cst_65 : f32 to vector<8x128xf32>
      %351 = arith.select %348, %349, %350 : vector<8x128xi1>, vector<8x128xf32>
      %352 = arith.addf %346, %351 : vector<8x128xf32>
      %353 = tpu.reciprocal %352 {approx = true} : vector<8x128xf32> -> vector<8x128xf32>
      %354 = arith.mulf %241, %353 : vector<8x128xf32>
      %cst_66 = arith.constant 1.000000e+00 : f32
      %355 = vector.broadcast %cst_66 : f32 to vector<8x128xf32>
      %356 = arith.minimumf %354, %355 : vector<8x128xf32>
      %357 = arith.subf %333, %237 : vector<8x128xf32>
      %358 = arith.mulf %356, %357 : vector<8x128xf32>
      %359 = arith.addf %237, %358 : vector<8x128xf32>
      %360 = arith.subf %335, %239 : vector<8x128xf32>
      %361 = arith.mulf %356, %360 : vector<8x128xf32>
      %362 = arith.addf %239, %361 : vector<8x128xf32>
      %363 = arith.select %344, %333, %333 : vector<8x128xi1>, vector<8x128xf32>
      %364 = arith.select %345, %359, %363 : vector<8x128xi1>, vector<8x128xf32>
      %365 = arith.select %344, %335, %27 : vector<8x128xi1>, vector<8x128xf32>
      %366 = arith.select %345, %362, %365 : vector<8x128xi1>, vector<8x128xf32>
      %367 = arith.select %342, %359, %333 : vector<8x128xi1>, vector<8x128xf32>
      %368 = arith.select %344, %333, %367 : vector<8x128xi1>, vector<8x128xf32>
      %369 = arith.select %342, %362, %27 : vector<8x128xi1>, vector<8x128xf32>
      %370 = arith.select %344, %335, %369 : vector<8x128xi1>, vector<8x128xf32>
      %371 = arith.addf %366, %27 : vector<8x128xf32>
      %cst_67 = arith.constant 0.000000e+00 : f32
      %372 = vector.broadcast %cst_67 : f32 to vector<8x128xf32>
      %373 = arith.cmpf oge, %273, %372 : vector<8x128xf32>
      %cst_68 = arith.constant 0.000000e+00 : f32
      %374 = vector.broadcast %cst_68 : f32 to vector<8x128xf32>
      %375 = arith.cmpf oge, %371, %374 : vector<8x128xf32>
      %376 = arith.xori %373, %375 : vector<8x128xi1>
      %377 = arith.subf %273, %371 : vector<8x128xf32>
      %cst_69 = arith.constant 0.000000e+00 : f32
      %378 = vector.broadcast %cst_69 : f32 to vector<8x128xf32>
      %379 = arith.cmpf oge, %377, %378 : vector<8x128xf32>
      %cst_70 = arith.constant 9.99999971E-10 : f32
      %cst_71 = arith.constant -9.99999971E-10 : f32
      %380 = vector.broadcast %cst_70 : f32 to vector<8x128xf32>
      %381 = vector.broadcast %cst_71 : f32 to vector<8x128xf32>
      %382 = arith.select %379, %380, %381 : vector<8x128xi1>, vector<8x128xf32>
      %383 = arith.addf %377, %382 : vector<8x128xf32>
      %384 = tpu.reciprocal %383 {approx = true} : vector<8x128xf32> -> vector<8x128xf32>
      %385 = arith.mulf %273, %384 : vector<8x128xf32>
      %cst_72 = arith.constant 1.000000e+00 : f32
      %386 = vector.broadcast %cst_72 : f32 to vector<8x128xf32>
      %387 = arith.minimumf %385, %386 : vector<8x128xf32>
      %388 = arith.subf %364, %269 : vector<8x128xf32>
      %389 = arith.mulf %387, %388 : vector<8x128xf32>
      %390 = arith.addf %269, %389 : vector<8x128xf32>
      %391 = arith.subf %366, %271 : vector<8x128xf32>
      %392 = arith.mulf %387, %391 : vector<8x128xf32>
      %393 = arith.addf %271, %392 : vector<8x128xf32>
      %394 = arith.select %375, %364, %364 : vector<8x128xi1>, vector<8x128xf32>
      %395 = arith.select %376, %390, %394 : vector<8x128xi1>, vector<8x128xf32>
      %396 = arith.select %375, %366, %31 : vector<8x128xi1>, vector<8x128xf32>
      %397 = arith.select %376, %393, %396 : vector<8x128xi1>, vector<8x128xf32>
      %398 = arith.select %373, %390, %364 : vector<8x128xi1>, vector<8x128xf32>
      %399 = arith.select %375, %364, %398 : vector<8x128xi1>, vector<8x128xf32>
      %400 = arith.select %373, %393, %31 : vector<8x128xi1>, vector<8x128xf32>
      %401 = arith.select %375, %366, %400 : vector<8x128xi1>, vector<8x128xf32>
      %402 = arith.mulf %301, %397 : vector<8x128xf32>
      %403 = arith.mulf %395, %303 : vector<8x128xf32>
      %404 = arith.subf %402, %403 : vector<8x128xf32>
      %405 = arith.addf %308, %404 : vector<8x128xf32>
      %406 = arith.mulf %395, %401 : vector<8x128xf32>
      %407 = arith.mulf %399, %397 : vector<8x128xf32>
      %408 = arith.subf %406, %407 : vector<8x128xf32>
      %409 = arith.addf %405, %408 : vector<8x128xf32>
      %410 = arith.addf %370, %27 : vector<8x128xf32>
      %cst_73 = arith.constant 0.000000e+00 : f32
      %411 = vector.broadcast %cst_73 : f32 to vector<8x128xf32>
      %412 = arith.cmpf oge, %371, %411 : vector<8x128xf32>
      %cst_74 = arith.constant 0.000000e+00 : f32
      %413 = vector.broadcast %cst_74 : f32 to vector<8x128xf32>
      %414 = arith.cmpf oge, %410, %413 : vector<8x128xf32>
      %415 = arith.xori %412, %414 : vector<8x128xi1>
      %416 = arith.subf %371, %410 : vector<8x128xf32>
      %cst_75 = arith.constant 0.000000e+00 : f32
      %417 = vector.broadcast %cst_75 : f32 to vector<8x128xf32>
      %418 = arith.cmpf oge, %416, %417 : vector<8x128xf32>
      %cst_76 = arith.constant 9.99999971E-10 : f32
      %cst_77 = arith.constant -9.99999971E-10 : f32
      %419 = vector.broadcast %cst_76 : f32 to vector<8x128xf32>
      %420 = vector.broadcast %cst_77 : f32 to vector<8x128xf32>
      %421 = arith.select %418, %419, %420 : vector<8x128xi1>, vector<8x128xf32>
      %422 = arith.addf %416, %421 : vector<8x128xf32>
      %423 = tpu.reciprocal %422 {approx = true} : vector<8x128xf32> -> vector<8x128xf32>
      %424 = arith.mulf %371, %423 : vector<8x128xf32>
      %cst_78 = arith.constant 1.000000e+00 : f32
      %425 = vector.broadcast %cst_78 : f32 to vector<8x128xf32>
      %426 = arith.minimumf %424, %425 : vector<8x128xf32>
      %427 = arith.subf %368, %364 : vector<8x128xf32>
      %428 = arith.mulf %426, %427 : vector<8x128xf32>
      %429 = arith.addf %364, %428 : vector<8x128xf32>
      %430 = arith.subf %370, %366 : vector<8x128xf32>
      %431 = arith.mulf %426, %430 : vector<8x128xf32>
      %432 = arith.addf %366, %431 : vector<8x128xf32>
      %433 = arith.select %414, %368, %368 : vector<8x128xi1>, vector<8x128xf32>
      %434 = arith.select %415, %429, %433 : vector<8x128xi1>, vector<8x128xf32>
      %435 = arith.select %414, %370, %31 : vector<8x128xi1>, vector<8x128xf32>
      %436 = arith.select %415, %432, %435 : vector<8x128xi1>, vector<8x128xf32>
      %437 = arith.select %412, %429, %368 : vector<8x128xi1>, vector<8x128xf32>
      %438 = arith.select %414, %368, %437 : vector<8x128xi1>, vector<8x128xf32>
      %439 = arith.select %412, %432, %31 : vector<8x128xi1>, vector<8x128xf32>
      %440 = arith.select %414, %370, %439 : vector<8x128xi1>, vector<8x128xf32>
      %441 = arith.mulf %399, %436 : vector<8x128xf32>
      %442 = arith.mulf %434, %401 : vector<8x128xf32>
      %443 = arith.subf %441, %442 : vector<8x128xf32>
      %444 = arith.addf %409, %443 : vector<8x128xf32>
      %445 = arith.mulf %434, %440 : vector<8x128xf32>
      %446 = arith.mulf %438, %436 : vector<8x128xf32>
      %447 = arith.subf %445, %446 : vector<8x128xf32>
      %448 = arith.addf %444, %447 : vector<8x128xf32>
      %449 = arith.subf %27, %339 : vector<8x128xf32>
      %cst_79 = arith.constant 0.000000e+00 : f32
      %450 = vector.broadcast %cst_79 : f32 to vector<8x128xf32>
      %451 = arith.cmpf oge, %340, %450 : vector<8x128xf32>
      %cst_80 = arith.constant 0.000000e+00 : f32
      %452 = vector.broadcast %cst_80 : f32 to vector<8x128xf32>
      %453 = arith.cmpf oge, %449, %452 : vector<8x128xf32>
      %454 = arith.xori %451, %453 : vector<8x128xi1>
      %455 = arith.subf %340, %449 : vector<8x128xf32>
      %cst_81 = arith.constant 0.000000e+00 : f32
      %456 = vector.broadcast %cst_81 : f32 to vector<8x128xf32>
      %457 = arith.cmpf oge, %455, %456 : vector<8x128xf32>
      %cst_82 = arith.constant 9.99999971E-10 : f32
      %cst_83 = arith.constant -9.99999971E-10 : f32
      %458 = vector.broadcast %cst_82 : f32 to vector<8x128xf32>
      %459 = vector.broadcast %cst_83 : f32 to vector<8x128xf32>
      %460 = arith.select %457, %458, %459 : vector<8x128xi1>, vector<8x128xf32>
      %461 = arith.addf %455, %460 : vector<8x128xf32>
      %462 = tpu.reciprocal %461 {approx = true} : vector<8x128xf32> -> vector<8x128xf32>
      %463 = arith.mulf %340, %462 : vector<8x128xf32>
      %cst_84 = arith.constant 1.000000e+00 : f32
      %464 = vector.broadcast %cst_84 : f32 to vector<8x128xf32>
      %465 = arith.minimumf %463, %464 : vector<8x128xf32>
      %466 = arith.subf %337, %333 : vector<8x128xf32>
      %467 = arith.mulf %465, %466 : vector<8x128xf32>
      %468 = arith.addf %333, %467 : vector<8x128xf32>
      %469 = arith.subf %339, %335 : vector<8x128xf32>
      %470 = arith.mulf %465, %469 : vector<8x128xf32>
      %471 = arith.addf %335, %470 : vector<8x128xf32>
      %472 = arith.select %453, %337, %337 : vector<8x128xi1>, vector<8x128xf32>
      %473 = arith.select %454, %468, %472 : vector<8x128xi1>, vector<8x128xf32>
      %474 = arith.select %453, %339, %27 : vector<8x128xi1>, vector<8x128xf32>
      %475 = arith.select %454, %471, %474 : vector<8x128xi1>, vector<8x128xf32>
      %476 = arith.select %451, %468, %337 : vector<8x128xi1>, vector<8x128xf32>
      %477 = arith.select %453, %337, %476 : vector<8x128xi1>, vector<8x128xf32>
      %478 = arith.select %451, %471, %27 : vector<8x128xi1>, vector<8x128xf32>
      %479 = arith.select %453, %339, %478 : vector<8x128xi1>, vector<8x128xf32>
      %480 = arith.addf %475, %27 : vector<8x128xf32>
      %cst_85 = arith.constant 0.000000e+00 : f32
      %481 = vector.broadcast %cst_85 : f32 to vector<8x128xf32>
      %482 = arith.cmpf oge, %410, %481 : vector<8x128xf32>
      %cst_86 = arith.constant 0.000000e+00 : f32
      %483 = vector.broadcast %cst_86 : f32 to vector<8x128xf32>
      %484 = arith.cmpf oge, %480, %483 : vector<8x128xf32>
      %485 = arith.xori %482, %484 : vector<8x128xi1>
      %486 = arith.subf %410, %480 : vector<8x128xf32>
      %cst_87 = arith.constant 0.000000e+00 : f32
      %487 = vector.broadcast %cst_87 : f32 to vector<8x128xf32>
      %488 = arith.cmpf oge, %486, %487 : vector<8x128xf32>
      %cst_88 = arith.constant 9.99999971E-10 : f32
      %cst_89 = arith.constant -9.99999971E-10 : f32
      %489 = vector.broadcast %cst_88 : f32 to vector<8x128xf32>
      %490 = vector.broadcast %cst_89 : f32 to vector<8x128xf32>
      %491 = arith.select %488, %489, %490 : vector<8x128xi1>, vector<8x128xf32>
      %492 = arith.addf %486, %491 : vector<8x128xf32>
      %493 = tpu.reciprocal %492 {approx = true} : vector<8x128xf32> -> vector<8x128xf32>
      %494 = arith.mulf %410, %493 : vector<8x128xf32>
      %cst_90 = arith.constant 1.000000e+00 : f32
      %495 = vector.broadcast %cst_90 : f32 to vector<8x128xf32>
      %496 = arith.minimumf %494, %495 : vector<8x128xf32>
      %497 = arith.subf %473, %368 : vector<8x128xf32>
      %498 = arith.mulf %496, %497 : vector<8x128xf32>
      %499 = arith.addf %368, %498 : vector<8x128xf32>
      %500 = arith.subf %475, %370 : vector<8x128xf32>
      %501 = arith.mulf %496, %500 : vector<8x128xf32>
      %502 = arith.addf %370, %501 : vector<8x128xf32>
      %503 = arith.select %484, %473, %473 : vector<8x128xi1>, vector<8x128xf32>
      %504 = arith.select %485, %499, %503 : vector<8x128xi1>, vector<8x128xf32>
      %505 = arith.select %484, %475, %31 : vector<8x128xi1>, vector<8x128xf32>
      %506 = arith.select %485, %502, %505 : vector<8x128xi1>, vector<8x128xf32>
      %507 = arith.select %482, %499, %473 : vector<8x128xi1>, vector<8x128xf32>
      %508 = arith.select %484, %473, %507 : vector<8x128xi1>, vector<8x128xf32>
      %509 = arith.select %482, %502, %31 : vector<8x128xi1>, vector<8x128xf32>
      %510 = arith.select %484, %475, %509 : vector<8x128xi1>, vector<8x128xf32>
      %511 = arith.mulf %438, %506 : vector<8x128xf32>
      %512 = arith.mulf %504, %440 : vector<8x128xf32>
      %513 = arith.subf %511, %512 : vector<8x128xf32>
      %514 = arith.addf %448, %513 : vector<8x128xf32>
      %515 = arith.mulf %504, %510 : vector<8x128xf32>
      %516 = arith.mulf %508, %506 : vector<8x128xf32>
      %517 = arith.subf %515, %516 : vector<8x128xf32>
      %518 = arith.addf %514, %517 : vector<8x128xf32>
      %519 = arith.addf %479, %27 : vector<8x128xf32>
      %cst_91 = arith.constant 0.000000e+00 : f32
      %520 = vector.broadcast %cst_91 : f32 to vector<8x128xf32>
      %521 = arith.cmpf oge, %480, %520 : vector<8x128xf32>
      %cst_92 = arith.constant 0.000000e+00 : f32
      %522 = vector.broadcast %cst_92 : f32 to vector<8x128xf32>
      %523 = arith.cmpf oge, %519, %522 : vector<8x128xf32>
      %524 = arith.xori %521, %523 : vector<8x128xi1>
      %525 = arith.subf %480, %519 : vector<8x128xf32>
      %cst_93 = arith.constant 0.000000e+00 : f32
      %526 = vector.broadcast %cst_93 : f32 to vector<8x128xf32>
      %527 = arith.cmpf oge, %525, %526 : vector<8x128xf32>
      %cst_94 = arith.constant 9.99999971E-10 : f32
      %cst_95 = arith.constant -9.99999971E-10 : f32
      %528 = vector.broadcast %cst_94 : f32 to vector<8x128xf32>
      %529 = vector.broadcast %cst_95 : f32 to vector<8x128xf32>
      %530 = arith.select %527, %528, %529 : vector<8x128xi1>, vector<8x128xf32>
      %531 = arith.addf %525, %530 : vector<8x128xf32>
      %532 = tpu.reciprocal %531 {approx = true} : vector<8x128xf32> -> vector<8x128xf32>
      %533 = arith.mulf %480, %532 : vector<8x128xf32>
      %cst_96 = arith.constant 1.000000e+00 : f32
      %534 = vector.broadcast %cst_96 : f32 to vector<8x128xf32>
      %535 = arith.minimumf %533, %534 : vector<8x128xf32>
      %536 = arith.subf %477, %473 : vector<8x128xf32>
      %537 = arith.mulf %535, %536 : vector<8x128xf32>
      %538 = arith.addf %473, %537 : vector<8x128xf32>
      %539 = arith.subf %479, %475 : vector<8x128xf32>
      %540 = arith.mulf %535, %539 : vector<8x128xf32>
      %541 = arith.addf %475, %540 : vector<8x128xf32>
      %542 = arith.select %523, %477, %477 : vector<8x128xi1>, vector<8x128xf32>
      %543 = arith.select %524, %538, %542 : vector<8x128xi1>, vector<8x128xf32>
      %544 = arith.select %523, %479, %31 : vector<8x128xi1>, vector<8x128xf32>
      %545 = arith.select %524, %541, %544 : vector<8x128xi1>, vector<8x128xf32>
      %546 = arith.select %521, %538, %477 : vector<8x128xi1>, vector<8x128xf32>
      %547 = arith.select %523, %477, %546 : vector<8x128xi1>, vector<8x128xf32>
      %548 = arith.select %521, %541, %31 : vector<8x128xi1>, vector<8x128xf32>
      %549 = arith.select %523, %479, %548 : vector<8x128xi1>, vector<8x128xf32>
      %550 = arith.mulf %508, %545 : vector<8x128xf32>
      %551 = arith.mulf %543, %510 : vector<8x128xf32>
      %552 = arith.subf %550, %551 : vector<8x128xf32>
      %553 = arith.addf %518, %552 : vector<8x128xf32>
      %554 = arith.mulf %543, %549 : vector<8x128xf32>
      %555 = arith.mulf %547, %545 : vector<8x128xf32>
      %556 = arith.subf %554, %555 : vector<8x128xf32>
      %557 = arith.addf %553, %556 : vector<8x128xf32>
      %558 = arith.addf %144, %25 : vector<8x128xf32>
      %cst_97 = arith.constant 0.000000e+00 : f32
      %559 = vector.broadcast %cst_97 : f32 to vector<8x128xf32>
      %560 = arith.cmpf oge, %309, %559 : vector<8x128xf32>
      %cst_98 = arith.constant 0.000000e+00 : f32
      %561 = vector.broadcast %cst_98 : f32 to vector<8x128xf32>
      %562 = arith.cmpf oge, %558, %561 : vector<8x128xf32>
      %563 = arith.xori %560, %562 : vector<8x128xi1>
      %564 = arith.subf %309, %558 : vector<8x128xf32>
      %cst_99 = arith.constant 0.000000e+00 : f32
      %565 = vector.broadcast %cst_99 : f32 to vector<8x128xf32>
      %566 = arith.cmpf oge, %564, %565 : vector<8x128xf32>
      %cst_100 = arith.constant 9.99999971E-10 : f32
      %cst_101 = arith.constant -9.99999971E-10 : f32
      %567 = vector.broadcast %cst_100 : f32 to vector<8x128xf32>
      %568 = vector.broadcast %cst_101 : f32 to vector<8x128xf32>
      %569 = arith.select %566, %567, %568 : vector<8x128xi1>, vector<8x128xf32>
      %570 = arith.addf %564, %569 : vector<8x128xf32>
      %571 = tpu.reciprocal %570 {approx = true} : vector<8x128xf32> -> vector<8x128xf32>
      %572 = arith.mulf %309, %571 : vector<8x128xf32>
      %cst_102 = arith.constant 1.000000e+00 : f32
      %573 = vector.broadcast %cst_102 : f32 to vector<8x128xf32>
      %574 = arith.minimumf %572, %573 : vector<8x128xf32>
      %575 = arith.subf %144, %140 : vector<8x128xf32>
      %576 = arith.mulf %574, %575 : vector<8x128xf32>
      %577 = arith.addf %140, %576 : vector<8x128xf32>
      %578 = arith.subf %146, %142 : vector<8x128xf32>
      %579 = arith.mulf %574, %578 : vector<8x128xf32>
      %580 = arith.addf %142, %579 : vector<8x128xf32>
      %581 = arith.select %562, %144, %29 : vector<8x128xi1>, vector<8x128xf32>
      %582 = arith.select %563, %577, %581 : vector<8x128xi1>, vector<8x128xf32>
      %583 = arith.select %562, %146, %146 : vector<8x128xi1>, vector<8x128xf32>
      %584 = arith.select %563, %580, %583 : vector<8x128xi1>, vector<8x128xf32>
      %585 = arith.select %560, %577, %29 : vector<8x128xi1>, vector<8x128xf32>
      %586 = arith.select %562, %144, %585 : vector<8x128xi1>, vector<8x128xf32>
      %587 = arith.select %560, %580, %146 : vector<8x128xi1>, vector<8x128xf32>
      %588 = arith.select %562, %146, %587 : vector<8x128xi1>, vector<8x128xf32>
      %589 = arith.subf %27, %584 : vector<8x128xf32>
      %cst_103 = arith.constant 0.000000e+00 : f32
      %590 = vector.broadcast %cst_103 : f32 to vector<8x128xf32>
      %591 = arith.cmpf oge, %449, %590 : vector<8x128xf32>
      %cst_104 = arith.constant 0.000000e+00 : f32
      %592 = vector.broadcast %cst_104 : f32 to vector<8x128xf32>
      %593 = arith.cmpf oge, %589, %592 : vector<8x128xf32>
      %594 = arith.xori %591, %593 : vector<8x128xi1>
      %595 = arith.subf %449, %589 : vector<8x128xf32>
      %cst_105 = arith.constant 0.000000e+00 : f32
      %596 = vector.broadcast %cst_105 : f32 to vector<8x128xf32>
      %597 = arith.cmpf oge, %595, %596 : vector<8x128xf32>
      %cst_106 = arith.constant 9.99999971E-10 : f32
      %cst_107 = arith.constant -9.99999971E-10 : f32
      %598 = vector.broadcast %cst_106 : f32 to vector<8x128xf32>
      %599 = vector.broadcast %cst_107 : f32 to vector<8x128xf32>
      %600 = arith.select %597, %598, %599 : vector<8x128xi1>, vector<8x128xf32>
      %601 = arith.addf %595, %600 : vector<8x128xf32>
      %602 = tpu.reciprocal %601 {approx = true} : vector<8x128xf32> -> vector<8x128xf32>
      %603 = arith.mulf %449, %602 : vector<8x128xf32>
      %cst_108 = arith.constant 1.000000e+00 : f32
      %604 = vector.broadcast %cst_108 : f32 to vector<8x128xf32>
      %605 = arith.minimumf %603, %604 : vector<8x128xf32>
      %606 = arith.subf %582, %337 : vector<8x128xf32>
      %607 = arith.mulf %605, %606 : vector<8x128xf32>
      %608 = arith.addf %337, %607 : vector<8x128xf32>
      %609 = arith.subf %584, %339 : vector<8x128xf32>
      %610 = arith.mulf %605, %609 : vector<8x128xf32>
      %611 = arith.addf %339, %610 : vector<8x128xf32>
      %612 = arith.select %593, %582, %582 : vector<8x128xi1>, vector<8x128xf32>
      %613 = arith.select %594, %608, %612 : vector<8x128xi1>, vector<8x128xf32>
      %614 = arith.select %593, %584, %27 : vector<8x128xi1>, vector<8x128xf32>
      %615 = arith.select %594, %611, %614 : vector<8x128xi1>, vector<8x128xf32>
      %616 = arith.select %591, %608, %582 : vector<8x128xi1>, vector<8x128xf32>
      %617 = arith.select %593, %582, %616 : vector<8x128xi1>, vector<8x128xf32>
      %618 = arith.select %591, %611, %27 : vector<8x128xi1>, vector<8x128xf32>
      %619 = arith.select %593, %584, %618 : vector<8x128xi1>, vector<8x128xf32>
      %620 = arith.addf %615, %27 : vector<8x128xf32>
      %cst_109 = arith.constant 0.000000e+00 : f32
      %621 = vector.broadcast %cst_109 : f32 to vector<8x128xf32>
      %622 = arith.cmpf oge, %519, %621 : vector<8x128xf32>
      %cst_110 = arith.constant 0.000000e+00 : f32
      %623 = vector.broadcast %cst_110 : f32 to vector<8x128xf32>
      %624 = arith.cmpf oge, %620, %623 : vector<8x128xf32>
      %625 = arith.xori %622, %624 : vector<8x128xi1>
      %626 = arith.subf %519, %620 : vector<8x128xf32>
      %cst_111 = arith.constant 0.000000e+00 : f32
      %627 = vector.broadcast %cst_111 : f32 to vector<8x128xf32>
      %628 = arith.cmpf oge, %626, %627 : vector<8x128xf32>
      %cst_112 = arith.constant 9.99999971E-10 : f32
      %cst_113 = arith.constant -9.99999971E-10 : f32
      %629 = vector.broadcast %cst_112 : f32 to vector<8x128xf32>
      %630 = vector.broadcast %cst_113 : f32 to vector<8x128xf32>
      %631 = arith.select %628, %629, %630 : vector<8x128xi1>, vector<8x128xf32>
      %632 = arith.addf %626, %631 : vector<8x128xf32>
      %633 = tpu.reciprocal %632 {approx = true} : vector<8x128xf32> -> vector<8x128xf32>
      %634 = arith.mulf %519, %633 : vector<8x128xf32>
      %cst_114 = arith.constant 1.000000e+00 : f32
      %635 = vector.broadcast %cst_114 : f32 to vector<8x128xf32>
      %636 = arith.minimumf %634, %635 : vector<8x128xf32>
      %637 = arith.subf %613, %477 : vector<8x128xf32>
      %638 = arith.mulf %636, %637 : vector<8x128xf32>
      %639 = arith.addf %477, %638 : vector<8x128xf32>
      %640 = arith.subf %615, %479 : vector<8x128xf32>
      %641 = arith.mulf %636, %640 : vector<8x128xf32>
      %642 = arith.addf %479, %641 : vector<8x128xf32>
      %643 = arith.select %624, %613, %613 : vector<8x128xi1>, vector<8x128xf32>
      %644 = arith.select %625, %639, %643 : vector<8x128xi1>, vector<8x128xf32>
      %645 = arith.select %624, %615, %31 : vector<8x128xi1>, vector<8x128xf32>
      %646 = arith.select %625, %642, %645 : vector<8x128xi1>, vector<8x128xf32>
      %647 = arith.select %622, %639, %613 : vector<8x128xi1>, vector<8x128xf32>
      %648 = arith.select %624, %613, %647 : vector<8x128xi1>, vector<8x128xf32>
      %649 = arith.select %622, %642, %31 : vector<8x128xi1>, vector<8x128xf32>
      %650 = arith.select %624, %615, %649 : vector<8x128xi1>, vector<8x128xf32>
      %651 = arith.mulf %547, %646 : vector<8x128xf32>
      %652 = arith.mulf %644, %549 : vector<8x128xf32>
      %653 = arith.subf %651, %652 : vector<8x128xf32>
      %654 = arith.addf %557, %653 : vector<8x128xf32>
      %655 = arith.mulf %644, %650 : vector<8x128xf32>
      %656 = arith.mulf %648, %646 : vector<8x128xf32>
      %657 = arith.subf %655, %656 : vector<8x128xf32>
      %658 = arith.addf %654, %657 : vector<8x128xf32>
      %659 = arith.addf %619, %27 : vector<8x128xf32>
      %cst_115 = arith.constant 0.000000e+00 : f32
      %660 = vector.broadcast %cst_115 : f32 to vector<8x128xf32>
      %661 = arith.cmpf oge, %620, %660 : vector<8x128xf32>
      %cst_116 = arith.constant 0.000000e+00 : f32
      %662 = vector.broadcast %cst_116 : f32 to vector<8x128xf32>
      %663 = arith.cmpf oge, %659, %662 : vector<8x128xf32>
      %664 = arith.xori %661, %663 : vector<8x128xi1>
      %665 = arith.subf %620, %659 : vector<8x128xf32>
      %cst_117 = arith.constant 0.000000e+00 : f32
      %666 = vector.broadcast %cst_117 : f32 to vector<8x128xf32>
      %667 = arith.cmpf oge, %665, %666 : vector<8x128xf32>
      %cst_118 = arith.constant 9.99999971E-10 : f32
      %cst_119 = arith.constant -9.99999971E-10 : f32
      %668 = vector.broadcast %cst_118 : f32 to vector<8x128xf32>
      %669 = vector.broadcast %cst_119 : f32 to vector<8x128xf32>
      %670 = arith.select %667, %668, %669 : vector<8x128xi1>, vector<8x128xf32>
      %671 = arith.addf %665, %670 : vector<8x128xf32>
      %672 = tpu.reciprocal %671 {approx = true} : vector<8x128xf32> -> vector<8x128xf32>
      %673 = arith.mulf %620, %672 : vector<8x128xf32>
      %cst_120 = arith.constant 1.000000e+00 : f32
      %674 = vector.broadcast %cst_120 : f32 to vector<8x128xf32>
      %675 = arith.minimumf %673, %674 : vector<8x128xf32>
      %676 = arith.subf %617, %613 : vector<8x128xf32>
      %677 = arith.mulf %675, %676 : vector<8x128xf32>
      %678 = arith.addf %613, %677 : vector<8x128xf32>
      %679 = arith.subf %619, %615 : vector<8x128xf32>
      %680 = arith.mulf %675, %679 : vector<8x128xf32>
      %681 = arith.addf %615, %680 : vector<8x128xf32>
      %682 = arith.select %663, %617, %617 : vector<8x128xi1>, vector<8x128xf32>
      %683 = arith.select %664, %678, %682 : vector<8x128xi1>, vector<8x128xf32>
      %684 = arith.select %663, %619, %31 : vector<8x128xi1>, vector<8x128xf32>
      %685 = arith.select %664, %681, %684 : vector<8x128xi1>, vector<8x128xf32>
      %686 = arith.select %661, %678, %617 : vector<8x128xi1>, vector<8x128xf32>
      %687 = arith.select %663, %617, %686 : vector<8x128xi1>, vector<8x128xf32>
      %688 = arith.select %661, %681, %31 : vector<8x128xi1>, vector<8x128xf32>
      %689 = arith.select %663, %619, %688 : vector<8x128xi1>, vector<8x128xf32>
      %690 = arith.mulf %648, %685 : vector<8x128xf32>
      %691 = arith.mulf %683, %650 : vector<8x128xf32>
      %692 = arith.subf %690, %691 : vector<8x128xf32>
      %693 = arith.addf %658, %692 : vector<8x128xf32>
      %694 = arith.mulf %683, %689 : vector<8x128xf32>
      %695 = arith.mulf %687, %685 : vector<8x128xf32>
      %696 = arith.subf %694, %695 : vector<8x128xf32>
      %697 = arith.addf %693, %696 : vector<8x128xf32>
      %698 = arith.subf %27, %588 : vector<8x128xf32>
      %cst_121 = arith.constant 0.000000e+00 : f32
      %699 = vector.broadcast %cst_121 : f32 to vector<8x128xf32>
      %700 = arith.cmpf oge, %589, %699 : vector<8x128xf32>
      %cst_122 = arith.constant 0.000000e+00 : f32
      %701 = vector.broadcast %cst_122 : f32 to vector<8x128xf32>
      %702 = arith.cmpf oge, %698, %701 : vector<8x128xf32>
      %703 = arith.xori %700, %702 : vector<8x128xi1>
      %704 = arith.subf %589, %698 : vector<8x128xf32>
      %cst_123 = arith.constant 0.000000e+00 : f32
      %705 = vector.broadcast %cst_123 : f32 to vector<8x128xf32>
      %706 = arith.cmpf oge, %704, %705 : vector<8x128xf32>
      %cst_124 = arith.constant 9.99999971E-10 : f32
      %cst_125 = arith.constant -9.99999971E-10 : f32
      %707 = vector.broadcast %cst_124 : f32 to vector<8x128xf32>
      %708 = vector.broadcast %cst_125 : f32 to vector<8x128xf32>
      %709 = arith.select %706, %707, %708 : vector<8x128xi1>, vector<8x128xf32>
      %710 = arith.addf %704, %709 : vector<8x128xf32>
      %711 = tpu.reciprocal %710 {approx = true} : vector<8x128xf32> -> vector<8x128xf32>
      %712 = arith.mulf %589, %711 : vector<8x128xf32>
      %cst_126 = arith.constant 1.000000e+00 : f32
      %713 = vector.broadcast %cst_126 : f32 to vector<8x128xf32>
      %714 = arith.minimumf %712, %713 : vector<8x128xf32>
      %715 = arith.subf %586, %582 : vector<8x128xf32>
      %716 = arith.mulf %714, %715 : vector<8x128xf32>
      %717 = arith.addf %582, %716 : vector<8x128xf32>
      %718 = arith.subf %588, %584 : vector<8x128xf32>
      %719 = arith.mulf %714, %718 : vector<8x128xf32>
      %720 = arith.addf %584, %719 : vector<8x128xf32>
      %721 = arith.select %702, %586, %586 : vector<8x128xi1>, vector<8x128xf32>
      %722 = arith.select %703, %717, %721 : vector<8x128xi1>, vector<8x128xf32>
      %723 = arith.select %702, %588, %27 : vector<8x128xi1>, vector<8x128xf32>
      %724 = arith.select %703, %720, %723 : vector<8x128xi1>, vector<8x128xf32>
      %725 = arith.select %700, %717, %586 : vector<8x128xi1>, vector<8x128xf32>
      %726 = arith.select %702, %586, %725 : vector<8x128xi1>, vector<8x128xf32>
      %727 = arith.select %700, %720, %27 : vector<8x128xi1>, vector<8x128xf32>
      %728 = arith.select %702, %588, %727 : vector<8x128xi1>, vector<8x128xf32>
      %729 = arith.addf %724, %27 : vector<8x128xf32>
      %cst_127 = arith.constant 0.000000e+00 : f32
      %730 = vector.broadcast %cst_127 : f32 to vector<8x128xf32>
      %731 = arith.cmpf oge, %659, %730 : vector<8x128xf32>
      %cst_128 = arith.constant 0.000000e+00 : f32
      %732 = vector.broadcast %cst_128 : f32 to vector<8x128xf32>
      %733 = arith.cmpf oge, %729, %732 : vector<8x128xf32>
      %734 = arith.xori %731, %733 : vector<8x128xi1>
      %735 = arith.subf %659, %729 : vector<8x128xf32>
      %cst_129 = arith.constant 0.000000e+00 : f32
      %736 = vector.broadcast %cst_129 : f32 to vector<8x128xf32>
      %737 = arith.cmpf oge, %735, %736 : vector<8x128xf32>
      %cst_130 = arith.constant 9.99999971E-10 : f32
      %cst_131 = arith.constant -9.99999971E-10 : f32
      %738 = vector.broadcast %cst_130 : f32 to vector<8x128xf32>
      %739 = vector.broadcast %cst_131 : f32 to vector<8x128xf32>
      %740 = arith.select %737, %738, %739 : vector<8x128xi1>, vector<8x128xf32>
      %741 = arith.addf %735, %740 : vector<8x128xf32>
      %742 = tpu.reciprocal %741 {approx = true} : vector<8x128xf32> -> vector<8x128xf32>
      %743 = arith.mulf %659, %742 : vector<8x128xf32>
      %cst_132 = arith.constant 1.000000e+00 : f32
      %744 = vector.broadcast %cst_132 : f32 to vector<8x128xf32>
      %745 = arith.minimumf %743, %744 : vector<8x128xf32>
      %746 = arith.subf %722, %617 : vector<8x128xf32>
      %747 = arith.mulf %745, %746 : vector<8x128xf32>
      %748 = arith.addf %617, %747 : vector<8x128xf32>
      %749 = arith.subf %724, %619 : vector<8x128xf32>
      %750 = arith.mulf %745, %749 : vector<8x128xf32>
      %751 = arith.addf %619, %750 : vector<8x128xf32>
      %752 = arith.select %733, %722, %722 : vector<8x128xi1>, vector<8x128xf32>
      %753 = arith.select %734, %748, %752 : vector<8x128xi1>, vector<8x128xf32>
      %754 = arith.select %733, %724, %31 : vector<8x128xi1>, vector<8x128xf32>
      %755 = arith.select %734, %751, %754 : vector<8x128xi1>, vector<8x128xf32>
      %756 = arith.select %731, %748, %722 : vector<8x128xi1>, vector<8x128xf32>
      %757 = arith.select %733, %722, %756 : vector<8x128xi1>, vector<8x128xf32>
      %758 = arith.select %731, %751, %31 : vector<8x128xi1>, vector<8x128xf32>
      %759 = arith.select %733, %724, %758 : vector<8x128xi1>, vector<8x128xf32>
      %760 = arith.mulf %687, %755 : vector<8x128xf32>
      %761 = arith.mulf %753, %689 : vector<8x128xf32>
      %762 = arith.subf %760, %761 : vector<8x128xf32>
      %763 = arith.addf %697, %762 : vector<8x128xf32>
      %764 = arith.mulf %753, %759 : vector<8x128xf32>
      %765 = arith.mulf %757, %755 : vector<8x128xf32>
      %766 = arith.subf %764, %765 : vector<8x128xf32>
      %767 = arith.addf %763, %766 : vector<8x128xf32>
      %768 = arith.addf %728, %27 : vector<8x128xf32>
      %cst_133 = arith.constant 0.000000e+00 : f32
      %769 = vector.broadcast %cst_133 : f32 to vector<8x128xf32>
      %770 = arith.cmpf oge, %729, %769 : vector<8x128xf32>
      %cst_134 = arith.constant 0.000000e+00 : f32
      %771 = vector.broadcast %cst_134 : f32 to vector<8x128xf32>
      %772 = arith.cmpf oge, %768, %771 : vector<8x128xf32>
      %773 = arith.xori %770, %772 : vector<8x128xi1>
      %774 = arith.subf %729, %768 : vector<8x128xf32>
      %cst_135 = arith.constant 0.000000e+00 : f32
      %775 = vector.broadcast %cst_135 : f32 to vector<8x128xf32>
      %776 = arith.cmpf oge, %774, %775 : vector<8x128xf32>
      %cst_136 = arith.constant 9.99999971E-10 : f32
      %cst_137 = arith.constant -9.99999971E-10 : f32
      %777 = vector.broadcast %cst_136 : f32 to vector<8x128xf32>
      %778 = vector.broadcast %cst_137 : f32 to vector<8x128xf32>
      %779 = arith.select %776, %777, %778 : vector<8x128xi1>, vector<8x128xf32>
      %780 = arith.addf %774, %779 : vector<8x128xf32>
      %781 = tpu.reciprocal %780 {approx = true} : vector<8x128xf32> -> vector<8x128xf32>
      %782 = arith.mulf %729, %781 : vector<8x128xf32>
      %cst_138 = arith.constant 1.000000e+00 : f32
      %783 = vector.broadcast %cst_138 : f32 to vector<8x128xf32>
      %784 = arith.minimumf %782, %783 : vector<8x128xf32>
      %785 = arith.subf %726, %722 : vector<8x128xf32>
      %786 = arith.mulf %784, %785 : vector<8x128xf32>
      %787 = arith.addf %722, %786 : vector<8x128xf32>
      %788 = arith.subf %728, %724 : vector<8x128xf32>
      %789 = arith.mulf %784, %788 : vector<8x128xf32>
      %790 = arith.addf %724, %789 : vector<8x128xf32>
      %791 = arith.select %772, %726, %726 : vector<8x128xi1>, vector<8x128xf32>
      %792 = arith.select %773, %787, %791 : vector<8x128xi1>, vector<8x128xf32>
      %793 = arith.select %772, %728, %31 : vector<8x128xi1>, vector<8x128xf32>
      %794 = arith.select %773, %790, %793 : vector<8x128xi1>, vector<8x128xf32>
      %795 = arith.select %770, %787, %726 : vector<8x128xi1>, vector<8x128xf32>
      %796 = arith.select %772, %726, %795 : vector<8x128xi1>, vector<8x128xf32>
      %797 = arith.select %770, %790, %31 : vector<8x128xi1>, vector<8x128xf32>
      %798 = arith.select %772, %728, %797 : vector<8x128xi1>, vector<8x128xf32>
      %799 = arith.mulf %757, %794 : vector<8x128xf32>
      %800 = arith.mulf %792, %759 : vector<8x128xf32>
      %801 = arith.subf %799, %800 : vector<8x128xf32>
      %802 = arith.addf %767, %801 : vector<8x128xf32>
      %803 = arith.mulf %792, %798 : vector<8x128xf32>
      %804 = arith.mulf %796, %794 : vector<8x128xf32>
      %805 = arith.subf %803, %804 : vector<8x128xf32>
      %806 = arith.addf %802, %805 : vector<8x128xf32>
      %807 = arith.addf %171, %25 : vector<8x128xf32>
      %cst_139 = arith.constant 0.000000e+00 : f32
      %808 = vector.broadcast %cst_139 : f32 to vector<8x128xf32>
      %809 = arith.cmpf oge, %558, %808 : vector<8x128xf32>
      %cst_140 = arith.constant 0.000000e+00 : f32
      %810 = vector.broadcast %cst_140 : f32 to vector<8x128xf32>
      %811 = arith.cmpf oge, %807, %810 : vector<8x128xf32>
      %812 = arith.xori %809, %811 : vector<8x128xi1>
      %813 = arith.subf %558, %807 : vector<8x128xf32>
      %cst_141 = arith.constant 0.000000e+00 : f32
      %814 = vector.broadcast %cst_141 : f32 to vector<8x128xf32>
      %815 = arith.cmpf oge, %813, %814 : vector<8x128xf32>
      %cst_142 = arith.constant 9.99999971E-10 : f32
      %cst_143 = arith.constant -9.99999971E-10 : f32
      %816 = vector.broadcast %cst_142 : f32 to vector<8x128xf32>
      %817 = vector.broadcast %cst_143 : f32 to vector<8x128xf32>
      %818 = arith.select %815, %816, %817 : vector<8x128xi1>, vector<8x128xf32>
      %819 = arith.addf %813, %818 : vector<8x128xf32>
      %820 = tpu.reciprocal %819 {approx = true} : vector<8x128xf32> -> vector<8x128xf32>
      %821 = arith.mulf %558, %820 : vector<8x128xf32>
      %cst_144 = arith.constant 1.000000e+00 : f32
      %822 = vector.broadcast %cst_144 : f32 to vector<8x128xf32>
      %823 = arith.minimumf %821, %822 : vector<8x128xf32>
      %824 = arith.subf %171, %144 : vector<8x128xf32>
      %825 = arith.mulf %823, %824 : vector<8x128xf32>
      %826 = arith.addf %144, %825 : vector<8x128xf32>
      %827 = arith.subf %173, %146 : vector<8x128xf32>
      %828 = arith.mulf %823, %827 : vector<8x128xf32>
      %829 = arith.addf %146, %828 : vector<8x128xf32>
      %830 = arith.select %811, %171, %29 : vector<8x128xi1>, vector<8x128xf32>
      %831 = arith.select %812, %826, %830 : vector<8x128xi1>, vector<8x128xf32>
      %832 = arith.select %811, %173, %173 : vector<8x128xi1>, vector<8x128xf32>
      %833 = arith.select %812, %829, %832 : vector<8x128xi1>, vector<8x128xf32>
      %834 = arith.select %809, %826, %29 : vector<8x128xi1>, vector<8x128xf32>
      %835 = arith.select %811, %171, %834 : vector<8x128xi1>, vector<8x128xf32>
      %836 = arith.select %809, %829, %173 : vector<8x128xi1>, vector<8x128xf32>
      %837 = arith.select %811, %173, %836 : vector<8x128xi1>, vector<8x128xf32>
      %838 = arith.subf %27, %833 : vector<8x128xf32>
      %cst_145 = arith.constant 0.000000e+00 : f32
      %839 = vector.broadcast %cst_145 : f32 to vector<8x128xf32>
      %840 = arith.cmpf oge, %698, %839 : vector<8x128xf32>
      %cst_146 = arith.constant 0.000000e+00 : f32
      %841 = vector.broadcast %cst_146 : f32 to vector<8x128xf32>
      %842 = arith.cmpf oge, %838, %841 : vector<8x128xf32>
      %843 = arith.xori %840, %842 : vector<8x128xi1>
      %844 = arith.subf %698, %838 : vector<8x128xf32>
      %cst_147 = arith.constant 0.000000e+00 : f32
      %845 = vector.broadcast %cst_147 : f32 to vector<8x128xf32>
      %846 = arith.cmpf oge, %844, %845 : vector<8x128xf32>
      %cst_148 = arith.constant 9.99999971E-10 : f32
      %cst_149 = arith.constant -9.99999971E-10 : f32
      %847 = vector.broadcast %cst_148 : f32 to vector<8x128xf32>
      %848 = vector.broadcast %cst_149 : f32 to vector<8x128xf32>
      %849 = arith.select %846, %847, %848 : vector<8x128xi1>, vector<8x128xf32>
      %850 = arith.addf %844, %849 : vector<8x128xf32>
      %851 = tpu.reciprocal %850 {approx = true} : vector<8x128xf32> -> vector<8x128xf32>
      %852 = arith.mulf %698, %851 : vector<8x128xf32>
      %cst_150 = arith.constant 1.000000e+00 : f32
      %853 = vector.broadcast %cst_150 : f32 to vector<8x128xf32>
      %854 = arith.minimumf %852, %853 : vector<8x128xf32>
      %855 = arith.subf %831, %586 : vector<8x128xf32>
      %856 = arith.mulf %854, %855 : vector<8x128xf32>
      %857 = arith.addf %586, %856 : vector<8x128xf32>
      %858 = arith.subf %833, %588 : vector<8x128xf32>
      %859 = arith.mulf %854, %858 : vector<8x128xf32>
      %860 = arith.addf %588, %859 : vector<8x128xf32>
      %861 = arith.select %842, %831, %831 : vector<8x128xi1>, vector<8x128xf32>
      %862 = arith.select %843, %857, %861 : vector<8x128xi1>, vector<8x128xf32>
      %863 = arith.select %842, %833, %27 : vector<8x128xi1>, vector<8x128xf32>
      %864 = arith.select %843, %860, %863 : vector<8x128xi1>, vector<8x128xf32>
      %865 = arith.select %840, %857, %831 : vector<8x128xi1>, vector<8x128xf32>
      %866 = arith.select %842, %831, %865 : vector<8x128xi1>, vector<8x128xf32>
      %867 = arith.select %840, %860, %27 : vector<8x128xi1>, vector<8x128xf32>
      %868 = arith.select %842, %833, %867 : vector<8x128xi1>, vector<8x128xf32>
      %869 = arith.addf %864, %27 : vector<8x128xf32>
      %cst_151 = arith.constant 0.000000e+00 : f32
      %870 = vector.broadcast %cst_151 : f32 to vector<8x128xf32>
      %871 = arith.cmpf oge, %768, %870 : vector<8x128xf32>
      %cst_152 = arith.constant 0.000000e+00 : f32
      %872 = vector.broadcast %cst_152 : f32 to vector<8x128xf32>
      %873 = arith.cmpf oge, %869, %872 : vector<8x128xf32>
      %874 = arith.xori %871, %873 : vector<8x128xi1>
      %875 = arith.subf %768, %869 : vector<8x128xf32>
      %cst_153 = arith.constant 0.000000e+00 : f32
      %876 = vector.broadcast %cst_153 : f32 to vector<8x128xf32>
      %877 = arith.cmpf oge, %875, %876 : vector<8x128xf32>
      %cst_154 = arith.constant 9.99999971E-10 : f32
      %cst_155 = arith.constant -9.99999971E-10 : f32
      %878 = vector.broadcast %cst_154 : f32 to vector<8x128xf32>
      %879 = vector.broadcast %cst_155 : f32 to vector<8x128xf32>
      %880 = arith.select %877, %878, %879 : vector<8x128xi1>, vector<8x128xf32>
      %881 = arith.addf %875, %880 : vector<8x128xf32>
      %882 = tpu.reciprocal %881 {approx = true} : vector<8x128xf32> -> vector<8x128xf32>
      %883 = arith.mulf %768, %882 : vector<8x128xf32>
      %cst_156 = arith.constant 1.000000e+00 : f32
      %884 = vector.broadcast %cst_156 : f32 to vector<8x128xf32>
      %885 = arith.minimumf %883, %884 : vector<8x128xf32>
      %886 = arith.subf %862, %726 : vector<8x128xf32>
      %887 = arith.mulf %885, %886 : vector<8x128xf32>
      %888 = arith.addf %726, %887 : vector<8x128xf32>
      %889 = arith.subf %864, %728 : vector<8x128xf32>
      %890 = arith.mulf %885, %889 : vector<8x128xf32>
      %891 = arith.addf %728, %890 : vector<8x128xf32>
      %892 = arith.select %873, %862, %862 : vector<8x128xi1>, vector<8x128xf32>
      %893 = arith.select %874, %888, %892 : vector<8x128xi1>, vector<8x128xf32>
      %894 = arith.select %873, %864, %31 : vector<8x128xi1>, vector<8x128xf32>
      %895 = arith.select %874, %891, %894 : vector<8x128xi1>, vector<8x128xf32>
      %896 = arith.select %871, %888, %862 : vector<8x128xi1>, vector<8x128xf32>
      %897 = arith.select %873, %862, %896 : vector<8x128xi1>, vector<8x128xf32>
      %898 = arith.select %871, %891, %31 : vector<8x128xi1>, vector<8x128xf32>
      %899 = arith.select %873, %864, %898 : vector<8x128xi1>, vector<8x128xf32>
      %900 = arith.mulf %796, %895 : vector<8x128xf32>
      %901 = arith.mulf %893, %798 : vector<8x128xf32>
      %902 = arith.subf %900, %901 : vector<8x128xf32>
      %903 = arith.addf %806, %902 : vector<8x128xf32>
      %904 = arith.mulf %893, %899 : vector<8x128xf32>
      %905 = arith.mulf %897, %895 : vector<8x128xf32>
      %906 = arith.subf %904, %905 : vector<8x128xf32>
      %907 = arith.addf %903, %906 : vector<8x128xf32>
      %908 = arith.addf %868, %27 : vector<8x128xf32>
      %cst_157 = arith.constant 0.000000e+00 : f32
      %909 = vector.broadcast %cst_157 : f32 to vector<8x128xf32>
      %910 = arith.cmpf oge, %869, %909 : vector<8x128xf32>
      %cst_158 = arith.constant 0.000000e+00 : f32
      %911 = vector.broadcast %cst_158 : f32 to vector<8x128xf32>
      %912 = arith.cmpf oge, %908, %911 : vector<8x128xf32>
      %913 = arith.xori %910, %912 : vector<8x128xi1>
      %914 = arith.subf %869, %908 : vector<8x128xf32>
      %cst_159 = arith.constant 0.000000e+00 : f32
      %915 = vector.broadcast %cst_159 : f32 to vector<8x128xf32>
      %916 = arith.cmpf oge, %914, %915 : vector<8x128xf32>
      %cst_160 = arith.constant 9.99999971E-10 : f32
      %cst_161 = arith.constant -9.99999971E-10 : f32
      %917 = vector.broadcast %cst_160 : f32 to vector<8x128xf32>
      %918 = vector.broadcast %cst_161 : f32 to vector<8x128xf32>
      %919 = arith.select %916, %917, %918 : vector<8x128xi1>, vector<8x128xf32>
      %920 = arith.addf %914, %919 : vector<8x128xf32>
      %921 = tpu.reciprocal %920 {approx = true} : vector<8x128xf32> -> vector<8x128xf32>
      %922 = arith.mulf %869, %921 : vector<8x128xf32>
      %cst_162 = arith.constant 1.000000e+00 : f32
      %923 = vector.broadcast %cst_162 : f32 to vector<8x128xf32>
      %924 = arith.minimumf %922, %923 : vector<8x128xf32>
      %925 = arith.subf %866, %862 : vector<8x128xf32>
      %926 = arith.mulf %924, %925 : vector<8x128xf32>
      %927 = arith.addf %862, %926 : vector<8x128xf32>
      %928 = arith.subf %868, %864 : vector<8x128xf32>
      %929 = arith.mulf %924, %928 : vector<8x128xf32>
      %930 = arith.addf %864, %929 : vector<8x128xf32>
      %931 = arith.select %912, %866, %866 : vector<8x128xi1>, vector<8x128xf32>
      %932 = arith.select %913, %927, %931 : vector<8x128xi1>, vector<8x128xf32>
      %933 = arith.select %912, %868, %31 : vector<8x128xi1>, vector<8x128xf32>
      %934 = arith.select %913, %930, %933 : vector<8x128xi1>, vector<8x128xf32>
      %935 = arith.select %910, %927, %866 : vector<8x128xi1>, vector<8x128xf32>
      %936 = arith.select %912, %866, %935 : vector<8x128xi1>, vector<8x128xf32>
      %937 = arith.select %910, %930, %31 : vector<8x128xi1>, vector<8x128xf32>
      %938 = arith.select %912, %868, %937 : vector<8x128xi1>, vector<8x128xf32>
      %939 = arith.mulf %897, %934 : vector<8x128xf32>
      %940 = arith.mulf %932, %899 : vector<8x128xf32>
      %941 = arith.subf %939, %940 : vector<8x128xf32>
      %942 = arith.addf %907, %941 : vector<8x128xf32>
      %943 = arith.mulf %932, %938 : vector<8x128xf32>
      %944 = arith.mulf %936, %934 : vector<8x128xf32>
      %945 = arith.subf %943, %944 : vector<8x128xf32>
      %946 = arith.addf %942, %945 : vector<8x128xf32>
      %947 = arith.subf %27, %837 : vector<8x128xf32>
      %cst_163 = arith.constant 0.000000e+00 : f32
      %948 = vector.broadcast %cst_163 : f32 to vector<8x128xf32>
      %949 = arith.cmpf oge, %838, %948 : vector<8x128xf32>
      %cst_164 = arith.constant 0.000000e+00 : f32
      %950 = vector.broadcast %cst_164 : f32 to vector<8x128xf32>
      %951 = arith.cmpf oge, %947, %950 : vector<8x128xf32>
      %952 = arith.xori %949, %951 : vector<8x128xi1>
      %953 = arith.subf %838, %947 : vector<8x128xf32>
      %cst_165 = arith.constant 0.000000e+00 : f32
      %954 = vector.broadcast %cst_165 : f32 to vector<8x128xf32>
      %955 = arith.cmpf oge, %953, %954 : vector<8x128xf32>
      %cst_166 = arith.constant 9.99999971E-10 : f32
      %cst_167 = arith.constant -9.99999971E-10 : f32
      %956 = vector.broadcast %cst_166 : f32 to vector<8x128xf32>
      %957 = vector.broadcast %cst_167 : f32 to vector<8x128xf32>
      %958 = arith.select %955, %956, %957 : vector<8x128xi1>, vector<8x128xf32>
      %959 = arith.addf %953, %958 : vector<8x128xf32>
      %960 = tpu.reciprocal %959 {approx = true} : vector<8x128xf32> -> vector<8x128xf32>
      %961 = arith.mulf %838, %960 : vector<8x128xf32>
      %cst_168 = arith.constant 1.000000e+00 : f32
      %962 = vector.broadcast %cst_168 : f32 to vector<8x128xf32>
      %963 = arith.minimumf %961, %962 : vector<8x128xf32>
      %964 = arith.subf %835, %831 : vector<8x128xf32>
      %965 = arith.mulf %963, %964 : vector<8x128xf32>
      %966 = arith.addf %831, %965 : vector<8x128xf32>
      %967 = arith.subf %837, %833 : vector<8x128xf32>
      %968 = arith.mulf %963, %967 : vector<8x128xf32>
      %969 = arith.addf %833, %968 : vector<8x128xf32>
      %970 = arith.select %951, %835, %835 : vector<8x128xi1>, vector<8x128xf32>
      %971 = arith.select %952, %966, %970 : vector<8x128xi1>, vector<8x128xf32>
      %972 = arith.select %951, %837, %27 : vector<8x128xi1>, vector<8x128xf32>
      %973 = arith.select %952, %969, %972 : vector<8x128xi1>, vector<8x128xf32>
      %974 = arith.select %949, %966, %835 : vector<8x128xi1>, vector<8x128xf32>
      %975 = arith.select %951, %835, %974 : vector<8x128xi1>, vector<8x128xf32>
      %976 = arith.select %949, %969, %27 : vector<8x128xi1>, vector<8x128xf32>
      %977 = arith.select %951, %837, %976 : vector<8x128xi1>, vector<8x128xf32>
      %978 = arith.addf %973, %27 : vector<8x128xf32>
      %cst_169 = arith.constant 0.000000e+00 : f32
      %979 = vector.broadcast %cst_169 : f32 to vector<8x128xf32>
      %980 = arith.cmpf oge, %908, %979 : vector<8x128xf32>
      %cst_170 = arith.constant 0.000000e+00 : f32
      %981 = vector.broadcast %cst_170 : f32 to vector<8x128xf32>
      %982 = arith.cmpf oge, %978, %981 : vector<8x128xf32>
      %983 = arith.xori %980, %982 : vector<8x128xi1>
      %984 = arith.subf %908, %978 : vector<8x128xf32>
      %cst_171 = arith.constant 0.000000e+00 : f32
      %985 = vector.broadcast %cst_171 : f32 to vector<8x128xf32>
      %986 = arith.cmpf oge, %984, %985 : vector<8x128xf32>
      %cst_172 = arith.constant 9.99999971E-10 : f32
      %cst_173 = arith.constant -9.99999971E-10 : f32
      %987 = vector.broadcast %cst_172 : f32 to vector<8x128xf32>
      %988 = vector.broadcast %cst_173 : f32 to vector<8x128xf32>
      %989 = arith.select %986, %987, %988 : vector<8x128xi1>, vector<8x128xf32>
      %990 = arith.addf %984, %989 : vector<8x128xf32>
      %991 = tpu.reciprocal %990 {approx = true} : vector<8x128xf32> -> vector<8x128xf32>
      %992 = arith.mulf %908, %991 : vector<8x128xf32>
      %cst_174 = arith.constant 1.000000e+00 : f32
      %993 = vector.broadcast %cst_174 : f32 to vector<8x128xf32>
      %994 = arith.minimumf %992, %993 : vector<8x128xf32>
      %995 = arith.subf %971, %866 : vector<8x128xf32>
      %996 = arith.mulf %994, %995 : vector<8x128xf32>
      %997 = arith.addf %866, %996 : vector<8x128xf32>
      %998 = arith.subf %973, %868 : vector<8x128xf32>
      %999 = arith.mulf %994, %998 : vector<8x128xf32>
      %1000 = arith.addf %868, %999 : vector<8x128xf32>
      %1001 = arith.select %982, %971, %971 : vector<8x128xi1>, vector<8x128xf32>
      %1002 = arith.select %983, %997, %1001 : vector<8x128xi1>, vector<8x128xf32>
      %1003 = arith.select %982, %973, %31 : vector<8x128xi1>, vector<8x128xf32>
      %1004 = arith.select %983, %1000, %1003 : vector<8x128xi1>, vector<8x128xf32>
      %1005 = arith.select %980, %997, %971 : vector<8x128xi1>, vector<8x128xf32>
      %1006 = arith.select %982, %971, %1005 : vector<8x128xi1>, vector<8x128xf32>
      %1007 = arith.select %980, %1000, %31 : vector<8x128xi1>, vector<8x128xf32>
      %1008 = arith.select %982, %973, %1007 : vector<8x128xi1>, vector<8x128xf32>
      %1009 = arith.mulf %936, %1004 : vector<8x128xf32>
      %1010 = arith.mulf %1002, %938 : vector<8x128xf32>
      %1011 = arith.subf %1009, %1010 : vector<8x128xf32>
      %1012 = arith.addf %946, %1011 : vector<8x128xf32>
      %1013 = arith.mulf %1002, %1008 : vector<8x128xf32>
      %1014 = arith.mulf %1006, %1004 : vector<8x128xf32>
      %1015 = arith.subf %1013, %1014 : vector<8x128xf32>
      %1016 = arith.addf %1012, %1015 : vector<8x128xf32>
      %1017 = arith.addf %977, %27 : vector<8x128xf32>
      %cst_175 = arith.constant 0.000000e+00 : f32
      %1018 = vector.broadcast %cst_175 : f32 to vector<8x128xf32>
      %1019 = arith.cmpf oge, %978, %1018 : vector<8x128xf32>
      %cst_176 = arith.constant 0.000000e+00 : f32
      %1020 = vector.broadcast %cst_176 : f32 to vector<8x128xf32>
      %1021 = arith.cmpf oge, %1017, %1020 : vector<8x128xf32>
      %1022 = arith.xori %1019, %1021 : vector<8x128xi1>
      %1023 = arith.subf %978, %1017 : vector<8x128xf32>
      %cst_177 = arith.constant 0.000000e+00 : f32
      %1024 = vector.broadcast %cst_177 : f32 to vector<8x128xf32>
      %1025 = arith.cmpf oge, %1023, %1024 : vector<8x128xf32>
      %cst_178 = arith.constant 9.99999971E-10 : f32
      %cst_179 = arith.constant -9.99999971E-10 : f32
      %1026 = vector.broadcast %cst_178 : f32 to vector<8x128xf32>
      %1027 = vector.broadcast %cst_179 : f32 to vector<8x128xf32>
      %1028 = arith.select %1025, %1026, %1027 : vector<8x128xi1>, vector<8x128xf32>
      %1029 = arith.addf %1023, %1028 : vector<8x128xf32>
      %1030 = tpu.reciprocal %1029 {approx = true} : vector<8x128xf32> -> vector<8x128xf32>
      %1031 = arith.mulf %978, %1030 : vector<8x128xf32>
      %cst_180 = arith.constant 1.000000e+00 : f32
      %1032 = vector.broadcast %cst_180 : f32 to vector<8x128xf32>
      %1033 = arith.minimumf %1031, %1032 : vector<8x128xf32>
      %1034 = arith.subf %975, %971 : vector<8x128xf32>
      %1035 = arith.mulf %1033, %1034 : vector<8x128xf32>
      %1036 = arith.addf %971, %1035 : vector<8x128xf32>
      %1037 = arith.subf %977, %973 : vector<8x128xf32>
      %1038 = arith.mulf %1033, %1037 : vector<8x128xf32>
      %1039 = arith.addf %973, %1038 : vector<8x128xf32>
      %1040 = arith.select %1021, %975, %975 : vector<8x128xi1>, vector<8x128xf32>
      %1041 = arith.select %1022, %1036, %1040 : vector<8x128xi1>, vector<8x128xf32>
      %1042 = arith.select %1021, %977, %31 : vector<8x128xi1>, vector<8x128xf32>
      %1043 = arith.select %1022, %1039, %1042 : vector<8x128xi1>, vector<8x128xf32>
      %1044 = arith.select %1019, %1036, %975 : vector<8x128xi1>, vector<8x128xf32>
      %1045 = arith.select %1021, %975, %1044 : vector<8x128xi1>, vector<8x128xf32>
      %1046 = arith.select %1019, %1039, %31 : vector<8x128xi1>, vector<8x128xf32>
      %1047 = arith.select %1021, %977, %1046 : vector<8x128xi1>, vector<8x128xf32>
      %1048 = arith.mulf %1006, %1043 : vector<8x128xf32>
      %1049 = arith.mulf %1041, %1008 : vector<8x128xf32>
      %1050 = arith.subf %1048, %1049 : vector<8x128xf32>
      %1051 = arith.addf %1016, %1050 : vector<8x128xf32>
      %1052 = arith.mulf %1041, %1047 : vector<8x128xf32>
      %1053 = arith.mulf %1045, %1043 : vector<8x128xf32>
      %1054 = arith.subf %1052, %1053 : vector<8x128xf32>
      %1055 = arith.addf %1051, %1054 : vector<8x128xf32>
      %1056 = arith.addf %175, %25 : vector<8x128xf32>
      %cst_181 = arith.constant 0.000000e+00 : f32
      %1057 = vector.broadcast %cst_181 : f32 to vector<8x128xf32>
      %1058 = arith.cmpf oge, %807, %1057 : vector<8x128xf32>
      %cst_182 = arith.constant 0.000000e+00 : f32
      %1059 = vector.broadcast %cst_182 : f32 to vector<8x128xf32>
      %1060 = arith.cmpf oge, %1056, %1059 : vector<8x128xf32>
      %1061 = arith.xori %1058, %1060 : vector<8x128xi1>
      %1062 = arith.subf %807, %1056 : vector<8x128xf32>
      %cst_183 = arith.constant 0.000000e+00 : f32
      %1063 = vector.broadcast %cst_183 : f32 to vector<8x128xf32>
      %1064 = arith.cmpf oge, %1062, %1063 : vector<8x128xf32>
      %cst_184 = arith.constant 9.99999971E-10 : f32
      %cst_185 = arith.constant -9.99999971E-10 : f32
      %1065 = vector.broadcast %cst_184 : f32 to vector<8x128xf32>
      %1066 = vector.broadcast %cst_185 : f32 to vector<8x128xf32>
      %1067 = arith.select %1064, %1065, %1066 : vector<8x128xi1>, vector<8x128xf32>
      %1068 = arith.addf %1062, %1067 : vector<8x128xf32>
      %1069 = tpu.reciprocal %1068 {approx = true} : vector<8x128xf32> -> vector<8x128xf32>
      %1070 = arith.mulf %807, %1069 : vector<8x128xf32>
      %cst_186 = arith.constant 1.000000e+00 : f32
      %1071 = vector.broadcast %cst_186 : f32 to vector<8x128xf32>
      %1072 = arith.minimumf %1070, %1071 : vector<8x128xf32>
      %1073 = arith.subf %175, %171 : vector<8x128xf32>
      %1074 = arith.mulf %1072, %1073 : vector<8x128xf32>
      %1075 = arith.addf %171, %1074 : vector<8x128xf32>
      %1076 = arith.subf %177, %173 : vector<8x128xf32>
      %1077 = arith.mulf %1072, %1076 : vector<8x128xf32>
      %1078 = arith.addf %173, %1077 : vector<8x128xf32>
      %1079 = arith.select %1060, %175, %29 : vector<8x128xi1>, vector<8x128xf32>
      %1080 = arith.select %1061, %1075, %1079 : vector<8x128xi1>, vector<8x128xf32>
      %1081 = arith.select %1060, %177, %177 : vector<8x128xi1>, vector<8x128xf32>
      %1082 = arith.select %1061, %1078, %1081 : vector<8x128xi1>, vector<8x128xf32>
      %1083 = arith.select %1058, %1075, %29 : vector<8x128xi1>, vector<8x128xf32>
      %1084 = arith.select %1060, %175, %1083 : vector<8x128xi1>, vector<8x128xf32>
      %1085 = arith.select %1058, %1078, %177 : vector<8x128xi1>, vector<8x128xf32>
      %1086 = arith.select %1060, %177, %1085 : vector<8x128xi1>, vector<8x128xf32>
      %1087 = arith.subf %27, %1082 : vector<8x128xf32>
      %cst_187 = arith.constant 0.000000e+00 : f32
      %1088 = vector.broadcast %cst_187 : f32 to vector<8x128xf32>
      %1089 = arith.cmpf oge, %947, %1088 : vector<8x128xf32>
      %cst_188 = arith.constant 0.000000e+00 : f32
      %1090 = vector.broadcast %cst_188 : f32 to vector<8x128xf32>
      %1091 = arith.cmpf oge, %1087, %1090 : vector<8x128xf32>
      %1092 = arith.xori %1089, %1091 : vector<8x128xi1>
      %1093 = arith.subf %947, %1087 : vector<8x128xf32>
      %cst_189 = arith.constant 0.000000e+00 : f32
      %1094 = vector.broadcast %cst_189 : f32 to vector<8x128xf32>
      %1095 = arith.cmpf oge, %1093, %1094 : vector<8x128xf32>
      %cst_190 = arith.constant 9.99999971E-10 : f32
      %cst_191 = arith.constant -9.99999971E-10 : f32
      %1096 = vector.broadcast %cst_190 : f32 to vector<8x128xf32>
      %1097 = vector.broadcast %cst_191 : f32 to vector<8x128xf32>
      %1098 = arith.select %1095, %1096, %1097 : vector<8x128xi1>, vector<8x128xf32>
      %1099 = arith.addf %1093, %1098 : vector<8x128xf32>
      %1100 = tpu.reciprocal %1099 {approx = true} : vector<8x128xf32> -> vector<8x128xf32>
      %1101 = arith.mulf %947, %1100 : vector<8x128xf32>
      %cst_192 = arith.constant 1.000000e+00 : f32
      %1102 = vector.broadcast %cst_192 : f32 to vector<8x128xf32>
      %1103 = arith.minimumf %1101, %1102 : vector<8x128xf32>
      %1104 = arith.subf %1080, %835 : vector<8x128xf32>
      %1105 = arith.mulf %1103, %1104 : vector<8x128xf32>
      %1106 = arith.addf %835, %1105 : vector<8x128xf32>
      %1107 = arith.subf %1082, %837 : vector<8x128xf32>
      %1108 = arith.mulf %1103, %1107 : vector<8x128xf32>
      %1109 = arith.addf %837, %1108 : vector<8x128xf32>
      %1110 = arith.select %1091, %1080, %1080 : vector<8x128xi1>, vector<8x128xf32>
      %1111 = arith.select %1092, %1106, %1110 : vector<8x128xi1>, vector<8x128xf32>
      %1112 = arith.select %1091, %1082, %27 : vector<8x128xi1>, vector<8x128xf32>
      %1113 = arith.select %1092, %1109, %1112 : vector<8x128xi1>, vector<8x128xf32>
      %1114 = arith.select %1089, %1106, %1080 : vector<8x128xi1>, vector<8x128xf32>
      %1115 = arith.select %1091, %1080, %1114 : vector<8x128xi1>, vector<8x128xf32>
      %1116 = arith.select %1089, %1109, %27 : vector<8x128xi1>, vector<8x128xf32>
      %1117 = arith.select %1091, %1082, %1116 : vector<8x128xi1>, vector<8x128xf32>
      %1118 = arith.addf %1113, %27 : vector<8x128xf32>
      %cst_193 = arith.constant 0.000000e+00 : f32
      %1119 = vector.broadcast %cst_193 : f32 to vector<8x128xf32>
      %1120 = arith.cmpf oge, %1017, %1119 : vector<8x128xf32>
      %cst_194 = arith.constant 0.000000e+00 : f32
      %1121 = vector.broadcast %cst_194 : f32 to vector<8x128xf32>
      %1122 = arith.cmpf oge, %1118, %1121 : vector<8x128xf32>
      %1123 = arith.xori %1120, %1122 : vector<8x128xi1>
      %1124 = arith.subf %1017, %1118 : vector<8x128xf32>
      %cst_195 = arith.constant 0.000000e+00 : f32
      %1125 = vector.broadcast %cst_195 : f32 to vector<8x128xf32>
      %1126 = arith.cmpf oge, %1124, %1125 : vector<8x128xf32>
      %cst_196 = arith.constant 9.99999971E-10 : f32
      %cst_197 = arith.constant -9.99999971E-10 : f32
      %1127 = vector.broadcast %cst_196 : f32 to vector<8x128xf32>
      %1128 = vector.broadcast %cst_197 : f32 to vector<8x128xf32>
      %1129 = arith.select %1126, %1127, %1128 : vector<8x128xi1>, vector<8x128xf32>
      %1130 = arith.addf %1124, %1129 : vector<8x128xf32>
      %1131 = tpu.reciprocal %1130 {approx = true} : vector<8x128xf32> -> vector<8x128xf32>
      %1132 = arith.mulf %1017, %1131 : vector<8x128xf32>
      %cst_198 = arith.constant 1.000000e+00 : f32
      %1133 = vector.broadcast %cst_198 : f32 to vector<8x128xf32>
      %1134 = arith.minimumf %1132, %1133 : vector<8x128xf32>
      %1135 = arith.subf %1111, %975 : vector<8x128xf32>
      %1136 = arith.mulf %1134, %1135 : vector<8x128xf32>
      %1137 = arith.addf %975, %1136 : vector<8x128xf32>
      %1138 = arith.subf %1113, %977 : vector<8x128xf32>
      %1139 = arith.mulf %1134, %1138 : vector<8x128xf32>
      %1140 = arith.addf %977, %1139 : vector<8x128xf32>
      %1141 = arith.select %1122, %1111, %1111 : vector<8x128xi1>, vector<8x128xf32>
      %1142 = arith.select %1123, %1137, %1141 : vector<8x128xi1>, vector<8x128xf32>
      %1143 = arith.select %1122, %1113, %31 : vector<8x128xi1>, vector<8x128xf32>
      %1144 = arith.select %1123, %1140, %1143 : vector<8x128xi1>, vector<8x128xf32>
      %1145 = arith.select %1120, %1137, %1111 : vector<8x128xi1>, vector<8x128xf32>
      %1146 = arith.select %1122, %1111, %1145 : vector<8x128xi1>, vector<8x128xf32>
      %1147 = arith.select %1120, %1140, %31 : vector<8x128xi1>, vector<8x128xf32>
      %1148 = arith.select %1122, %1113, %1147 : vector<8x128xi1>, vector<8x128xf32>
      %1149 = arith.mulf %1045, %1144 : vector<8x128xf32>
      %1150 = arith.mulf %1142, %1047 : vector<8x128xf32>
      %1151 = arith.subf %1149, %1150 : vector<8x128xf32>
      %1152 = arith.addf %1055, %1151 : vector<8x128xf32>
      %1153 = arith.mulf %1142, %1148 : vector<8x128xf32>
      %1154 = arith.mulf %1146, %1144 : vector<8x128xf32>
      %1155 = arith.subf %1153, %1154 : vector<8x128xf32>
      %1156 = arith.addf %1152, %1155 : vector<8x128xf32>
      %1157 = arith.addf %1117, %27 : vector<8x128xf32>
      %cst_199 = arith.constant 0.000000e+00 : f32
      %1158 = vector.broadcast %cst_199 : f32 to vector<8x128xf32>
      %1159 = arith.cmpf oge, %1118, %1158 : vector<8x128xf32>
      %cst_200 = arith.constant 0.000000e+00 : f32
      %1160 = vector.broadcast %cst_200 : f32 to vector<8x128xf32>
      %1161 = arith.cmpf oge, %1157, %1160 : vector<8x128xf32>
      %1162 = arith.xori %1159, %1161 : vector<8x128xi1>
      %1163 = arith.subf %1118, %1157 : vector<8x128xf32>
      %cst_201 = arith.constant 0.000000e+00 : f32
      %1164 = vector.broadcast %cst_201 : f32 to vector<8x128xf32>
      %1165 = arith.cmpf oge, %1163, %1164 : vector<8x128xf32>
      %cst_202 = arith.constant 9.99999971E-10 : f32
      %cst_203 = arith.constant -9.99999971E-10 : f32
      %1166 = vector.broadcast %cst_202 : f32 to vector<8x128xf32>
      %1167 = vector.broadcast %cst_203 : f32 to vector<8x128xf32>
      %1168 = arith.select %1165, %1166, %1167 : vector<8x128xi1>, vector<8x128xf32>
      %1169 = arith.addf %1163, %1168 : vector<8x128xf32>
      %1170 = tpu.reciprocal %1169 {approx = true} : vector<8x128xf32> -> vector<8x128xf32>
      %1171 = arith.mulf %1118, %1170 : vector<8x128xf32>
      %cst_204 = arith.constant 1.000000e+00 : f32
      %1172 = vector.broadcast %cst_204 : f32 to vector<8x128xf32>
      %1173 = arith.minimumf %1171, %1172 : vector<8x128xf32>
      %1174 = arith.subf %1115, %1111 : vector<8x128xf32>
      %1175 = arith.mulf %1173, %1174 : vector<8x128xf32>
      %1176 = arith.addf %1111, %1175 : vector<8x128xf32>
      %1177 = arith.subf %1117, %1113 : vector<8x128xf32>
      %1178 = arith.mulf %1173, %1177 : vector<8x128xf32>
      %1179 = arith.addf %1113, %1178 : vector<8x128xf32>
      %1180 = arith.select %1161, %1115, %1115 : vector<8x128xi1>, vector<8x128xf32>
      %1181 = arith.select %1162, %1176, %1180 : vector<8x128xi1>, vector<8x128xf32>
      %1182 = arith.select %1161, %1117, %31 : vector<8x128xi1>, vector<8x128xf32>
      %1183 = arith.select %1162, %1179, %1182 : vector<8x128xi1>, vector<8x128xf32>
      %1184 = arith.select %1159, %1176, %1115 : vector<8x128xi1>, vector<8x128xf32>
      %1185 = arith.select %1161, %1115, %1184 : vector<8x128xi1>, vector<8x128xf32>
      %1186 = arith.select %1159, %1179, %31 : vector<8x128xi1>, vector<8x128xf32>
      %1187 = arith.select %1161, %1117, %1186 : vector<8x128xi1>, vector<8x128xf32>
      %1188 = arith.mulf %1146, %1183 : vector<8x128xf32>
      %1189 = arith.mulf %1181, %1148 : vector<8x128xf32>
      %1190 = arith.subf %1188, %1189 : vector<8x128xf32>
      %1191 = arith.addf %1156, %1190 : vector<8x128xf32>
      %1192 = arith.mulf %1181, %1187 : vector<8x128xf32>
      %1193 = arith.mulf %1185, %1183 : vector<8x128xf32>
      %1194 = arith.subf %1192, %1193 : vector<8x128xf32>
      %1195 = arith.addf %1191, %1194 : vector<8x128xf32>
      %1196 = arith.subf %27, %1086 : vector<8x128xf32>
      %cst_205 = arith.constant 0.000000e+00 : f32
      %1197 = vector.broadcast %cst_205 : f32 to vector<8x128xf32>
      %1198 = arith.cmpf oge, %1087, %1197 : vector<8x128xf32>
      %cst_206 = arith.constant 0.000000e+00 : f32
      %1199 = vector.broadcast %cst_206 : f32 to vector<8x128xf32>
      %1200 = arith.cmpf oge, %1196, %1199 : vector<8x128xf32>
      %1201 = arith.xori %1198, %1200 : vector<8x128xi1>
      %1202 = arith.subf %1087, %1196 : vector<8x128xf32>
      %cst_207 = arith.constant 0.000000e+00 : f32
      %1203 = vector.broadcast %cst_207 : f32 to vector<8x128xf32>
      %1204 = arith.cmpf oge, %1202, %1203 : vector<8x128xf32>
      %cst_208 = arith.constant 9.99999971E-10 : f32
      %cst_209 = arith.constant -9.99999971E-10 : f32
      %1205 = vector.broadcast %cst_208 : f32 to vector<8x128xf32>
      %1206 = vector.broadcast %cst_209 : f32 to vector<8x128xf32>
      %1207 = arith.select %1204, %1205, %1206 : vector<8x128xi1>, vector<8x128xf32>
      %1208 = arith.addf %1202, %1207 : vector<8x128xf32>
      %1209 = tpu.reciprocal %1208 {approx = true} : vector<8x128xf32> -> vector<8x128xf32>
      %1210 = arith.mulf %1087, %1209 : vector<8x128xf32>
      %cst_210 = arith.constant 1.000000e+00 : f32
      %1211 = vector.broadcast %cst_210 : f32 to vector<8x128xf32>
      %1212 = arith.minimumf %1210, %1211 : vector<8x128xf32>
      %1213 = arith.subf %1084, %1080 : vector<8x128xf32>
      %1214 = arith.mulf %1212, %1213 : vector<8x128xf32>
      %1215 = arith.addf %1080, %1214 : vector<8x128xf32>
      %1216 = arith.subf %1086, %1082 : vector<8x128xf32>
      %1217 = arith.mulf %1212, %1216 : vector<8x128xf32>
      %1218 = arith.addf %1082, %1217 : vector<8x128xf32>
      %1219 = arith.select %1200, %1084, %1084 : vector<8x128xi1>, vector<8x128xf32>
      %1220 = arith.select %1201, %1215, %1219 : vector<8x128xi1>, vector<8x128xf32>
      %1221 = arith.select %1200, %1086, %27 : vector<8x128xi1>, vector<8x128xf32>
      %1222 = arith.select %1201, %1218, %1221 : vector<8x128xi1>, vector<8x128xf32>
      %1223 = arith.select %1198, %1215, %1084 : vector<8x128xi1>, vector<8x128xf32>
      %1224 = arith.select %1200, %1084, %1223 : vector<8x128xi1>, vector<8x128xf32>
      %1225 = arith.select %1198, %1218, %27 : vector<8x128xi1>, vector<8x128xf32>
      %1226 = arith.select %1200, %1086, %1225 : vector<8x128xi1>, vector<8x128xf32>
      %1227 = arith.addf %1222, %27 : vector<8x128xf32>
      %cst_211 = arith.constant 0.000000e+00 : f32
      %1228 = vector.broadcast %cst_211 : f32 to vector<8x128xf32>
      %1229 = arith.cmpf oge, %1157, %1228 : vector<8x128xf32>
      %cst_212 = arith.constant 0.000000e+00 : f32
      %1230 = vector.broadcast %cst_212 : f32 to vector<8x128xf32>
      %1231 = arith.cmpf oge, %1227, %1230 : vector<8x128xf32>
      %1232 = arith.xori %1229, %1231 : vector<8x128xi1>
      %1233 = arith.subf %1157, %1227 : vector<8x128xf32>
      %cst_213 = arith.constant 0.000000e+00 : f32
      %1234 = vector.broadcast %cst_213 : f32 to vector<8x128xf32>
      %1235 = arith.cmpf oge, %1233, %1234 : vector<8x128xf32>
      %cst_214 = arith.constant 9.99999971E-10 : f32
      %cst_215 = arith.constant -9.99999971E-10 : f32
      %1236 = vector.broadcast %cst_214 : f32 to vector<8x128xf32>
      %1237 = vector.broadcast %cst_215 : f32 to vector<8x128xf32>
      %1238 = arith.select %1235, %1236, %1237 : vector<8x128xi1>, vector<8x128xf32>
      %1239 = arith.addf %1233, %1238 : vector<8x128xf32>
      %1240 = tpu.reciprocal %1239 {approx = true} : vector<8x128xf32> -> vector<8x128xf32>
      %1241 = arith.mulf %1157, %1240 : vector<8x128xf32>
      %cst_216 = arith.constant 1.000000e+00 : f32
      %1242 = vector.broadcast %cst_216 : f32 to vector<8x128xf32>
      %1243 = arith.minimumf %1241, %1242 : vector<8x128xf32>
      %1244 = arith.subf %1220, %1115 : vector<8x128xf32>
      %1245 = arith.mulf %1243, %1244 : vector<8x128xf32>
      %1246 = arith.addf %1115, %1245 : vector<8x128xf32>
      %1247 = arith.subf %1222, %1117 : vector<8x128xf32>
      %1248 = arith.mulf %1243, %1247 : vector<8x128xf32>
      %1249 = arith.addf %1117, %1248 : vector<8x128xf32>
      %1250 = arith.select %1231, %1220, %1220 : vector<8x128xi1>, vector<8x128xf32>
      %1251 = arith.select %1232, %1246, %1250 : vector<8x128xi1>, vector<8x128xf32>
      %1252 = arith.select %1231, %1222, %31 : vector<8x128xi1>, vector<8x128xf32>
      %1253 = arith.select %1232, %1249, %1252 : vector<8x128xi1>, vector<8x128xf32>
      %1254 = arith.select %1229, %1246, %1220 : vector<8x128xi1>, vector<8x128xf32>
      %1255 = arith.select %1231, %1220, %1254 : vector<8x128xi1>, vector<8x128xf32>
      %1256 = arith.select %1229, %1249, %31 : vector<8x128xi1>, vector<8x128xf32>
      %1257 = arith.select %1231, %1222, %1256 : vector<8x128xi1>, vector<8x128xf32>
      %1258 = arith.mulf %1185, %1253 : vector<8x128xf32>
      %1259 = arith.mulf %1251, %1187 : vector<8x128xf32>
      %1260 = arith.subf %1258, %1259 : vector<8x128xf32>
      %1261 = arith.addf %1195, %1260 : vector<8x128xf32>
      %1262 = arith.mulf %1251, %1257 : vector<8x128xf32>
      %1263 = arith.mulf %1255, %1253 : vector<8x128xf32>
      %1264 = arith.subf %1262, %1263 : vector<8x128xf32>
      %1265 = arith.addf %1261, %1264 : vector<8x128xf32>
      %1266 = arith.addf %1226, %27 : vector<8x128xf32>
      %cst_217 = arith.constant 0.000000e+00 : f32
      %1267 = vector.broadcast %cst_217 : f32 to vector<8x128xf32>
      %1268 = arith.cmpf oge, %1227, %1267 : vector<8x128xf32>
      %cst_218 = arith.constant 0.000000e+00 : f32
      %1269 = vector.broadcast %cst_218 : f32 to vector<8x128xf32>
      %1270 = arith.cmpf oge, %1266, %1269 : vector<8x128xf32>
      %1271 = arith.xori %1268, %1270 : vector<8x128xi1>
      %1272 = arith.subf %1227, %1266 : vector<8x128xf32>
      %cst_219 = arith.constant 0.000000e+00 : f32
      %1273 = vector.broadcast %cst_219 : f32 to vector<8x128xf32>
      %1274 = arith.cmpf oge, %1272, %1273 : vector<8x128xf32>
      %cst_220 = arith.constant 9.99999971E-10 : f32
      %cst_221 = arith.constant -9.99999971E-10 : f32
      %1275 = vector.broadcast %cst_220 : f32 to vector<8x128xf32>
      %1276 = vector.broadcast %cst_221 : f32 to vector<8x128xf32>
      %1277 = arith.select %1274, %1275, %1276 : vector<8x128xi1>, vector<8x128xf32>
      %1278 = arith.addf %1272, %1277 : vector<8x128xf32>
      %1279 = tpu.reciprocal %1278 {approx = true} : vector<8x128xf32> -> vector<8x128xf32>
      %1280 = arith.mulf %1227, %1279 : vector<8x128xf32>
      %cst_222 = arith.constant 1.000000e+00 : f32
      %1281 = vector.broadcast %cst_222 : f32 to vector<8x128xf32>
      %1282 = arith.minimumf %1280, %1281 : vector<8x128xf32>
      %1283 = arith.subf %1224, %1220 : vector<8x128xf32>
      %1284 = arith.mulf %1282, %1283 : vector<8x128xf32>
      %1285 = arith.addf %1220, %1284 : vector<8x128xf32>
      %1286 = arith.subf %1226, %1222 : vector<8x128xf32>
      %1287 = arith.mulf %1282, %1286 : vector<8x128xf32>
      %1288 = arith.addf %1222, %1287 : vector<8x128xf32>
      %1289 = arith.select %1270, %1224, %1224 : vector<8x128xi1>, vector<8x128xf32>
      %1290 = arith.select %1271, %1285, %1289 : vector<8x128xi1>, vector<8x128xf32>
      %1291 = arith.select %1270, %1226, %31 : vector<8x128xi1>, vector<8x128xf32>
      %1292 = arith.select %1271, %1288, %1291 : vector<8x128xi1>, vector<8x128xf32>
      %1293 = arith.select %1268, %1285, %1224 : vector<8x128xi1>, vector<8x128xf32>
      %1294 = arith.select %1270, %1224, %1293 : vector<8x128xi1>, vector<8x128xf32>
      %1295 = arith.select %1268, %1288, %31 : vector<8x128xi1>, vector<8x128xf32>
      %1296 = arith.select %1270, %1226, %1295 : vector<8x128xi1>, vector<8x128xf32>
      %1297 = arith.mulf %1255, %1292 : vector<8x128xf32>
      %1298 = arith.mulf %1290, %1257 : vector<8x128xf32>
      %1299 = arith.subf %1297, %1298 : vector<8x128xf32>
      %1300 = arith.addf %1265, %1299 : vector<8x128xf32>
      %1301 = arith.mulf %1290, %1296 : vector<8x128xf32>
      %1302 = arith.mulf %1294, %1292 : vector<8x128xf32>
      %1303 = arith.subf %1301, %1302 : vector<8x128xf32>
      %1304 = arith.addf %1300, %1303 : vector<8x128xf32>
      %1305 = arith.addf %201, %25 : vector<8x128xf32>
      %cst_223 = arith.constant 0.000000e+00 : f32
      %1306 = vector.broadcast %cst_223 : f32 to vector<8x128xf32>
      %1307 = arith.cmpf oge, %1056, %1306 : vector<8x128xf32>
      %cst_224 = arith.constant 0.000000e+00 : f32
      %1308 = vector.broadcast %cst_224 : f32 to vector<8x128xf32>
      %1309 = arith.cmpf oge, %1305, %1308 : vector<8x128xf32>
      %1310 = arith.xori %1307, %1309 : vector<8x128xi1>
      %1311 = arith.subf %1056, %1305 : vector<8x128xf32>
      %cst_225 = arith.constant 0.000000e+00 : f32
      %1312 = vector.broadcast %cst_225 : f32 to vector<8x128xf32>
      %1313 = arith.cmpf oge, %1311, %1312 : vector<8x128xf32>
      %cst_226 = arith.constant 9.99999971E-10 : f32
      %cst_227 = arith.constant -9.99999971E-10 : f32
      %1314 = vector.broadcast %cst_226 : f32 to vector<8x128xf32>
      %1315 = vector.broadcast %cst_227 : f32 to vector<8x128xf32>
      %1316 = arith.select %1313, %1314, %1315 : vector<8x128xi1>, vector<8x128xf32>
      %1317 = arith.addf %1311, %1316 : vector<8x128xf32>
      %1318 = tpu.reciprocal %1317 {approx = true} : vector<8x128xf32> -> vector<8x128xf32>
      %1319 = arith.mulf %1056, %1318 : vector<8x128xf32>
      %cst_228 = arith.constant 1.000000e+00 : f32
      %1320 = vector.broadcast %cst_228 : f32 to vector<8x128xf32>
      %1321 = arith.minimumf %1319, %1320 : vector<8x128xf32>
      %1322 = arith.subf %201, %175 : vector<8x128xf32>
      %1323 = arith.mulf %1321, %1322 : vector<8x128xf32>
      %1324 = arith.addf %175, %1323 : vector<8x128xf32>
      %1325 = arith.subf %203, %177 : vector<8x128xf32>
      %1326 = arith.mulf %1321, %1325 : vector<8x128xf32>
      %1327 = arith.addf %177, %1326 : vector<8x128xf32>
      %1328 = arith.select %1309, %201, %29 : vector<8x128xi1>, vector<8x128xf32>
      %1329 = arith.select %1310, %1324, %1328 : vector<8x128xi1>, vector<8x128xf32>
      %1330 = arith.select %1309, %203, %203 : vector<8x128xi1>, vector<8x128xf32>
      %1331 = arith.select %1310, %1327, %1330 : vector<8x128xi1>, vector<8x128xf32>
      %1332 = arith.select %1307, %1324, %29 : vector<8x128xi1>, vector<8x128xf32>
      %1333 = arith.select %1309, %201, %1332 : vector<8x128xi1>, vector<8x128xf32>
      %1334 = arith.select %1307, %1327, %203 : vector<8x128xi1>, vector<8x128xf32>
      %1335 = arith.select %1309, %203, %1334 : vector<8x128xi1>, vector<8x128xf32>
      %1336 = arith.subf %27, %1331 : vector<8x128xf32>
      %cst_229 = arith.constant 0.000000e+00 : f32
      %1337 = vector.broadcast %cst_229 : f32 to vector<8x128xf32>
      %1338 = arith.cmpf oge, %1196, %1337 : vector<8x128xf32>
      %cst_230 = arith.constant 0.000000e+00 : f32
      %1339 = vector.broadcast %cst_230 : f32 to vector<8x128xf32>
      %1340 = arith.cmpf oge, %1336, %1339 : vector<8x128xf32>
      %1341 = arith.xori %1338, %1340 : vector<8x128xi1>
      %1342 = arith.subf %1196, %1336 : vector<8x128xf32>
      %cst_231 = arith.constant 0.000000e+00 : f32
      %1343 = vector.broadcast %cst_231 : f32 to vector<8x128xf32>
      %1344 = arith.cmpf oge, %1342, %1343 : vector<8x128xf32>
      %cst_232 = arith.constant 9.99999971E-10 : f32
      %cst_233 = arith.constant -9.99999971E-10 : f32
      %1345 = vector.broadcast %cst_232 : f32 to vector<8x128xf32>
      %1346 = vector.broadcast %cst_233 : f32 to vector<8x128xf32>
      %1347 = arith.select %1344, %1345, %1346 : vector<8x128xi1>, vector<8x128xf32>
      %1348 = arith.addf %1342, %1347 : vector<8x128xf32>
      %1349 = tpu.reciprocal %1348 {approx = true} : vector<8x128xf32> -> vector<8x128xf32>
      %1350 = arith.mulf %1196, %1349 : vector<8x128xf32>
      %cst_234 = arith.constant 1.000000e+00 : f32
      %1351 = vector.broadcast %cst_234 : f32 to vector<8x128xf32>
      %1352 = arith.minimumf %1350, %1351 : vector<8x128xf32>
      %1353 = arith.subf %1329, %1084 : vector<8x128xf32>
      %1354 = arith.mulf %1352, %1353 : vector<8x128xf32>
      %1355 = arith.addf %1084, %1354 : vector<8x128xf32>
      %1356 = arith.subf %1331, %1086 : vector<8x128xf32>
      %1357 = arith.mulf %1352, %1356 : vector<8x128xf32>
      %1358 = arith.addf %1086, %1357 : vector<8x128xf32>
      %1359 = arith.select %1340, %1329, %1329 : vector<8x128xi1>, vector<8x128xf32>
      %1360 = arith.select %1341, %1355, %1359 : vector<8x128xi1>, vector<8x128xf32>
      %1361 = arith.select %1340, %1331, %27 : vector<8x128xi1>, vector<8x128xf32>
      %1362 = arith.select %1341, %1358, %1361 : vector<8x128xi1>, vector<8x128xf32>
      %1363 = arith.select %1338, %1355, %1329 : vector<8x128xi1>, vector<8x128xf32>
      %1364 = arith.select %1340, %1329, %1363 : vector<8x128xi1>, vector<8x128xf32>
      %1365 = arith.select %1338, %1358, %27 : vector<8x128xi1>, vector<8x128xf32>
      %1366 = arith.select %1340, %1331, %1365 : vector<8x128xi1>, vector<8x128xf32>
      %1367 = arith.addf %1362, %27 : vector<8x128xf32>
      %cst_235 = arith.constant 0.000000e+00 : f32
      %1368 = vector.broadcast %cst_235 : f32 to vector<8x128xf32>
      %1369 = arith.cmpf oge, %1266, %1368 : vector<8x128xf32>
      %cst_236 = arith.constant 0.000000e+00 : f32
      %1370 = vector.broadcast %cst_236 : f32 to vector<8x128xf32>
      %1371 = arith.cmpf oge, %1367, %1370 : vector<8x128xf32>
      %1372 = arith.xori %1369, %1371 : vector<8x128xi1>
      %1373 = arith.subf %1266, %1367 : vector<8x128xf32>
      %cst_237 = arith.constant 0.000000e+00 : f32
      %1374 = vector.broadcast %cst_237 : f32 to vector<8x128xf32>
      %1375 = arith.cmpf oge, %1373, %1374 : vector<8x128xf32>
      %cst_238 = arith.constant 9.99999971E-10 : f32
      %cst_239 = arith.constant -9.99999971E-10 : f32
      %1376 = vector.broadcast %cst_238 : f32 to vector<8x128xf32>
      %1377 = vector.broadcast %cst_239 : f32 to vector<8x128xf32>
      %1378 = arith.select %1375, %1376, %1377 : vector<8x128xi1>, vector<8x128xf32>
      %1379 = arith.addf %1373, %1378 : vector<8x128xf32>
      %1380 = tpu.reciprocal %1379 {approx = true} : vector<8x128xf32> -> vector<8x128xf32>
      %1381 = arith.mulf %1266, %1380 : vector<8x128xf32>
      %cst_240 = arith.constant 1.000000e+00 : f32
      %1382 = vector.broadcast %cst_240 : f32 to vector<8x128xf32>
      %1383 = arith.minimumf %1381, %1382 : vector<8x128xf32>
      %1384 = arith.subf %1360, %1224 : vector<8x128xf32>
      %1385 = arith.mulf %1383, %1384 : vector<8x128xf32>
      %1386 = arith.addf %1224, %1385 : vector<8x128xf32>
      %1387 = arith.subf %1362, %1226 : vector<8x128xf32>
      %1388 = arith.mulf %1383, %1387 : vector<8x128xf32>
      %1389 = arith.addf %1226, %1388 : vector<8x128xf32>
      %1390 = arith.select %1371, %1360, %1360 : vector<8x128xi1>, vector<8x128xf32>
      %1391 = arith.select %1372, %1386, %1390 : vector<8x128xi1>, vector<8x128xf32>
      %1392 = arith.select %1371, %1362, %31 : vector<8x128xi1>, vector<8x128xf32>
      %1393 = arith.select %1372, %1389, %1392 : vector<8x128xi1>, vector<8x128xf32>
      %1394 = arith.select %1369, %1386, %1360 : vector<8x128xi1>, vector<8x128xf32>
      %1395 = arith.select %1371, %1360, %1394 : vector<8x128xi1>, vector<8x128xf32>
      %1396 = arith.select %1369, %1389, %31 : vector<8x128xi1>, vector<8x128xf32>
      %1397 = arith.select %1371, %1362, %1396 : vector<8x128xi1>, vector<8x128xf32>
      %1398 = arith.mulf %1294, %1393 : vector<8x128xf32>
      %1399 = arith.mulf %1391, %1296 : vector<8x128xf32>
      %1400 = arith.subf %1398, %1399 : vector<8x128xf32>
      %1401 = arith.addf %1304, %1400 : vector<8x128xf32>
      %1402 = arith.mulf %1391, %1397 : vector<8x128xf32>
      %1403 = arith.mulf %1395, %1393 : vector<8x128xf32>
      %1404 = arith.subf %1402, %1403 : vector<8x128xf32>
      %1405 = arith.addf %1401, %1404 : vector<8x128xf32>
      %1406 = arith.addf %1366, %27 : vector<8x128xf32>
      %cst_241 = arith.constant 0.000000e+00 : f32
      %1407 = vector.broadcast %cst_241 : f32 to vector<8x128xf32>
      %1408 = arith.cmpf oge, %1367, %1407 : vector<8x128xf32>
      %cst_242 = arith.constant 0.000000e+00 : f32
      %1409 = vector.broadcast %cst_242 : f32 to vector<8x128xf32>
      %1410 = arith.cmpf oge, %1406, %1409 : vector<8x128xf32>
      %1411 = arith.xori %1408, %1410 : vector<8x128xi1>
      %1412 = arith.subf %1367, %1406 : vector<8x128xf32>
      %cst_243 = arith.constant 0.000000e+00 : f32
      %1413 = vector.broadcast %cst_243 : f32 to vector<8x128xf32>
      %1414 = arith.cmpf oge, %1412, %1413 : vector<8x128xf32>
      %cst_244 = arith.constant 9.99999971E-10 : f32
      %cst_245 = arith.constant -9.99999971E-10 : f32
      %1415 = vector.broadcast %cst_244 : f32 to vector<8x128xf32>
      %1416 = vector.broadcast %cst_245 : f32 to vector<8x128xf32>
      %1417 = arith.select %1414, %1415, %1416 : vector<8x128xi1>, vector<8x128xf32>
      %1418 = arith.addf %1412, %1417 : vector<8x128xf32>
      %1419 = tpu.reciprocal %1418 {approx = true} : vector<8x128xf32> -> vector<8x128xf32>
      %1420 = arith.mulf %1367, %1419 : vector<8x128xf32>
      %cst_246 = arith.constant 1.000000e+00 : f32
      %1421 = vector.broadcast %cst_246 : f32 to vector<8x128xf32>
      %1422 = arith.minimumf %1420, %1421 : vector<8x128xf32>
      %1423 = arith.subf %1364, %1360 : vector<8x128xf32>
      %1424 = arith.mulf %1422, %1423 : vector<8x128xf32>
      %1425 = arith.addf %1360, %1424 : vector<8x128xf32>
      %1426 = arith.subf %1366, %1362 : vector<8x128xf32>
      %1427 = arith.mulf %1422, %1426 : vector<8x128xf32>
      %1428 = arith.addf %1362, %1427 : vector<8x128xf32>
      %1429 = arith.select %1410, %1364, %1364 : vector<8x128xi1>, vector<8x128xf32>
      %1430 = arith.select %1411, %1425, %1429 : vector<8x128xi1>, vector<8x128xf32>
      %1431 = arith.select %1410, %1366, %31 : vector<8x128xi1>, vector<8x128xf32>
      %1432 = arith.select %1411, %1428, %1431 : vector<8x128xi1>, vector<8x128xf32>
      %1433 = arith.select %1408, %1425, %1364 : vector<8x128xi1>, vector<8x128xf32>
      %1434 = arith.select %1410, %1364, %1433 : vector<8x128xi1>, vector<8x128xf32>
      %1435 = arith.select %1408, %1428, %31 : vector<8x128xi1>, vector<8x128xf32>
      %1436 = arith.select %1410, %1366, %1435 : vector<8x128xi1>, vector<8x128xf32>
      %1437 = arith.mulf %1395, %1432 : vector<8x128xf32>
      %1438 = arith.mulf %1430, %1397 : vector<8x128xf32>
      %1439 = arith.subf %1437, %1438 : vector<8x128xf32>
      %1440 = arith.addf %1405, %1439 : vector<8x128xf32>
      %1441 = arith.mulf %1430, %1436 : vector<8x128xf32>
      %1442 = arith.mulf %1434, %1432 : vector<8x128xf32>
      %1443 = arith.subf %1441, %1442 : vector<8x128xf32>
      %1444 = arith.addf %1440, %1443 : vector<8x128xf32>
      %1445 = arith.subf %27, %1335 : vector<8x128xf32>
      %cst_247 = arith.constant 0.000000e+00 : f32
      %1446 = vector.broadcast %cst_247 : f32 to vector<8x128xf32>
      %1447 = arith.cmpf oge, %1336, %1446 : vector<8x128xf32>
      %cst_248 = arith.constant 0.000000e+00 : f32
      %1448 = vector.broadcast %cst_248 : f32 to vector<8x128xf32>
      %1449 = arith.cmpf oge, %1445, %1448 : vector<8x128xf32>
      %1450 = arith.xori %1447, %1449 : vector<8x128xi1>
      %1451 = arith.subf %1336, %1445 : vector<8x128xf32>
      %cst_249 = arith.constant 0.000000e+00 : f32
      %1452 = vector.broadcast %cst_249 : f32 to vector<8x128xf32>
      %1453 = arith.cmpf oge, %1451, %1452 : vector<8x128xf32>
      %cst_250 = arith.constant 9.99999971E-10 : f32
      %cst_251 = arith.constant -9.99999971E-10 : f32
      %1454 = vector.broadcast %cst_250 : f32 to vector<8x128xf32>
      %1455 = vector.broadcast %cst_251 : f32 to vector<8x128xf32>
      %1456 = arith.select %1453, %1454, %1455 : vector<8x128xi1>, vector<8x128xf32>
      %1457 = arith.addf %1451, %1456 : vector<8x128xf32>
      %1458 = tpu.reciprocal %1457 {approx = true} : vector<8x128xf32> -> vector<8x128xf32>
      %1459 = arith.mulf %1336, %1458 : vector<8x128xf32>
      %cst_252 = arith.constant 1.000000e+00 : f32
      %1460 = vector.broadcast %cst_252 : f32 to vector<8x128xf32>
      %1461 = arith.minimumf %1459, %1460 : vector<8x128xf32>
      %1462 = arith.subf %1333, %1329 : vector<8x128xf32>
      %1463 = arith.mulf %1461, %1462 : vector<8x128xf32>
      %1464 = arith.addf %1329, %1463 : vector<8x128xf32>
      %1465 = arith.subf %1335, %1331 : vector<8x128xf32>
      %1466 = arith.mulf %1461, %1465 : vector<8x128xf32>
      %1467 = arith.addf %1331, %1466 : vector<8x128xf32>
      %1468 = arith.select %1449, %1333, %1333 : vector<8x128xi1>, vector<8x128xf32>
      %1469 = arith.select %1450, %1464, %1468 : vector<8x128xi1>, vector<8x128xf32>
      %1470 = arith.select %1449, %1335, %27 : vector<8x128xi1>, vector<8x128xf32>
      %1471 = arith.select %1450, %1467, %1470 : vector<8x128xi1>, vector<8x128xf32>
      %1472 = arith.select %1447, %1464, %1333 : vector<8x128xi1>, vector<8x128xf32>
      %1473 = arith.select %1449, %1333, %1472 : vector<8x128xi1>, vector<8x128xf32>
      %1474 = arith.select %1447, %1467, %27 : vector<8x128xi1>, vector<8x128xf32>
      %1475 = arith.select %1449, %1335, %1474 : vector<8x128xi1>, vector<8x128xf32>
      %1476 = arith.addf %1471, %27 : vector<8x128xf32>
      %cst_253 = arith.constant 0.000000e+00 : f32
      %1477 = vector.broadcast %cst_253 : f32 to vector<8x128xf32>
      %1478 = arith.cmpf oge, %1406, %1477 : vector<8x128xf32>
      %cst_254 = arith.constant 0.000000e+00 : f32
      %1479 = vector.broadcast %cst_254 : f32 to vector<8x128xf32>
      %1480 = arith.cmpf oge, %1476, %1479 : vector<8x128xf32>
      %1481 = arith.xori %1478, %1480 : vector<8x128xi1>
      %1482 = arith.subf %1406, %1476 : vector<8x128xf32>
      %cst_255 = arith.constant 0.000000e+00 : f32
      %1483 = vector.broadcast %cst_255 : f32 to vector<8x128xf32>
      %1484 = arith.cmpf oge, %1482, %1483 : vector<8x128xf32>
      %cst_256 = arith.constant 9.99999971E-10 : f32
      %cst_257 = arith.constant -9.99999971E-10 : f32
      %1485 = vector.broadcast %cst_256 : f32 to vector<8x128xf32>
      %1486 = vector.broadcast %cst_257 : f32 to vector<8x128xf32>
      %1487 = arith.select %1484, %1485, %1486 : vector<8x128xi1>, vector<8x128xf32>
      %1488 = arith.addf %1482, %1487 : vector<8x128xf32>
      %1489 = tpu.reciprocal %1488 {approx = true} : vector<8x128xf32> -> vector<8x128xf32>
      %1490 = arith.mulf %1406, %1489 : vector<8x128xf32>
      %cst_258 = arith.constant 1.000000e+00 : f32
      %1491 = vector.broadcast %cst_258 : f32 to vector<8x128xf32>
      %1492 = arith.minimumf %1490, %1491 : vector<8x128xf32>
      %1493 = arith.subf %1469, %1364 : vector<8x128xf32>
      %1494 = arith.mulf %1492, %1493 : vector<8x128xf32>
      %1495 = arith.addf %1364, %1494 : vector<8x128xf32>
      %1496 = arith.subf %1471, %1366 : vector<8x128xf32>
      %1497 = arith.mulf %1492, %1496 : vector<8x128xf32>
      %1498 = arith.addf %1366, %1497 : vector<8x128xf32>
      %1499 = arith.select %1480, %1469, %1469 : vector<8x128xi1>, vector<8x128xf32>
      %1500 = arith.select %1481, %1495, %1499 : vector<8x128xi1>, vector<8x128xf32>
      %1501 = arith.select %1480, %1471, %31 : vector<8x128xi1>, vector<8x128xf32>
      %1502 = arith.select %1481, %1498, %1501 : vector<8x128xi1>, vector<8x128xf32>
      %1503 = arith.select %1478, %1495, %1469 : vector<8x128xi1>, vector<8x128xf32>
      %1504 = arith.select %1480, %1469, %1503 : vector<8x128xi1>, vector<8x128xf32>
      %1505 = arith.select %1478, %1498, %31 : vector<8x128xi1>, vector<8x128xf32>
      %1506 = arith.select %1480, %1471, %1505 : vector<8x128xi1>, vector<8x128xf32>
      %1507 = arith.mulf %1434, %1502 : vector<8x128xf32>
      %1508 = arith.mulf %1500, %1436 : vector<8x128xf32>
      %1509 = arith.subf %1507, %1508 : vector<8x128xf32>
      %1510 = arith.addf %1444, %1509 : vector<8x128xf32>
      %1511 = arith.mulf %1500, %1506 : vector<8x128xf32>
      %1512 = arith.mulf %1504, %1502 : vector<8x128xf32>
      %1513 = arith.subf %1511, %1512 : vector<8x128xf32>
      %1514 = arith.addf %1510, %1513 : vector<8x128xf32>
      %1515 = arith.addf %1475, %27 : vector<8x128xf32>
      %cst_259 = arith.constant 0.000000e+00 : f32
      %1516 = vector.broadcast %cst_259 : f32 to vector<8x128xf32>
      %1517 = arith.cmpf oge, %1476, %1516 : vector<8x128xf32>
      %cst_260 = arith.constant 0.000000e+00 : f32
      %1518 = vector.broadcast %cst_260 : f32 to vector<8x128xf32>
      %1519 = arith.cmpf oge, %1515, %1518 : vector<8x128xf32>
      %1520 = arith.xori %1517, %1519 : vector<8x128xi1>
      %1521 = arith.subf %1476, %1515 : vector<8x128xf32>
      %cst_261 = arith.constant 0.000000e+00 : f32
      %1522 = vector.broadcast %cst_261 : f32 to vector<8x128xf32>
      %1523 = arith.cmpf oge, %1521, %1522 : vector<8x128xf32>
      %cst_262 = arith.constant 9.99999971E-10 : f32
      %cst_263 = arith.constant -9.99999971E-10 : f32
      %1524 = vector.broadcast %cst_262 : f32 to vector<8x128xf32>
      %1525 = vector.broadcast %cst_263 : f32 to vector<8x128xf32>
      %1526 = arith.select %1523, %1524, %1525 : vector<8x128xi1>, vector<8x128xf32>
      %1527 = arith.addf %1521, %1526 : vector<8x128xf32>
      %1528 = tpu.reciprocal %1527 {approx = true} : vector<8x128xf32> -> vector<8x128xf32>
      %1529 = arith.mulf %1476, %1528 : vector<8x128xf32>
      %cst_264 = arith.constant 1.000000e+00 : f32
      %1530 = vector.broadcast %cst_264 : f32 to vector<8x128xf32>
      %1531 = arith.minimumf %1529, %1530 : vector<8x128xf32>
      %1532 = arith.subf %1473, %1469 : vector<8x128xf32>
      %1533 = arith.mulf %1531, %1532 : vector<8x128xf32>
      %1534 = arith.addf %1469, %1533 : vector<8x128xf32>
      %1535 = arith.subf %1475, %1471 : vector<8x128xf32>
      %1536 = arith.mulf %1531, %1535 : vector<8x128xf32>
      %1537 = arith.addf %1471, %1536 : vector<8x128xf32>
      %1538 = arith.select %1519, %1473, %1473 : vector<8x128xi1>, vector<8x128xf32>
      %1539 = arith.select %1520, %1534, %1538 : vector<8x128xi1>, vector<8x128xf32>
      %1540 = arith.select %1519, %1475, %31 : vector<8x128xi1>, vector<8x128xf32>
      %1541 = arith.select %1520, %1537, %1540 : vector<8x128xi1>, vector<8x128xf32>
      %1542 = arith.select %1517, %1534, %1473 : vector<8x128xi1>, vector<8x128xf32>
      %1543 = arith.select %1519, %1473, %1542 : vector<8x128xi1>, vector<8x128xf32>
      %1544 = arith.select %1517, %1537, %31 : vector<8x128xi1>, vector<8x128xf32>
      %1545 = arith.select %1519, %1475, %1544 : vector<8x128xi1>, vector<8x128xf32>
      %1546 = arith.mulf %1504, %1541 : vector<8x128xf32>
      %1547 = arith.mulf %1539, %1506 : vector<8x128xf32>
      %1548 = arith.subf %1546, %1547 : vector<8x128xf32>
      %1549 = arith.addf %1514, %1548 : vector<8x128xf32>
      %1550 = arith.mulf %1539, %1545 : vector<8x128xf32>
      %1551 = arith.mulf %1543, %1541 : vector<8x128xf32>
      %1552 = arith.subf %1550, %1551 : vector<8x128xf32>
      %1553 = arith.addf %1549, %1552 : vector<8x128xf32>
      %1554 = arith.addf %205, %25 : vector<8x128xf32>
      %cst_265 = arith.constant 0.000000e+00 : f32
      %1555 = vector.broadcast %cst_265 : f32 to vector<8x128xf32>
      %1556 = arith.cmpf oge, %1305, %1555 : vector<8x128xf32>
      %cst_266 = arith.constant 0.000000e+00 : f32
      %1557 = vector.broadcast %cst_266 : f32 to vector<8x128xf32>
      %1558 = arith.cmpf oge, %1554, %1557 : vector<8x128xf32>
      %1559 = arith.xori %1556, %1558 : vector<8x128xi1>
      %1560 = arith.subf %1305, %1554 : vector<8x128xf32>
      %cst_267 = arith.constant 0.000000e+00 : f32
      %1561 = vector.broadcast %cst_267 : f32 to vector<8x128xf32>
      %1562 = arith.cmpf oge, %1560, %1561 : vector<8x128xf32>
      %cst_268 = arith.constant 9.99999971E-10 : f32
      %cst_269 = arith.constant -9.99999971E-10 : f32
      %1563 = vector.broadcast %cst_268 : f32 to vector<8x128xf32>
      %1564 = vector.broadcast %cst_269 : f32 to vector<8x128xf32>
      %1565 = arith.select %1562, %1563, %1564 : vector<8x128xi1>, vector<8x128xf32>
      %1566 = arith.addf %1560, %1565 : vector<8x128xf32>
      %1567 = tpu.reciprocal %1566 {approx = true} : vector<8x128xf32> -> vector<8x128xf32>
      %1568 = arith.mulf %1305, %1567 : vector<8x128xf32>
      %cst_270 = arith.constant 1.000000e+00 : f32
      %1569 = vector.broadcast %cst_270 : f32 to vector<8x128xf32>
      %1570 = arith.minimumf %1568, %1569 : vector<8x128xf32>
      %1571 = arith.subf %205, %201 : vector<8x128xf32>
      %1572 = arith.mulf %1570, %1571 : vector<8x128xf32>
      %1573 = arith.addf %201, %1572 : vector<8x128xf32>
      %1574 = arith.subf %207, %203 : vector<8x128xf32>
      %1575 = arith.mulf %1570, %1574 : vector<8x128xf32>
      %1576 = arith.addf %203, %1575 : vector<8x128xf32>
      %1577 = arith.select %1558, %205, %29 : vector<8x128xi1>, vector<8x128xf32>
      %1578 = arith.select %1559, %1573, %1577 : vector<8x128xi1>, vector<8x128xf32>
      %1579 = arith.select %1558, %207, %207 : vector<8x128xi1>, vector<8x128xf32>
      %1580 = arith.select %1559, %1576, %1579 : vector<8x128xi1>, vector<8x128xf32>
      %1581 = arith.select %1556, %1573, %29 : vector<8x128xi1>, vector<8x128xf32>
      %1582 = arith.select %1558, %205, %1581 : vector<8x128xi1>, vector<8x128xf32>
      %1583 = arith.select %1556, %1576, %207 : vector<8x128xi1>, vector<8x128xf32>
      %1584 = arith.select %1558, %207, %1583 : vector<8x128xi1>, vector<8x128xf32>
      %1585 = arith.subf %27, %1580 : vector<8x128xf32>
      %cst_271 = arith.constant 0.000000e+00 : f32
      %1586 = vector.broadcast %cst_271 : f32 to vector<8x128xf32>
      %1587 = arith.cmpf oge, %1445, %1586 : vector<8x128xf32>
      %cst_272 = arith.constant 0.000000e+00 : f32
      %1588 = vector.broadcast %cst_272 : f32 to vector<8x128xf32>
      %1589 = arith.cmpf oge, %1585, %1588 : vector<8x128xf32>
      %1590 = arith.xori %1587, %1589 : vector<8x128xi1>
      %1591 = arith.subf %1445, %1585 : vector<8x128xf32>
      %cst_273 = arith.constant 0.000000e+00 : f32
      %1592 = vector.broadcast %cst_273 : f32 to vector<8x128xf32>
      %1593 = arith.cmpf oge, %1591, %1592 : vector<8x128xf32>
      %cst_274 = arith.constant 9.99999971E-10 : f32
      %cst_275 = arith.constant -9.99999971E-10 : f32
      %1594 = vector.broadcast %cst_274 : f32 to vector<8x128xf32>
      %1595 = vector.broadcast %cst_275 : f32 to vector<8x128xf32>
      %1596 = arith.select %1593, %1594, %1595 : vector<8x128xi1>, vector<8x128xf32>
      %1597 = arith.addf %1591, %1596 : vector<8x128xf32>
      %1598 = tpu.reciprocal %1597 {approx = true} : vector<8x128xf32> -> vector<8x128xf32>
      %1599 = arith.mulf %1445, %1598 : vector<8x128xf32>
      %cst_276 = arith.constant 1.000000e+00 : f32
      %1600 = vector.broadcast %cst_276 : f32 to vector<8x128xf32>
      %1601 = arith.minimumf %1599, %1600 : vector<8x128xf32>
      %1602 = arith.subf %1578, %1333 : vector<8x128xf32>
      %1603 = arith.mulf %1601, %1602 : vector<8x128xf32>
      %1604 = arith.addf %1333, %1603 : vector<8x128xf32>
      %1605 = arith.subf %1580, %1335 : vector<8x128xf32>
      %1606 = arith.mulf %1601, %1605 : vector<8x128xf32>
      %1607 = arith.addf %1335, %1606 : vector<8x128xf32>
      %1608 = arith.select %1589, %1578, %1578 : vector<8x128xi1>, vector<8x128xf32>
      %1609 = arith.select %1590, %1604, %1608 : vector<8x128xi1>, vector<8x128xf32>
      %1610 = arith.select %1589, %1580, %27 : vector<8x128xi1>, vector<8x128xf32>
      %1611 = arith.select %1590, %1607, %1610 : vector<8x128xi1>, vector<8x128xf32>
      %1612 = arith.select %1587, %1604, %1578 : vector<8x128xi1>, vector<8x128xf32>
      %1613 = arith.select %1589, %1578, %1612 : vector<8x128xi1>, vector<8x128xf32>
      %1614 = arith.select %1587, %1607, %27 : vector<8x128xi1>, vector<8x128xf32>
      %1615 = arith.select %1589, %1580, %1614 : vector<8x128xi1>, vector<8x128xf32>
      %1616 = arith.addf %1611, %27 : vector<8x128xf32>
      %cst_277 = arith.constant 0.000000e+00 : f32
      %1617 = vector.broadcast %cst_277 : f32 to vector<8x128xf32>
      %1618 = arith.cmpf oge, %1515, %1617 : vector<8x128xf32>
      %cst_278 = arith.constant 0.000000e+00 : f32
      %1619 = vector.broadcast %cst_278 : f32 to vector<8x128xf32>
      %1620 = arith.cmpf oge, %1616, %1619 : vector<8x128xf32>
      %1621 = arith.xori %1618, %1620 : vector<8x128xi1>
      %1622 = arith.subf %1515, %1616 : vector<8x128xf32>
      %cst_279 = arith.constant 0.000000e+00 : f32
      %1623 = vector.broadcast %cst_279 : f32 to vector<8x128xf32>
      %1624 = arith.cmpf oge, %1622, %1623 : vector<8x128xf32>
      %cst_280 = arith.constant 9.99999971E-10 : f32
      %cst_281 = arith.constant -9.99999971E-10 : f32
      %1625 = vector.broadcast %cst_280 : f32 to vector<8x128xf32>
      %1626 = vector.broadcast %cst_281 : f32 to vector<8x128xf32>
      %1627 = arith.select %1624, %1625, %1626 : vector<8x128xi1>, vector<8x128xf32>
      %1628 = arith.addf %1622, %1627 : vector<8x128xf32>
      %1629 = tpu.reciprocal %1628 {approx = true} : vector<8x128xf32> -> vector<8x128xf32>
      %1630 = arith.mulf %1515, %1629 : vector<8x128xf32>
      %cst_282 = arith.constant 1.000000e+00 : f32
      %1631 = vector.broadcast %cst_282 : f32 to vector<8x128xf32>
      %1632 = arith.minimumf %1630, %1631 : vector<8x128xf32>
      %1633 = arith.subf %1609, %1473 : vector<8x128xf32>
      %1634 = arith.mulf %1632, %1633 : vector<8x128xf32>
      %1635 = arith.addf %1473, %1634 : vector<8x128xf32>
      %1636 = arith.subf %1611, %1475 : vector<8x128xf32>
      %1637 = arith.mulf %1632, %1636 : vector<8x128xf32>
      %1638 = arith.addf %1475, %1637 : vector<8x128xf32>
      %1639 = arith.select %1620, %1609, %1609 : vector<8x128xi1>, vector<8x128xf32>
      %1640 = arith.select %1621, %1635, %1639 : vector<8x128xi1>, vector<8x128xf32>
      %1641 = arith.select %1620, %1611, %31 : vector<8x128xi1>, vector<8x128xf32>
      %1642 = arith.select %1621, %1638, %1641 : vector<8x128xi1>, vector<8x128xf32>
      %1643 = arith.select %1618, %1635, %1609 : vector<8x128xi1>, vector<8x128xf32>
      %1644 = arith.select %1620, %1609, %1643 : vector<8x128xi1>, vector<8x128xf32>
      %1645 = arith.select %1618, %1638, %31 : vector<8x128xi1>, vector<8x128xf32>
      %1646 = arith.select %1620, %1611, %1645 : vector<8x128xi1>, vector<8x128xf32>
      %1647 = arith.mulf %1543, %1642 : vector<8x128xf32>
      %1648 = arith.mulf %1640, %1545 : vector<8x128xf32>
      %1649 = arith.subf %1647, %1648 : vector<8x128xf32>
      %1650 = arith.addf %1553, %1649 : vector<8x128xf32>
      %1651 = arith.mulf %1640, %1646 : vector<8x128xf32>
      %1652 = arith.mulf %1644, %1642 : vector<8x128xf32>
      %1653 = arith.subf %1651, %1652 : vector<8x128xf32>
      %1654 = arith.addf %1650, %1653 : vector<8x128xf32>
      %1655 = arith.addf %1615, %27 : vector<8x128xf32>
      %cst_283 = arith.constant 0.000000e+00 : f32
      %1656 = vector.broadcast %cst_283 : f32 to vector<8x128xf32>
      %1657 = arith.cmpf oge, %1616, %1656 : vector<8x128xf32>
      %cst_284 = arith.constant 0.000000e+00 : f32
      %1658 = vector.broadcast %cst_284 : f32 to vector<8x128xf32>
      %1659 = arith.cmpf oge, %1655, %1658 : vector<8x128xf32>
      %1660 = arith.xori %1657, %1659 : vector<8x128xi1>
      %1661 = arith.subf %1616, %1655 : vector<8x128xf32>
      %cst_285 = arith.constant 0.000000e+00 : f32
      %1662 = vector.broadcast %cst_285 : f32 to vector<8x128xf32>
      %1663 = arith.cmpf oge, %1661, %1662 : vector<8x128xf32>
      %cst_286 = arith.constant 9.99999971E-10 : f32
      %cst_287 = arith.constant -9.99999971E-10 : f32
      %1664 = vector.broadcast %cst_286 : f32 to vector<8x128xf32>
      %1665 = vector.broadcast %cst_287 : f32 to vector<8x128xf32>
      %1666 = arith.select %1663, %1664, %1665 : vector<8x128xi1>, vector<8x128xf32>
      %1667 = arith.addf %1661, %1666 : vector<8x128xf32>
      %1668 = tpu.reciprocal %1667 {approx = true} : vector<8x128xf32> -> vector<8x128xf32>
      %1669 = arith.mulf %1616, %1668 : vector<8x128xf32>
      %cst_288 = arith.constant 1.000000e+00 : f32
      %1670 = vector.broadcast %cst_288 : f32 to vector<8x128xf32>
      %1671 = arith.minimumf %1669, %1670 : vector<8x128xf32>
      %1672 = arith.subf %1613, %1609 : vector<8x128xf32>
      %1673 = arith.mulf %1671, %1672 : vector<8x128xf32>
      %1674 = arith.addf %1609, %1673 : vector<8x128xf32>
      %1675 = arith.subf %1615, %1611 : vector<8x128xf32>
      %1676 = arith.mulf %1671, %1675 : vector<8x128xf32>
      %1677 = arith.addf %1611, %1676 : vector<8x128xf32>
      %1678 = arith.select %1659, %1613, %1613 : vector<8x128xi1>, vector<8x128xf32>
      %1679 = arith.select %1660, %1674, %1678 : vector<8x128xi1>, vector<8x128xf32>
      %1680 = arith.select %1659, %1615, %31 : vector<8x128xi1>, vector<8x128xf32>
      %1681 = arith.select %1660, %1677, %1680 : vector<8x128xi1>, vector<8x128xf32>
      %1682 = arith.select %1657, %1674, %1613 : vector<8x128xi1>, vector<8x128xf32>
      %1683 = arith.select %1659, %1613, %1682 : vector<8x128xi1>, vector<8x128xf32>
      %1684 = arith.select %1657, %1677, %31 : vector<8x128xi1>, vector<8x128xf32>
      %1685 = arith.select %1659, %1615, %1684 : vector<8x128xi1>, vector<8x128xf32>
      %1686 = arith.mulf %1644, %1681 : vector<8x128xf32>
      %1687 = arith.mulf %1679, %1646 : vector<8x128xf32>
      %1688 = arith.subf %1686, %1687 : vector<8x128xf32>
      %1689 = arith.addf %1654, %1688 : vector<8x128xf32>
      %1690 = arith.mulf %1679, %1685 : vector<8x128xf32>
      %1691 = arith.mulf %1683, %1681 : vector<8x128xf32>
      %1692 = arith.subf %1690, %1691 : vector<8x128xf32>
      %1693 = arith.addf %1689, %1692 : vector<8x128xf32>
      %1694 = arith.subf %27, %1584 : vector<8x128xf32>
      %cst_289 = arith.constant 0.000000e+00 : f32
      %1695 = vector.broadcast %cst_289 : f32 to vector<8x128xf32>
      %1696 = arith.cmpf oge, %1585, %1695 : vector<8x128xf32>
      %cst_290 = arith.constant 0.000000e+00 : f32
      %1697 = vector.broadcast %cst_290 : f32 to vector<8x128xf32>
      %1698 = arith.cmpf oge, %1694, %1697 : vector<8x128xf32>
      %1699 = arith.xori %1696, %1698 : vector<8x128xi1>
      %1700 = arith.subf %1585, %1694 : vector<8x128xf32>
      %cst_291 = arith.constant 0.000000e+00 : f32
      %1701 = vector.broadcast %cst_291 : f32 to vector<8x128xf32>
      %1702 = arith.cmpf oge, %1700, %1701 : vector<8x128xf32>
      %cst_292 = arith.constant 9.99999971E-10 : f32
      %cst_293 = arith.constant -9.99999971E-10 : f32
      %1703 = vector.broadcast %cst_292 : f32 to vector<8x128xf32>
      %1704 = vector.broadcast %cst_293 : f32 to vector<8x128xf32>
      %1705 = arith.select %1702, %1703, %1704 : vector<8x128xi1>, vector<8x128xf32>
      %1706 = arith.addf %1700, %1705 : vector<8x128xf32>
      %1707 = tpu.reciprocal %1706 {approx = true} : vector<8x128xf32> -> vector<8x128xf32>
      %1708 = arith.mulf %1585, %1707 : vector<8x128xf32>
      %cst_294 = arith.constant 1.000000e+00 : f32
      %1709 = vector.broadcast %cst_294 : f32 to vector<8x128xf32>
      %1710 = arith.minimumf %1708, %1709 : vector<8x128xf32>
      %1711 = arith.subf %1582, %1578 : vector<8x128xf32>
      %1712 = arith.mulf %1710, %1711 : vector<8x128xf32>
      %1713 = arith.addf %1578, %1712 : vector<8x128xf32>
      %1714 = arith.subf %1584, %1580 : vector<8x128xf32>
      %1715 = arith.mulf %1710, %1714 : vector<8x128xf32>
      %1716 = arith.addf %1580, %1715 : vector<8x128xf32>
      %1717 = arith.select %1698, %1582, %1582 : vector<8x128xi1>, vector<8x128xf32>
      %1718 = arith.select %1699, %1713, %1717 : vector<8x128xi1>, vector<8x128xf32>
      %1719 = arith.select %1698, %1584, %27 : vector<8x128xi1>, vector<8x128xf32>
      %1720 = arith.select %1699, %1716, %1719 : vector<8x128xi1>, vector<8x128xf32>
      %1721 = arith.select %1696, %1713, %1582 : vector<8x128xi1>, vector<8x128xf32>
      %1722 = arith.select %1698, %1582, %1721 : vector<8x128xi1>, vector<8x128xf32>
      %1723 = arith.select %1696, %1716, %27 : vector<8x128xi1>, vector<8x128xf32>
      %1724 = arith.select %1698, %1584, %1723 : vector<8x128xi1>, vector<8x128xf32>
      %1725 = arith.addf %1720, %27 : vector<8x128xf32>
      %cst_295 = arith.constant 0.000000e+00 : f32
      %1726 = vector.broadcast %cst_295 : f32 to vector<8x128xf32>
      %1727 = arith.cmpf oge, %1655, %1726 : vector<8x128xf32>
      %cst_296 = arith.constant 0.000000e+00 : f32
      %1728 = vector.broadcast %cst_296 : f32 to vector<8x128xf32>
      %1729 = arith.cmpf oge, %1725, %1728 : vector<8x128xf32>
      %1730 = arith.xori %1727, %1729 : vector<8x128xi1>
      %1731 = arith.subf %1655, %1725 : vector<8x128xf32>
      %cst_297 = arith.constant 0.000000e+00 : f32
      %1732 = vector.broadcast %cst_297 : f32 to vector<8x128xf32>
      %1733 = arith.cmpf oge, %1731, %1732 : vector<8x128xf32>
      %cst_298 = arith.constant 9.99999971E-10 : f32
      %cst_299 = arith.constant -9.99999971E-10 : f32
      %1734 = vector.broadcast %cst_298 : f32 to vector<8x128xf32>
      %1735 = vector.broadcast %cst_299 : f32 to vector<8x128xf32>
      %1736 = arith.select %1733, %1734, %1735 : vector<8x128xi1>, vector<8x128xf32>
      %1737 = arith.addf %1731, %1736 : vector<8x128xf32>
      %1738 = tpu.reciprocal %1737 {approx = true} : vector<8x128xf32> -> vector<8x128xf32>
      %1739 = arith.mulf %1655, %1738 : vector<8x128xf32>
      %cst_300 = arith.constant 1.000000e+00 : f32
      %1740 = vector.broadcast %cst_300 : f32 to vector<8x128xf32>
      %1741 = arith.minimumf %1739, %1740 : vector<8x128xf32>
      %1742 = arith.subf %1718, %1613 : vector<8x128xf32>
      %1743 = arith.mulf %1741, %1742 : vector<8x128xf32>
      %1744 = arith.addf %1613, %1743 : vector<8x128xf32>
      %1745 = arith.subf %1720, %1615 : vector<8x128xf32>
      %1746 = arith.mulf %1741, %1745 : vector<8x128xf32>
      %1747 = arith.addf %1615, %1746 : vector<8x128xf32>
      %1748 = arith.select %1729, %1718, %1718 : vector<8x128xi1>, vector<8x128xf32>
      %1749 = arith.select %1730, %1744, %1748 : vector<8x128xi1>, vector<8x128xf32>
      %1750 = arith.select %1729, %1720, %31 : vector<8x128xi1>, vector<8x128xf32>
      %1751 = arith.select %1730, %1747, %1750 : vector<8x128xi1>, vector<8x128xf32>
      %1752 = arith.select %1727, %1744, %1718 : vector<8x128xi1>, vector<8x128xf32>
      %1753 = arith.select %1729, %1718, %1752 : vector<8x128xi1>, vector<8x128xf32>
      %1754 = arith.select %1727, %1747, %31 : vector<8x128xi1>, vector<8x128xf32>
      %1755 = arith.select %1729, %1720, %1754 : vector<8x128xi1>, vector<8x128xf32>
      %1756 = arith.mulf %1683, %1751 : vector<8x128xf32>
      %1757 = arith.mulf %1749, %1685 : vector<8x128xf32>
      %1758 = arith.subf %1756, %1757 : vector<8x128xf32>
      %1759 = arith.addf %1693, %1758 : vector<8x128xf32>
      %1760 = arith.mulf %1749, %1755 : vector<8x128xf32>
      %1761 = arith.mulf %1753, %1751 : vector<8x128xf32>
      %1762 = arith.subf %1760, %1761 : vector<8x128xf32>
      %1763 = arith.addf %1759, %1762 : vector<8x128xf32>
      %1764 = arith.addf %1724, %27 : vector<8x128xf32>
      %cst_301 = arith.constant 0.000000e+00 : f32
      %1765 = vector.broadcast %cst_301 : f32 to vector<8x128xf32>
      %1766 = arith.cmpf oge, %1725, %1765 : vector<8x128xf32>
      %cst_302 = arith.constant 0.000000e+00 : f32
      %1767 = vector.broadcast %cst_302 : f32 to vector<8x128xf32>
      %1768 = arith.cmpf oge, %1764, %1767 : vector<8x128xf32>
      %1769 = arith.xori %1766, %1768 : vector<8x128xi1>
      %1770 = arith.subf %1725, %1764 : vector<8x128xf32>
      %cst_303 = arith.constant 0.000000e+00 : f32
      %1771 = vector.broadcast %cst_303 : f32 to vector<8x128xf32>
      %1772 = arith.cmpf oge, %1770, %1771 : vector<8x128xf32>
      %cst_304 = arith.constant 9.99999971E-10 : f32
      %cst_305 = arith.constant -9.99999971E-10 : f32
      %1773 = vector.broadcast %cst_304 : f32 to vector<8x128xf32>
      %1774 = vector.broadcast %cst_305 : f32 to vector<8x128xf32>
      %1775 = arith.select %1772, %1773, %1774 : vector<8x128xi1>, vector<8x128xf32>
      %1776 = arith.addf %1770, %1775 : vector<8x128xf32>
      %1777 = tpu.reciprocal %1776 {approx = true} : vector<8x128xf32> -> vector<8x128xf32>
      %1778 = arith.mulf %1725, %1777 : vector<8x128xf32>
      %cst_306 = arith.constant 1.000000e+00 : f32
      %1779 = vector.broadcast %cst_306 : f32 to vector<8x128xf32>
      %1780 = arith.minimumf %1778, %1779 : vector<8x128xf32>
      %1781 = arith.subf %1722, %1718 : vector<8x128xf32>
      %1782 = arith.mulf %1780, %1781 : vector<8x128xf32>
      %1783 = arith.addf %1718, %1782 : vector<8x128xf32>
      %1784 = arith.subf %1724, %1720 : vector<8x128xf32>
      %1785 = arith.mulf %1780, %1784 : vector<8x128xf32>
      %1786 = arith.addf %1720, %1785 : vector<8x128xf32>
      %1787 = arith.select %1768, %1722, %1722 : vector<8x128xi1>, vector<8x128xf32>
      %1788 = arith.select %1769, %1783, %1787 : vector<8x128xi1>, vector<8x128xf32>
      %1789 = arith.select %1768, %1724, %31 : vector<8x128xi1>, vector<8x128xf32>
      %1790 = arith.select %1769, %1786, %1789 : vector<8x128xi1>, vector<8x128xf32>
      %1791 = arith.select %1766, %1783, %1722 : vector<8x128xi1>, vector<8x128xf32>
      %1792 = arith.select %1768, %1722, %1791 : vector<8x128xi1>, vector<8x128xf32>
      %1793 = arith.select %1766, %1786, %31 : vector<8x128xi1>, vector<8x128xf32>
      %1794 = arith.select %1768, %1724, %1793 : vector<8x128xi1>, vector<8x128xf32>
      %1795 = arith.mulf %1753, %1790 : vector<8x128xf32>
      %1796 = arith.mulf %1788, %1755 : vector<8x128xf32>
      %1797 = arith.subf %1795, %1796 : vector<8x128xf32>
      %1798 = arith.addf %1763, %1797 : vector<8x128xf32>
      %1799 = arith.mulf %1788, %1794 : vector<8x128xf32>
      %1800 = arith.mulf %1792, %1790 : vector<8x128xf32>
      %1801 = arith.subf %1799, %1800 : vector<8x128xf32>
      %1802 = arith.addf %1798, %1801 : vector<8x128xf32>
      %cst_307 = arith.constant 0.000000e+00 : f32
      %1803 = vector.broadcast %cst_307 : f32 to vector<8x128xf32>
      %1804 = arith.cmpf oge, %1554, %1803 : vector<8x128xf32>
      %cst_308 = arith.constant 0.000000e+00 : f32
      %1805 = vector.broadcast %cst_308 : f32 to vector<8x128xf32>
      %1806 = arith.cmpf oge, %208, %1805 : vector<8x128xf32>
      %1807 = arith.xori %1804, %1806 : vector<8x128xi1>
      %1808 = arith.subf %1554, %208 : vector<8x128xf32>
      %cst_309 = arith.constant 0.000000e+00 : f32
      %1809 = vector.broadcast %cst_309 : f32 to vector<8x128xf32>
      %1810 = arith.cmpf oge, %1808, %1809 : vector<8x128xf32>
      %cst_310 = arith.constant 9.99999971E-10 : f32
      %cst_311 = arith.constant -9.99999971E-10 : f32
      %1811 = vector.broadcast %cst_310 : f32 to vector<8x128xf32>
      %1812 = vector.broadcast %cst_311 : f32 to vector<8x128xf32>
      %1813 = arith.select %1810, %1811, %1812 : vector<8x128xi1>, vector<8x128xf32>
      %1814 = arith.addf %1808, %1813 : vector<8x128xf32>
      %1815 = tpu.reciprocal %1814 {approx = true} : vector<8x128xf32> -> vector<8x128xf32>
      %1816 = arith.mulf %1554, %1815 : vector<8x128xf32>
      %cst_312 = arith.constant 1.000000e+00 : f32
      %1817 = vector.broadcast %cst_312 : f32 to vector<8x128xf32>
      %1818 = arith.minimumf %1816, %1817 : vector<8x128xf32>
      %1819 = arith.subf %109, %205 : vector<8x128xf32>
      %1820 = arith.mulf %1818, %1819 : vector<8x128xf32>
      %1821 = arith.addf %205, %1820 : vector<8x128xf32>
      %1822 = arith.subf %111, %207 : vector<8x128xf32>
      %1823 = arith.mulf %1818, %1822 : vector<8x128xf32>
      %1824 = arith.addf %207, %1823 : vector<8x128xf32>
      %1825 = arith.select %1806, %109, %29 : vector<8x128xi1>, vector<8x128xf32>
      %1826 = arith.select %1807, %1821, %1825 : vector<8x128xi1>, vector<8x128xf32>
      %1827 = arith.select %1806, %111, %111 : vector<8x128xi1>, vector<8x128xf32>
      %1828 = arith.select %1807, %1824, %1827 : vector<8x128xi1>, vector<8x128xf32>
      %1829 = arith.select %1804, %1821, %29 : vector<8x128xi1>, vector<8x128xf32>
      %1830 = arith.select %1806, %109, %1829 : vector<8x128xi1>, vector<8x128xf32>
      %1831 = arith.select %1804, %1824, %111 : vector<8x128xi1>, vector<8x128xf32>
      %1832 = arith.select %1806, %111, %1831 : vector<8x128xi1>, vector<8x128xf32>
      %1833 = arith.subf %27, %1828 : vector<8x128xf32>
      %cst_313 = arith.constant 0.000000e+00 : f32
      %1834 = vector.broadcast %cst_313 : f32 to vector<8x128xf32>
      %1835 = arith.cmpf oge, %1694, %1834 : vector<8x128xf32>
      %cst_314 = arith.constant 0.000000e+00 : f32
      %1836 = vector.broadcast %cst_314 : f32 to vector<8x128xf32>
      %1837 = arith.cmpf oge, %1833, %1836 : vector<8x128xf32>
      %1838 = arith.xori %1835, %1837 : vector<8x128xi1>
      %1839 = arith.subf %1694, %1833 : vector<8x128xf32>
      %cst_315 = arith.constant 0.000000e+00 : f32
      %1840 = vector.broadcast %cst_315 : f32 to vector<8x128xf32>
      %1841 = arith.cmpf oge, %1839, %1840 : vector<8x128xf32>
      %cst_316 = arith.constant 9.99999971E-10 : f32
      %cst_317 = arith.constant -9.99999971E-10 : f32
      %1842 = vector.broadcast %cst_316 : f32 to vector<8x128xf32>
      %1843 = vector.broadcast %cst_317 : f32 to vector<8x128xf32>
      %1844 = arith.select %1841, %1842, %1843 : vector<8x128xi1>, vector<8x128xf32>
      %1845 = arith.addf %1839, %1844 : vector<8x128xf32>
      %1846 = tpu.reciprocal %1845 {approx = true} : vector<8x128xf32> -> vector<8x128xf32>
      %1847 = arith.mulf %1694, %1846 : vector<8x128xf32>
      %cst_318 = arith.constant 1.000000e+00 : f32
      %1848 = vector.broadcast %cst_318 : f32 to vector<8x128xf32>
      %1849 = arith.minimumf %1847, %1848 : vector<8x128xf32>
      %1850 = arith.subf %1826, %1582 : vector<8x128xf32>
      %1851 = arith.mulf %1849, %1850 : vector<8x128xf32>
      %1852 = arith.addf %1582, %1851 : vector<8x128xf32>
      %1853 = arith.subf %1828, %1584 : vector<8x128xf32>
      %1854 = arith.mulf %1849, %1853 : vector<8x128xf32>
      %1855 = arith.addf %1584, %1854 : vector<8x128xf32>
      %1856 = arith.select %1837, %1826, %1826 : vector<8x128xi1>, vector<8x128xf32>
      %1857 = arith.select %1838, %1852, %1856 : vector<8x128xi1>, vector<8x128xf32>
      %1858 = arith.select %1837, %1828, %27 : vector<8x128xi1>, vector<8x128xf32>
      %1859 = arith.select %1838, %1855, %1858 : vector<8x128xi1>, vector<8x128xf32>
      %1860 = arith.select %1835, %1852, %1826 : vector<8x128xi1>, vector<8x128xf32>
      %1861 = arith.select %1837, %1826, %1860 : vector<8x128xi1>, vector<8x128xf32>
      %1862 = arith.select %1835, %1855, %27 : vector<8x128xi1>, vector<8x128xf32>
      %1863 = arith.select %1837, %1828, %1862 : vector<8x128xi1>, vector<8x128xf32>
      %1864 = arith.addf %1859, %27 : vector<8x128xf32>
      %cst_319 = arith.constant 0.000000e+00 : f32
      %1865 = vector.broadcast %cst_319 : f32 to vector<8x128xf32>
      %1866 = arith.cmpf oge, %1764, %1865 : vector<8x128xf32>
      %cst_320 = arith.constant 0.000000e+00 : f32
      %1867 = vector.broadcast %cst_320 : f32 to vector<8x128xf32>
      %1868 = arith.cmpf oge, %1864, %1867 : vector<8x128xf32>
      %1869 = arith.xori %1866, %1868 : vector<8x128xi1>
      %1870 = arith.subf %1764, %1864 : vector<8x128xf32>
      %cst_321 = arith.constant 0.000000e+00 : f32
      %1871 = vector.broadcast %cst_321 : f32 to vector<8x128xf32>
      %1872 = arith.cmpf oge, %1870, %1871 : vector<8x128xf32>
      %cst_322 = arith.constant 9.99999971E-10 : f32
      %cst_323 = arith.constant -9.99999971E-10 : f32
      %1873 = vector.broadcast %cst_322 : f32 to vector<8x128xf32>
      %1874 = vector.broadcast %cst_323 : f32 to vector<8x128xf32>
      %1875 = arith.select %1872, %1873, %1874 : vector<8x128xi1>, vector<8x128xf32>
      %1876 = arith.addf %1870, %1875 : vector<8x128xf32>
      %1877 = tpu.reciprocal %1876 {approx = true} : vector<8x128xf32> -> vector<8x128xf32>
      %1878 = arith.mulf %1764, %1877 : vector<8x128xf32>
      %cst_324 = arith.constant 1.000000e+00 : f32
      %1879 = vector.broadcast %cst_324 : f32 to vector<8x128xf32>
      %1880 = arith.minimumf %1878, %1879 : vector<8x128xf32>
      %1881 = arith.subf %1857, %1722 : vector<8x128xf32>
      %1882 = arith.mulf %1880, %1881 : vector<8x128xf32>
      %1883 = arith.addf %1722, %1882 : vector<8x128xf32>
      %1884 = arith.subf %1859, %1724 : vector<8x128xf32>
      %1885 = arith.mulf %1880, %1884 : vector<8x128xf32>
      %1886 = arith.addf %1724, %1885 : vector<8x128xf32>
      %1887 = arith.select %1868, %1857, %1857 : vector<8x128xi1>, vector<8x128xf32>
      %1888 = arith.select %1869, %1883, %1887 : vector<8x128xi1>, vector<8x128xf32>
      %1889 = arith.select %1868, %1859, %31 : vector<8x128xi1>, vector<8x128xf32>
      %1890 = arith.select %1869, %1886, %1889 : vector<8x128xi1>, vector<8x128xf32>
      %1891 = arith.select %1866, %1883, %1857 : vector<8x128xi1>, vector<8x128xf32>
      %1892 = arith.select %1868, %1857, %1891 : vector<8x128xi1>, vector<8x128xf32>
      %1893 = arith.select %1866, %1886, %31 : vector<8x128xi1>, vector<8x128xf32>
      %1894 = arith.select %1868, %1859, %1893 : vector<8x128xi1>, vector<8x128xf32>
      %1895 = arith.mulf %1792, %1890 : vector<8x128xf32>
      %1896 = arith.mulf %1888, %1794 : vector<8x128xf32>
      %1897 = arith.subf %1895, %1896 : vector<8x128xf32>
      %1898 = arith.addf %1802, %1897 : vector<8x128xf32>
      %1899 = arith.mulf %1888, %1894 : vector<8x128xf32>
      %1900 = arith.mulf %1892, %1890 : vector<8x128xf32>
      %1901 = arith.subf %1899, %1900 : vector<8x128xf32>
      %1902 = arith.addf %1898, %1901 : vector<8x128xf32>
      %1903 = arith.addf %1863, %27 : vector<8x128xf32>
      %cst_325 = arith.constant 0.000000e+00 : f32
      %1904 = vector.broadcast %cst_325 : f32 to vector<8x128xf32>
      %1905 = arith.cmpf oge, %1864, %1904 : vector<8x128xf32>
      %cst_326 = arith.constant 0.000000e+00 : f32
      %1906 = vector.broadcast %cst_326 : f32 to vector<8x128xf32>
      %1907 = arith.cmpf oge, %1903, %1906 : vector<8x128xf32>
      %1908 = arith.xori %1905, %1907 : vector<8x128xi1>
      %1909 = arith.subf %1864, %1903 : vector<8x128xf32>
      %cst_327 = arith.constant 0.000000e+00 : f32
      %1910 = vector.broadcast %cst_327 : f32 to vector<8x128xf32>
      %1911 = arith.cmpf oge, %1909, %1910 : vector<8x128xf32>
      %cst_328 = arith.constant 9.99999971E-10 : f32
      %cst_329 = arith.constant -9.99999971E-10 : f32
      %1912 = vector.broadcast %cst_328 : f32 to vector<8x128xf32>
      %1913 = vector.broadcast %cst_329 : f32 to vector<8x128xf32>
      %1914 = arith.select %1911, %1912, %1913 : vector<8x128xi1>, vector<8x128xf32>
      %1915 = arith.addf %1909, %1914 : vector<8x128xf32>
      %1916 = tpu.reciprocal %1915 {approx = true} : vector<8x128xf32> -> vector<8x128xf32>
      %1917 = arith.mulf %1864, %1916 : vector<8x128xf32>
      %cst_330 = arith.constant 1.000000e+00 : f32
      %1918 = vector.broadcast %cst_330 : f32 to vector<8x128xf32>
      %1919 = arith.minimumf %1917, %1918 : vector<8x128xf32>
      %1920 = arith.subf %1861, %1857 : vector<8x128xf32>
      %1921 = arith.mulf %1919, %1920 : vector<8x128xf32>
      %1922 = arith.addf %1857, %1921 : vector<8x128xf32>
      %1923 = arith.subf %1863, %1859 : vector<8x128xf32>
      %1924 = arith.mulf %1919, %1923 : vector<8x128xf32>
      %1925 = arith.addf %1859, %1924 : vector<8x128xf32>
      %1926 = arith.select %1907, %1861, %1861 : vector<8x128xi1>, vector<8x128xf32>
      %1927 = arith.select %1908, %1922, %1926 : vector<8x128xi1>, vector<8x128xf32>
      %1928 = arith.select %1907, %1863, %31 : vector<8x128xi1>, vector<8x128xf32>
      %1929 = arith.select %1908, %1925, %1928 : vector<8x128xi1>, vector<8x128xf32>
      %1930 = arith.select %1905, %1922, %1861 : vector<8x128xi1>, vector<8x128xf32>
      %1931 = arith.select %1907, %1861, %1930 : vector<8x128xi1>, vector<8x128xf32>
      %1932 = arith.select %1905, %1925, %31 : vector<8x128xi1>, vector<8x128xf32>
      %1933 = arith.select %1907, %1863, %1932 : vector<8x128xi1>, vector<8x128xf32>
      %1934 = arith.mulf %1892, %1929 : vector<8x128xf32>
      %1935 = arith.mulf %1927, %1894 : vector<8x128xf32>
      %1936 = arith.subf %1934, %1935 : vector<8x128xf32>
      %1937 = arith.addf %1902, %1936 : vector<8x128xf32>
      %1938 = arith.mulf %1927, %1933 : vector<8x128xf32>
      %1939 = arith.mulf %1931, %1929 : vector<8x128xf32>
      %1940 = arith.subf %1938, %1939 : vector<8x128xf32>
      %1941 = arith.addf %1937, %1940 : vector<8x128xf32>
      %1942 = arith.subf %27, %1832 : vector<8x128xf32>
      %cst_331 = arith.constant 0.000000e+00 : f32
      %1943 = vector.broadcast %cst_331 : f32 to vector<8x128xf32>
      %1944 = arith.cmpf oge, %1833, %1943 : vector<8x128xf32>
      %cst_332 = arith.constant 0.000000e+00 : f32
      %1945 = vector.broadcast %cst_332 : f32 to vector<8x128xf32>
      %1946 = arith.cmpf oge, %1942, %1945 : vector<8x128xf32>
      %1947 = arith.xori %1944, %1946 : vector<8x128xi1>
      %1948 = arith.subf %1833, %1942 : vector<8x128xf32>
      %cst_333 = arith.constant 0.000000e+00 : f32
      %1949 = vector.broadcast %cst_333 : f32 to vector<8x128xf32>
      %1950 = arith.cmpf oge, %1948, %1949 : vector<8x128xf32>
      %cst_334 = arith.constant 9.99999971E-10 : f32
      %cst_335 = arith.constant -9.99999971E-10 : f32
      %1951 = vector.broadcast %cst_334 : f32 to vector<8x128xf32>
      %1952 = vector.broadcast %cst_335 : f32 to vector<8x128xf32>
      %1953 = arith.select %1950, %1951, %1952 : vector<8x128xi1>, vector<8x128xf32>
      %1954 = arith.addf %1948, %1953 : vector<8x128xf32>
      %1955 = tpu.reciprocal %1954 {approx = true} : vector<8x128xf32> -> vector<8x128xf32>
      %1956 = arith.mulf %1833, %1955 : vector<8x128xf32>
      %cst_336 = arith.constant 1.000000e+00 : f32
      %1957 = vector.broadcast %cst_336 : f32 to vector<8x128xf32>
      %1958 = arith.minimumf %1956, %1957 : vector<8x128xf32>
      %1959 = arith.subf %1830, %1826 : vector<8x128xf32>
      %1960 = arith.mulf %1958, %1959 : vector<8x128xf32>
      %1961 = arith.addf %1826, %1960 : vector<8x128xf32>
      %1962 = arith.subf %1832, %1828 : vector<8x128xf32>
      %1963 = arith.mulf %1958, %1962 : vector<8x128xf32>
      %1964 = arith.addf %1828, %1963 : vector<8x128xf32>
      %1965 = arith.select %1946, %1830, %1830 : vector<8x128xi1>, vector<8x128xf32>
      %1966 = arith.select %1947, %1961, %1965 : vector<8x128xi1>, vector<8x128xf32>
      %1967 = arith.select %1946, %1832, %27 : vector<8x128xi1>, vector<8x128xf32>
      %1968 = arith.select %1947, %1964, %1967 : vector<8x128xi1>, vector<8x128xf32>
      %1969 = arith.select %1944, %1961, %1830 : vector<8x128xi1>, vector<8x128xf32>
      %1970 = arith.select %1946, %1830, %1969 : vector<8x128xi1>, vector<8x128xf32>
      %1971 = arith.select %1944, %1964, %27 : vector<8x128xi1>, vector<8x128xf32>
      %1972 = arith.select %1946, %1832, %1971 : vector<8x128xi1>, vector<8x128xf32>
      %1973 = arith.addf %1968, %27 : vector<8x128xf32>
      %cst_337 = arith.constant 0.000000e+00 : f32
      %1974 = vector.broadcast %cst_337 : f32 to vector<8x128xf32>
      %1975 = arith.cmpf oge, %1903, %1974 : vector<8x128xf32>
      %cst_338 = arith.constant 0.000000e+00 : f32
      %1976 = vector.broadcast %cst_338 : f32 to vector<8x128xf32>
      %1977 = arith.cmpf oge, %1973, %1976 : vector<8x128xf32>
      %1978 = arith.xori %1975, %1977 : vector<8x128xi1>
      %1979 = arith.subf %1903, %1973 : vector<8x128xf32>
      %cst_339 = arith.constant 0.000000e+00 : f32
      %1980 = vector.broadcast %cst_339 : f32 to vector<8x128xf32>
      %1981 = arith.cmpf oge, %1979, %1980 : vector<8x128xf32>
      %cst_340 = arith.constant 9.99999971E-10 : f32
      %cst_341 = arith.constant -9.99999971E-10 : f32
      %1982 = vector.broadcast %cst_340 : f32 to vector<8x128xf32>
      %1983 = vector.broadcast %cst_341 : f32 to vector<8x128xf32>
      %1984 = arith.select %1981, %1982, %1983 : vector<8x128xi1>, vector<8x128xf32>
      %1985 = arith.addf %1979, %1984 : vector<8x128xf32>
      %1986 = tpu.reciprocal %1985 {approx = true} : vector<8x128xf32> -> vector<8x128xf32>
      %1987 = arith.mulf %1903, %1986 : vector<8x128xf32>
      %cst_342 = arith.constant 1.000000e+00 : f32
      %1988 = vector.broadcast %cst_342 : f32 to vector<8x128xf32>
      %1989 = arith.minimumf %1987, %1988 : vector<8x128xf32>
      %1990 = arith.subf %1966, %1861 : vector<8x128xf32>
      %1991 = arith.mulf %1989, %1990 : vector<8x128xf32>
      %1992 = arith.addf %1861, %1991 : vector<8x128xf32>
      %1993 = arith.subf %1968, %1863 : vector<8x128xf32>
      %1994 = arith.mulf %1989, %1993 : vector<8x128xf32>
      %1995 = arith.addf %1863, %1994 : vector<8x128xf32>
      %1996 = arith.select %1977, %1966, %1966 : vector<8x128xi1>, vector<8x128xf32>
      %1997 = arith.select %1978, %1992, %1996 : vector<8x128xi1>, vector<8x128xf32>
      %1998 = arith.select %1977, %1968, %31 : vector<8x128xi1>, vector<8x128xf32>
      %1999 = arith.select %1978, %1995, %1998 : vector<8x128xi1>, vector<8x128xf32>
      %2000 = arith.select %1975, %1992, %1966 : vector<8x128xi1>, vector<8x128xf32>
      %2001 = arith.select %1977, %1966, %2000 : vector<8x128xi1>, vector<8x128xf32>
      %2002 = arith.select %1975, %1995, %31 : vector<8x128xi1>, vector<8x128xf32>
      %2003 = arith.select %1977, %1968, %2002 : vector<8x128xi1>, vector<8x128xf32>
      %2004 = arith.mulf %1931, %1999 : vector<8x128xf32>
      %2005 = arith.mulf %1997, %1933 : vector<8x128xf32>
      %2006 = arith.subf %2004, %2005 : vector<8x128xf32>
      %2007 = arith.addf %1941, %2006 : vector<8x128xf32>
      %2008 = arith.mulf %1997, %2003 : vector<8x128xf32>
      %2009 = arith.mulf %2001, %1999 : vector<8x128xf32>
      %2010 = arith.subf %2008, %2009 : vector<8x128xf32>
      %2011 = arith.addf %2007, %2010 : vector<8x128xf32>
      %2012 = arith.addf %1972, %27 : vector<8x128xf32>
      %cst_343 = arith.constant 0.000000e+00 : f32
      %2013 = vector.broadcast %cst_343 : f32 to vector<8x128xf32>
      %2014 = arith.cmpf oge, %1973, %2013 : vector<8x128xf32>
      %cst_344 = arith.constant 0.000000e+00 : f32
      %2015 = vector.broadcast %cst_344 : f32 to vector<8x128xf32>
      %2016 = arith.cmpf oge, %2012, %2015 : vector<8x128xf32>
      %2017 = arith.xori %2014, %2016 : vector<8x128xi1>
      %2018 = arith.subf %1973, %2012 : vector<8x128xf32>
      %cst_345 = arith.constant 0.000000e+00 : f32
      %2019 = vector.broadcast %cst_345 : f32 to vector<8x128xf32>
      %2020 = arith.cmpf oge, %2018, %2019 : vector<8x128xf32>
      %cst_346 = arith.constant 9.99999971E-10 : f32
      %cst_347 = arith.constant -9.99999971E-10 : f32
      %2021 = vector.broadcast %cst_346 : f32 to vector<8x128xf32>
      %2022 = vector.broadcast %cst_347 : f32 to vector<8x128xf32>
      %2023 = arith.select %2020, %2021, %2022 : vector<8x128xi1>, vector<8x128xf32>
      %2024 = arith.addf %2018, %2023 : vector<8x128xf32>
      %2025 = tpu.reciprocal %2024 {approx = true} : vector<8x128xf32> -> vector<8x128xf32>
      %2026 = arith.mulf %1973, %2025 : vector<8x128xf32>
      %cst_348 = arith.constant 1.000000e+00 : f32
      %2027 = vector.broadcast %cst_348 : f32 to vector<8x128xf32>
      %2028 = arith.minimumf %2026, %2027 : vector<8x128xf32>
      %2029 = arith.subf %1970, %1966 : vector<8x128xf32>
      %2030 = arith.mulf %2028, %2029 : vector<8x128xf32>
      %2031 = arith.addf %1966, %2030 : vector<8x128xf32>
      %2032 = arith.subf %1972, %1968 : vector<8x128xf32>
      %2033 = arith.mulf %2028, %2032 : vector<8x128xf32>
      %2034 = arith.addf %1968, %2033 : vector<8x128xf32>
      %2035 = arith.select %2016, %1970, %1970 : vector<8x128xi1>, vector<8x128xf32>
      %2036 = arith.select %2017, %2031, %2035 : vector<8x128xi1>, vector<8x128xf32>
      %2037 = arith.select %2016, %1972, %31 : vector<8x128xi1>, vector<8x128xf32>
      %2038 = arith.select %2017, %2034, %2037 : vector<8x128xi1>, vector<8x128xf32>
      %2039 = arith.select %2014, %2031, %1970 : vector<8x128xi1>, vector<8x128xf32>
      %2040 = arith.select %2016, %1970, %2039 : vector<8x128xi1>, vector<8x128xf32>
      %2041 = arith.select %2014, %2034, %31 : vector<8x128xi1>, vector<8x128xf32>
      %2042 = arith.select %2016, %1972, %2041 : vector<8x128xi1>, vector<8x128xf32>
      %2043 = arith.mulf %2001, %2038 : vector<8x128xf32>
      %2044 = arith.mulf %2036, %2003 : vector<8x128xf32>
      %2045 = arith.subf %2043, %2044 : vector<8x128xf32>
      %2046 = arith.addf %2011, %2045 : vector<8x128xf32>
      %2047 = arith.mulf %2036, %2042 : vector<8x128xf32>
      %2048 = arith.mulf %2040, %2038 : vector<8x128xf32>
      %2049 = arith.subf %2047, %2048 : vector<8x128xf32>
      %2050 = arith.addf %2046, %2049 : vector<8x128xf32>
      %cst_349 = arith.constant 0.000000e+00 : f32
      %2051 = vector.broadcast %cst_349 : f32 to vector<8x128xf32>
      %2052 = arith.cmpf oge, %1942, %2051 : vector<8x128xf32>
      %cst_350 = arith.constant 0.000000e+00 : f32
      %2053 = vector.broadcast %cst_350 : f32 to vector<8x128xf32>
      %2054 = arith.cmpf oge, %240, %2053 : vector<8x128xf32>
      %2055 = arith.xori %2052, %2054 : vector<8x128xi1>
      %2056 = arith.subf %1942, %240 : vector<8x128xf32>
      %cst_351 = arith.constant 0.000000e+00 : f32
      %2057 = vector.broadcast %cst_351 : f32 to vector<8x128xf32>
      %2058 = arith.cmpf oge, %2056, %2057 : vector<8x128xf32>
      %cst_352 = arith.constant 9.99999971E-10 : f32
      %cst_353 = arith.constant -9.99999971E-10 : f32
      %2059 = vector.broadcast %cst_352 : f32 to vector<8x128xf32>
      %2060 = vector.broadcast %cst_353 : f32 to vector<8x128xf32>
      %2061 = arith.select %2058, %2059, %2060 : vector<8x128xi1>, vector<8x128xf32>
      %2062 = arith.addf %2056, %2061 : vector<8x128xf32>
      %2063 = tpu.reciprocal %2062 {approx = true} : vector<8x128xf32> -> vector<8x128xf32>
      %2064 = arith.mulf %1942, %2063 : vector<8x128xf32>
      %cst_354 = arith.constant 1.000000e+00 : f32
      %2065 = vector.broadcast %cst_354 : f32 to vector<8x128xf32>
      %2066 = arith.minimumf %2064, %2065 : vector<8x128xf32>
      %2067 = arith.subf %233, %1830 : vector<8x128xf32>
      %2068 = arith.mulf %2066, %2067 : vector<8x128xf32>
      %2069 = arith.addf %1830, %2068 : vector<8x128xf32>
      %2070 = arith.subf %235, %1832 : vector<8x128xf32>
      %2071 = arith.mulf %2066, %2070 : vector<8x128xf32>
      %2072 = arith.addf %1832, %2071 : vector<8x128xf32>
      %2073 = arith.select %2054, %233, %233 : vector<8x128xi1>, vector<8x128xf32>
      %2074 = arith.select %2055, %2069, %2073 : vector<8x128xi1>, vector<8x128xf32>
      %2075 = arith.select %2054, %235, %27 : vector<8x128xi1>, vector<8x128xf32>
      %2076 = arith.select %2055, %2072, %2075 : vector<8x128xi1>, vector<8x128xf32>
      %2077 = arith.select %2052, %2069, %233 : vector<8x128xi1>, vector<8x128xf32>
      %2078 = arith.select %2054, %233, %2077 : vector<8x128xi1>, vector<8x128xf32>
      %2079 = arith.select %2052, %2072, %27 : vector<8x128xi1>, vector<8x128xf32>
      %2080 = arith.select %2054, %235, %2079 : vector<8x128xi1>, vector<8x128xf32>
      %2081 = arith.addf %2076, %27 : vector<8x128xf32>
      %cst_355 = arith.constant 0.000000e+00 : f32
      %2082 = vector.broadcast %cst_355 : f32 to vector<8x128xf32>
      %2083 = arith.cmpf oge, %2012, %2082 : vector<8x128xf32>
      %cst_356 = arith.constant 0.000000e+00 : f32
      %2084 = vector.broadcast %cst_356 : f32 to vector<8x128xf32>
      %2085 = arith.cmpf oge, %2081, %2084 : vector<8x128xf32>
      %2086 = arith.xori %2083, %2085 : vector<8x128xi1>
      %2087 = arith.subf %2012, %2081 : vector<8x128xf32>
      %cst_357 = arith.constant 0.000000e+00 : f32
      %2088 = vector.broadcast %cst_357 : f32 to vector<8x128xf32>
      %2089 = arith.cmpf oge, %2087, %2088 : vector<8x128xf32>
      %cst_358 = arith.constant 9.99999971E-10 : f32
      %cst_359 = arith.constant -9.99999971E-10 : f32
      %2090 = vector.broadcast %cst_358 : f32 to vector<8x128xf32>
      %2091 = vector.broadcast %cst_359 : f32 to vector<8x128xf32>
      %2092 = arith.select %2089, %2090, %2091 : vector<8x128xi1>, vector<8x128xf32>
      %2093 = arith.addf %2087, %2092 : vector<8x128xf32>
      %2094 = tpu.reciprocal %2093 {approx = true} : vector<8x128xf32> -> vector<8x128xf32>
      %2095 = arith.mulf %2012, %2094 : vector<8x128xf32>
      %cst_360 = arith.constant 1.000000e+00 : f32
      %2096 = vector.broadcast %cst_360 : f32 to vector<8x128xf32>
      %2097 = arith.minimumf %2095, %2096 : vector<8x128xf32>
      %2098 = arith.subf %2074, %1970 : vector<8x128xf32>
      %2099 = arith.mulf %2097, %2098 : vector<8x128xf32>
      %2100 = arith.addf %1970, %2099 : vector<8x128xf32>
      %2101 = arith.subf %2076, %1972 : vector<8x128xf32>
      %2102 = arith.mulf %2097, %2101 : vector<8x128xf32>
      %2103 = arith.addf %1972, %2102 : vector<8x128xf32>
      %2104 = arith.select %2085, %2074, %2074 : vector<8x128xi1>, vector<8x128xf32>
      %2105 = arith.select %2086, %2100, %2104 : vector<8x128xi1>, vector<8x128xf32>
      %2106 = arith.select %2085, %2076, %31 : vector<8x128xi1>, vector<8x128xf32>
      %2107 = arith.select %2086, %2103, %2106 : vector<8x128xi1>, vector<8x128xf32>
      %2108 = arith.select %2083, %2100, %2074 : vector<8x128xi1>, vector<8x128xf32>
      %2109 = arith.select %2085, %2074, %2108 : vector<8x128xi1>, vector<8x128xf32>
      %2110 = arith.select %2083, %2103, %31 : vector<8x128xi1>, vector<8x128xf32>
      %2111 = arith.select %2085, %2076, %2110 : vector<8x128xi1>, vector<8x128xf32>
      %2112 = arith.mulf %2040, %2107 : vector<8x128xf32>
      %2113 = arith.mulf %2105, %2042 : vector<8x128xf32>
      %2114 = arith.subf %2112, %2113 : vector<8x128xf32>
      %2115 = arith.addf %2050, %2114 : vector<8x128xf32>
      %2116 = arith.mulf %2105, %2111 : vector<8x128xf32>
      %2117 = arith.mulf %2109, %2107 : vector<8x128xf32>
      %2118 = arith.subf %2116, %2117 : vector<8x128xf32>
      %2119 = arith.addf %2115, %2118 : vector<8x128xf32>
      %2120 = arith.addf %2080, %27 : vector<8x128xf32>
      %cst_361 = arith.constant 0.000000e+00 : f32
      %2121 = vector.broadcast %cst_361 : f32 to vector<8x128xf32>
      %2122 = arith.cmpf oge, %2081, %2121 : vector<8x128xf32>
      %cst_362 = arith.constant 0.000000e+00 : f32
      %2123 = vector.broadcast %cst_362 : f32 to vector<8x128xf32>
      %2124 = arith.cmpf oge, %2120, %2123 : vector<8x128xf32>
      %2125 = arith.xori %2122, %2124 : vector<8x128xi1>
      %2126 = arith.subf %2081, %2120 : vector<8x128xf32>
      %cst_363 = arith.constant 0.000000e+00 : f32
      %2127 = vector.broadcast %cst_363 : f32 to vector<8x128xf32>
      %2128 = arith.cmpf oge, %2126, %2127 : vector<8x128xf32>
      %cst_364 = arith.constant 9.99999971E-10 : f32
      %cst_365 = arith.constant -9.99999971E-10 : f32
      %2129 = vector.broadcast %cst_364 : f32 to vector<8x128xf32>
      %2130 = vector.broadcast %cst_365 : f32 to vector<8x128xf32>
      %2131 = arith.select %2128, %2129, %2130 : vector<8x128xi1>, vector<8x128xf32>
      %2132 = arith.addf %2126, %2131 : vector<8x128xf32>
      %2133 = tpu.reciprocal %2132 {approx = true} : vector<8x128xf32> -> vector<8x128xf32>
      %2134 = arith.mulf %2081, %2133 : vector<8x128xf32>
      %cst_366 = arith.constant 1.000000e+00 : f32
      %2135 = vector.broadcast %cst_366 : f32 to vector<8x128xf32>
      %2136 = arith.minimumf %2134, %2135 : vector<8x128xf32>
      %2137 = arith.subf %2078, %2074 : vector<8x128xf32>
      %2138 = arith.mulf %2136, %2137 : vector<8x128xf32>
      %2139 = arith.addf %2074, %2138 : vector<8x128xf32>
      %2140 = arith.subf %2080, %2076 : vector<8x128xf32>
      %2141 = arith.mulf %2136, %2140 : vector<8x128xf32>
      %2142 = arith.addf %2076, %2141 : vector<8x128xf32>
      %2143 = arith.select %2124, %2078, %2078 : vector<8x128xi1>, vector<8x128xf32>
      %2144 = arith.select %2125, %2139, %2143 : vector<8x128xi1>, vector<8x128xf32>
      %2145 = arith.select %2124, %2080, %31 : vector<8x128xi1>, vector<8x128xf32>
      %2146 = arith.select %2125, %2142, %2145 : vector<8x128xi1>, vector<8x128xf32>
      %2147 = arith.select %2122, %2139, %2078 : vector<8x128xi1>, vector<8x128xf32>
      %2148 = arith.select %2124, %2078, %2147 : vector<8x128xi1>, vector<8x128xf32>
      %2149 = arith.select %2122, %2142, %31 : vector<8x128xi1>, vector<8x128xf32>
      %2150 = arith.select %2124, %2080, %2149 : vector<8x128xi1>, vector<8x128xf32>
      %2151 = arith.mulf %2109, %2146 : vector<8x128xf32>
      %2152 = arith.mulf %2144, %2111 : vector<8x128xf32>
      %2153 = arith.subf %2151, %2152 : vector<8x128xf32>
      %2154 = arith.addf %2119, %2153 : vector<8x128xf32>
      %2155 = arith.mulf %2144, %2150 : vector<8x128xf32>
      %2156 = arith.mulf %2148, %2146 : vector<8x128xf32>
      %2157 = arith.subf %2155, %2156 : vector<8x128xf32>
      %2158 = arith.addf %2154, %2157 : vector<8x128xf32>
      %cst_367 = arith.constant 0.000000e+00 : f32
      %2159 = vector.broadcast %cst_367 : f32 to vector<8x128xf32>
      %2160 = arith.cmpf oge, %2120, %2159 : vector<8x128xf32>
      %cst_368 = arith.constant 0.000000e+00 : f32
      %2161 = vector.broadcast %cst_368 : f32 to vector<8x128xf32>
      %2162 = arith.cmpf oge, %272, %2161 : vector<8x128xf32>
      %2163 = arith.xori %2160, %2162 : vector<8x128xi1>
      %2164 = arith.subf %2120, %272 : vector<8x128xf32>
      %cst_369 = arith.constant 0.000000e+00 : f32
      %2165 = vector.broadcast %cst_369 : f32 to vector<8x128xf32>
      %2166 = arith.cmpf oge, %2164, %2165 : vector<8x128xf32>
      %cst_370 = arith.constant 9.99999971E-10 : f32
      %cst_371 = arith.constant -9.99999971E-10 : f32
      %2167 = vector.broadcast %cst_370 : f32 to vector<8x128xf32>
      %2168 = vector.broadcast %cst_371 : f32 to vector<8x128xf32>
      %2169 = arith.select %2166, %2167, %2168 : vector<8x128xi1>, vector<8x128xf32>
      %2170 = arith.addf %2164, %2169 : vector<8x128xf32>
      %2171 = tpu.reciprocal %2170 {approx = true} : vector<8x128xf32> -> vector<8x128xf32>
      %2172 = arith.mulf %2120, %2171 : vector<8x128xf32>
      %cst_372 = arith.constant 1.000000e+00 : f32
      %2173 = vector.broadcast %cst_372 : f32 to vector<8x128xf32>
      %2174 = arith.minimumf %2172, %2173 : vector<8x128xf32>
      %2175 = arith.subf %265, %2078 : vector<8x128xf32>
      %2176 = arith.mulf %2174, %2175 : vector<8x128xf32>
      %2177 = arith.addf %2078, %2176 : vector<8x128xf32>
      %2178 = arith.subf %267, %2080 : vector<8x128xf32>
      %2179 = arith.mulf %2174, %2178 : vector<8x128xf32>
      %2180 = arith.addf %2080, %2179 : vector<8x128xf32>
      %2181 = arith.select %2162, %265, %265 : vector<8x128xi1>, vector<8x128xf32>
      %2182 = arith.select %2163, %2177, %2181 : vector<8x128xi1>, vector<8x128xf32>
      %2183 = arith.select %2162, %267, %31 : vector<8x128xi1>, vector<8x128xf32>
      %2184 = arith.select %2163, %2180, %2183 : vector<8x128xi1>, vector<8x128xf32>
      %2185 = arith.select %2160, %2177, %265 : vector<8x128xi1>, vector<8x128xf32>
      %2186 = arith.select %2162, %265, %2185 : vector<8x128xi1>, vector<8x128xf32>
      %2187 = arith.select %2160, %2180, %31 : vector<8x128xi1>, vector<8x128xf32>
      %2188 = arith.select %2162, %267, %2187 : vector<8x128xi1>, vector<8x128xf32>
      %2189 = arith.mulf %2148, %2184 : vector<8x128xf32>
      %2190 = arith.mulf %2182, %2150 : vector<8x128xf32>
      %2191 = arith.subf %2189, %2190 : vector<8x128xf32>
      %2192 = arith.addf %2158, %2191 : vector<8x128xf32>
      %2193 = arith.mulf %2182, %2188 : vector<8x128xf32>
      %2194 = arith.mulf %2186, %2184 : vector<8x128xf32>
      %2195 = arith.subf %2193, %2194 : vector<8x128xf32>
      %2196 = arith.addf %2192, %2195 : vector<8x128xf32>
      %2197 = arith.mulf %2186, %299 : vector<8x128xf32>
      %2198 = arith.mulf %297, %2188 : vector<8x128xf32>
      %2199 = arith.subf %2197, %2198 : vector<8x128xf32>
      %2200 = arith.addf %2196, %2199 : vector<8x128xf32>
      %cst_373 = arith.constant 5.000000e-01 : f32
      %2201 = vector.broadcast %cst_373 : f32 to vector<8x128xf32>
      %2202 = arith.mulf %2201, %2200 : vector<8x128xf32>
      %cst_374 = arith.constant 0.000000e+00 : f32
      %2203 = vector.broadcast %cst_374 : f32 to vector<8x128xf32>
      %2204 = arith.maximumf %2202, %2203 : vector<8x128xf32>
      %2205 = vector.extract_strided_slice %35 {offsets = [0, 8], sizes = [8, 1], strides = [1, 1]} : vector<8x13xf32> to vector<8x1xf32>
      %2206 = vector.extract_strided_slice %35 {offsets = [0, 9], sizes = [8, 1], strides = [1, 1]} : vector<8x13xf32> to vector<8x1xf32>
      %2207 = vector.extract_strided_slice %35 {offsets = [0, 10], sizes = [8, 1], strides = [1, 1]} : vector<8x13xf32> to vector<8x1xf32>
      %2208 = vector.extract_strided_slice %35 {offsets = [0, 11], sizes = [8, 1], strides = [1, 1]} : vector<8x13xf32> to vector<8x1xf32>
      %2209 = vector.extract_strided_slice %35 {offsets = [0, 12], sizes = [8, 1], strides = [1, 1]} : vector<8x13xf32> to vector<8x1xf32>
      %2210 = vector.broadcast %11 : vector<1x128xf32> to vector<8x128xf32>
      %2211 = vector.broadcast %2206 : vector<8x1xf32> to vector<8x128xf32>
      %2212 = arith.minimumf %2210, %2211 : vector<8x128xf32>
      %2213 = vector.broadcast %10 : vector<1x128xf32> to vector<8x128xf32>
      %2214 = vector.broadcast %2205 : vector<8x1xf32> to vector<8x128xf32>
      %2215 = arith.maximumf %2213, %2214 : vector<8x128xf32>
      %2216 = arith.subf %2212, %2215 : vector<8x128xf32>
      %cst_375 = arith.constant 0.000000e+00 : f32
      %2217 = vector.broadcast %cst_375 : f32 to vector<8x128xf32>
      %2218 = arith.maximumf %2216, %2217 : vector<8x128xf32>
      %2219 = arith.mulf %2204, %2218 : vector<8x128xf32>
      %2220 = vector.broadcast %12 : vector<1x128xf32> to vector<8x128xf32>
      %2221 = vector.broadcast %2207 : vector<8x1xf32> to vector<8x128xf32>
      %2222 = arith.addf %2220, %2221 : vector<8x128xf32>
      %2223 = arith.subf %2222, %2219 : vector<8x128xf32>
      %cst_376 = arith.constant 9.99999997E-7 : f32
      %2224 = vector.broadcast %cst_376 : f32 to vector<8x128xf32>
      %2225 = arith.maximumf %2223, %2224 : vector<8x128xf32>
      %2226 = arith.divf %2219, %2225 : vector<8x128xf32>
      %cst_377 = arith.constant 5.000000e-01 : f32
      %2227 = vector.broadcast %cst_377 : f32 to vector<8x1xf32>
      %2228 = arith.cmpf ogt, %2209, %2227 : vector<8x1xf32>
      %2229 = vector.broadcast %2208 : vector<8x1xf32> to vector<8x128xf32>
      %2230 = vector.broadcast %15 : vector<1x128xf32> to vector<8x128xf32>
      %2231 = arith.cmpf oeq, %2229, %2230 : vector<8x128xf32>
      %2232 = vector.broadcast %2228 : vector<8x1xi1> to vector<8x128xi1>
      %2233 = arith.andi %2232, %2231 : vector<8x128xi1>
      %cst_378 = arith.constant -1.000000e+00 : f32
      %2234 = vector.broadcast %cst_378 : f32 to vector<8x128xf32>
      %2235 = arith.select %2233, %2226, %2234 : vector<8x128xi1>, vector<8x128xf32>
      %cst_379 = arith.constant dense<0xFF800000> : vector<128xf32>
      %2236 = vector.multi_reduction <maximumf>, %2235, %cst_379 [0] : vector<8x128xf32> to vector<128xf32>
      %2237 = vector.shape_cast %2236 : vector<128xf32> to vector<1x128xf32>
      %2238 = tpu.iota {dimensions = array<i32: 0>} : vector<8x128xi32>
      %c0_i32_380 = arith.constant 0 : i32
      %2239 = vector.broadcast %c0_i32_380 : i32 to vector<8x128xi32>
      %2240 = arith.addi %2238, %2239 : vector<8x128xi32>
      %2241 = vector.broadcast %2237 : vector<1x128xf32> to vector<8x128xf32>
      %2242 = arith.cmpf oge, %2235, %2241 : vector<8x128xf32>
      %c8_i32 = arith.constant 8 : i32
      %2243 = vector.broadcast %c8_i32 : i32 to vector<8x128xi32>
      %2244 = arith.select %2242, %2240, %2243 : vector<8x128xi1>, vector<8x128xi32>
      %cst_381 = arith.constant dense<2147483647> : vector<128xi32>
      %2245 = vector.multi_reduction <minsi>, %2244, %cst_381 [0] : vector<8x128xi32> to vector<128xi32>
      %2246 = vector.shape_cast %2245 : vector<128xi32> to vector<1x128xi32>
      %2247 = arith.cmpf ogt, %2237, %32 : vector<1x128xf32>
      %2248 = arith.maximumf %2237, %32 : vector<1x128xf32>
      %2249 = arith.select %2247, %2246, %33 : vector<1x128xi1>, vector<1x128xi32>
      %cst_382 = arith.constant 0.000000e+00 : f32
      %2250 = vector.broadcast %cst_382 : f32 to vector<1x128xf32>
      %2251 = arith.maximumf %2248, %2250 : vector<1x128xf32>
      %c0_383 = arith.constant 0 : index
      %c0_384 = arith.constant 0 : index
      %2252 = arith.index_cast %2 : i32 to index
      %c0_385 = arith.constant 0 : index
      %c0_386 = arith.constant 0 : index
      %2253 = vector.load %arg4[%c0_383, %c0_384, %2252, %c0_385, %c0_386] : memref<1x1x2x1x128xf32, #tpu.memory_space<vmem>>, vector<1x1x1x1x128xf32>
      %2254 = vector.shape_cast %2253 : vector<1x1x1x1x128xf32> to vector<1x128xf32>
      %2255 = vector.shape_cast %2251 : vector<1x128xf32> to vector<1x1x1x1x128xf32>
      tpu.vector_store %arg4[%c0_383, %c0_384, %2252, %c0_385, %c0_386], %2255 {strides = array<i32>} : memref<1x1x2x1x128xf32, #tpu.memory_space<vmem>>, vector<1x1x1x1x128xf32>,
      %c0_387 = arith.constant 0 : index
      %c0_388 = arith.constant 0 : index
      %2256 = arith.index_cast %2 : i32 to index
      %c0_389 = arith.constant 0 : index
      %c0_390 = arith.constant 0 : index
      %2257 = vector.load %arg5[%c0_387, %c0_388, %2256, %c0_389, %c0_390] : memref<1x1x2x1x128xi32, #tpu.memory_space<vmem>>, vector<1x1x1x1x128xi32>
      %2258 = vector.shape_cast %2257 : vector<1x1x1x1x128xi32> to vector<1x128xi32>
      %2259 = vector.shape_cast %2249 : vector<1x128xi32> to vector<1x1x1x1x128xi32>
      tpu.vector_store %arg5[%c0_387, %c0_388, %2256, %c0_389, %c0_390], %2259 {strides = array<i32>} : memref<1x1x2x1x128xi32, #tpu.memory_space<vmem>>, vector<1x1x1x1x128xi32>,
    }
    %c2_i32_0 = arith.constant 2 : i32
    return
  }
  func.func @transform_0(%arg0: i32, %arg1: i32) -> (i32, i32, i32, i32, i32) {
    %c0_i32 = arith.constant 0 : i32
    %c0_i32_0 = arith.constant 0 : i32
    %c0_i32_1 = arith.constant 0 : i32
    %c0_i32_2 = arith.constant 0 : i32
    return %arg0, %arg1, %c0_i32, %c0_i32_0, %c0_i32_1 : i32, i32, i32, i32, i32
  }
  func.func @transform_1(%arg0: i32, %arg1: i32) -> (i32, i32, i32) {
    %c0_i32 = arith.constant 0 : i32
    %c0_i32_0 = arith.constant 0 : i32
    %c0_i32_1 = arith.constant 0 : i32
    return %arg0, %c0_i32, %c0_i32_0 : i32, i32, i32
  }
  func.func @transform_2(%arg0: i32, %arg1: i32) -> (i32, i32, i32, i32, i32) {
    %c0_i32 = arith.constant 0 : i32
    %c0_i32_0 = arith.constant 0 : i32
    %c0_i32_1 = arith.constant 0 : i32
    %c0_i32_2 = arith.constant 0 : i32
    return %arg0, %arg1, %c0_i32, %c0_i32_0, %c0_i32_1 : i32, i32, i32, i32, i32
  }
  func.func @transform_3(%arg0: i32, %arg1: i32) -> (i32, i32, i32, i32, i32) {
    %c0_i32 = arith.constant 0 : i32
    %c0_i32_0 = arith.constant 0 : i32
    %c0_i32_1 = arith.constant 0 : i32
    %c0_i32_2 = arith.constant 0 : i32
    return %arg0, %arg1, %c0_i32, %c0_i32_0, %c0_i32_1 : i32, i32, i32, i32, i32
  }
}

</mosaic_0001>

<bundles_post_ra>
// kernel: tpu_custom_call.1
= control target key start
LH: loop header
LB: loop body
LE: loop exit
PB: predicated region body
PF: predicated region fallthrough
CT: control target
= control target key end

     0   :  { %9 = vsyncpa [#allocation3], 0  ;;  %s6511_s0 = inlined_call_operand.vmem [shape: f32[2,1,2,10,128], index: 0, kind: input, shape index: {}]   ;;  %s6512_s1 = inlined_call_operand.vmem [shape: f32[2,8,13], index: 1, kind: input, shape index: {}]   ;;  %s6513_s2 = inlined_call_operand.hbm [shape: f32[2,1,2,1,128], index: 2, kind: output, shape index: {0}]   ;;  %s6514_s3 = inlined_call_operand.hbm [shape: s32[2,1,2,1,128], index: 3, kind: output, shape index: {1}]  }
   0x1   :  { %11 = vsyncpa [#allocation3 + $0x1], 0 }
   0x2   :  { %12 = vsyncpa [#allocation5], 0 }
   0x3   :  { %14 = vsyncpa [#allocation5 + $0x1], 0  ;;  %s2625_s12 = smov 0   ;;  %s2627_s13 = smov 0  }
   0x4   :  { %s2629_s14 = smov 0   ;;  %s2631_s15 = smov 0  }
   0x5   :  { %s2633_s16 = smov 0   ;;  %s2635_s17 = smov 0  }
   0x6 LB: > { %s2222_s18 = sadd.s32 4294967295, %s2581_s17   ;;  %s2223_s19 = sadd.s32 4294967294, %s2581_s17   ;;  %s2581_s17 = sphi %s2635_s17, %s20_s17   ;;  %s2577_s16 = sphi %s2633_s16, %s7261_s16   ;;  %s2573_s15 = sphi %s2631_s15, %s7260_s15   ;;  %s2569_s14 = sphi %s2629_s14, %s7259_s14   ;;  %s2565_s13 = sphi %s2627_s13, %s7258_s13   ;;  %s2561_s12 = sphi %s2625_s12, %s7257_s12  }
   0x7   : > { %s32_s20 = sadd.s32 1, %s2577_s16  ;;  %s95_s21 = sadd.s32 1, %s2569_s14 }
   0x8   : > { %p34_p0 = scmp.ge.s32.totalorder %s32_s20, 2  ;;  %p105_p1 = scmp.ne.s32.totalorder %s2569_s14, %s2565_s13 }
   0x9   : > { %p106_p2 = scmp.eq.s32.totalorder %s2222_s18, 1  ;;  %p111_p3 = scmp.ne.s32.totalorder %s2565_s13, %s2561_s12 }
   0xa   : > { %s7263_s20 = smov (%p34_p0, %s32_s20), 0  ;;  %p112_p5 = scmp.eq.s32.totalorder %s2223_s19, 1 }
   0xb   : > { %p2665_p4 = por %p106_p2, %p105_p1  ;;  %s90_s23 = ssub.s32 %s2577_s16, %s7263_s20 }
   0xc   : > { %p2226_p6 = scmp.ge.s32.totalorder %s2581_s17, 1  ;;  %p93_p7 = scmp.eq.s32.totalorder %s90_s23, 0 }
   0xd   : > { %p2672_p8 = por %p112_p5, %p111_p3  ;;  %p177_p9 = scmp.lt.s32.totalorder %s2581_s17, 3 }
   0xe   : > { %s2678_s25 = scalar_select %p93_p7, %s2569_s14, %s95_s21  }
   0xf   : > { %p178_p10 = pnand %p2226_p6, %p177_p9 }
  0x10   : > { %s2681_s26 = sand.u32 (!%p178_p10), 1, %s2565_s13   ;;  %p214_p11 = scmp.lt.s32.totalorder (!%p178_p10), %s2573_s15, 1 }
  0x11   : > { %181 = sbr.rel (%p178_p10) target bundleno = 711 (0x2c7), region = 28  ;;  %s2227_s27 = sshll.u32 (!%p178_p10), %s2681_s26, 1 }
  0x12   : > { %s2696_s10 = scalar_lea.vmem (!%p178_p10), [#allocation2], %s2227_s27  ;;  %s2698_s11 = scalar_lea.vmem (!%p178_p10), [#allocation4], %s2227_s27 }
  0x13   : > { %s2700_s18 = smov (!%p178_p10), 0  }
  0x18   : > { %s215_s28 = scalar_select %p214_p11, %s2573_s15, 1 }
  0x1a   : > { %s2241_s29 = sshll.u32 %s215_s28, 5  ;;  %s2231_s30 = sshll.u32 %s215_s28, 3 }
  0x1b   : > { %s2689_s6 = scalar_lea.vmem %s6511_s0, %s2241_s29  ;;  %s2694_s9 = scalar_lea.vmem %s6512_s1, %s2231_s30 }
  0x1c LB: >> { %v2706_v0 = vld [vmem:[%s2694_s9] sm:$0xff]  ;;  %v2587_v1 = vmov 2   ;;  %v2588_v2 = vmov 0   ;;  %v2589_v3 = vmov 3   ;;  %v2590_v4 = vmov 1   ;;  %s2232_s19 = sshll.u32 %s2585_s18, 4  ;;  %s2041_s23 = scalar_lea.vmem %s2696_s10, %s2585_s18 [#allocation2]  ;;  %s2585_s18 = sphi %s2700_s18, %s232_s18  }
  0x1d   : >> { %2330 = vset.pattern.permute.xlu1 %v2587_v1  ;;  %2328 = vset.pattern.permute.xlu0 %v2588_v2  ;;  %v2591_v5 = vmov 4   ;;  %v2592_v6 = vmov 5   ;;  %v2593_v7 = vmov 6   ;;  %v2594_v8 = vmov 7   ;;  %s2721_s21 = scalar_lea.vmem %s2689_s6, %s2232_s19  ;;  %s2043_s27 = scalar_lea.vmem %s2698_s11, %s2585_s18 [#allocation4] }
  0x1e   : >> { %282 = vperm.xlu1 %2330, %v2706_v0   ;;  %266 = vperm.xlu0 %2328, %v2706_v0   ;;  %v237_v9 = vlaneseq  ;;  %v2725_v12 = vld [vmem:[%s2721_s21] sm:$0xff]  ;;  %v236_v19 = vld [vmem:[%s2721_s21 + $0x8] sm:$0x3]  ;;  %v6518_v48 = vmov -1e-09   ;;  %vm2001_vm9 = vcmp.gt.f32.partialorder %v2706_v0, 0.5 }
  0x1f   : >> { %s232_s18 = sadd.s32 1, %s2585_s18  }
  0x20   : >> { %v2718_v10 = vshrl.u32 %v237_v9, 7  ;;  %p229_p12 = scmp.ge.s32.totalorder %s232_s18, 2  }
  0x21   : > { %s2242_s28 = sshll.u32 (%p229_p12), %s2573_s15, 5  ;;  %s2066_s5 = sshll.u32 (%p229_p12), %s2696_s10, 4  ;;  %s6423_s5 = int_to_ptr.vmem [resolvable:$true] %s2066_s5 }
  0x22   : >> { %2331 = vset.pattern.permute.xlu1 %v2589_v3  ;;  %2329 = vset.pattern.permute.xlu0 %v2590_v4  ;;  %6731 = vst [vmem:[#allocation8_spill] sm:$0xff] %v2718_v10  ;;  %v239_v11 = vsub.s32 0, %v2718_v10  ;;  %v6515_v13 = vsub.s32 1, %v2718_v10  ;;  %v247_v16 = vsub.s32 7, %v2718_v10  ;;  %v255_v20 = vsub.s32 2, %v2718_v10  ;;  %s6420_s4 = scalar_lea.hbm (%p229_p12), %s6513_s2, %s2242_s28  ;;  %s2046_s7 = scalar_lea.sflag (%p229_p12), [#allocation3], %s2681_s26 }
  0x23   : >> { %287 = vperm.xlu1 %2331, %v2706_v0   ;;  %271 = vperm.xlu0 %2329, %v2706_v0   ;;  %s2467_s8 = scalar_lea.vmem (%p229_p12), %s6423_s5, 32  ;;  %s2601_s6 = smov (%p229_p12), [#allocation2]  }
  0x24   : >> { %v240_v15 = vrot.slane %v2725_v12, %v239_v11  ;;  %v244_v18 = vrot.slane %v2725_v12, %v6515_v13  ;;  %v2736_v21 = vrot.slane %v2725_v12, %v247_v16  ;;  %v2740_v26 = vrot.slane %v236_v19, %v239_v11  ;;  %p2468_p13 = scmp.ne.s32.totalorder (%p229_p12), %s6423_s5, %s2467_s8 }
  0x25   : >> { %v2745_v29 = vrot.slane %v2725_v12, %v255_v20 }
  0x26   : > { %p2469_p0 = pnand (%p229_p12), %p2468_p13, %p2665_p4 }
  0x27   : >> { %2332 = vset.pattern.permute.xlu1 %v2591_v5  ;;  %2333 = vset.pattern.permute.xlu0 %v2592_v6 }
  0x28   : >> { %298 = vperm.xlu1 %2332, %v2706_v0   ;;  %303 = vperm.xlu0 %2333, %v2706_v0   ;;  %p2470_p1 = pneg (%p229_p12), %p2469_p0 }
  0x2c   : >> { %2334 = vset.pattern.permute.xlu1 %v2593_v7 }
  0x2d   : >> { %314 = vperm.xlu1 %2334, %v2706_v0  }
  0x31   : >> { %2335 = vset.pattern.permute.xlu1 %v2594_v8 }
  0x32   : >> { %319 = vperm.xlu1 %2335, %v2706_v0  }
  0x9d   : >> { %v283_v14 = vpop.permute.xlu1 %282  ;;  %v267_v17 = vpop.permute.xlu0 %266 }
  0x9e   : >> { %v2738_v22 = vsub.f32 %v283_v14, %v240_v15  ;;  %v269_v23 = vsub.f32 %v267_v17, %v240_v15 }
  0xa0   : >> { %v291_v30 = vmul.f32 %v2738_v22, %v2736_v21  ;;  %v275_v31 = vmul.f32 %v269_v23, %v2736_v21  ;;  %v279_v63 = vmul.f32 %v269_v23, %v2740_v26 }
  0xa2   : >> { %v288_v24 = vpop.permute.xlu1 %287  ;;  %v272_v25 = vpop.permute.xlu0 %271 }
  0xa3   : >> { %v2742_v27 = vsub.f32 %v288_v24, %v244_v18  ;;  %v274_v28 = vsub.f32 %v272_v25, %v244_v18 }
  0xa5   : >> { %v292_v32 = vmul.f32 %v2742_v27, %v2740_v26  ;;  %v276_v33 = vmul.f32 %v274_v28, %v2740_v26  ;;  %v278_v58 = vmul.f32 %v274_v28, %v2736_v21 }
  0xa7   : >> { %v2753_v34 = vadd.f32 %v292_v32, %v291_v30  ;;  %v2755_v35 = vadd.f32 %v276_v33, %v275_v31  ;;  %v299_v36 = vpop.permute.xlu1 %298  ;;  %v304_v37 = vpop.permute.xlu0 %303  ;;  %v2802_v4 = vsub.f32 %v278_v58, %v279_v63  ;;  %v294_v33 = vmul.f32 %v2742_v27, %v2736_v21 }
  0xa8   : >> { %v2757_v38 = vsub.f32 %v299_v36, %v240_v15  ;;  %v2759_v39 = vsub.f32 %v304_v37, %v244_v18  ;;  %v2903_v58 = vsel %vm2001_vm9, 1, %v2588_v2 }
  0xa9   : >> { %v2763_v40 = vsub.f32 %v2745_v29, %v2753_v34  ;;  %v2767_v41 = vsub.f32 %v2745_v29, %v2755_v35  ;;  %v341_v17 = vsub.f32 %v2753_v34, %v2755_v35  ;;  %6740 = vst [vmem:[#allocation13_spill] sm:$0xff] %v2903_v58 }
  0xaa   : >> { %v307_v42 = vmul.f32 %v2757_v38, %v2736_v21  ;;  %v308_v43 = vmul.f32 %v2759_v39, %v2740_v26 }
  0xab   : >> { %vm331_vm0 = vcmp.ge.f32.partialorder %v2767_v41, 0.0  ;;  %v334_v44 = vsub.f32 %v2767_v41, %v2763_v40  ;;  %vm332_vm5 = vcmp.ge.f32.partialorder %v2763_v40, 0.0 }
  0xac   : >> { %v2780_v45 = vsel %vm331_vm0, %v2755_v35, %v2745_v29  ;;  %v2782_v46 = vadd.f32 %v308_v43, %v307_v42  ;;  %v315_v47 = vpop.permute.xlu1 %314  ;;  %v347_v28 = vsel %vm332_vm5, %v2753_v34, %v2745_v29  ;;  %vm2830_vm6 = vmxor %vm331_vm0, %vm332_vm5  ;;  %v311_v42 = vmul.f32 %v2757_v38, %v2740_v26 }
  0xad   : >> { %vm335_vm1 = vcmp.ge.f32.partialorder %v334_v44, 0.0  ;;  %v317_v51 = vsub.f32 %v315_v47, %v240_v15  ;;  %v295_v47 = vmul.f32 %v2738_v22, %v2740_v26 }
  0xae   : >> { %v336_v49 = vsel %vm335_vm1, 1e-09, %v6518_v48  ;;  %v2787_v50 = vsub.f32 %v2745_v29, %v2782_v46  ;;  %v364_v32 = vsub.f32 %v2782_v46, %v2753_v34 }
  0xaf   : >> { %v337_v52 = vadd.f32 %v336_v49, %v334_v44  ;;  %v323_v55 = vmul.f32 %v317_v51, %v2736_v21  ;;  %v327_v56 = vmul.f32 %v317_v51, %v2740_v26  ;;  %v310_v44 = vmul.f32 %v2759_v39, %v2736_v21 }
  0xb0   : >> { %v357_v53 = vsub.f32 %v2763_v40, %v2787_v50  ;;  %vm355_vm7 = vcmp.ge.f32.partialorder %v2787_v50, 0.0 }
  0xb1   : >> { %2342 = vrcp.f32 %v337_v52  ;;  %v320_v54 = vpop.permute.xlu1 %319  ;;  %v259_v52 = vsub.s32 3, %v2718_v10  ;;  %vm2873_vm8 = vmxor %vm332_vm5, %vm355_vm7  ;;  %v370_v22 = vsel %vm355_vm7, %v2782_v46, %v2745_v29 }
  0xb2   : >> { %vm358_vm2 = vcmp.ge.f32.partialorder %v357_v53, 0.0  ;;  %v322_v57 = vsub.f32 %v320_v54, %v244_v18 }
  0xb3   : >> { %v359_v59 = vsel %vm358_vm2, 1e-09, %v6518_v48 }
  0xb4   : >> { %v360_v60 = vadd.f32 %v359_v59, %v357_v53  ;;  %v324_v61 = vmul.f32 %v322_v57, %v2740_v26  ;;  %v326_v62 = vmul.f32 %v322_v57, %v2736_v21  ;;  %v2867_v53 = vsub.f32 %v294_v33, %v295_v47 }
  0xb5   : >> { %v2882_v26 = vsub.f32 %v310_v44, %v311_v42  ;;  %v2906_v59 = vrot.slane %v2725_v12, %v259_v52 }
  0xb6   : >> { %2344 = vrcp.f32 %v360_v60  ;;  %v2798_v1 = vadd.f32 %v324_v61, %v323_v55  ;;  %v2800_v3 = vsub.f32 %v326_v62, %v327_v56  ;;  %v344_v60 = vsub.f32 %v2867_v53, %v2802_v4 }
  0xb7   : >> { %6741 = vst [vmem:[#allocation14_spill] sm:$0xff] %v2906_v59  ;;  %v367_v62 = vsub.f32 %v2882_v26, %v2867_v53 }
  0xb8   : >> { %v2806_v5 = vsub.f32 %v2745_v29, %v2798_v1  ;;  %v411_v6 = vsub.f32 %v2802_v4, %v2800_v3  ;;  %v387_v2 = vsub.f32 %v2798_v1, %v2782_v46 }
  0xba   : >> { %v380_v7 = vsub.f32 %v2787_v50, %v2806_v5  ;;  %v401_v8 = vsub.f32 %v2806_v5, %v2767_v41  ;;  %vm378_vm13 = vcmp.ge.f32.partialorder %v2806_v5, 0.0 }
  0xbb   : >> { %v2343_v9 = vpop.eup %2342  ;;  %vm379_vm14 = vmxor %vm355_vm7, %vm378_vm13 }
  0xbc   : >> { %v339_v11 = vmul.f32 %v2343_v9, %v2767_v41  ;;  %vm381_vm3 = vcmp.ge.f32.partialorder %v380_v7, 0.0  ;;  %vm402_vm4 = vcmp.ge.f32.partialorder %v401_v8, 0.0  ;;  %v390_v9 = vsub.f32 %v2800_v3, %v2882_v26  ;;  %vm400_vm15 = vmxor %vm378_vm13, %vm331_vm0 }
  0xbd   : >> { %v382_v14 = vsel %vm381_vm3, 1e-09, %v6518_v48  ;;  %v403_v15 = vsel %vm402_vm4, 1e-09, %v6518_v48 }
  0xbe   : >> { %v340_v16 = vmin.f32 %v339_v11, 1.0  ;;  %v383_v18 = vadd.f32 %v382_v14, %v380_v7  ;;  %v404_v19 = vadd.f32 %v403_v15, %v401_v8  ;;  %v408_v11 = vsub.f32 %v2755_v35, %v2798_v1 }
  0xc0   : >> { %v2345_v20 = vpop.eup %2344  ;;  %v342_v23 = vmul.f32 %v341_v17, %v340_v16  ;;  %2346 = vrcp.f32 %v383_v18  ;;  %v345_v12 = vmul.f32 %v344_v60, %v340_v16 }
  0xc1   : >> { %v362_v24 = vmul.f32 %v2345_v20, %v2763_v40  ;;  %2348 = vrcp.f32 %v404_v19 }
  0xc2   : >> { %v343_v25 = vadd.f32 %v342_v23, %v2755_v35 }
  0xc3   : >> { %v363_v31 = vmin.f32 %v362_v24, 1.0 }
  0xc4   : >> { %v2840_v36 = vsel %vm2830_vm6, %v343_v25, %v347_v28  ;;  %v350_v37 = vsel %vm331_vm0, %v343_v25, %v2745_v29  ;;  %v393_v28 = vsel %vm378_vm13, %v2798_v1, %v2745_v29 }
  0xc5   : >> { %6734 = vst [vmem:[#allocation9_spill] sm:$0xff] %v2840_v36  ;;  %v2850_v43 = vsel %vm332_vm5, %v2753_v34, %v350_v37  ;;  %v365_v27 = vmul.f32 %v364_v32, %v363_v31  ;;  %v2859_v49 = vadd.f32 %v2840_v36, %v2745_v29  ;;  %v368_v17 = vmul.f32 %v367_v62, %v363_v31 }
  0xc6   : >> { %6735 = vst [vmem:[#allocation10_spill] sm:$0xff] %v2850_v43  ;;  %v2863_v38 = vadd.f32 %v2850_v43, %v2745_v29  ;;  %v346_v31 = vadd.f32 %v345_v12, %v2802_v4 }
  0xc7   : >> { %6736 = vst [vmem:[#allocation11_spill] sm:$0xff] %v2859_v49  ;;  %v366_v51 = vadd.f32 %v365_v27, %v2753_v34  ;;  %v369_v42 = vadd.f32 %v368_v17, %v2867_v53  ;;  %vm6533_vm2 = vcmp.ge.f32.partialorder %v2859_v49, 0.0 }
  0xc8   : >> { %6737 = vst [vmem:[#allocation12_spill] sm:$0xff] %v2863_v38  ;;  %v426_v56 = vsub.f32 %v2859_v49, %v2863_v38 }
  0xc9   : >> { %v2886_v34 = vsel %vm2873_vm8, %v366_v51, %v370_v22  ;;  %v373_v39 = vsel %vm332_vm5, %v366_v51, %v2745_v29 }
  0xca   : >> { %v2347_v54 = vpop.eup %2346  ;;  %v2894_v55 = vsel %vm355_vm7, %v2782_v46, %v373_v39  ;;  %v2900_v0 = vadd.f32 %v2886_v34, %v2745_v29  ;;  %vm427_vm10 = vcmp.ge.f32.partialorder %v426_v56, 0.0 }
  0xcb   : >> { %v2349_v57 = vpop.eup %2348  ;;  %v2912_v61 = vadd.f32 %v2894_v55, %v2745_v29  ;;  %v385_v7 = vmul.f32 %v2347_v54, %v2787_v50  ;;  %v428_v24 = vsel %vm427_vm10, 1e-09, %v6518_v48  ;;  %v703_v50 = vsub.f32 %v2894_v55, %v2886_v34 }
  0xcc   : >> { %v503_v63 = vsub.f32 %v2863_v38, %v2900_v0  ;;  %v406_v15 = vmul.f32 %v2349_v57, %v2806_v5  ;;  %v429_v47 = vadd.f32 %v428_v24, %v426_v56  ;;  %v352_v56 = vsel %vm331_vm0, %v346_v31, %v2867_v53 }
  0xcd   : >> { %v696_v8 = vsub.f32 %v2900_v0, %v2912_v61  ;;  %v386_v14 = vmin.f32 %v385_v7, 1.0  ;;  %v3014_v5 = vsub.f32 0.0, %v2906_v59  ;;  %v3028_v41 = vsel %vm332_vm5, %v2867_v53, %v352_v56 }
  0xce   : >> { %vm504_vm11 = vcmp.ge.f32.partialorder %v503_v63, 0.0  ;;  %v407_v32 = vmin.f32 %v406_v15, 1.0  ;;  %6748 = vst [vmem:[#allocation21_spill] sm:$0xff] %v3028_v41  ;;  %v372_v15 = vsel %vm2873_vm8, %v369_v42, %v2882_v26  ;;  %vm501_vm3 = vcmp.ge.f32.partialorder %v2900_v0, 0.0 }
  0xcf   : >> { %v505_v18 = vsel %vm504_vm11, 1e-09, %v6518_v48  ;;  %vm697_vm12 = vcmp.ge.f32.partialorder %v696_v8, 0.0  ;;  %v388_v20 = vmul.f32 %v387_v2, %v386_v14  ;;  %v391_v23 = vmul.f32 %v390_v9, %v386_v14 }
  0xd0   : >> { %v506_v16 = vadd.f32 %v505_v18, %v503_v63  ;;  %v698_v19 = vsel %vm697_vm12, 1e-09, %v6518_v48  ;;  %v409_v44 = vmul.f32 %v408_v11, %v407_v32  ;;  %v412_v27 = vmul.f32 %v411_v6, %v407_v32 }
  0xd1   : >> { %v699_v25 = vadd.f32 %v698_v19, %v696_v8  ;;  %v389_v33 = vadd.f32 %v388_v20, %v2782_v46  ;;  %v392_v37 = vadd.f32 %v391_v23, %v2882_v26  ;;  %v2998_v2 = vsub.f32 0.0, %v2745_v29 }
  0xd2   : >> { %2350 = vrcp.f32 %v506_v16  ;;  %v410_v39 = vadd.f32 %v409_v44, %v2798_v1  ;;  %v413_v54 = vadd.f32 %v412_v27, %v2800_v3  ;;  %v375_v8 = vsel %vm332_vm5, %v369_v42, %v2882_v26 }
  0xd3   : >> { %2352 = vrcp.f32 %v699_v25  ;;  %v2947_v51 = vsel %vm379_vm14, %v389_v33, %v393_v28  ;;  %v396_v46 = vsel %vm355_vm7, %v389_v33, %v2745_v29  ;;  %v398_v52 = vsel %vm355_vm7, %v392_v37, %v2800_v3  ;;  %6744 = vst [vmem:[#allocation17_spill] sm:$0xff] %v2998_v2 }
  0xd4   : >> { %v2958_v22 = vsel %vm378_vm13, %v2798_v1, %v396_v46  ;;  %v2963_v6 = vsel %vm378_vm13, %v2800_v3, %v398_v52  ;;  %v2971_v57 = vsel %vm379_vm14, %v392_v37, %v2800_v3  ;;  %v2979_v60 = vadd.f32 %v2947_v51, %v2745_v29 }
  0xd5   : >> { %v2983_v1 = vadd.f32 %v2958_v22, %v2745_v29  ;;  %v2986_v62 = vsel %vm400_vm15, %v410_v39, %v2780_v45  ;;  %v2989_v63 = vsel %vm400_vm15, %v413_v54, %v2802_v4  ;;  %v417_v3 = vsel %vm378_vm13, %v410_v39, %v2745_v29 }
  0xd6   : >> { %6742 = vst [vmem:[#allocation15_spill] sm:$0xff] %v2986_v62  ;;  %6743 = vst [vmem:[#allocation16_spill] sm:$0xff] %v2989_v63  ;;  %v419_v7 = vsel %vm378_vm13, %v413_v54, %v2802_v4  ;;  %2354 = vrcp.f32 %v429_v47  ;;  %v3003_v45 = vsel %vm331_vm0, %v2755_v35, %v417_v3  ;;  %v889_v9 = vsub.f32 %v2912_v61, %v2979_v60 }
  0xd7   : >> { %6745 = vst [vmem:[#allocation18_spill] sm:$0xff] %v3003_v45  ;;  %v3008_v12 = vsel %vm331_vm0, %v2802_v4, %v419_v7  ;;  %v1082_v11 = vsub.f32 %v2979_v60, %v2983_v1  ;;  %v3023_v35 = vsel %vm2830_vm6, %v346_v31, %v2867_v53  ;;  %v433_v4 = vsub.f32 %v2850_v43, %v2840_v36 }
  0xd8   : >> { %6746 = vst [vmem:[#allocation19_spill] sm:$0xff] %v3008_v12  ;;  %6747 = vst [vmem:[#allocation20_spill] sm:$0xff] %v3023_v35  ;;  %vm890_vm0 = vcmp.ge.f32.partialorder %v889_v9, 0.0  ;;  %v3039_v30 = vadd.f32 %v2986_v62, %v2745_v29  ;;  %v3045_v40 = vsel %vm355_vm7, %v2882_v26, %v375_v8  ;;  %v510_v19 = vsub.f32 %v2886_v34, %v2850_v43 }
  0xd9   : >> { %vm1083_vm1 = vcmp.ge.f32.partialorder %v1082_v11, 0.0  ;;  %v891_v53 = vsel %vm890_vm0, 1e-09, %v6518_v48  ;;  %v513_v24 = vsub.f32 %v372_v15, %v3028_v41  ;;  %vm694_vm4 = vcmp.ge.f32.partialorder %v2912_v61, 0.0 }
  0xda   : >> { %6749 = vst [vmem:[#allocation22_spill] sm:$0xff] %v3039_v30  ;;  %v1084_v18 = vsel %vm1083_vm1, 1e-09, %v6518_v48  ;;  %v892_v20 = vadd.f32 %v891_v53, %v889_v9  ;;  %v1275_v26 = vsub.f32 %v2983_v1, %v3039_v30  ;;  %v706_v33 = vsub.f32 %v3045_v40, %v372_v15  ;;  %vm695_vm8 = vmxor %vm501_vm3, %vm694_vm4 }
  0xdb   : >> { %v1085_v23 = vadd.f32 %v1084_v18, %v1082_v11  ;;  %v436_v47 = vsub.f32 %v3028_v41, %v3023_v35  ;;  %vm6573_vm6 = vcmp.ge.f32.partialorder %v2863_v38, 0.0  ;;  %v3077_v7 = vsel %vm6533_vm2, %v2840_v36, %v2998_v2 }
  0xdc   : >> { %v2351_v17 = vpop.eup %2350  ;;  %2356 = vrcp.f32 %v892_v20  ;;  %vm1276_vm5 = vcmp.ge.f32.partialorder %v1275_v26, 0.0  ;;  %6751 = vst [vmem:[#allocation24_spill] sm:$0xff] %v3077_v7  ;;  %vm3083_vm7 = vmxor %vm6573_vm6, %vm501_vm3  ;;  %v6752_v8 = vmov 0  ;;  %vm887_vm9 = vcmp.ge.f32.partialorder %v2979_v60, 0.0 }
  0xdd   : >> { %v2353_v21 = vpop.eup %2352  ;;  %v508_v16 = vmul.f32 %v2351_v17, %v2863_v38  ;;  %2358 = vrcp.f32 %v1085_v23  ;;  %v1277_v44 = vsel %vm1276_vm5, 1e-09, %v6518_v48  ;;  %v6753_v8 = vsel %vm3083_vm7, 4294967295, %v6752_v8  ;;  %vm888_vm14 = vmxor %vm694_vm4, %vm887_vm9 }
  0xde   : >> { %v701_v25 = vmul.f32 %v2353_v21, %v2900_v0  ;;  %v1278_v39 = vadd.f32 %v1277_v44, %v1275_v26  ;;  %6754 = vst [vmem:[#allocation25_spill] sm:$0xff] %v6753_v8  ;;  %v709_v17 = vsel %vm694_vm4, %v2894_v55, %v2998_v2  ;;  %vm1080_vm10 = vcmp.ge.f32.partialorder %v2983_v1, 0.0 }
  0xdf   : >> { %v509_v28 = vmin.f32 %v508_v16, 1.0  ;;  %v896_v0 = vsub.f32 %v2947_v51, %v2894_v55  ;;  %vm6562_vm15 = vcmp.ge.f32.partialorder %v3039_v30, 0.0 }
  0xe0   : >> { %v702_v31 = vmin.f32 %v701_v25, 1.0  ;;  %v2355_v27 = vpop.eup %2354  ;;  %2360 = vrcp.f32 %v1278_v39 }
  0xe1   : >> { %v511_v37 = vmul.f32 %v510_v19, %v509_v28  ;;  %v514_v42 = vmul.f32 %v513_v24, %v509_v28  ;;  %v431_v53 = vmul.f32 %v2355_v27, %v2859_v49 }
  0xe2   : >> { %v704_v46 = vmul.f32 %v703_v50, %v702_v31  ;;  %v707_v52 = vmul.f32 %v706_v33, %v702_v31 }
  0xe3   : >> { %v3068_v54 = vadd.f32 %v511_v37, %v2850_v43  ;;  %v515_v56 = vadd.f32 %v514_v42, %v3028_v41  ;;  %v3147_v37 = vsel %vm501_vm3, %v2886_v34, %v2998_v2  ;;  %v432_v39 = vmin.f32 %v431_v53, 1.0 }
  0xe4   : >> { %v705_v9 = vadd.f32 %v704_v46, %v2886_v34  ;;  %v708_v11 = vadd.f32 %v707_v52, %v372_v15  ;;  %6760 = vst [vmem:[#allocation31_spill] sm:$0xff] %v3147_v37  ;;  %v1095_v53 = vsel %vm1080_vm10, %v2958_v22, %v2998_v2 }
  0xe5   : >> { %6750 = vst [vmem:[#allocation23_spill] sm:$0xff] %v3068_v54  ;;  %v519_v18 = vsel %vm6573_vm6, %v3068_v54, %v2998_v2  ;;  %v521_v21 = vsel %vm6573_vm6, %v515_v56, %v372_v15  ;;  %v3105_v16 = vsel %vm3083_vm7, %v515_v56, %v372_v15  ;;  %v3199_v31 = vmul.f32 %v433_v4, %v432_v39 }
  0xe6   : >> { %6755 = vst [vmem:[#allocation26_spill] sm:$0xff] %v3105_v16  ;;  %v3110_v19 = vsel %vm501_vm3, %v2886_v34, %v519_v18  ;;  %v3114_v20 = vsel %vm501_vm3, %v372_v15, %v521_v21  ;;  %v3116_v23 = vsel %vm695_vm8, %v705_v9, %v709_v17  ;;  %v3123_v25 = vsel %vm695_vm8, %v708_v11, %v3045_v40  ;;  %v2357_v33 = vpop.eup %2356 }
  0xe7   : >> { %6756 = vst [vmem:[#allocation27_spill] sm:$0xff] %v3110_v19  ;;  %6757 = vst [vmem:[#allocation28_spill] sm:$0xff] %v3114_v20  ;;  %v3120_v24 = vsub.f32 %v2906_v59, %v3114_v20  ;;  %v712_v50 = vsel %vm501_vm3, %v705_v9, %v2998_v2  ;;  %v714_v26 = vsel %vm501_vm3, %v708_v11, %v3045_v40  ;;  %v2359_v52 = vpop.eup %2358 }
  0xe8   : >> { %6758 = vst [vmem:[#allocation29_spill] sm:$0xff] %v3116_v23  ;;  %v3132_v15 = vsel %vm694_vm4, %v2894_v55, %v712_v50  ;;  %v3139_v28 = vsub.f32 %v2906_v59, %v3123_v25  ;;  %v3151_v42 = vsub.f32 %v2906_v59, %v3105_v16  ;;  %v3156_v44 = vsel %vm694_vm4, %v3045_v40, %v714_v26  ;;  %vm1081_vm3 = vmxor %vm887_vm9, %vm1080_vm10 }
  0xe9   : >> { %6759 = vst [vmem:[#allocation30_spill] sm:$0xff] %v3120_v24  ;;  %v3163_v46 = vsub.f32 %v2906_v59, %v3156_v44  ;;  %v894_v56 = vmul.f32 %v2357_v33, %v2912_v61  ;;  %v899_v9 = vsub.f32 %v2971_v57, %v3045_v40  ;;  %v902_v11 = vsel %vm887_vm9, %v2947_v51, %v2998_v2 }
  0xea   : >> { %6761 = vst [vmem:[#allocation32_spill] sm:$0xff] %v3151_v42  ;;  %v719_v27 = vsub.f32 %v3120_v24, %v3139_v28  ;;  %v1089_v18 = vsub.f32 %v2958_v22, %v2947_v51  ;;  %v3186_v21 = vsub.f32 %v3151_v42, %v3120_v24  ;;  %v3191_v33 = vadd.f32 %v3003_v45, %v2745_v29  ;;  %v2361_v34 = vpop.eup %2360 }
  0xeb   : >> { %v804_v17 = vsub.f32 %v3139_v28, %v3163_v46  ;;  %v895_v26 = vmin.f32 %v894_v56, 1.0  ;;  %v1087_v3 = vmul.f32 %v2359_v52, %v2979_v60  ;;  %v3202_v7 = vmul.f32 %v436_v47, %v432_v39 }
  0xec   : >> { %vm720_vm11 = vcmp.ge.f32.partialorder %v719_v27, 0.0  ;;  %6762 = vst [vmem:[#allocation33_spill] sm:$0xff] %v3191_v33  ;;  %vm612_vm13 = vcmp.ge.f32.partialorder %v3186_v21, 0.0  ;;  %v3209_v32 = vsub.f32 %v3039_v30, %v3191_v33  ;;  %v3219_v47 = vmul.f32 %v2361_v34, %v2983_v1 }
  0xed   : >> { %v721_v50 = vsel %vm720_vm11, 1e-09, %v6518_v48  ;;  %vm805_vm12 = vcmp.ge.f32.partialorder %v804_v17, 0.0  ;;  %v897_v56 = vmul.f32 %v896_v0, %v895_v26  ;;  %v900_v10 = vmul.f32 %v899_v9, %v895_v26 }
  0xee   : >> { %v722_v13 = vadd.f32 %v721_v50, %v719_v27  ;;  %v806_v14 = vsel %vm805_vm12, 1e-09, %v6518_v48  ;;  %v1088_v27 = vmin.f32 %v1087_v3, 1.0  ;;  %v729_v61 = vsub.f32 %v3123_v25, %v3114_v20 }
  0xef   : >> { %v807_v29 = vadd.f32 %v806_v14, %v804_v17  ;;  %v898_v52 = vadd.f32 %v897_v56, %v2894_v55  ;;  %v901_v50 = vadd.f32 %v900_v10, %v3045_v40  ;;  %vm717_vm0 = vcmp.ge.f32.partialorder %v3139_v28, 0.0 }
  0xf0   : >> { %2362 = vrcp.f32 %v722_v13  ;;  %v1090_v4 = vmul.f32 %v1089_v18, %v1088_v27  ;;  %v6763_v13 = vsub.f32 %v2963_v6, %v2971_v57  ;;  %v814_v18 = vsub.f32 %v3156_v44, %v3123_v25 }
  0xf1   : >> { %2364 = vrcp.f32 %v807_v29  ;;  %v3221_v55 = vsel %vm888_vm14, %v898_v52, %v902_v11  ;;  %v3224_v10 = vsel %vm888_vm14, %v901_v50, %v2971_v57  ;;  %v905_v40 = vsel %vm694_vm4, %v898_v52, %v2998_v2 }
  0xf2   : >> { %v1093_v14 = vmul.f32 %v6763_v13, %v1088_v27  ;;  %v907_v3 = vsel %vm694_vm4, %v901_v50, %v2971_v57  ;;  %v3235_v0 = vsel %vm887_vm9, %v2947_v51, %v905_v40  ;;  %v3244_v39 = vsub.f32 %v2906_v59, %v3224_v10 }
  0xf3   : >> { %v3240_v34 = vsel %vm887_vm9, %v2971_v57, %v907_v3  ;;  %v1091_v56 = vadd.f32 %v1090_v4, %v2947_v51  ;;  %v613_v27 = vsel %vm612_vm13, 1e-09, %v6518_v48  ;;  %vm802_vm1 = vcmp.ge.f32.partialorder %v3163_v46, 0.0 }
  0xf4   : >> { %v3252_v11 = vsub.f32 %v2906_v59, %v3240_v34  ;;  %v912_v26 = vsub.f32 %v3163_v46, %v3244_v39  ;;  %v1094_v29 = vadd.f32 %v1093_v14, %v2971_v57  ;;  %vm1469_vm4 = vcmp.ge.f32.partialorder %v3209_v32, 0.0 }
  0xf5   : >> { %v3277_v57 = vsel %vm1081_vm3, %v1091_v56, %v1095_v53  ;;  %v1098_v13 = vsel %vm887_vm9, %v1091_v56, %v2998_v2  ;;  %v3361_v42 = vsel %vm6562_vm15, %v2986_v62, %v2998_v2  ;;  %vm910_vm2 = vcmp.ge.f32.partialorder %v3244_v39, 0.0 }
  0xf6   : >> { %v997_v52 = vsub.f32 %v3244_v39, %v3252_v11  ;;  %vm913_vm5 = vcmp.ge.f32.partialorder %v912_v26, 0.0  ;;  %vm995_vm8 = vcmp.ge.f32.partialorder %v3252_v11, 0.0  ;;  %v3280_v50 = vsel %vm1081_vm3, %v1094_v29, %v2963_v6 }
  0xf7   : >> { %v914_v4 = vsel %vm913_vm5, 1e-09, %v6518_v48  ;;  %v1100_v14 = vsel %vm887_vm9, %v1094_v29, %v2963_v6  ;;  %v3293_v53 = vsel %vm1080_vm10, %v2958_v22, %v1098_v13  ;;  %v3303_v60 = vsub.f32 %v2906_v59, %v3280_v50 }
  0xf8   : >> { %vm998_vm11 = vcmp.ge.f32.partialorder %v997_v52, 0.0  ;;  %v915_v3 = vadd.f32 %v914_v4, %v912_v26  ;;  %v3298_v9 = vsel %vm1080_vm10, %v2963_v6, %v1100_v14  ;;  %vm6561_vm3 = vcmp.ge.f32.partialorder %v3120_v24, 0.0 }
  0xf9   : >> { %v999_v17 = vsel %vm998_vm11, 1e-09, %v6518_v48  ;;  %v3311_v13 = vsub.f32 %v2906_v59, %v3298_v9  ;;  %vm1103_vm9 = vcmp.ge.f32.partialorder %v3303_v60, 0.0  ;;  %v1105_v4 = vsub.f32 %v3252_v11, %v3303_v60  ;;  %vm3400_vm11 = vmxor %vm717_vm0, %vm802_vm1 }
  0xfa   : >> { %v2363_v40 = vpop.eup %2362  ;;  %v1000_v51 = vadd.f32 %v999_v17, %v997_v52  ;;  %2366 = vrcp.f32 %v915_v3  ;;  %vm3322_vm12 = vmxor %vm995_vm8, %vm1103_vm9  ;;  %v3346_v48 = vadd.f32 %v3199_v31, %v2840_v36 }
  0xfb   : >> { %v724_v56 = vmul.f32 %v2363_v40, %v3120_v24  ;;  %v2365_v29 = vpop.eup %2364  ;;  %v614_v40 = vadd.f32 %v613_v27, %v3186_v21  ;;  %vm6576_vm13 = vcmp.ge.f32.partialorder %v3311_v13, 0.0  ;;  %vm1106_vm5 = vcmp.ge.f32.partialorder %v1105_v4, 0.0 }
  0xfc   : >> { %v809_v52 = vmul.f32 %v2365_v29, %v3139_v28  ;;  %2368 = vrcp.f32 %v1000_v51  ;;  %v1190_v51 = vsub.f32 %v3303_v60, %v3311_v13  ;;  %vm3338_vm14 = vmxor %vm1103_vm9, %vm6576_vm13  ;;  %6769 = vst [vmem:[#allocation34_spill] sm:$0xff] %v3346_v48  ;;  %v3587_v28 = vsel %vm6576_vm13, %v3298_v9, %v2906_v59 }
  0xfd   : >> { %v725_v17 = vmin.f32 %v724_v56, 1.0  ;;  %v6766_v56 = vsub.f32 %v3116_v23, %v3110_v19  ;;  %2370 = vrcp.f32 %v614_v40 }
  0xfe   : >> { %v810_v29 = vmin.f32 %v809_v52, 1.0 }
  0xff   : >> { %v727_v21 = vmul.f32 %v6766_v56, %v725_v17  ;;  %v730_v27 = vmul.f32 %v729_v61, %v725_v17  ;;  %v3350_v56 = vadd.f32 %v3202_v7, %v3023_v35  ;;  %v6771_v61 = vmin.f32 %v3219_v47, 1.0 }
 0x100   : >> { %v6772_v17 = vsub.f32 %v2986_v62, %v2958_v22  ;;  %v6774_v7 = vsub.f32 %v3132_v15, %v3116_v23  ;;  %v815_v8 = vmul.f32 %v814_v18, %v810_v29 }
 0x101   : >> { %6770 = vst [vmem:[#allocation35_spill] sm:$0xff] %v3350_v56  ;;  %v3364_v26 = vadd.f32 %v727_v21, %v3110_v19  ;;  %v3367_v31 = vadd.f32 %v730_v27, %v3114_v20  ;;  %v818_v21 = vsel %vm802_vm1, %v3156_v44, %v2906_v59  ;;  %v6775_v27 = vmov -1e-09  }
 0x102   : >> { %v1283_v52 = vmul.f32 %v6772_v17, %v6771_v61  ;;  %v812_v58 = vmul.f32 %v6774_v7, %v810_v29  ;;  %v3377_v61 = vsel %vm717_vm0, %v3123_v25, %v2906_v59  ;;  %v1470_v17 = vsel %vm1469_vm4, 1e-09, %v6775_v27 }
 0x103   : >> { %6773 = vst [vmem:[#allocation36_spill] sm:$0xff] %v3364_v26  ;;  %v735_v18 = vsel %vm6561_vm3, %v3364_v26, %v3116_v23  ;;  %v816_v40 = vadd.f32 %v815_v8, %v3123_v25  ;;  %vm1191_vm4 = vcmp.ge.f32.partialorder %v1190_v51, 0.0  ;;  %v6780_v8 = vmin.f32 %v3219_v47, 1.0 }
 0x104   : >> { %v813_v29 = vadd.f32 %v812_v58, %v3116_v23  ;;  %v3394_v7 = vsel %vm717_vm0, %v3116_v23, %v735_v18  ;;  %v3406_v26 = vadd.f32 %v1283_v52, %v2958_v22  ;;  %v737_v58 = vsel %vm6561_vm3, %v3367_v31, %v2906_v59  ;;  %v2367_v23 = vpop.eup %2366 }
 0x105   : >> { %6776 = vst [vmem:[#allocation37_spill] sm:$0xff] %v3394_v7  ;;  %v6781_v22 = vsub.f32 %v2989_v63, %v2963_v6  ;;  %v1107_v37 = vsel %vm1106_vm5, 1e-09, %v6775_v27  ;;  %v3432_v35 = vadd.f32 %v1470_v17, %v3209_v32  ;;  %v3447_v32 = vsel %vm717_vm0, %v3123_v25, %v737_v58  ;;  %vm3471_vm5 = vmxor %vm1080_vm10, %vm6562_vm15 }
 0x106   : >> { %v3415_v18 = vsel %vm3400_vm11, %v813_v29, %v3132_v15  ;;  %v820_v7 = vsel %vm717_vm0, %v813_v29, %v3132_v15  ;;  %v3436_v29 = vsub.f32 %v3191_v33, %v2859_v49  ;;  %v2369_v47 = vpop.eup %2368  ;;  %6785 = vst [vmem:[#allocation42_spill] sm:$0xff] %v3447_v32  ;;  %v3451_v17 = vsel %vm3400_vm11, %v816_v40, %v818_v21  ;;  %vm911_vm11 = vmxor %vm802_vm1, %vm910_vm2 }
 0x107   : >> { %6779 = vst [vmem:[#allocation38_spill] sm:$0xff] %v3415_v18  ;;  %v1286_v52 = vmul.f32 %v6781_v22, %v6780_v8  ;;  %v3428_v54 = vsel %vm802_vm1, %v3132_v15, %v820_v7  ;;  %6783 = vst [vmem:[#allocation40_spill] sm:$0xff] %v3432_v35  ;;  %v922_v8 = vsub.f32 %v3224_v10, %v3156_v44  ;;  %v1192_v7 = vsel %vm1191_vm4, 1e-09, %v6775_v27 }
 0x108   : >> { %6782 = vst [vmem:[#allocation39_spill] sm:$0xff] %v3428_v54  ;;  %6784 = vst [vmem:[#allocation41_spill] sm:$0xff] %v3436_v29  ;;  %v917_v22 = vmul.f32 %v2367_v23, %v3163_v46  ;;  %v1002_v12 = vmul.f32 %v2369_v47, %v3244_v39  ;;  %v822_v18 = vsel %vm717_vm0, %v816_v40, %v2906_v59 }
 0x109   : >> { %6786 = vst [vmem:[#allocation43_spill] sm:$0xff] %v3451_v17  ;;  %v1108_v36 = vadd.f32 %v1107_v37, %v1105_v4  ;;  %v1287_v43 = vadd.f32 %v1286_v52, %v2963_v6  ;;  %v3463_v25 = vsel %vm1080_vm10, %v3406_v26, %v2998_v2  ;;  %v1007_v23 = vsub.f32 %v3240_v34, %v3224_v10  ;;  %vm3569_vm4 = vmxor %vm6561_vm3, %vm717_vm0 }
 0x10a   : >> { %v918_v19 = vmin.f32 %v917_v22, 1.0  ;;  %v1003_v21 = vmin.f32 %v1002_v12, 1.0  ;;  %v1193_v58 = vadd.f32 %v1192_v7, %v1190_v51  ;;  %v3477_v6 = vadd.f32 %v3447_v32, %v2906_v59  ;;  %v3504_v32 = vpop.eup %2370 }
 0x10b   : >> { %v3481_v4 = vadd.f32 %v3451_v17, %v2906_v59  ;;  %v926_v12 = vsel %vm910_vm2, %v3224_v10, %v2906_v59  ;;  %v3490_v51 = vsel %vm3471_vm5, %v1287_v43, %v2989_v63  ;;  %v3495_v40 = vsel %vm802_vm1, %v3156_v44, %v822_v18  ;;  %6793 = vst [vmem:[#allocation47_spill] sm:$0xff] %v3504_v32 }
 0x10c   : >> { %6789 = vst [vmem:[#allocation44_spill] sm:$0xff] %v3477_v6  ;;  %6791 = vst [vmem:[#allocation46_spill] sm:$0xff] %v3495_v40  ;;  %v6792_v52 = vsub.f32 %v3221_v55, %v3132_v15  ;;  %v923_v7 = vmul.f32 %v922_v8, %v918_v19  ;;  %v1011_v22 = vsel %vm995_vm8, %v3240_v34, %v2906_v59  ;;  %2372 = vrcp.f32 %v1108_v36 }
 0x10d   : >> { %6790 = vst [vmem:[#allocation45_spill] sm:$0xff] %v3481_v4  ;;  %v6794_v56 = vsub.f32 %v3235_v0, %v3221_v55  ;;  %v1008_v48 = vmul.f32 %v1007_v23, %v1003_v21  ;;  %v3513_v18 = vsel %vm1103_vm9, %v3280_v50, %v2906_v59  ;;  %2374 = vrcp.f32 %v1193_v58 }
 0x10e   : >> { %v920_v47 = vmul.f32 %v6792_v52, %v918_v19  ;;  %v924_v19 = vadd.f32 %v923_v7, %v3156_v44  ;;  %v1293_v52 = vsel %vm1080_vm10, %v1287_v43, %v2989_v63  ;;  %v3526_v36 = vadd.f32 %v3495_v40, %v2906_v59  ;;  %vm996_vm10 = vmxor %vm910_vm2, %vm995_vm8 }
 0x10f   : >> { %v1005_v41 = vmul.f32 %v6794_v56, %v1003_v21  ;;  %v3522_v56 = vsub.f32 %v3477_v6, %v3481_v4  ;;  %v3536_v1 = vsel %vm6562_vm15, %v2989_v63, %v1293_v52  ;;  %v1009_v23 = vadd.f32 %v1008_v48, %v3224_v10 }
 0x110   : >> { %v921_v8 = vadd.f32 %v920_v47, %v3132_v15  ;;  %6796 = vst [vmem:[#allocation49_spill] sm:$0xff] %v3526_v36  ;;  %v3541_v44 = vsel %vm911_vm11, %v924_v19, %v926_v12  ;;  %v930_v58 = vsel %vm802_vm1, %v924_v19, %v2906_v59  ;;  %v6800_v48 = vmov 0 }
 0x111   : >> { %6795 = vst [vmem:[#allocation48_spill] sm:$0xff] %v3522_v56  ;;  %v1006_v15 = vadd.f32 %v1005_v41, %v3221_v55  ;;  %6798 = vst [vmem:[#allocation51_spill] sm:$0xff] %v3541_v44  ;;  %v3557_v47 = vadd.f32 %v3541_v44, %v2906_v59  ;;  %v6801_v48 = vsel %vm3569_vm4, 4294967295, %v6800_v48  ;;  %v3576_v46 = vsel %vm910_vm2, %v3224_v10, %v930_v58 }
 0x112   : >> { %v3539_v43 = vsel %vm911_vm11, %v921_v8, %v3221_v55  ;;  %v928_v21 = vsel %vm802_vm1, %v921_v8, %v3221_v55  ;;  %6802 = vst [vmem:[#allocation53_spill] sm:$0xff] %v6801_v48  ;;  %v3593_v8 = vsel %vm3569_vm4, %v3367_v31, %v3377_v61  ;;  %v3599_v19 = vadd.f32 %v3576_v46, %v2906_v59 }
 0x113   : >> { %6797 = vst [vmem:[#allocation50_spill] sm:$0xff] %v3539_v43  ;;  %v3550_v41 = vsel %vm910_vm2, %v3221_v55, %v928_v21  ;;  %6799 = vst [vmem:[#allocation52_spill] sm:$0xff] %v3557_v47  ;;  %v3581_v7 = vsel %vm996_vm10, %v1006_v15, %v3235_v0  ;;  %v935_v10 = vsub.f32 %v3526_v36, %v3557_v47  ;;  %vm828_vm0 = vcmp.ge.f32.partialorder %v3522_v56, 0.0 }
 0x114   : >> { %6803 = vst [vmem:[#allocation54_spill] sm:$0xff] %v3593_v8  ;;  %v3605_v52 = vsel %vm3471_vm5, %v3406_v26, %v3361_v42  ;;  %v3607_v21 = vsel %vm996_vm10, %v1009_v23, %v1011_v22  ;;  %v1013_v31 = vsel %vm910_vm2, %v1006_v15, %v3235_v0  ;;  %v1015_v61 = vsel %vm910_vm2, %v1009_v23, %v2906_v59 }
 0x115   : >> { %6804 = vst [vmem:[#allocation55_spill] sm:$0xff] %v3605_v52  ;;  %vm936_vm1 = vcmp.ge.f32.partialorder %v935_v10, 0.0  ;;  %v966_v42 = vsub.f32 %v3557_v47, %v3599_v19  ;;  %v3623_v26 = vsel %vm995_vm8, %v3235_v0, %v1013_v31  ;;  %vm964_vm5 = vcmp.ge.f32.partialorder %v3599_v19, 0.0 }
 0x116   : >> { %v937_v37 = vsel %vm936_vm1, 1e-09, %v6775_v27  ;;  %v3630_v39 = vsel %vm995_vm8, %v3240_v34, %v1015_v61  ;;  %v3634_v22 = vadd.f32 %v3607_v21, %v2906_v59  ;;  %v2373_v15 = vpop.eup %2372  ;;  %v3638_v23 = vsub.f32 %v3481_v4, %v3526_v36 }
 0x117   : >> { %v938_v31 = vadd.f32 %v937_v37, %v935_v10  ;;  %vm967_vm2 = vcmp.ge.f32.partialorder %v966_v42, 0.0  ;;  %v3642_v12 = vadd.f32 %v3630_v39, %v2906_v59  ;;  %v2375_v58 = vpop.eup %2374  ;;  %v3653_v4 = vsel %vm6562_vm15, %v2986_v62, %v3463_v25 }
 0x118   : >> { %v968_v55 = vsel %vm967_vm2, 1e-09, %v6775_v27  ;;  %v1020_v61 = vsub.f32 %v3599_v19, %v3634_v22  ;;  %6805 = vst [vmem:[#allocation56_spill] sm:$0xff] %v3653_v4  ;;  %v3658_v10 = vsel %vm828_vm0, 1e-09, %v6775_v27  ;;  %v3666_v54 = vsel %vm964_vm5, %v3576_v46, %v3014_v5 }
 0x119   : >> { %6806 = vst [vmem:[#allocation57_spill] sm:$0xff] %v3658_v10  ;;  %v969_v37 = vadd.f32 %v968_v55, %v966_v42  ;;  %2376 = vrcp.f32 %v938_v31  ;;  %vm1018_vm11 = vcmp.ge.f32.partialorder %v3634_v22, 0.0  ;;  %v1051_v25 = vsub.f32 %v3634_v22, %v3642_v12 }
 0x11a   : >> { %vm1021_vm10 = vcmp.ge.f32.partialorder %v1020_v61, 0.0  ;;  %v1110_v55 = vmul.f32 %v2373_v15, %v3252_v11  ;;  %v1195_v42 = vmul.f32 %v2375_v58, %v3303_v60  ;;  %v3676_v63 = vsub.f32 %v2906_v59, %v3490_v51 }
 0x11b   : >> { %2378 = vrcp.f32 %v969_v37  ;;  %v1022_v48 = vsel %vm1021_vm10, 1e-09, %v6775_v27  ;;  %vm1052_vm0 = vcmp.ge.f32.partialorder %v1051_v25, 0.0  ;;  %v6808_v58 = vsub.f32 %v3277_v57, %v3235_v0 }
 0x11c   : >> { %v1023_v24 = vadd.f32 %v1022_v48, %v1020_v61  ;;  %6807 = vst [vmem:[#allocation58_spill] sm:$0xff] %v3676_v63  ;;  %v1053_v32 = vsel %vm1052_vm0, 1e-09, %v6775_v27  ;;  %v1111_v30 = vmin.f32 %v1110_v55, 1.0  ;;  %v1196_v49 = vmin.f32 %v1195_v42, 1.0 }
 0x11d   : >> { %v1054_v15 = vadd.f32 %v1053_v32, %v1051_v25  ;;  %vm6566_vm1 = vcmp.ge.f32.partialorder %v3676_v63, 0.0  ;;  %v3686_v48 = vsub.f32 %v3311_v13, %v3676_v63  ;;  %v6809_v31 = vsub.f32 %v3280_v50, %v3240_v34 }
 0x11e   : >> { %2380 = vrcp.f32 %v1023_v24  ;;  %v1113_v61 = vmul.f32 %v6808_v58, %v1111_v30  ;;  %v6810_v42 = vsub.f32 %v3293_v53, %v3277_v57  ;;  %v6811_v24 = vsub.f32 %v3298_v9, %v3280_v50  ;;  %vm3704_vm2 = vmxor %vm6576_vm13, %vm6566_vm1 }
 0x11f   : >> { %v1116_v55 = vmul.f32 %v6809_v31, %v1111_v30  ;;  %v6812_v25 = vmov 0  ;;  %v1030_v58 = vsub.f32 %v3607_v21, %v3576_v46  ;;  %v3714_v30 = vsel %vm1018_vm11, %v3607_v21, %v3014_v5 }
 0x120   : >> { %v1198_v37 = vmul.f32 %v6810_v42, %v1196_v49  ;;  %v1201_v32 = vmul.f32 %v6811_v24, %v1196_v49  ;;  %v6813_v25 = vsel %vm3704_vm2, 4294967295, %v6812_v25  ;;  %2382 = vrcp.f32 %v1054_v15 }
 0x121   : >> { %6814 = vst [vmem:[#allocation59_spill] sm:$0xff] %v6813_v25  ;;  %v3718_v49 = vsub.f32 %v2906_v59, %v3536_v1  ;;  %v1114_v31 = vadd.f32 %v1113_v61, %v3235_v0  ;;  %v1117_v42 = vadd.f32 %v1116_v55, %v3240_v34  ;;  %vm6601_vm10 = vcmp.ge.f32.partialorder %v3557_v47, 0.0 }
 0x122   : >> { %v1199_v24 = vadd.f32 %v1198_v37, %v3277_v57  ;;  %v3724_v25 = vadd.f32 %v1201_v32, %v3280_v50  ;;  %vm6581_vm0 = vcmp.ge.f32.partialorder %v3642_v12, 0.0  ;;  %v6816_v32 = vmov 0 }
 0x123   : >> { %6815 = vst [vmem:[#allocation60_spill] sm:$0xff] %v3718_v49  ;;  %vm6565_vm3 = vcmp.ge.f32.partialorder %v3718_v49, 0.0  ;;  %v3731_v15 = vsub.f32 %v3676_v63, %v3718_v49  ;;  %v3738_v34 = vsel %vm3322_vm12, %v1114_v31, %v3277_v57  ;;  %v3743_v37 = vsel %vm3322_vm12, %v1117_v42, %v3513_v18  ;;  %v3759_v0 = vpop.eup %2376 }
 0x124   : >> { %v1121_v61 = vsel %vm995_vm8, %v1114_v31, %v3277_v57  ;;  %v1123_v55 = vsel %vm995_vm8, %v1117_v42, %v2906_v59  ;;  %vm3755_vm15 = vmxor %vm6566_vm1, %vm6565_vm3  ;;  %v3773_v18 = vadd.f32 %v3743_v37, %v2906_v59  ;;  %vm1299_vm8 = vcmp.ge.f32.partialorder %v3686_v48, 0.0 }
 0x125   : >> { %v6817_v32 = vsel %vm3755_vm15, 4294967295, %v6816_v32  ;;  %v3764_v3 = vsel %vm1103_vm9, %v3277_v57, %v1121_v61  ;;  %v3769_v11 = vsel %vm1103_vm9, %v3280_v50, %v1123_v55  ;;  %v2379_v31 = vpop.eup %2378  ;;  %v1061_v55 = vsub.f32 %v3630_v39, %v3607_v21 }
 0x126   : >> { %6818 = vst [vmem:[#allocation61_spill] sm:$0xff] %v6817_v32  ;;  %v3782_v57 = vadd.f32 %v3769_v11, %v2906_v59  ;;  %v971_v61 = vmul.f32 %v2379_v31, %v3557_v47  ;;  %vm1126_vm12 = vcmp.ge.f32.partialorder %v3773_v18, 0.0  ;;  %v1128_v42 = vsub.f32 %v3642_v12, %v3773_v18 }
 0x127   : >> { %v3796_v32 = vsel %vm6581_vm0, %v3630_v39, %v3014_v5  ;;  %vm3802_vm3 = vmxor %vm6581_vm0, %vm1126_vm12  ;;  %v3815_v63 = vsel %vm1126_vm12, %v3743_v37, %v3014_v5  ;;  %v3828_v4 = vsel %vm1299_vm8, 1e-09, %v6775_v27  ;;  %v3835_v17 = vsel %vm3338_vm14, %v1199_v24, %v3293_v53 }
 0x128   : >> { %vm1157_vm1 = vcmp.ge.f32.partialorder %v3782_v57, 0.0  ;;  %v1159_v50 = vsub.f32 %v3773_v18, %v3782_v57  ;;  %v2381_v52 = vpop.eup %2380  ;;  %v972_v49 = vmin.f32 %v971_v61, 1.0  ;;  %vm1129_vm6 = vcmp.ge.f32.partialorder %v1128_v42, 0.0 }
 0x129   : >> { %vm3821_vm13 = vmxor %vm1126_vm12, %vm1157_vm1  ;;  %v1025_v61 = vmul.f32 %v2381_v52, %v3599_v19  ;;  %v1130_v40 = vsel %vm1129_vm6, 1e-09, %v6775_v27  ;;  %v6823_v20 = vsub.f32 %v3550_v41, %v3539_v43  ;;  %v6824_v2 = vsub.f32 %v3576_v46, %v3541_v44 }
 0x12a   : >> { %vm1160_vm0 = vcmp.ge.f32.partialorder %v1159_v50, 0.0  ;;  %v2383_v6 = vpop.eup %2382  ;;  %v1131_v10 = vadd.f32 %v1130_v40, %v1128_v42  ;;  %v3849_v62 = vsel %vm3338_vm14, %v3724_v25, %v3587_v28  ;;  %vm965_vm6 = vmxor %vm6601_vm10, %vm964_vm5  ;;  %vm6836_vm8 = vcmp.ge.f32.partialorder %v3311_v13, 0.0 }
 0x12b   : >> { %v974_v16 = vmul.f32 %v6823_v20, %v972_v49  ;;  %v977_v35 = vmul.f32 %v6824_v2, %v972_v49  ;;  %v1161_v52 = vsel %vm1160_vm0, 1e-09, %v6775_v27  ;;  %v1026_v56 = vmin.f32 %v1025_v61, 1.0  ;;  %vm1019_vm14 = vmxor %vm964_vm5, %vm1018_vm11 }
 0x12c   : >> { %v1056_v29 = vmul.f32 %v2383_v6, %v3634_v22  ;;  %v1162_v45 = vadd.f32 %v1161_v52, %v1159_v50  ;;  %2384 = vrcp.f32 %v1131_v10  ;;  %v1206_v2 = vsel %vm1103_vm9, %v1199_v24, %v3293_v53 }
 0x12d   : >> { %v975_v8 = vadd.f32 %v974_v16, %v3539_v43  ;;  %v978_v20 = vadd.f32 %v977_v35, %v3541_v44  ;;  %v6825_v6 = vsub.f32 %v3581_v7, %v3550_v41  ;;  %v1031_v40 = vmul.f32 %v1030_v58, %v1026_v56 }
 0x12e   : >> { %v1057_v28 = vmin.f32 %v1056_v29, 1.0  ;;  %2386 = vrcp.f32 %v1162_v45  ;;  %v6830_v24 = vsub.f32 %v3623_v26, %v3581_v7 }
 0x12f   : >> { %v1028_v14 = vmul.f32 %v6825_v6, %v1026_v56  ;;  %v3864_v16 = vsel %vm965_vm6, %v975_v8, %v3550_v41  ;;  %v3867_v35 = vsel %vm965_vm6, %v978_v20, %v3666_v54  ;;  %v982_v10 = vsel %vm6601_vm10, %v975_v8, %v3550_v41 }
 0x130   : >> { %6826 = vst [vmem:[#allocation62_spill] sm:$0xff] %v3864_v16  ;;  %6827 = vst [vmem:[#allocation63_spill] sm:$0xff] %v3867_v35  ;;  %v984_v49 = vsel %vm6601_vm10, %v978_v20, %v3014_v5  ;;  %v983_v56 = vsel %vm964_vm5, %v3550_v41, %v982_v10  ;;  %v1032_v54 = vadd.f32 %v1031_v40, %v3576_v46 }
 0x131   : >> { %v985_v45 = vsel %vm964_vm5, %v3576_v46, %v984_v49  ;;  %v1029_v29 = vadd.f32 %v1028_v14, %v3550_v41  ;;  %v3887_v8 = vmul.f32 %v983_v56, %v3867_v35  ;;  %v1059_v42 = vmul.f32 %v6830_v24, %v1057_v28  ;;  %v6903_v35 = vld [vmem:[#allocation20_spill] sm:$0xff] }
 0x132   : >> { %v3884_v58 = vmul.f32 %v985_v45, %v3864_v16  ;;  %v1062_v50 = vmul.f32 %v1061_v55, %v1057_v28  ;;  %v1035_v46 = vsel %vm1019_vm14, %v1032_v54, %v3714_v30  ;;  %v1038_v52 = vsel %vm964_vm5, %v1032_v54, %v3014_v5  ;;  %v6902_v16 = vld [vmem:[#allocation19_spill] sm:$0xff] }
 0x133   : >> { %6829 = vst [vmem:[#allocation65_spill] sm:$0xff] %v3887_v8  ;;  %v1033_v41 = vsel %vm1019_vm14, %v1029_v29, %v3581_v7  ;;  %v1036_v61 = vsel %vm964_vm5, %v1029_v29, %v3581_v7  ;;  %v1039_v55 = vsel %vm1018_vm11, %v3607_v21, %v1038_v52  ;;  %v3912_v30 = vmul.f32 %v1035_v46, %v983_v56 }
 0x134   : >> { %6828 = vst [vmem:[#allocation64_spill] sm:$0xff] %v3884_v58  ;;  %v1037_v6 = vsel %vm1018_vm11, %v3581_v7, %v1036_v61  ;;  %v3914_v14 = vmul.f32 %v1033_v41, %v985_v45  ;;  %v3916_v40 = vmul.f32 %v1039_v55, %v1033_v41  ;;  %v1060_v19 = vadd.f32 %v1059_v42, %v3581_v7 }
 0x135   : >> { %6831 = vst [vmem:[#allocation66_spill] sm:$0xff] %v3912_v30  ;;  %v3918_v28 = vmul.f32 %v1037_v6, %v1035_v46  ;;  %vm6835_vm5 = vcmp.ge.f32.partialorder %v3642_v12, 0.0  ;;  %v1063_v10 = vadd.f32 %v1062_v50, %v3607_v21  ;;  %v3929_v49 = vsel %vm6836_vm8, %v3293_v53, %v1206_v2  ;;  %v6892_v30 = vld [vmem:[#allocation10_spill] sm:$0xff] }
 0x136   : >> { %6832 = vst [vmem:[#allocation67_spill] sm:$0xff] %v3914_v14  ;;  %6833 = vst [vmem:[#allocation68_spill] sm:$0xff] %v3916_v40  ;;  %v1208_v56 = vsel %vm1103_vm9, %v3724_v25, %v2906_v59  ;;  %v3937_v7 = vadd.f32 %v3849_v62, %v2906_v59  ;;  %v1067_v2 = vsel %vm1018_vm11, %v1060_v19, %v3623_v26  ;;  %v2385_v54 = vpop.eup %2384 }
 0x137   : >> { %6834 = vst [vmem:[#allocation69_spill] sm:$0xff] %v3918_v28  ;;  %vm1050_vm0 = vmxor %vm1018_vm11, %vm6835_vm5  ;;  %v1069_v24 = vsel %vm1018_vm11, %v1063_v10, %v3014_v5  ;;  %v6849_v20 = vsub.f32 %v3769_v11, %v3743_v37 }
 0x138   : >> { %v1064_v29 = vsel %vm1050_vm0, %v1060_v19, %v3623_v26  ;;  %v1066_v60 = vsel %vm1050_vm0, %v1063_v10, %v3796_v32  ;;  %vm6837_vm9 = vmmov %vm6835_vm5  ;;  %v2387_v50 = vpop.eup %2386  ;;  %v1133_v32 = vmul.f32 %v2385_v54, %v3642_v12  ;;  %vm1211_vm14 = vcmp.ge.f32.partialorder %v3937_v7, 0.0 }
 0x139   : >> { %v1068_v25 = vsel %vm6837_vm9, %v3623_v26, %v1067_v2  ;;  %v3954_v42 = vmul.f32 %v1064_v29, %v1039_v55  ;;  %vm6839_vm6 = vmmov %vm6835_vm5  ;;  %v3959_v46 = vmul.f32 %v1066_v60, %v1037_v6  ;;  %v1164_v19 = vmul.f32 %v2387_v50, %v3773_v18 }
 0x13a   : >> { %v1070_v41 = vsel %vm6839_vm6, %v3630_v39, %v1069_v24  ;;  %v3961_v61 = vmul.f32 %v1068_v25, %v1066_v60  ;;  %vm6843_vm11 = vmmov %vm6836_vm8  ;;  %v1134_v6 = vmin.f32 %v1133_v32, 1.0  ;;  %v1173_v60 = vsel %vm1157_vm1, %v3769_v11, %v3014_v5 }
 0x13b   : >> { %6838 = vst [vmem:[#allocation70_spill] sm:$0xff] %v3954_v42  ;;  %6840 = vst [vmem:[#allocation71_spill] sm:$0xff] %v3959_v46  ;;  %v3964_v52 = vmul.f32 %v1070_v41, %v1064_v29  ;;  %v3970_v22 = vsel %vm6843_vm11, %v3298_v9, %v1208_v56  ;;  %v1213_v29 = vsub.f32 %v3782_v57, %v3937_v7  ;;  %v1165_v54 = vmin.f32 %v1164_v19, 1.0 }
 0x13c   : >> { %6841 = vst [vmem:[#allocation72_spill] sm:$0xff] %v3961_v61  ;;  %vm3979_vm5 = vmxor %vm1157_vm1, %vm1211_vm14  ;;  %v6846_v50 = vsub.f32 %v3738_v34, %v3623_v26  ;;  %v6847_v55 = vsub.f32 %v3743_v37, %v3630_v39  ;;  %v4003_v19 = vadd.f32 %v3970_v22, %v2906_v59  ;;  %v6848_v2 = vsub.f32 %v3764_v3, %v3738_v34 }
 0x13d   : >> { %6842 = vst [vmem:[#allocation73_spill] sm:$0xff] %v3964_v52  ;;  %vm1214_vm0 = vcmp.ge.f32.partialorder %v1213_v29, 0.0  ;;  %v1170_v24 = vmul.f32 %v6849_v20, %v1165_v54  ;;  %vm859_vm8 = vcmp.ge.f32.partialorder %v3638_v23, 0.0  ;;  %vm1466_vm11 = vcmp.ge.f32.partialorder %v3191_v33, 0.0 }
 0x13e   : >> { %v1136_v32 = vmul.f32 %v6846_v50, %v1134_v6  ;;  %v1139_v21 = vmul.f32 %v6847_v55, %v1134_v6  ;;  %v1167_v45 = vmul.f32 %v6848_v2, %v1165_v54  ;;  %v1215_v56 = vsel %vm1214_vm0, 1e-09, %v6775_v27  ;;  %v6915_v50 = vld [vmem:[#allocation32_spill] sm:$0xff] }
 0x13f   : >> { %v1216_v61 = vadd.f32 %v1215_v56, %v1213_v29  ;;  %vm1242_vm9 = vcmp.ge.f32.partialorder %v4003_v19, 0.0  ;;  %v1171_v52 = vadd.f32 %v1170_v24, %v3743_v37  ;;  %vm6852_vm0 = vcmp.ge.f32.partialorder %v3642_v12, 0.0 }
 0x140   : >> { %v1137_v55 = vadd.f32 %v1136_v32, %v3623_v26  ;;  %v1140_v6 = vadd.f32 %v1139_v21, %v3630_v39  ;;  %v1168_v2 = vadd.f32 %v1167_v45, %v3738_v34  ;;  %vm4024_vm6 = vmxor %vm1211_vm14, %vm1242_vm9  ;;  %v1244_v26 = vsub.f32 %v3937_v7, %v4003_v19 }
 0x141   : >> { %vm6853_vm10 = vmmov %vm6852_vm0  ;;  %2388 = vrcp.f32 %v1216_v61 }
 0x142   : >> { %v1141_v45 = vsel %vm3802_vm3, %v1137_v55, %v3738_v34  ;;  %v1143_v21 = vsel %vm3802_vm3, %v1140_v6, %v3815_v63  ;;  %v1144_v29 = vsel %vm6852_vm0, %v1137_v55, %v3738_v34  ;;  %v1146_v56 = vsel %vm6853_vm10, %v1140_v6, %v3014_v5 }
 0x143   : >> { %v1145_v54 = vsel %vm1126_vm12, %v3738_v34, %v1144_v29  ;;  %v1147_v24 = vsel %vm1126_vm12, %v3743_v37, %v1146_v56  ;;  %v4051_v32 = vmul.f32 %v1143_v21, %v1068_v25  ;;  %v4053_v31 = vmul.f32 %v1141_v45, %v1070_v41  ;;  %v6870_v34 = vld [vmem:[#allocation40_spill] sm:$0xff] }
 0x144   : >> { %v4055_v63 = vmul.f32 %v1147_v24, %v1141_v45  ;;  %v4057_v39 = vmul.f32 %v1145_v54, %v1143_v21  ;;  %v1172_v12 = vsel %vm3821_vm13, %v1168_v2, %v3764_v3  ;;  %v1174_v55 = vsel %vm3821_vm13, %v1171_v52, %v1173_v60 }
 0x145   : >> { %6854 = vst [vmem:[#allocation74_spill] sm:$0xff] %v4051_v32  ;;  %6855 = vst [vmem:[#allocation75_spill] sm:$0xff] %v4053_v31  ;;  %v1175_v37 = vsel %vm1126_vm12, %v1168_v2, %v3764_v3  ;;  %v1177_v25 = vsel %vm1126_vm12, %v1171_v52, %v3014_v5  ;;  %v4072_v41 = vmul.f32 %v1174_v55, %v1145_v54  ;;  %vm1245_vm13 = vcmp.ge.f32.partialorder %v1244_v26, 0.0  ;;  %v6869_v54 = vld [vmem:[#allocation57_spill] sm:$0xff]  ;;  %v6887_v31 = vld [vmem:[#allocation58_spill] sm:$0xff] }
 0x146   : >> { %6856 = vst [vmem:[#allocation76_spill] sm:$0xff] %v4055_v63  ;;  %6857 = vst [vmem:[#allocation77_spill] sm:$0xff] %v4057_v39  ;;  %v4079_v38 = vsel %vm1157_vm1, %v3764_v3, %v1175_v37  ;;  %v4084_v60 = vsel %vm1157_vm1, %v3769_v11, %v1177_v25  ;;  %v4086_v2 = vmul.f32 %v1172_v12, %v1147_v24  ;;  %v1246_v29 = vsel %vm1245_vm13, 1e-09, %v6775_v27  ;;  %v6865_v37 = vld [vmem:[#allocation15_spill] sm:$0xff]  ;;  %v6866_v25 = vld [vmem:[#allocation18_spill] sm:$0xff] }
 0x147   : >> { %6858 = vst [vmem:[#allocation78_spill] sm:$0xff] %v4072_v41  ;;  %v4089_v18 = vmul.f32 %v4084_v60, %v1172_v12  ;;  %v4092_v52 = vmul.f32 %v4079_v38, %v1174_v55  ;;  %v4096_v45 = vmul.f32 %v3759_v0, %v3526_v36  ;;  %v1301_v56 = vadd.f32 %v3828_v4, %v3686_v48  ;;  %v6863_v0 = vld [vmem:[#allocation54_spill] sm:$0xff]  ;;  %v2464_v63 = vld [vmem:[%s2694_s9] sm:$0xff]  ;;  %s2471_s9 = sshll.u32 (%p229_p12), %s2601_s6, 4  ;;  %s2472_s9 = int_to_ptr.vmem [resolvable:$false] %s2471_s9 }
 0x148   : >> { %6859 = vst [vmem:[#allocation79_spill] sm:$0xff] %v4086_v2  ;;  %v1247_v24 = vadd.f32 %v1246_v29, %v1244_v26  ;;  %vm1384_vm3 = vcmp.ge.f32.partialorder %v3731_v15, 0.0  ;;  %v4110_v12 = vadd.f32 %v6863_v0, %v2906_v59  ;;  %v860_v4 = vsel %vm859_vm8, 1e-09, %v6775_v27  ;;  %v6867_v26 = vld [vmem:[#allocation41_spill] sm:$0xff]  ;;  %v6868_v29 = vld [vmem:[#allocation48_spill] sm:$0xff]  ;;  %p2474_p2 = scmp.lt.s32.totalorder (%p229_p12), %s6423_s5, %s2472_s9 }
 0x149   : >> { %6860 = vst [vmem:[#allocation80_spill] sm:$0xff] %v4089_v18  ;;  %6861 = vst [vmem:[#allocation81_spill] sm:$0xff] %v4092_v52  ;;  %2390 = vrcp.f32 %v1301_v56  ;;  %v1385_v55 = vsel %vm1384_vm3, 1e-09, %v6775_v27  ;;  %vm1660_vm10 = vcmp.ge.f32.partialorder %v6867_v26, 0.0  ;;  %v830_v6 = vadd.f32 %v6869_v54, %v6868_v29  ;;  %v6871_v56 = vld [vmem:[#allocation17_spill] sm:$0xff] }
 0x14a   : >> { %6862 = vst [vmem:[#allocation82_spill] sm:$0xff] %v4096_v45  ;;  %6864 = vst [vmem:[#allocation83_spill] sm:$0xff] %v4110_v12  ;;  %2392 = vrcp.f32 %v1247_v24  ;;  %v1386_v48 = vadd.f32 %v1385_v55, %v3731_v15  ;;  %v4127_v61 = vsel %vm1466_vm11, %v6866_v25, %v6871_v56  ;;  %v2596_v15 = vmov 8   ;;  %v6874_v55 = vld [vmem:[#allocation44_spill] sm:$0xff]  ;;  %v6877_v29 = vld [vmem:[#allocation46_spill] sm:$0xff]  ;;  %s2473_s18 = scalar_lea.vmem (%p229_p12), %s2472_s9, 64 }
 0x14b   : >> { %2394 = vrcp.f32 %v6870_v34  ;;  %2337 = vset.pattern.permute.xlu1 %v2596_v15  ;;  %v4134_v18 = vsub.f32 %v4110_v12, %v6874_v55  ;;  %v861_v34 = vadd.f32 %v860_v4, %v3638_v23  ;;  %v1661_v41 = vsel %vm1660_vm10, 1e-09, %v6775_v27  ;;  %v6878_v15 = vld [vmem:[#allocation12_spill] sm:$0xff]  ;;  %v6880_v52 = vld [vmem:[#allocation11_spill] sm:$0xff]  ;;  %v6882_v23 = vld [vmem:[#allocation34_spill] sm:$0xff]  ;;  %v2389_v46 = vpop.eup %2388  ;;  %p2475_p3 = scmp.lt.s32.totalorder (%p229_p12), %s2473_s18, %s2467_s8 }
 0x14c   : >> { %2396 = vrcp.f32 %v1386_v48  ;;  %v2597_v39 = vmov 9   ;;  %1981 = vperm.xlu1 %2337, %v2464_v63   ;;  %v945_v48 = vsub.f32 %v3541_v44, %v6877_v29  ;;  %vm6879_vm12 = vcmp.ge.f32.partialorder %v6878_v15, 0.0  ;;  %v6884_v2 = vld [vmem:[#allocation21_spill] sm:$0xff]  ;;  %v6885_v24 = vld [vmem:[#allocation35_spill] sm:$0xff] }
 0x14d   : >> { %6875 = vst [vmem:[#allocation15_spill] sm:$0xff] %v4134_v18  ;;  %2336 = vset.pattern.permute.xlu0 %v2597_v39  ;;  %vm6881_vm8 = vcmp.ge.f32.partialorder %v6880_v52, 0.0  ;;  %2398 = vrcp.f32 %v830_v6  ;;  %vm6888_vm10 = vcmp.ge.f32.partialorder %v6887_v31, 0.0  ;;  %v6890_v28 = vmin.f32 %v4096_v45, 1.0  ;;  %v6906_v29 = vld [vmem:[#allocation31_spill] sm:$0xff]  ;;  %p2476_p5 = por (%p229_p12), %p2475_p3, %p2474_p2 }
 0x14e   : >> { %1972 = vperm.xlu0 %2336, %v2464_v63   ;;  %vm425_vm0 = vmxor %vm6881_vm8, %vm6879_vm12  ;;  %v4159_v32 = vsel %vm6888_vm10, %v3490_v51, %v2906_v59  ;;  %v1662_v14 = vadd.f32 %v1661_v41, %v6867_v26  ;;  %v439_v6 = vsel %vm6879_vm12, %v6892_v30, %v6871_v56  ;;  %2400 = vrcp.f32 %v861_v34  ;;  %v6899_v34 = vld [vmem:[#allocation60_spill] sm:$0xff] }
 0x14f   : >> { %vm6883_vm13 = vmmov %vm6881_vm8  ;;  %v4163_v42 = vsel %vm425_vm0, %v6885_v24, %v6884_v2  ;;  %v4167_v40 = vmul.f32 %v945_v48, %v6890_v28  ;;  %v1227_v28 = vsel %vm1211_vm14, %v3849_v62, %v3014_v5  ;;  %v2598_v48 = vmov 10   ;;  %p2477_p6 = pnand (%p229_p12), %p2476_p5, %p2470_p1 }
 0x150   : >> { %v442_v4 = vsel %vm6883_vm13, %v6882_v23, %v6871_v56  ;;  %vm6886_vm3 = vmmov %vm6881_vm8  ;;  %6889 = vst [vmem:[#allocation18_spill] sm:$0xff] %v4163_v42  ;;  %2338 = vset.pattern.permute.xlu1 %v2598_v48  ;;  %v4185_v41 = vsel %vm425_vm0, %v6882_v23, %v439_v6  ;;  %vm6900_vm0 = vcmp.ge.f32.partialorder %v6899_v34, 0.0  ;;  %v6901_v6 = vld [vmem:[#allocation9_spill] sm:$0xff]  ;;  %2402 = vrcp.f32 %v1662_v14 }
 0x151   : >> { %v444_v39 = vsel %vm6886_vm3, %v6885_v24, %v6884_v2  ;;  %6891 = vst [vmem:[#allocation41_spill] sm:$0xff] %v4167_v40  ;;  %vm6893_vm8 = vmmov %vm6879_vm12  ;;  %v1218_v24 = vmul.f32 %v2389_v46, %v3782_v57  ;;  %v4196_v46 = vsel %vm1242_vm9, %v3970_v22, %v3014_v5  ;;  %1993 = vperm.xlu1 %2338, %v2464_v63   ;;  %v2600_v18 = vmov 12  }
 0x152   : >> { %v4177_v8 = vsel %vm6893_vm8, %v6884_v2, %v444_v39  ;;  %6895 = vst [vmem:[#allocation57_spill] sm:$0xff] %v4185_v41  ;;  %vm6896_vm13 = vmmov %vm6893_vm8  ;;  %v2599_v2 = vmov 11   ;;  %v4200_v39 = vsub.f32 %v2906_v59, %v4163_v42  ;;  %v6904_v40 = vsub.f32 %v3835_v17, %v3764_v3 }
 0x153   : >> { %6894 = vst [vmem:[#allocation48_spill] sm:$0xff] %v4177_v8  ;;  %v4190_v26 = vsel %vm6896_vm13, %v6892_v30, %v442_v4  ;;  %2339 = vset.pattern.permute.xlu0 %v2599_v2  ;;  %v4204_v23 = vsub.f32 %v2906_v59, %v4177_v8  ;;  %v2391_v30 = vpop.eup %2390  ;;  %v1219_v15 = vmin.f32 %v1218_v24, 1.0  ;;  %v4210_v4 = vsel %vm6900_vm0, %v3536_v1, %v2906_v59  ;;  %v6910_v24 = vld [vmem:[#allocation22_spill] sm:$0xff] }
 0x154   : >> { %6897 = vst [vmem:[#allocation40_spill] sm:$0xff] %v4190_v26  ;;  %6898 = vst [vmem:[#allocation12_spill] sm:$0xff] %v4200_v39  ;;  %2003 = vperm.xlu0 %2339, %v2464_v63   ;;  %v2393_v2 = vpop.eup %2392  ;;  %v1303_v58 = vmul.f32 %v2391_v30, %v3311_v13  ;;  %v6905_v45 = vsub.f32 %v3849_v62, %v3769_v11  ;;  %v6907_v30 = vld [vmem:[#allocation23_spill] sm:$0xff]  ;;  %v6914_v12 = vsub.f32 %v3490_v51, %v3298_v9 }
 0x155   : >> { %v2395_v44 = vpop.eup %2394  ;;  %v1221_v43 = vmul.f32 %v6904_v40, %v1219_v15  ;;  %v1249_v63 = vmul.f32 %v2393_v2, %v3937_v7  ;;  %v4230_v54 = vsel %vm3083_vm7, %v6907_v30, %v6906_v29  ;;  %2340 = vset.pattern.permute.xlu1 %v2600_v18  ;;  %v4237_v40 = vsub.f32 %v4200_v39, %v4204_v23 }
 0x156   : >> { %v1224_v48 = vmul.f32 %v6905_v45, %v1219_v15  ;;  %6909 = vst [vmem:[#allocation34_spill] sm:$0xff] %v4230_v54  ;;  %v2397_v47 = vpop.eup %2396  ;;  %v1304_v36 = vmin.f32 %v1303_v58, 1.0  ;;  %v4233_v55 = vmul.f32 %v2395_v44, %v6910_v24  ;;  %v6911_v58 = vld [vmem:[#allocation13_spill] sm:$0xff]  ;;  %v6912_v44 = vld [vmem:[#allocation55_spill] sm:$0xff]  ;;  %v6921_v57 = vsub.f32 %v3929_v49, %v3835_v17 }
 0x157   : >> { %v1222_v15 = vadd.f32 %v1221_v43, %v3764_v3  ;;  %v1250_v29 = vmin.f32 %v1249_v63, 1.0  ;;  %v1388_v30 = vmul.f32 %v2397_v47, %v6887_v31  ;;  %2013 = vperm.xlu1 %2340, %v6911_v58   ;;  %v6913_v14 = vsub.f32 %v6912_v44, %v3293_v53  ;;  %v4256_v3 = vpop.eup %2398 }
 0x158   : >> { %v1225_v2 = vadd.f32 %v1224_v48, %v3769_v11  ;;  %2341 = vset.pattern.permute.xlu0 %v2600_v18  ;;  %v1309_v21 = vmul.f32 %v6914_v12, %v1304_v36  ;;  %v4254_v43 = vsub.f32 %v4204_v23, %v6915_v50  ;;  %6916 = vst [vmem:[#allocation21_spill] sm:$0xff] %v4256_v3  ;;  %v6924_v3 = vmin.f32 %v4233_v55, 1.0 }
 0x159   : >> { %v1306_v0 = vmul.f32 %v6913_v14, %v1304_v36  ;;  %v1226_v47 = vsel %vm3979_vm5, %v1222_v15, %v3835_v17  ;;  %v1229_v18 = vsel %vm1157_vm1, %v1222_v15, %v3835_v17  ;;  %v6922_v58 = vsub.f32 %v3970_v22, %v3849_v62 }
 0x15a   : >> { %v1228_v11 = vsel %vm3979_vm5, %v1225_v2, %v1227_v28  ;;  %v1231_v36 = vsel %vm1157_vm1, %v1225_v2, %v3014_v5  ;;  %v1230_v12 = vsel %vm1211_vm14, %v3835_v17, %v1229_v18  ;;  %v4279_v10 = vmul.f32 %v1226_v47, %v4084_v60  ;;  %v4291_v18 = vpop.eup %2400 }
 0x15b   : >> { %v1232_v48 = vsel %vm1211_vm14, %v3849_v62, %v1231_v36  ;;  %v4276_v63 = vmul.f32 %v1228_v11, %v4079_v38  ;;  %v4283_v15 = vmul.f32 %v1230_v12, %v1228_v11  ;;  %v1252_v2 = vmul.f32 %v6921_v57, %v1250_v29  ;;  %6923 = vst [vmem:[#allocation19_spill] sm:$0xff] %v4291_v18  ;;  %v4306_v18 = vpop.eup %2402 }
 0x15c   : >> { %6918 = vst [vmem:[#allocation58_spill] sm:$0xff] %v4279_v10  ;;  %v4281_v28 = vmul.f32 %v1232_v48, %v1226_v47  ;;  %v1255_v14 = vmul.f32 %v6922_v58, %v1250_v29  ;;  %v1307_v60 = vadd.f32 %v1306_v0, %v3293_v53  ;;  %v1310_v47 = vadd.f32 %v1309_v21, %v3298_v9 }
 0x15d   : >> { %6917 = vst [vmem:[#allocation35_spill] sm:$0xff] %v4276_v63  ;;  %6920 = vst [vmem:[#allocation60_spill] sm:$0xff] %v4283_v15  ;;  %v1389_v36 = vmin.f32 %v1388_v30, 1.0  ;;  %v1253_v45 = vadd.f32 %v1252_v2, %v3835_v17  ;;  %v6925_v29 = vsub.f32 %v6866_v25, %v6865_v37  ;;  %vm6927_vm7 = vcmp.ge.f32.partialorder %v3311_v13, 0.0 }
 0x15e   : >> { %6919 = vst [vmem:[#allocation10_spill] sm:$0xff] %v4281_v28  ;;  %v1256_v57 = vadd.f32 %v1255_v14, %v3849_v62  ;;  %v4311_v9 = vsel %vm3704_vm2, %v1307_v60, %v6912_v44  ;;  %v4316_v21 = vsel %vm3704_vm2, %v1310_v47, %v4159_v32  ;;  %v1314_v62 = vsel %vm6927_vm7, %v1307_v60, %v6912_v44  ;;  %vm6928_vm1 = vmmov %vm6927_vm7 }
 0x15f   : >> { %v1476_v58 = vmul.f32 %v6925_v29, %v6924_v3  ;;  %v1316_v17 = vsel %vm6928_vm1, %v1310_v47, %v2906_v59  ;;  %v1257_v0 = vsel %vm4024_vm6, %v1253_v45, %v3929_v49  ;;  %v1260_v32 = vsel %vm1211_vm14, %v1253_v45, %v3929_v49  ;;  %vm6933_vm2 = vmmov %vm6888_vm10 }
 0x160   : >> { %v1259_v30 = vsel %vm4024_vm6, %v1256_v57, %v4196_v46  ;;  %v1262_v3 = vsel %vm1211_vm14, %v1256_v57, %v3014_v5  ;;  %v4339_v13 = vsel %vm1242_vm9, %v3929_v49, %v1260_v32  ;;  %v4348_v46 = vmul.f32 %v1257_v0, %v1232_v48  ;;  %vm6934_vm14 = vmmov %vm6933_vm2 }
 0x161   : >> { %v4344_v2 = vsel %vm1242_vm9, %v3970_v22, %v1262_v3  ;;  %v4346_v20 = vmul.f32 %v1259_v30, %v1230_v12  ;;  %v4354_v7 = vmul.f32 %v4339_v13, %v1259_v30  ;;  %v4359_v14 = vsel %vm6933_vm2, %v6912_v44, %v1314_v62  ;;  %v6935_v30 = vld [vmem:[#allocation56_spill] sm:$0xff]  ;;  %vm6949_vm0 = vmmov %vm6933_vm2 }
 0x162   : >> { %6930 = vst [vmem:[#allocation23_spill] sm:$0xff] %v4348_v46  ;;  %v4351_v45 = vmul.f32 %v4344_v2, %v1257_v0  ;;  %v4364_v60 = vsel %vm6934_vm14, %v3490_v51, %v1316_v17  ;;  %v4370_v48 = vadd.f32 %v4316_v21, %v2906_v59  ;;  %v6936_v32 = vsub.f32 %v6935_v30, %v6912_v44  ;;  %v6940_v17 = vld [vmem:[#allocation47_spill] sm:$0xff]  ;;  %vm6950_vm7 = vmmov %vm6949_vm0 }
 0x163   : >> { %6929 = vst [vmem:[#allocation31_spill] sm:$0xff] %v4346_v20  ;;  %6932 = vst [vmem:[#allocation22_spill] sm:$0xff] %v4354_v7  ;;  %v4380_v53 = vadd.f32 %v4364_v60, %v2906_v59  ;;  %v6937_v29 = vsub.f32 %v3536_v1, %v3490_v51  ;;  %vm452_vm8 = vcmp.ge.f32.partialorder %v4237_v40, 0.0  ;;  %v6945_v7 = vmin.f32 %v4233_v55, 1.0 }
 0x164   : >> { %6931 = vst [vmem:[#allocation25_spill] sm:$0xff] %v4351_v45  ;;  %vm1319_vm5 = vcmp.ge.f32.partialorder %v4370_v48, 0.0  ;;  %v1321_v0 = vsub.f32 %v4003_v19, %v4370_v48  ;;  %v1391_v3 = vmul.f32 %v6936_v32, %v1389_v36  ;;  %v4408_v32 = vmul.f32 %v6940_v17, %v6915_v50  ;;  %v6946_v45 = vld [vmem:[#allocation16_spill] sm:$0xff] }
 0x165   : >> { %v1394_v12 = vmul.f32 %v6937_v29, %v1389_v36  ;;  %vm4399_vm6 = vmxor %vm1242_vm9, %vm1319_vm5  ;;  %vm1350_vm3 = vcmp.ge.f32.partialorder %v4380_v53, 0.0  ;;  %v1352_v38 = vsub.f32 %v4370_v48, %v4380_v53  ;;  %v1477_v36 = vadd.f32 %v1476_v58, %v6865_v37 }
 0x166   : >> { %6941 = vst [vmem:[#allocation13_spill] sm:$0xff] %v4408_v32  ;;  %vm1322_vm10 = vcmp.ge.f32.partialorder %v1321_v0, 0.0  ;;  %vm4416_vm12 = vmxor %vm1319_vm5, %vm1350_vm3  ;;  %v1392_v57 = vadd.f32 %v1391_v3, %v6912_v44  ;;  %v6947_v46 = vsub.f32 %v6902_v16, %v6946_v45  ;;  %vm6951_vm1 = vcmp.ge.f32.partialorder %v6899_v34, 0.0 }
 0x167   : >> { %v1395_v47 = vadd.f32 %v1394_v12, %v3490_v51  ;;  %v1323_v17 = vsel %vm1322_vm10, 1e-09, %v6775_v27  ;;  %vm1353_vm13 = vcmp.ge.f32.partialorder %v1352_v38, 0.0  ;;  %v453_v3 = vsel %vm452_vm8, 1e-09, %v6775_v27 }
 0x168   : >> { %v1479_v20 = vmul.f32 %v6947_v46, %v6945_v7  ;;  %v1324_v15 = vadd.f32 %v1323_v17, %v1321_v0  ;;  %v1354_v28 = vsel %vm1353_vm13, 1e-09, %v6775_v27  ;;  %v4434_v51 = vsel %vm3755_vm15, %v1392_v57, %v6935_v30 }
 0x169   : >> { %v4439_v12 = vsel %vm3755_vm15, %v1395_v47, %v4210_v4  ;;  %v1355_v37 = vadd.f32 %v1354_v28, %v1352_v38  ;;  %v1399_v55 = vsel %vm6949_vm0, %v1392_v57, %v6935_v30  ;;  %v1401_v58 = vsel %vm6950_vm7, %v1395_v47, %v2906_v59  ;;  %vm6952_vm15 = vmmov %vm6951_vm1 }
 0x16a   : >> { %v4449_v46 = vadd.f32 %v4439_v12, %v2906_v59  ;;  %2404 = vrcp.f32 %v1324_v15  ;;  %v4454_v7 = vsel %vm6951_vm1, %v6935_v30, %v1399_v55  ;;  %v4459_v4 = vsel %vm6952_vm15, %v3536_v1, %v1401_v58 }
 0x16b   : >> { %2406 = vrcp.f32 %v1355_v37  ;;  %v4478_v47 = vadd.f32 %v4459_v4, %v2906_v59  ;;  %v4491_v17 = vsel %vm1319_vm5, %v4316_v21, %v3014_v5  ;;  %v1480_v44 = vadd.f32 %v1479_v20, %v6946_v45 }
 0x16c   : >> { %vm6646_vm2 = vcmp.ge.f32.partialorder %v4449_v46, 0.0  ;;  %v1406_v31 = vsub.f32 %v4380_v53, %v4449_v46  ;;  %v1664_v37 = vmul.f32 %v4306_v18, %v3191_v33  ;;  %v4500_v55 = vsel %vm1350_vm3, %v4364_v60, %v3014_v5 }
 0x16d   : >> { %vm4472_vm14 = vmxor %vm1350_vm3, %vm6646_vm2  ;;  %6955 = vst [vmem:[#allocation55_spill] sm:$0xff] %v4478_v47  ;;  %vm1435_vm8 = vcmp.ge.f32.partialorder %v4478_v47, 0.0  ;;  %v1437_v0 = vsub.f32 %v4449_v46, %v4478_v47  ;;  %vm6956_vm13 = vcmp.ge.f32.partialorder %v6910_v24, 0.0  ;;  %v6966_v54 = vmov 0 }
 0x16e   : >> { %vm1407_vm10 = vcmp.ge.f32.partialorder %v1406_v31, 0.0  ;;  %vm1467_vm0 = vmxor %vm6956_vm13, %vm1466_vm11  ;;  %v6969_v26 = vsub.f32 %v6903_v35, %v6902_v16 }
 0x16f   : >> { %v1408_v58 = vsel %vm1407_vm10, 1e-09, %v6775_v27  ;;  %vm4514_vm7 = vmxor %vm6646_vm2, %vm1435_vm8  ;;  %v4519_v45 = vsel %vm1467_vm0, %v1477_v36, %v4127_v61  ;;  %v4522_v57 = vsel %vm1467_vm0, %v1480_v44, %v6902_v16  ;;  %vm1438_vm15 = vcmp.ge.f32.partialorder %v1437_v0, 0.0 }
 0x170   : >> { %v1409_v20 = vadd.f32 %v1408_v58, %v1406_v31  ;;  %vm6959_vm1 = vmmov %vm6956_vm13  ;;  %v4534_v58 = vsub.f32 %v2906_v59, %v4522_v57  ;;  %v1439_v28 = vsel %vm1438_vm15, 1e-09, %v6775_v27  ;;  %vm6962_vm0 = vcmp.ge.f32.partialorder %v6899_v34, 0.0 }
 0x171   : >> { %v1486_v15 = vsel %vm6959_vm1, %v1480_v44, %v6902_v16  ;;  %vm6960_vm10 = vmmov %vm6959_vm1 }
 0x172   : >> { %v4530_v31 = vsel %vm1466_vm11, %v6902_v16, %v1486_v15  ;;  %2408 = vrcp.f32 %v1409_v20  ;;  %v1484_v44 = vsel %vm6960_vm10, %v1477_v36, %v6871_v56  ;;  %v1440_v15 = vadd.f32 %v1439_v28, %v1437_v0 }
 0x173   : >> { %v4544_v10 = vsub.f32 %v2906_v59, %v4530_v31  ;;  %vm1489_vm13 = vcmp.ge.f32.partialorder %v4534_v58, 0.0  ;;  %v1491_v63 = vsub.f32 %v6899_v34, %v4534_v58  ;;  %v4555_v20 = vsel %vm6646_vm2, %v4439_v12, %v3014_v5 }
 0x174   : >> { %vm4561_vm1 = vmxor %vm6962_vm0, %vm1489_vm13  ;;  %v1665_v28 = vmin.f32 %v1664_v37, 1.0  ;;  %v2405_v0 = vpop.eup %2404  ;;  %v4571_v61 = vsel %vm1466_vm11, %v6866_v25, %v1484_v44  ;;  %v454_v37 = vadd.f32 %v453_v3, %v4237_v40  ;;  %2410 = vrcp.f32 %v1440_v15 }
 0x175   : >> { %6961 = vst [vmem:[#allocation59_spill] sm:$0xff] %v4544_v10  ;;  %vm1574_vm15 = vcmp.ge.f32.partialorder %v4544_v10, 0.0  ;;  %v1576_v36 = vsub.f32 %v4534_v58, %v4544_v10  ;;  %6965 = vst [vmem:[#allocation56_spill] sm:$0xff] %v4571_v61  ;;  %vm1492_vm10 = vcmp.ge.f32.partialorder %v1491_v63, 0.0  ;;  %v2407_v62 = vpop.eup %2406  ;;  %v1326_v42 = vmul.f32 %v2405_v0, %v4003_v19 }
 0x176   : >> { %vm4579_vm0 = vmxor %vm1489_vm13, %vm1574_vm15  ;;  %v1493_v44 = vsel %vm1492_vm10, 1e-09, %v6775_v27  ;;  %v1357_v8 = vmul.f32 %v2407_v62, %v4370_v48  ;;  %v1670_v32 = vmul.f32 %v6969_v26, %v1665_v28  ;;  %v6970_v40 = vsub.f32 %v6901_v6, %v6866_v25 }
 0x177   : >> { %v6967_v54 = vsel %vm4579_vm0, 4294967295, %v6966_v54  ;;  %vm1577_vm2 = vcmp.ge.f32.partialorder %v1576_v36, 0.0  ;;  %v1494_v56 = vadd.f32 %v1493_v44, %v1491_v63  ;;  %v1327_v50 = vmin.f32 %v1326_v42, 1.0 }
 0x178   : >> { %6968 = vst [vmem:[#allocation47_spill] sm:$0xff] %v6967_v54  ;;  %v1578_v41 = vsel %vm1577_vm2, 1e-09, %v6775_v27  ;;  %v1667_v3 = vmul.f32 %v6970_v40, %v1665_v28  ;;  %2412 = vrcp.f32 %v454_v37  ;;  %v1358_v15 = vmin.f32 %v1357_v8, 1.0 }
 0x179   : >> { %v1579_v54 = vadd.f32 %v1578_v41, %v1576_v36  ;;  %v4598_v62 = vsel %vm1435_vm8, %v4459_v4, %v3014_v5  ;;  %2414 = vrcp.f32 %v1494_v56  ;;  %v4601_v63 = vadd.f32 %v1670_v32, %v6902_v16 }
 0x17a   : >> { %v6972_v42 = vsub.f32 %v4311_v9, %v3929_v49  ;;  %v6973_v26 = vsub.f32 %v4316_v21, %v3970_v22  ;;  %vm6974_vm2 = vcmp.ge.f32.partialorder %v6880_v52, 0.0  ;;  %v6977_v16 = vsub.f32 %v4359_v14, %v4311_v9 }
 0x17b   : >> { %6971 = vst [vmem:[#allocation16_spill] sm:$0xff] %v4601_v63  ;;  %2416 = vrcp.f32 %v1579_v54  ;;  %vm4615_vm10 = vmxor %vm1466_vm11, %vm6974_vm2  ;;  %v6978_v28 = vsub.f32 %v4364_v60, %v4316_v21  ;;  %v4629_v54 = vsel %vm1489_vm13, %v4522_v57, %v2906_v59 }
 0x17c   : >> { %v1329_v41 = vmul.f32 %v6972_v42, %v1327_v50  ;;  %v1332_v36 = vmul.f32 %v6973_v26, %v1327_v50  ;;  %v1360_v32 = vmul.f32 %v6977_v16, %v1358_v15  ;;  %v4635_v0 = vsel %vm4615_vm10, %v4601_v63, %v6903_v35  ;;  %v2409_v37 = vpop.eup %2408  ;;  %v7071_v35 = vld [vmem:[#allocation44_spill] sm:$0xff] }
 0x17d   : >> { %v1363_v50 = vmul.f32 %v6978_v28, %v1358_v15  ;;  %6979 = vst [vmem:[#allocation61_spill] sm:$0xff] %v4635_v0  ;;  %v4643_v15 = vsel %vm1574_vm15, %v4530_v31, %v2906_v59  ;;  %v4646_v42 = vadd.f32 %v1667_v3, %v6866_v25  ;;  %v1411_v28 = vmul.f32 %v2409_v37, %v4380_v53 }
 0x17e   : >> { %v1330_v44 = vadd.f32 %v1329_v41, %v3929_v49  ;;  %v1333_v40 = vadd.f32 %v1332_v36, %v3970_v22  ;;  %v1361_v26 = vadd.f32 %v1360_v32, %v4311_v9  ;;  %v4653_v49 = vsub.f32 %v2906_v59, %v4635_v0 }
 0x17f   : >> { %6980 = vst [vmem:[#allocation84_spill] sm:$0xff] %v4646_v42  ;;  %v1364_v16 = vadd.f32 %v1363_v50, %v4316_v21 }
 0x180   : >> { %6981 = vst [vmem:[#allocation85_spill] sm:$0xff] %v4653_v49  ;;  %v1334_v22 = vsel %vm4399_vm6, %v1330_v44, %v4311_v9  ;;  %v1336_v41 = vsel %vm4399_vm6, %v1333_v40, %v4491_v17  ;;  %v1337_v25 = vsel %vm1242_vm9, %v1330_v44, %v4311_v9  ;;  %v1339_v3 = vsel %vm1242_vm9, %v1333_v40, %v3014_v5  ;;  %v2411_v17 = vpop.eup %2410 }
 0x181   : >> { %v1338_v36 = vsel %vm1319_vm5, %v4311_v9, %v1337_v25  ;;  %v1340_v32 = vsel %vm1319_vm5, %v4316_v21, %v1339_v3  ;;  %v4674_v50 = vmul.f32 %v1336_v41, %v4339_v13  ;;  %v4677_v11 = vmul.f32 %v1334_v22, %v4344_v2 }
 0x182   : >> { %v4679_v37 = vmul.f32 %v1340_v32, %v1334_v22  ;;  %v4681_v44 = vmul.f32 %v1338_v36, %v1336_v41  ;;  %v1365_v19 = vsel %vm4416_vm12, %v1361_v26, %v4359_v14  ;;  %v1367_v9 = vsel %vm4416_vm12, %v1364_v16, %v4500_v55  ;;  %v2413_v22 = vpop.eup %2412 }
 0x183   : >> { %6982 = vst [vmem:[#allocation86_spill] sm:$0xff] %v4674_v50  ;;  %6983 = vst [vmem:[#allocation87_spill] sm:$0xff] %v4677_v11  ;;  %v1368_v13 = vsel %vm1319_vm5, %v1361_v26, %v4359_v14  ;;  %v1370_v2 = vsel %vm1319_vm5, %v1364_v16, %v3014_v5  ;;  %v4697_v40 = vmul.f32 %v1367_v9, %v1338_v36  ;;  %v2415_v26 = vpop.eup %2414  ;;  %v1412_v16 = vmin.f32 %v1411_v28, 1.0 }
 0x184   : >> { %6984 = vst [vmem:[#allocation88_spill] sm:$0xff] %v4679_v37  ;;  %6985 = vst [vmem:[#allocation89_spill] sm:$0xff] %v4681_v44  ;;  %v1369_v29 = vsel %vm1350_vm3, %v4359_v14, %v1368_v13  ;;  %v1371_v55 = vsel %vm1350_vm3, %v4364_v60, %v1370_v2  ;;  %v4707_v25 = vmul.f32 %v1365_v19, %v1340_v32  ;;  %vm527_vm5 = vcmp.ge.f32.partialorder %v4254_v43, 0.0 }
 0x185   : >> { %6986 = vst [vmem:[#allocation90_spill] sm:$0xff] %v4697_v40  ;;  %v4709_v3 = vmul.f32 %v1371_v55, %v1365_v19  ;;  %v4711_v48 = vmul.f32 %v1369_v29, %v1367_v9  ;;  %v1442_v36 = vmul.f32 %v2411_v17, %v4449_v46  ;;  %v2417_v21 = vpop.eup %2416  ;;  %v1496_v13 = vmul.f32 %v2415_v26, %v6899_v34 }
 0x186   : >> { %6987 = vst [vmem:[#allocation91_spill] sm:$0xff] %v4707_v25  ;;  %v4719_v8 = vsub.f32 %v4544_v10, %v4653_v49  ;;  %v6990_v28 = vsub.f32 %v4434_v51, %v4359_v14  ;;  %v6991_v9 = vsub.f32 %v4439_v12, %v4364_v60  ;;  %v1581_v25 = vmul.f32 %v2417_v21, %v4534_v58  ;;  %v7031_v58 = vld [vmem:[#allocation48_spill] sm:$0xff] }
 0x187   : >> { %6988 = vst [vmem:[#allocation92_spill] sm:$0xff] %v4709_v3  ;;  %6989 = vst [vmem:[#allocation93_spill] sm:$0xff] %v4711_v48  ;;  %v1443_v41 = vmin.f32 %v1442_v36, 1.0  ;;  %v1497_v26 = vmin.f32 %v1496_v13, 1.0  ;;  %v4734_v40 = vmul.f32 %v2413_v22, %v4200_v39  ;;  %v6994_v21 = vsub.f32 %v4519_v45, %v6935_v30 }
 0x188   : >> { %v1414_v17 = vmul.f32 %v6990_v28, %v1412_v16  ;;  %v1417_v2 = vmul.f32 %v6991_v9, %v1412_v16  ;;  %vm1683_vm9 = vcmp.ge.f32.partialorder %v4719_v8, 0.0  ;;  %v6992_v28 = vsub.f32 %v4454_v7, %v4434_v51 }
 0x189   : >> { %v6993_v16 = vsub.f32 %v4459_v4, %v4439_v12  ;;  %v1499_v13 = vmul.f32 %v6994_v21, %v1497_v26  ;;  %v6995_v22 = vsub.f32 %v4522_v57, %v3536_v1  ;;  %v1582_v3 = vmin.f32 %v1581_v25, 1.0 }
 0x18a   : >> { %v1415_v32 = vadd.f32 %v1414_v17, %v4359_v14  ;;  %v1418_v19 = vadd.f32 %v1417_v2, %v4364_v60  ;;  %v1445_v48 = vmul.f32 %v6992_v28, %v1443_v41  ;;  %v1684_v14 = vsel %vm1683_vm9, 1e-09, %v6775_v27 }
 0x18b   : >> { %v1448_v36 = vmul.f32 %v6993_v16, %v1443_v41  ;;  %v1502_v9 = vmul.f32 %v6995_v22, %v1497_v26  ;;  %vm6996_vm6 = vcmp.ge.f32.partialorder %v4449_v46, 0.0  ;;  %v1500_v21 = vadd.f32 %v1499_v13, %v6935_v30  ;;  %v7021_v16 = vld [vmem:[#allocation13_spill] sm:$0xff] }
 0x18c   : >> { %v1419_v60 = vsel %vm4472_vm14, %v1415_v32, %v4434_v51  ;;  %v1421_v17 = vsel %vm4472_vm14, %v1418_v19, %v4555_v20  ;;  %v1422_v41 = vsel %vm1350_vm3, %v1415_v32, %v4434_v51  ;;  %v1424_v2 = vsel %vm1350_vm3, %v1418_v19, %v3014_v5  ;;  %vm6997_vm12 = vmmov %vm6996_vm6 }
 0x18d   : >> { %v1423_v25 = vsel %vm6996_vm6, %v4434_v51, %v1422_v41  ;;  %v1425_v26 = vsel %vm6997_vm12, %v4439_v12, %v1424_v2  ;;  %v4770_v38 = vmul.f32 %v1421_v17, %v1369_v29  ;;  %v4772_v20 = vmul.f32 %v1419_v60, %v1371_v55  ;;  %vm7003_vm3 = vmmov %vm6996_vm6 }
 0x18e   : >> { %v4774_v28 = vmul.f32 %v1425_v26, %v1419_v60  ;;  %v4776_v32 = vmul.f32 %v1423_v25, %v1421_v17  ;;  %v1446_v53 = vadd.f32 %v1445_v48, %v4434_v51  ;;  %v1449_v19 = vadd.f32 %v1448_v36, %v4439_v12  ;;  %vm7005_vm14 = vmmov %vm7003_vm3 }
 0x18f   : >> { %6998 = vst [vmem:[#allocation94_spill] sm:$0xff] %v4770_v38  ;;  %6999 = vst [vmem:[#allocation95_spill] sm:$0xff] %v4772_v20  ;;  %v1503_v22 = vadd.f32 %v1502_v9, %v3536_v1  ;;  %v7002_v29 = vsub.f32 %v4571_v61, %v4519_v45  ;;  %v4821_v9 = vsel %vm4561_vm1, %v1500_v21, %v4519_v45  ;;  %vm449_vm9 = vcmp.ge.f32.partialorder %v4204_v23, 0.0 }
 0x190   : >> { %7000 = vst [vmem:[#allocation96_spill] sm:$0xff] %v4774_v28  ;;  %7001 = vst [vmem:[#allocation97_spill] sm:$0xff] %v4776_v32  ;;  %v1450_v51 = vsel %vm4514_vm7, %v1446_v53, %v4454_v7  ;;  %v1452_v12 = vsel %vm4514_vm7, %v1449_v19, %v4598_v62  ;;  %v1453_v30 = vsel %vm7003_vm3, %v1446_v53, %v4454_v7  ;;  %vm7013_vm7 = vcmp.ge.f32.partialorder %v6899_v34, 0.0  ;;  %v7035_v53 = vld [vmem:[#allocation34_spill] sm:$0xff] }
 0x191   : >> { %v1584_v55 = vmul.f32 %v7002_v29, %v1582_v3  ;;  %v4801_v1 = vsel %vm1435_vm8, %v4454_v7, %v1453_v30  ;;  %v1455_v48 = vsel %vm7005_vm14, %v1449_v19, %v3014_v5  ;;  %v4806_v36 = vmul.f32 %v1452_v12, %v1423_v25  ;;  %7010 = vst [vmem:[#allocation103_spill] sm:$0xff] %v4821_v9  ;;  %vm7014_vm2 = vmmov %vm7013_vm7 }
 0x192   : >> { %7004 = vst [vmem:[#allocation98_spill] sm:$0xff] %v4801_v1  ;;  %v4808_v13 = vmul.f32 %v1450_v51, %v1425_v26  ;;  %v4813_v18 = vsel %vm1435_vm8, %v4459_v4, %v1455_v48  ;;  %v4816_v62 = vmul.f32 %v4801_v1, %v1452_v12  ;;  %v4826_v46 = vsel %vm4561_vm1, %v1503_v22, %v4629_v54 }
 0x193   : >> { %7006 = vst [vmem:[#allocation99_spill] sm:$0xff] %v4806_v36  ;;  %7008 = vst [vmem:[#allocation101_spill] sm:$0xff] %v4813_v18  ;;  %v4831_v41 = vmul.f32 %v4813_v18, %v1450_v51  ;;  %v1507_v2 = vsel %vm7013_vm7, %v1500_v21, %v4519_v45  ;;  %v1509_v25 = vsel %vm7014_vm2, %v1503_v22, %v2906_v59  ;;  %vm448_vm1 = vcmp.ge.f32.partialorder %v4200_v39, 0.0  ;;  %v7037_v36 = vld [vmem:[#allocation28_spill] sm:$0xff] }
 0x194   : >> { %7007 = vst [vmem:[#allocation100_spill] sm:$0xff] %v4808_v13  ;;  %7009 = vst [vmem:[#allocation102_spill] sm:$0xff] %v4816_v62  ;;  %v4843_v24 = vsel %vm1489_vm13, %v4519_v45, %v1507_v2  ;;  %v4848_v54 = vsel %vm1489_vm13, %v4522_v57, %v1509_v25  ;;  %v4852_v26 = vadd.f32 %v4826_v46, %v2906_v59  ;;  %v7020_v2 = vld [vmem:[#allocation32_spill] sm:$0xff]  ;;  %v457_v17 = vmin.f32 %v4734_v40, 1.0 }
 0x195   : >> { %7011 = vst [vmem:[#allocation104_spill] sm:$0xff] %v4826_v46  ;;  %7012 = vst [vmem:[#allocation105_spill] sm:$0xff] %v4831_v41  ;;  %v4861_v19 = vadd.f32 %v4848_v54, %v2906_v59  ;;  %v1585_v51 = vadd.f32 %v1584_v55, %v4519_v45  ;;  %v7019_v12 = vsub.f32 %v4530_v31, %v4522_v57  ;;  %vm524_vm6 = vcmp.ge.f32.partialorder %v7020_v2, 0.0  ;;  %v7070_v2 = vld [vmem:[#allocation42_spill] sm:$0xff] }
 0x196   : >> { %7015 = vst [vmem:[#allocation106_spill] sm:$0xff] %v4843_v24  ;;  %7016 = vst [vmem:[#allocation107_spill] sm:$0xff] %v4848_v54  ;;  %v1514_v29 = vsub.f32 %v4478_v47, %v4852_v26  ;;  %v1685_v48 = vadd.f32 %v1684_v14, %v4719_v8  ;;  %v528_v60 = vsel %vm527_vm5, 1e-09, %v6775_v27  ;;  %v617_v22 = vmin.f32 %v7021_v16, 1.0 }
 0x197   : >> { %7017 = vst [vmem:[#allocation108_spill] sm:$0xff] %v4852_v26  ;;  %7018 = vst [vmem:[#allocation109_spill] sm:$0xff] %v4861_v19  ;;  %v1587_v30 = vmul.f32 %v7019_v12, %v1582_v3  ;;  %v1545_v25 = vsub.f32 %v4852_v26, %v4861_v19  ;;  %v4886_v8 = vsel %vm4579_vm0, %v1585_v51, %v4571_v61 }
 0x198   : >> { %vm1515_vm12 = vcmp.ge.f32.partialorder %v1514_v29, 0.0  ;;  %7023 = vst [vmem:[#allocation32_spill] sm:$0xff] %v4886_v8  ;;  %v1592_v14 = vsel %vm1489_vm13, %v1585_v51, %v4571_v61  ;;  %2418 = vrcp.f32 %v1685_v48  ;;  %v529_v51 = vadd.f32 %v528_v60, %v4254_v43  ;;  %v7028_v48 = vld [vmem:[#allocation40_spill] sm:$0xff]  ;;  %v7034_v60 = vld [vmem:[#allocation27_spill] sm:$0xff] }
 0x199   : >> { %v1588_v45 = vadd.f32 %v1587_v30, %v4522_v57  ;;  %v1516_v40 = vsel %vm1515_vm12, 1e-09, %v6775_v27  ;;  %vm1546_vm3 = vcmp.ge.f32.partialorder %v1545_v25, 0.0  ;;  %v4895_v55 = vsel %vm1574_vm15, %v4571_v61, %v1592_v14 }
 0x19a   : >> { %7024 = vst [vmem:[#allocation13_spill] sm:$0xff] %v4895_v55  ;;  %v1517_v16 = vadd.f32 %v1516_v40, %v1514_v29  ;;  %v1547_v30 = vsel %vm1546_vm3, 1e-09, %v6775_v27  ;;  %v7036_v34 = vsub.f32 %v7034_v60, %v7035_v53 }
 0x19b   : >> { %v4900_v57 = vsel %vm4579_vm0, %v1588_v45, %v4643_v15  ;;  %v1594_v12 = vsel %vm1489_vm13, %v1588_v45, %v2906_v59  ;;  %v7029_v15 = vld [vmem:[#allocation57_spill] sm:$0xff]  ;;  %v7032_v45 = vld [vmem:[#allocation18_spill] sm:$0xff]  ;;  %vm450_vm0 = vmxor %vm448_vm1, %vm449_vm9 }
 0x19c   : >> { %7025 = vst [vmem:[#allocation47_spill] sm:$0xff] %v4900_v57  ;;  %v4910_v14 = vsel %vm1574_vm15, %v4530_v31, %v1594_v12  ;;  %v4914_v29 = vadd.f32 %v4900_v57, %v2906_v59  ;;  %v7030_v3 = vsub.f32 %v7028_v48, %v7029_v15  ;;  %2420 = vrcp.f32 %v1517_v16  ;;  %v7038_v12 = vld [vmem:[#allocation26_spill] sm:$0xff] }
 0x19d   : >> { %7026 = vst [vmem:[#allocation110_spill] sm:$0xff] %v4910_v14  ;;  %v7033_v21 = vsub.f32 %v7031_v58, %v7032_v45  ;;  %v619_v13 = vmul.f32 %v7036_v34, %v617_v22  ;;  %v7039_v32 = vsub.f32 %v7037_v36, %v7038_v12  ;;  %v465_v34 = vsel %vm449_vm9, %v7031_v58, %v2906_v59 }
 0x19e   : >> { %7027 = vst [vmem:[#allocation111_spill] sm:$0xff] %v4914_v29  ;;  %v459_v40 = vmul.f32 %v7030_v3, %v457_v17  ;;  %v1599_v20 = vsub.f32 %v4861_v19, %v4914_v29  ;;  %2422 = vrcp.f32 %v529_v51  ;;  %v7043_v51 = vld [vmem:[#allocation24_spill] sm:$0xff] }
 0x19f   : >> { %v462_v43 = vmul.f32 %v7033_v21, %v457_v17  ;;  %v622_v28 = vmul.f32 %v7039_v32, %v617_v22  ;;  %v1548_v21 = vadd.f32 %v1547_v30, %v1545_v25 }
 0x1a0   : >> { %v460_v38 = vadd.f32 %v459_v40, %v7029_v15  ;;  %vm1600_vm13 = vcmp.ge.f32.partialorder %v1599_v20, 0.0  ;;  %v7040_v40 = vld [vmem:[#allocation29_spill] sm:$0xff] }
 0x1a1   : >> { %v463_v17 = vadd.f32 %v462_v43, %v7032_v45  ;;  %v623_v32 = vadd.f32 %v622_v28, %v7038_v12  ;;  %v7041_v43 = vld [vmem:[#allocation36_spill] sm:$0xff]  ;;  %v4958_v28 = vsel %vm4615_vm10, %v4646_v42, %v7043_v51  ;;  %v620_v45 = vadd.f32 %v619_v13, %v7035_v53 }
 0x1a2   : >> { %v467_v22 = vsel %vm448_vm1, %v460_v38, %v7028_v48  ;;  %v4952_v16 = vsel %vm3569_vm4, %v7041_v43, %v7040_v40  ;;  %7044 = vst [vmem:[#allocation40_spill] sm:$0xff] %v4958_v28  ;;  %v1601_v15 = vsel %vm1600_vm13, 1e-09, %v6775_v27  ;;  %v7047_v40 = vld [vmem:[#allocation30_spill] sm:$0xff]  ;;  %v2419_v44 = vpop.eup %2418  ;;  %2424 = vrcp.f32 %v1548_v21 }
 0x1a3   : >> { %v4960_v25 = vsel %vm450_vm0, %v463_v17, %v465_v34  ;;  %v469_v30 = vsel %vm448_vm1, %v463_v17, %v2906_v59  ;;  %vm7048_vm4 = vcmp.ge.f32.partialorder %v7047_v40, 0.0  ;;  %v4989_v17 = vsel %vm450_vm0, %v460_v38, %v7028_v48 }
 0x1a4   : >> { %7045 = vst [vmem:[#allocation48_spill] sm:$0xff] %v4960_v25  ;;  %v4970_v3 = vsel %vm449_vm9, %v7031_v58, %v469_v30  ;;  %v4974_v56 = vadd.f32 %v4960_v25, %v2906_v59  ;;  %vm4980_vm10 = vmxor %vm524_vm6, %vm7048_vm4  ;;  %v4994_v43 = vsel %vm449_vm9, %v7028_v48, %v467_v22  ;;  %v1689_v37 = vsub.f32 %v4958_v28, %v4571_v61 }
 0x1a5   : >> { %vm7051_vm5 = vmmov %vm7048_vm4  ;;  %7052 = vst [vmem:[#allocation34_spill] sm:$0xff] %v4989_v17  ;;  %v4998_v51 = vadd.f32 %v4970_v3, %v2906_v59  ;;  %v540_v38 = vsel %vm524_vm6, %v7038_v12, %v2906_v59  ;;  %v629_v22 = vsel %vm524_vm6, %v623_v32, %v2906_v59  ;;  %v5013_v6 = vadd.f32 %v1601_v15, %v1599_v20 }
 0x1a6   : >> { %7046 = vst [vmem:[#allocation27_spill] sm:$0xff] %v4974_v56  ;;  %v625_v13 = vsel %vm7051_vm5, %v7037_v36, %v2906_v59  ;;  %v1687_v11 = vmul.f32 %v2419_v44, %v4544_v10  ;;  %v627_v21 = vsel %vm524_vm6, %v620_v45, %v7034_v60  ;;  %vm7054_vm7 = vmmov %vm7048_vm4  ;;  %v2421_v20 = vpop.eup %2420  ;;  %v7057_v10 = vsub.f32 %v4635_v0, %v4530_v31 }
 0x1a7   : >> { %v5002_v30 = vsel %vm4980_vm10, %v623_v32, %v625_v13  ;;  %7053 = vst [vmem:[#allocation28_spill] sm:$0xff] %v5013_v6  ;;  %v476_v13 = vsub.f32 %v4974_v56, %v4998_v51  ;;  %vm474_vm14 = vcmp.ge.f32.partialorder %v4998_v51, 0.0  ;;  %v5027_v32 = vsel %vm7054_vm7, %v7037_v36, %v629_v22  ;;  %vm7055_vm12 = vmmov %vm7048_vm4 }
 0x1a8   : >> { %v5031_v44 = vadd.f32 %v5002_v30, %v2906_v59  ;;  %v1688_v15 = vmin.f32 %v1687_v11, 1.0  ;;  %v5037_v39 = vadd.f32 %v5027_v32, %v2906_v59  ;;  %v1519_v50 = vmul.f32 %v2421_v20, %v4478_v47  ;;  %v2423_v22 = vpop.eup %2422  ;;  %vm525_vm5 = vmxor %vm449_vm9, %vm524_vm6 }
 0x1a9   : >> { %vm477_vm2 = vcmp.ge.f32.partialorder %v476_v13, 0.0  ;;  %v5044_v36 = vsel %vm4980_vm10, %v620_v45, %v7034_v60  ;;  %v5049_v11 = vsel %vm7055_vm12, %v7034_v60, %v627_v21  ;;  %v5060_v34 = vsel %vm474_vm14, %v4970_v3, %v3014_v5 }
 0x1aa   : >> { %v478_v52 = vsel %vm477_vm2, 1e-09, %v6775_v27  ;;  %v5051_v42 = vmul.f32 %v1689_v37, %v1688_v15  ;;  %v1693_v28 = vmul.f32 %v7057_v10, %v1688_v15  ;;  %v1520_v45 = vmin.f32 %v1519_v50, 1.0  ;;  %v7059_v10 = vld [vmem:[#allocation83_spill] sm:$0xff] }
 0x1ab   : >> { %v479_v20 = vadd.f32 %v478_v52, %v476_v13  ;;  %v531_v49 = vmul.f32 %v2423_v22, %v4204_v23  ;;  %vm632_vm3 = vcmp.ge.f32.partialorder %v5031_v44, 0.0  ;;  %v665_v37 = vsub.f32 %v5031_v44, %v5037_v39 }
 0x1ac   : >> { %7056 = vst [vmem:[#allocation26_spill] sm:$0xff] %v5051_v42  ;;  %v5067_v60 = vadd.f32 %v1693_v28, %v4530_v31  ;;  %v742_v40 = vsub.f32 %v5037_v39, %v7059_v10  ;;  %v7060_v50 = vsub.f32 %v4821_v9, %v4454_v7  ;;  %v7061_v21 = vsub.f32 %v4826_v46, %v4459_v4  ;;  %v7074_v42 = vld [vmem:[#allocation21_spill] sm:$0xff] }
 0x1ad   : >> { %2426 = vrcp.f32 %v479_v20  ;;  %v532_v22 = vmin.f32 %v531_v49, 1.0  ;;  %vm666_vm13 = vcmp.ge.f32.partialorder %v665_v37, 0.0  ;;  %vm663_vm0 = vcmp.ge.f32.partialorder %v5037_v39, 0.0  ;;  %v5083_v20 = vpop.eup %2424 }
 0x1ae   : >> { %7058 = vst [vmem:[#allocation29_spill] sm:$0xff] %v5067_v60  ;;  %v1522_v13 = vmul.f32 %v7060_v50, %v1520_v45  ;;  %v1525_v15 = vmul.f32 %v7061_v21, %v1520_v45  ;;  %v667_v31 = vsel %vm666_vm13, 1e-09, %v6775_v27  ;;  %vm743_vm4 = vcmp.ge.f32.partialorder %v742_v40, 0.0  ;;  %7062 = vst [vmem:[#allocation36_spill] sm:$0xff] %v5083_v20 }
 0x1af   : >> { %v7065_v49 = vsub.f32 %v7035_v53, %v7028_v48  ;;  %v7066_v21 = vsub.f32 %v7038_v12, %v7031_v58  ;;  %v5101_v28 = vsel %vm632_vm3, %v5002_v30, %v3014_v5  ;;  %v668_v0 = vadd.f32 %v667_v31, %v665_v37  ;;  %v7067_v37 = vld [vmem:[#allocation54_spill] sm:$0xff] }
 0x1b0   : >> { %v5086_v52 = vadd.f32 %v1522_v13, %v4454_v7  ;;  %v5089_v50 = vadd.f32 %v1525_v15, %v4459_v4  ;;  %vm740_vm10 = vcmp.ge.f32.partialorder %v7059_v10, 0.0  ;;  %v5112_v15 = vsel %vm663_vm0, %v5027_v32, %v3014_v5 }
 0x1b1   : >> { %v534_v45 = vmul.f32 %v7065_v49, %v532_v22  ;;  %v537_v60 = vmul.f32 %v7066_v21, %v532_v22  ;;  %v744_v22 = vsel %vm743_vm4, 1e-09, %v6775_v27  ;;  %2428 = vrcp.f32 %v668_v0 }
 0x1b2   : >> { %7063 = vst [vmem:[#allocation53_spill] sm:$0xff] %v5086_v52  ;;  %7064 = vst [vmem:[#allocation24_spill] sm:$0xff] %v5089_v50  ;;  %vm473_vm2 = vcmp.ge.f32.partialorder %v4974_v56, 0.0  ;;  %v745_v7 = vadd.f32 %v744_v22, %v742_v40  ;;  %v5158_v23 = vsel %vm740_vm10, %v7067_v37, %v3014_v5  ;;  %vm771_vm12 = vcmp.ge.f32.partialorder %v7071_v35, 0.0 }
 0x1b3   : >> { %v535_v4 = vadd.f32 %v534_v45, %v7028_v48  ;;  %v538_v13 = vadd.f32 %v537_v60, %v7031_v58  ;;  %v7068_v48 = vld [vmem:[#allocation15_spill] sm:$0xff]  ;;  %v7069_v58 = vld [vmem:[#allocation37_spill] sm:$0xff]  ;;  %v7073_v22 = vsub.f32 %v4970_v3, %v4960_v25  ;;  %v832_v61 = vmul.f32 %v7074_v42, %v7071_v35 }
 0x1b4   : >> { %vm774_vm7 = vcmp.ge.f32.partialorder %v7068_v48, 0.0  ;;  %2430 = vrcp.f32 %v745_v7  ;;  %v7072_v7 = vsub.f32 %v4994_v43, %v4989_v17  ;;  %v7076_v42 = vld [vmem:[#allocation49_spill] sm:$0xff]  ;;  %v7087_v18 = vsub.f32 %v4952_v16, %v5049_v11 }
 0x1b5   : >> { %v5126_v49 = vsel %vm525_vm5, %v535_v4, %v7035_v53  ;;  %v5128_v45 = vsel %vm525_vm5, %v538_v13, %v540_v38  ;;  %v542_v21 = vsel %vm449_vm9, %v535_v4, %v7035_v53  ;;  %v544_v0 = vsel %vm449_vm9, %v538_v13, %v2906_v59 }
 0x1b6   : >> { %v5139_v31 = vsel %vm524_vm6, %v7035_v53, %v542_v21  ;;  %v5144_v60 = vsel %vm524_vm6, %v7038_v12, %v544_v0  ;;  %v5148_v38 = vadd.f32 %v5128_v45, %v2906_v59  ;;  %v775_v53 = vsel %vm774_vm7, 1e-09, %v6775_v27  ;;  %vm475_vm7 = vmxor %vm473_vm2, %vm474_vm14 }
 0x1b7   : >> { %v5152_v4 = vadd.f32 %v5144_v60, %v2906_v59  ;;  %v2427_v13 = vpop.eup %2426  ;;  %v7095_v47 = vsub.f32 %v5144_v60, %v5128_v45  ;;  %v7096_v41 = vsub.f32 %v5044_v36, %v5139_v31 }
 0x1b8   : >> { %v549_v21 = vsub.f32 %v4998_v51, %v5148_v38  ;;  %v481_v33 = vmul.f32 %v2427_v13, %v4974_v56  ;;  %vm547_vm9 = vcmp.ge.f32.partialorder %v5148_v38, 0.0 }
 0x1b9   : >> { %v580_v12 = vsub.f32 %v5148_v38, %v5152_v4  ;;  %v634_v40 = vsub.f32 %v5152_v4, %v5031_v44  ;;  %v5189_v63 = vsel %vm547_vm9, %v5128_v45, %v3014_v5  ;;  %vm578_vm5 = vcmp.ge.f32.partialorder %v5152_v4, 0.0 }
 0x1ba   : >> { %vm550_vm6 = vcmp.ge.f32.partialorder %v549_v21, 0.0  ;;  %v482_v0 = vmin.f32 %v481_v33, 1.0 }
 0x1bb   : >> { %v551_v13 = vsel %vm550_vm6, 1e-09, %v6775_v27  ;;  %vm581_vm13 = vcmp.ge.f32.partialorder %v580_v12, 0.0  ;;  %vm635_vm4 = vcmp.ge.f32.partialorder %v634_v40, 0.0  ;;  %vm856_vm6 = vcmp.ge.f32.partialorder %v7076_v42, 0.0  ;;  %v7124_v42 = vld [vmem:[#allocation108_spill] sm:$0xff] }
 0x1bc   : >> { %v552_v14 = vadd.f32 %v551_v13, %v549_v21  ;;  %v582_v59 = vsel %vm581_vm13, 1e-09, %v6775_v27  ;;  %v484_v33 = vmul.f32 %v7072_v7, %v482_v0  ;;  %v487_v57 = vmul.f32 %v7073_v22, %v482_v0  ;;  %v2429_v13 = vpop.eup %2428 }
 0x1bd   : >> { %v583_v54 = vadd.f32 %v582_v59, %v580_v12  ;;  %v636_v21 = vsel %vm635_vm4, 1e-09, %v6775_v27  ;;  %v670_v7 = vmul.f32 %v2429_v13, %v5031_v44  ;;  %v776_v59 = vadd.f32 %v775_v53, %v7068_v48  ;;  %v7075_v12 = vld [vmem:[#allocation38_spill] sm:$0xff]  ;;  %v7079_v53 = vld [vmem:[#allocation43_spill] sm:$0xff] }
 0x1be   : >> { %2432 = vrcp.f32 %v552_v14  ;;  %v637_v55 = vadd.f32 %v636_v21, %v634_v40  ;;  %v485_v8 = vadd.f32 %v484_v33, %v4989_v17  ;;  %v488_v24 = vadd.f32 %v487_v57, %v4960_v25  ;;  %v7080_v33 = vld [vmem:[#allocation45_spill] sm:$0xff]  ;;  %v2431_v13 = vpop.eup %2430 }
 0x1bf   : >> { %2434 = vrcp.f32 %v583_v54  ;;  %v833_v14 = vmin.f32 %v832_v61, 1.0  ;;  %v834_v40 = vsub.f32 %v7075_v12, %v7069_v58  ;;  %v837_v0 = vsub.f32 %v7079_v53, %v7070_v2 }
 0x1c0   : >> { %2436 = vrcp.f32 %v637_v55  ;;  %v5214_v22 = vsel %vm475_vm7, %v485_v8, %v4994_v43  ;;  %v5217_v54 = vsel %vm475_vm7, %v488_v24, %v5060_v34  ;;  %v492_v57 = vsel %vm473_vm2, %v485_v8, %v4994_v43  ;;  %vm664_vm7 = vmxor %vm632_vm3, %vm663_vm0 }
 0x1c1   : >> { %7077 = vst [vmem:[#allocation30_spill] sm:$0xff] %v5214_v22  ;;  %7078 = vst [vmem:[#allocation83_spill] sm:$0xff] %v5217_v54  ;;  %v494_v55 = vsel %vm473_vm2, %v488_v24, %v3014_v5  ;;  %v5228_v61 = vsel %vm474_vm14, %v4994_v43, %v492_v57  ;;  %v671_v34 = vmin.f32 %v670_v7, 1.0  ;;  %vm825_vm13 = vcmp.ge.f32.partialorder %v7080_v33, 0.0 }
 0x1c2   : >> { %v5233_v48 = vsel %vm474_vm14, %v4970_v3, %v494_v55  ;;  %v5243_v24 = vmul.f32 %v5228_v61, %v5217_v54  ;;  %v835_v21 = vmul.f32 %v834_v40, %v833_v14  ;;  %v7081_v57 = vsub.f32 %v5049_v11, %v5044_v36  ;;  %vm5276_vm4 = vmxor %vm771_vm12, %vm825_vm13 }
 0x1c3   : >> { %v5239_v8 = vmul.f32 %v5233_v48, %v5214_v22  ;;  %v7082_v7 = vsub.f32 %v5027_v32, %v5002_v30  ;;  %v838_v25 = vmul.f32 %v837_v0, %v833_v14  ;;  %v7083_v22 = vld [vmem:[#allocation19_spill] sm:$0xff]  ;;  %v5260_v54 = vsel %vm578_vm5, %v5144_v60, %v3014_v5 }
 0x1c4   : >> { %v673_v55 = vmul.f32 %v7081_v57, %v671_v34  ;;  %v5254_v56 = vmul.f32 %v7083_v22, %v7080_v33  ;;  %v747_v40 = vmul.f32 %v2431_v13, %v5037_v39  ;;  %v5267_v57 = vsel %vm771_vm12, %v7070_v2, %v3014_v5 }
 0x1c5   : >> { %v676_v17 = vmul.f32 %v7082_v7, %v671_v34  ;;  %7084 = vst [vmem:[#allocation54_spill] sm:$0xff] %v5267_v57  ;;  %v836_v14 = vadd.f32 %v835_v21, %v7069_v58  ;;  %2438 = vrcp.f32 %v776_v59  ;;  %v841_v13 = vsel %vm825_vm13, %v7079_v53, %v3014_v5 }
 0x1c6   : >> { %v674_v34 = vadd.f32 %v673_v55, %v5044_v36  ;;  %v748_v55 = vmin.f32 %v747_v40, 1.0  ;;  %v5305_v27 = vadd.f32 %v838_v25, %v7070_v2 }
 0x1c7   : >> { %v677_v22 = vadd.f32 %v676_v17, %v5002_v30  ;;  %v5289_v17 = vsel %vm5276_vm4, %v836_v14, %v7075_v12  ;;  %v843_v59 = vsel %vm771_vm12, %v836_v14, %v7075_v12 }
 0x1c8   : >> { %v2433_v7 = vpop.eup %2432  ;;  %v681_v21 = vsel %vm632_vm3, %v674_v34, %v5049_v11  ;;  %v5310_v20 = vsel %vm664_vm7, %v674_v34, %v5049_v11  ;;  %v750_v1 = vmul.f32 %v7087_v18, %v748_v55 }
 0x1c9   : >> { %v683_v40 = vsel %vm632_vm3, %v677_v22, %v3014_v5  ;;  %v2435_v14 = vpop.eup %2434  ;;  %v554_v29 = vmul.f32 %v2433_v7, %v4998_v51  ;;  %v5322_v6 = vsel %vm664_vm7, %v677_v22, %v5112_v15  ;;  %v5327_v34 = vsel %vm663_vm0, %v5049_v11, %v681_v21  ;;  %vm5347_vm7 = vmxor %vm663_vm0, %vm740_vm10 }
 0x1ca   : >> { %v5315_v19 = vsel %vm663_vm0, %v5027_v32, %v683_v40  ;;  %v2437_v50 = vpop.eup %2436  ;;  %v585_v25 = vmul.f32 %v2435_v14, %v5148_v38  ;;  %v7088_v7 = vsub.f32 %v7067_v37, %v5027_v32  ;;  %v751_v18 = vadd.f32 %v750_v1, %v5049_v11  ;;  %v7091_v11 = vld [vmem:[#allocation46_spill] sm:$0xff] }
 0x1cb   : >> { %v555_v52 = vmin.f32 %v554_v29, 1.0  ;;  %v639_v9 = vmul.f32 %v2437_v50, %v5152_v4  ;;  %v5337_v14 = vsel %vm825_vm13, %v7075_v12, %v843_v59  ;;  %v5341_v22 = vmul.f32 %v5315_v19, %v5310_v20 }
 0x1cc   : >> { %v753_v40 = vmul.f32 %v7088_v7, %v748_v55  ;;  %v586_v15 = vmin.f32 %v585_v25, 1.0  ;;  %v5354_v1 = vsel %vm5276_vm4, %v5305_v27, %v841_v13  ;;  %v5360_v50 = vsel %vm856_vm6, %v7091_v11, %v3014_v5  ;;  %vm548_vm4 = vmxor %vm474_vm14, %vm547_vm9 }
 0x1cd   : >> { %v7092_v21 = vsub.f32 %v5126_v49, %v4994_v43  ;;  %v7093_v59 = vsub.f32 %v5128_v45, %v4970_v3  ;;  %v640_v7 = vmin.f32 %v639_v9, 1.0  ;;  %v5371_v0 = vsel %vm5347_vm7, %v751_v18, %v4952_v16 }
 0x1ce   : >> { %v7094_v13 = vsub.f32 %v5139_v31, %v5126_v49  ;;  %v591_v26 = vmul.f32 %v7095_v47, %v586_v15  ;;  %v758_v9 = vsel %vm663_vm0, %v751_v18, %v4952_v16  ;;  %v754_v62 = vadd.f32 %v753_v40, %v5027_v32 }
 0x1cf   : >> { %v557_v55 = vmul.f32 %v7092_v21, %v555_v52  ;;  %v560_v25 = vmul.f32 %v7093_v59, %v555_v52  ;;  %v5381_v21 = vmul.f32 %v5327_v34, %v5322_v6  ;;  %v2439_v57 = vpop.eup %2438 }
 0x1d0   : >> { %v588_v46 = vmul.f32 %v7094_v13, %v586_v15  ;;  %v642_v13 = vmul.f32 %v7096_v41, %v640_v7  ;;  %v592_v18 = vadd.f32 %v591_v26, %v5128_v45  ;;  %v5404_v41 = vsel %vm740_vm10, %v4952_v16, %v758_v9 }
 0x1d1   : >> { %v558_v52 = vadd.f32 %v557_v55, %v4994_v43  ;;  %v561_v59 = vadd.f32 %v560_v25, %v4970_v3  ;;  %v7097_v43 = vsub.f32 %v5002_v30, %v5144_v60 }
 0x1d2   : >> { %v589_v47 = vadd.f32 %v588_v46, %v5126_v49 }
 0x1d3   : >> { %v645_v3 = vmul.f32 %v7097_v43, %v640_v7  ;;  %v562_v32 = vsel %vm548_vm4, %v558_v52, %v5126_v49  ;;  %v564_v40 = vsel %vm548_vm4, %v561_v59, %v5189_v63  ;;  %v565_v15 = vsel %vm474_vm14, %v558_v52, %v5126_v49  ;;  %vm579_vm4 = vmxor %vm547_vm9, %vm578_vm5 }
 0x1d4   : >> { %v567_v46 = vsel %vm474_vm14, %v561_v59, %v3014_v5  ;;  %v566_v26 = vsel %vm547_vm9, %v5126_v49, %v565_v15  ;;  %v569_v25 = vmul.f32 %v564_v40, %v5228_v61  ;;  %v570_v63 = vmul.f32 %v562_v32, %v5233_v48  ;;  %vm633_vm14 = vmxor %vm578_vm5, %vm632_vm3 }
 0x1d5   : >> { %v568_v55 = vsel %vm547_vm9, %v5128_v45, %v567_v46  ;;  %v574_v51 = vmul.f32 %v566_v26, %v564_v40  ;;  %v593_v9 = vsel %vm579_vm4, %v589_v47, %v5139_v31  ;;  %v595_v52 = vsel %vm579_vm4, %v592_v18, %v5260_v54 }
 0x1d6   : >> { %v573_v7 = vmul.f32 %v568_v55, %v562_v32  ;;  %v571_v49 = vsub.f32 %v569_v25, %v570_v63  ;;  %v596_v45 = vsel %vm547_vm9, %v589_v47, %v5139_v31  ;;  %v598_v61 = vsel %vm547_vm9, %v592_v18, %v3014_v5 }
 0x1d7   : >> { %v600_v48 = vmul.f32 %v595_v52, %v566_v26  ;;  %v597_v43 = vsel %vm578_vm5, %v5139_v31, %v596_v45  ;;  %v599_v32 = vsel %vm578_vm5, %v5144_v60, %v598_v61  ;;  %v760_v54 = vsel %vm663_vm0, %v754_v62, %v3014_v5 }
 0x1d8   : >> { %v575_v59 = vsub.f32 %v573_v7, %v574_v51  ;;  %v7098_v47 = vsub.f32 %v5239_v8, %v5243_v24  ;;  %v601_v38 = vmul.f32 %v593_v9, %v568_v55  ;;  %v604_v18 = vmul.f32 %v599_v32, %v593_v9 }
 0x1d9   : >> { %v757_v15 = vsel %vm5347_vm7, %v754_v62, %v5158_v23  ;;  %v605_v46 = vmul.f32 %v597_v43, %v595_v52  ;;  %v643_v26 = vadd.f32 %v642_v13, %v5139_v31  ;;  %v646_v25 = vadd.f32 %v645_v3, %v5144_v60  ;;  %vm772_vm7 = vmxor %vm740_vm10, %vm771_vm12 }
 0x1da   : >> { %v572_v40 = vadd.f32 %v571_v49, %v7098_v47  ;;  %v691_v63 = vsub.f32 %v5341_v22, %v5381_v21  ;;  %v602_v7 = vsub.f32 %v600_v48, %v601_v38  ;;  %v5460_v8 = vsel %vm740_vm10, %v7067_v37, %v760_v54  ;;  %v7100_v54 = vld [vmem:[#allocation39_spill] sm:$0xff] }
 0x1db   : >> { %v845_v62 = vsel %vm771_vm12, %v5305_v27, %v3014_v5  ;;  %v647_v31 = vsel %vm633_vm14, %v643_v26, %v5044_v36  ;;  %v649_v60 = vsel %vm633_vm14, %v646_v25, %v5101_v28  ;;  %v650_v23 = vsel %vm578_vm5, %v643_v26, %v5044_v36 }
 0x1dc   : >> { %v576_v39 = vadd.f32 %v575_v59, %v572_v40  ;;  %v762_v24 = vmul.f32 %v757_v15, %v5327_v34  ;;  %v606_v29 = vsub.f32 %v604_v18, %v605_v46  ;;  %v651_v21 = vsel %vm632_vm3, %v5044_v36, %v650_v23  ;;  %v7104_v46 = vld [vmem:[#allocation82_spill] sm:$0xff]  ;;  %v7110_v23 = vld [vmem:[#allocation52_spill] sm:$0xff] }
 0x1dd   : >> { %v652_v27 = vsel %vm578_vm5, %v646_v25, %v3014_v5  ;;  %v654_v13 = vmul.f32 %v649_v60, %v597_v43  ;;  %v655_v3 = vmul.f32 %v647_v31, %v599_v32  ;;  %v659_v55 = vmul.f32 %v651_v21, %v649_v60  ;;  %v7106_v25 = vld [vmem:[#allocation50_spill] sm:$0xff]  ;;  %v7109_v60 = vld [vmem:[#allocation51_spill] sm:$0xff]  ;;  %vm857_vm5 = vmxor %vm825_vm13, %vm856_vm6 }
 0x1de   : >> { %v603_v22 = vadd.f32 %v602_v7, %v576_v39  ;;  %v653_v28 = vsel %vm632_vm3, %v5002_v30, %v652_v27  ;;  %v685_v34 = vmul.f32 %v5322_v6, %v651_v21  ;;  %v763_v36 = vmul.f32 %v5371_v0, %v5315_v19 }
 0x1df   : >> { %v658_v9 = vmul.f32 %v653_v28, %v647_v31  ;;  %v686_v52 = vmul.f32 %v5310_v20, %v653_v28  ;;  %v656_v49 = vsub.f32 %v654_v13, %v655_v3  ;;  %v766_v4 = vmul.f32 %v5460_v8, %v5371_v0 }
 0x1e0   : >> { %v607_v51 = vadd.f32 %v606_v29, %v603_v22  ;;  %v767_v45 = vmul.f32 %v5404_v41, %v757_v15  ;;  %v778_v61 = vmul.f32 %v2439_v57, %v7059_v10  ;;  %v846_v48 = vsel %vm825_vm13, %v7079_v53, %v845_v62  ;;  %v7108_v62 = vld [vmem:[#allocation41_spill] sm:$0xff] }
 0x1e1   : >> { %v660_v44 = vsub.f32 %v658_v9, %v659_v55  ;;  %v687_v30 = vsub.f32 %v685_v34, %v686_v52  ;;  %v764_v59 = vsub.f32 %v762_v24, %v763_v36  ;;  %v5493_v43 = vmul.f32 %v846_v48, %v5289_v17 }
 0x1e2   : >> { %v657_v6 = vadd.f32 %v656_v49, %v607_v51  ;;  %v768_v20 = vsub.f32 %v766_v4, %v767_v45  ;;  %v779_v19 = vmin.f32 %v778_v61, 1.0  ;;  %v5497_v0 = vmul.f32 %v5337_v14, %v5354_v1  ;;  %v7117_v45 = vld [vmem:[#allocation54_spill] sm:$0xff] }
 0x1e3   : >> { %v7099_v32 = vmin.f32 %v5254_v56, 1.0  ;;  %v7101_v57 = vsub.f32 %v7100_v54, %v7075_v12  ;;  %v7103_v38 = vsub.f32 %v7091_v11, %v7079_v53  ;;  %v7105_v26 = vmin.f32 %v7104_v46, 1.0 }
 0x1e4   : >> { %v661_v15 = vadd.f32 %v660_v44, %v657_v6  ;;  %v7107_v39 = vsub.f32 %v7106_v25, %v7100_v54  ;;  %v947_v31 = vadd.f32 %v7108_v62, %v7091_v11  ;;  %vm7111_vm3 = vcmp.ge.f32.partialorder %v7110_v23, 0.0  ;;  %v7126_v23 = vld [vmem:[#allocation104_spill] sm:$0xff] }
 0x1e5   : >> { %v866_v47 = vmul.f32 %v7101_v57, %v7099_v32  ;;  %v7102_v40 = vmov %v7099_v32  ;;  %v949_v24 = vsel %vm7111_vm3, %v7109_v60, %v3014_v5  ;;  %v7112_v56 = vsub.f32 %v7069_v58, %v4952_v16  ;;  %vm7114_vm0 = vmmov %vm7111_vm3 }
 0x1e6   : >> { %v869_v18 = vmul.f32 %v7103_v38, %v7102_v40  ;;  %v943_v7 = vmul.f32 %v7107_v39, %v7105_v26  ;;  %v7113_v29 = vsub.f32 %v7070_v2, %v7067_v37  ;;  %v853_v27 = vsub.f32 %v5493_v43, %v5497_v0  ;;  %vm5533_vm9 = vmxor %vm856_vm6, %vm7114_vm0  ;;  %v7133_v43 = vld [vmem:[#allocation36_spill] sm:$0xff] }
 0x1e7   : >> { %v781_v22 = vmul.f32 %v7112_v56, %v779_v19  ;;  %v867_v28 = vadd.f32 %v866_v47, %v7075_v12  ;;  %v688_v3 = vadd.f32 %v687_v30, %v661_v15  ;;  %v950_v12 = vsel %vm5533_vm9, %v947_v31, %v949_v24  ;;  %v7120_v24 = vld [vmem:[#allocation63_spill] sm:$0xff] }
 0x1e8   : >> { %v784_v21 = vmul.f32 %v7113_v29, %v779_v19  ;;  %v870_v55 = vadd.f32 %v869_v18, %v7079_v53  ;;  %v944_v51 = vadd.f32 %v943_v7, %v7100_v54  ;;  %v7121_v29 = vld [vmem:[#allocation62_spill] sm:$0xff]  ;;  %v1550_v0 = vmul.f32 %v7133_v43, %v7124_v42 }
 0x1e9   : >> { %v782_v9 = vadd.f32 %v781_v22, %v4952_v16  ;;  %v871_v52 = vsel %vm857_vm5, %v867_v28, %v7100_v54  ;;  %v874_v49 = vsel %vm825_vm13, %v867_v28, %v7100_v54  ;;  %v692_v36 = vadd.f32 %v691_v63, %v688_v3  ;;  %v7123_v28 = vld [vmem:[#allocation105_spill] sm:$0xff] }
 0x1ea   : >> { %v785_v34 = vadd.f32 %v784_v21, %v7067_v37  ;;  %v873_v53 = vsel %vm857_vm5, %v870_v55, %v5360_v50  ;;  %v875_v16 = vsel %vm856_vm6, %v7100_v54, %v874_v49  ;;  %v876_v37 = vsel %vm825_vm13, %v870_v55, %v3014_v5  ;;  %v7129_v49 = vld [vmem:[#allocation24_spill] sm:$0xff] }
 0x1eb   : >> { %v786_v4 = vsel %vm772_vm7, %v782_v9, %v7069_v58  ;;  %v789_v63 = vsel %vm740_vm10, %v782_v9, %v7069_v58  ;;  %v765_v30 = vadd.f32 %v764_v59, %v692_v36  ;;  %v877_v59 = vsel %vm856_vm6, %v7091_v11, %v876_v37 }
 0x1ec   : >> { %v788_v44 = vsel %vm772_vm7, %v785_v34, %v7117_v45  ;;  %v791_v50 = vsel %vm740_vm10, %v785_v34, %v3014_v5  ;;  %v790_v61 = vsel %vm771_vm12, %v7069_v58, %v789_v63  ;;  %v794_v19 = vmul.f32 %v786_v4, %v5460_v8  ;;  %vm7118_vm10 = vmmov %vm7114_vm0 }
 0x1ed   : >> { %v792_v33 = vsel %vm771_vm12, %v7070_v2, %v791_v50  ;;  %v793_v6 = vmul.f32 %v788_v44, %v5404_v41  ;;  %v798_v54 = vmul.f32 %v790_v61, %v788_v44  ;;  %v847_v57 = vmul.f32 %v5354_v1, %v790_v61  ;;  %vm7119_vm12 = vmmov %vm7114_vm0  ;;  %v7131_v44 = vld [vmem:[#allocation101_spill] sm:$0xff] }
 0x1ee   : >> { %v797_v32 = vmul.f32 %v792_v33, %v786_v4  ;;  %v769_v47 = vadd.f32 %v768_v20, %v765_v30  ;;  %v848_v10 = vmul.f32 %v5289_v17, %v792_v33  ;;  %v878_v58 = vmul.f32 %v873_v53, %v5337_v14  ;;  %v7130_v4 = vld [vmem:[#allocation98_spill] sm:$0xff]  ;;  %v7132_v61 = vld [vmem:[#allocation109_spill] sm:$0xff] }
 0x1ef   : >> { %v795_v40 = vsub.f32 %v793_v6, %v794_v19  ;;  %v879_v2 = vmul.f32 %v871_v52, %v846_v48  ;;  %v882_v38 = vmul.f32 %v877_v59, %v871_v52  ;;  %v883_v18 = vmul.f32 %v875_v16, %v873_v53 }
 0x1f0   : >> { %v799_v35 = vsub.f32 %v797_v32, %v798_v54  ;;  %v849_v41 = vsub.f32 %v847_v57, %v848_v10  ;;  %v948_v8 = vsel %vm5533_vm9, %v944_v51, %v7106_v25  ;;  %v951_v17 = vsel %vm856_vm6, %v944_v51, %v7106_v25  ;;  %v7127_v51 = vld [vmem:[#allocation103_spill] sm:$0xff]  ;;  %v7137_v57 = vld [vmem:[#allocation28_spill] sm:$0xff] }
 0x1f1   : >> { %v796_v1 = vadd.f32 %v795_v40, %v769_v47  ;;  %v880_v20 = vsub.f32 %v878_v58, %v879_v2  ;;  %v952_v14 = vsel %vm7118_vm10, %v7106_v25, %v951_v17  ;;  %v953_v11 = vsel %vm856_vm6, %v947_v31, %v3014_v5  ;;  %v7122_v25 = vld [vmem:[#allocation102_spill] sm:$0xff]  ;;  %v7136_v54 = vld [vmem:[#allocation111_spill] sm:$0xff]  ;;  %v7139_v10 = vld [vmem:[#allocation32_spill] sm:$0xff] }
 0x1f2   : >> { %v884_v48 = vsub.f32 %v882_v38, %v883_v18  ;;  %v954_v15 = vsel %vm7119_vm12, %v7109_v60, %v953_v11  ;;  %v955_v46 = vmul.f32 %v950_v12, %v875_v16  ;;  %v956_v26 = vmul.f32 %v948_v8, %v877_v59  ;;  %v7138_v47 = vld [vmem:[#allocation106_spill] sm:$0xff]  ;;  %v7140_v58 = vld [vmem:[#allocation56_spill] sm:$0xff]  ;;  %v7144_v18 = vld [vmem:[#allocation107_spill] sm:$0xff] }
 0x1f3   : >> { %v800_v39 = vadd.f32 %v799_v35, %v796_v1  ;;  %v959_v7 = vmul.f32 %v954_v15, %v948_v8  ;;  %v960_v62 = vmul.f32 %v952_v14, %v950_v12  ;;  %v986_v56 = vmul.f32 %v7120_v24, %v952_v14  ;;  %v7128_v12 = vld [vmem:[#allocation53_spill] sm:$0xff]  ;;  %v7141_v40 = vld [vmem:[#allocation26_spill] sm:$0xff]  ;;  %v7145_v8 = vld [vmem:[#allocation47_spill] sm:$0xff] }
 0x1f4   : >> { %v957_v22 = vsub.f32 %v955_v46, %v956_v26  ;;  %v987_v21 = vmul.f32 %v7121_v29, %v954_v15  ;;  %vm1512_vm6 = vcmp.ge.f32.partialorder %v7124_v42, 0.0  ;;  %v1530_v9 = vsel %vm1435_vm8, %v7128_v12, %v7127_v51  ;;  %v7149_v15 = vld [vmem:[#allocation110_spill] sm:$0xff]  ;;  %v7150_v26 = vld [vmem:[#allocation13_spill] sm:$0xff] }
 0x1f5   : >> { %v850_v31 = vadd.f32 %v849_v41, %v800_v39  ;;  %v961_v3 = vsub.f32 %v959_v7, %v960_v62  ;;  %vm1513_vm13 = vmxor %vm1435_vm8, %vm1512_vm6  ;;  %v1528_v55 = vsel %vm1512_vm6, %v7126_v23, %v3014_v5  ;;  %v1531_v53 = vsel %vm1512_vm6, %v7127_v51, %v1530_v9  ;;  %v7151_v7 = vld [vmem:[#allocation20_spill] sm:$0xff] }
 0x1f6   : >> { %v988_v34 = vsub.f32 %v986_v56, %v987_v21  ;;  %v1527_v52 = vsel %vm1513_vm13, %v7128_v12, %v7127_v51  ;;  %v1529_v36 = vsel %vm1513_vm13, %v7129_v49, %v1528_v55  ;;  %v1532_v37 = vsel %vm1435_vm8, %v7129_v49, %v3014_v5  ;;  %v7152_v62 = vld [vmem:[#allocation16_spill] sm:$0xff] }
 0x1f7   : >> { %v854_v16 = vadd.f32 %v853_v27, %v850_v31  ;;  %v5630_v45 = vmul.f32 %v1529_v36, %v7130_v4  ;;  %v5633_v63 = vmul.f32 %v1527_v52, %v7131_v44  ;;  %v1533_v50 = vsel %vm1512_vm6, %v7126_v23, %v1532_v37 }
 0x1f8   : >> { %v5638_v30 = vmul.f32 %v1531_v53, %v1529_v36  ;;  %vm1543_vm4 = vcmp.ge.f32.partialorder %v7132_v61, 0.0  ;;  %v5645_v6 = vmul.f32 %v1533_v50, %v1527_v52  ;;  %v1551_v32 = vmin.f32 %v1550_v0, 1.0  ;;  %v7197_v52 = vld [vmem:[#allocation12_spill] sm:$0xff] }
 0x1f9   : >> { %v881_v27 = vadd.f32 %v880_v20, %v854_v16  ;;  %vm5651_vm8 = vmxor %vm1512_vm6, %vm1543_vm4  ;;  %vm1597_vm14 = vcmp.ge.f32.partialorder %v7136_v54, 0.0  ;;  %2440 = vrcp.f32 %v7137_v57  ;;  %v1606_v59 = vsub.f32 %v7139_v10, %v7138_v47  ;;  %v7161_v57 = vld [vmem:[#allocation64_spill] sm:$0xff] }
 0x1fa   : >> { %v1691_v35 = vadd.f32 %v7141_v40, %v7140_v58  ;;  %vm5667_vm3 = vmxor %vm1543_vm4, %vm1597_vm14  ;;  %v1609_v17 = vsub.f32 %v7145_v8, %v7144_v18  ;;  %v7146_v1 = vsub.f32 %v7138_v47, %v7127_v51  ;;  %v7147_v14 = vsub.f32 %v7144_v18, %v7126_v23  ;;  %v7162_v58 = vld [vmem:[#allocation65_spill] sm:$0xff] }
 0x1fb   : >> { %v885_v2 = vadd.f32 %v884_v48, %v881_v27  ;;  %v7148_v48 = vld [vmem:[#allocation14_spill] sm:$0xff]  ;;  %v1637_v39 = vsub.f32 %v7150_v26, %v7139_v10  ;;  %v1677_v56 = vsel %vm1466_vm11, %v7152_v62, %v7151_v7  ;;  %v1640_v21 = vsub.f32 %v7149_v15, %v7145_v8  ;;  %v7189_v62 = vld [vmem:[#allocation77_spill] sm:$0xff] }
 0x1fc   : >> { %v1553_v20 = vmul.f32 %v7146_v1, %v1551_v32  ;;  %v1556_v11 = vmul.f32 %v7147_v14, %v1551_v32  ;;  %v5681_v46 = vadd.f32 %v7149_v15, %v7148_v48  ;;  %v1559_v9 = vsel %vm1543_vm4, %v7144_v18, %v3014_v5 }
 0x1fd   : >> { %v958_v29 = vadd.f32 %v957_v22, %v885_v2  ;;  %v7164_v2 = vmov -1e-09  }
 0x1fe   : >> { %v1554_v31 = vadd.f32 %v1553_v20, %v7127_v51  ;;  %v1557_v60 = vadd.f32 %v1556_v11, %v7126_v23  ;;  %vm1628_vm0 = vcmp.ge.f32.partialorder %v5681_v46, 0.0  ;;  %v1630_v55 = vsub.f32 %v7136_v54, %v5681_v46  ;;  %v7156_v23 = vld [vmem:[#allocation85_spill] sm:$0xff]  ;;  %v7157_v51 = vld [vmem:[#allocation40_spill] sm:$0xff] }
 0x1ff   : >> { %v962_v12 = vadd.f32 %v961_v3, %v958_v29  ;;  %vm5704_vm9 = vmxor %vm1597_vm14, %vm1628_vm0  ;;  %vm1680_vm5 = vcmp.ge.f32.partialorder %v7156_v23, 0.0  ;;  %v1698_v49 = vsel %vm1574_vm15, %v1691_v35, %v7157_v51 }
 0x200   : >> { %v1558_v3 = vsel %vm5651_vm8, %v1554_v31, %v7138_v47  ;;  %v1560_v36 = vsel %vm5651_vm8, %v1557_v60, %v1559_v9  ;;  %v1561_v16 = vsel %vm1512_vm6, %v1554_v31, %v7138_v47  ;;  %v1563_v37 = vsel %vm1512_vm6, %v1557_v60, %v3014_v5  ;;  %vm5727_vm7 = vmxor %vm1574_vm15, %vm1680_vm5  ;;  %v7166_v31 = vld [vmem:[#allocation29_spill] sm:$0xff] }
 0x201   : >> { %v989_v44 = vadd.f32 %v988_v34, %v962_v12  ;;  %v1562_v43 = vsel %vm1543_vm4, %v7138_v47, %v1561_v16  ;;  %v1564_v0 = vsel %vm1543_vm4, %v7144_v18, %v1563_v37  ;;  %v5737_v27 = vmul.f32 %v1560_v36, %v1531_v53  ;;  %v7165_v53 = vld [vmem:[#allocation61_spill] sm:$0xff]  ;;  %v7168_v12 = vld [vmem:[#allocation67_spill] sm:$0xff] }
 0x202   : >> { %v5739_v42 = vmul.f32 %v1558_v3, %v1533_v50  ;;  %v5741_v19 = vmul.f32 %v1564_v0, %v1558_v3  ;;  %v5743_v32 = vmul.f32 %v1562_v43, %v1560_v36  ;;  %vm1631_vm10 = vcmp.ge.f32.partialorder %v1630_v55, 0.0 }
 0x203   : >> { %v7163_v34 = vsub.f32 %v7161_v57, %v7162_v58  ;;  %v1632_v1 = vsel %vm1631_vm10, 1e-09, %v7164_v2  ;;  %v5752_v20 = vsel %vm5727_vm7, %v1691_v35, %v7157_v51  ;;  %v1696_v50 = vsel %vm1680_vm5, %v7165_v53, %v7148_v48  ;;  %v2441_v14 = vpop.eup %2440  ;;  %v7167_v35 = vld [vmem:[#allocation66_spill] sm:$0xff]  ;;  %v7171_v57 = vld [vmem:[#allocation69_spill] sm:$0xff] }
 0x204   : >> { %v1633_v29 = vadd.f32 %v1632_v1, %v1630_v55  ;;  %v5765_v60 = vsel %vm5727_vm7, %v7166_v31, %v1696_v50  ;;  %v7169_v9 = vsub.f32 %v7167_v35, %v7168_v12  ;;  %v1604_v36 = vmul.f32 %v2441_v14, %v7132_v61  ;;  %v7174_v35 = vld [vmem:[#allocation70_spill] sm:$0xff]  ;;  %v7194_v61 = vld [vmem:[#allocation80_spill] sm:$0xff] }
 0x205   : >> { %v993_v40 = vadd.f32 %v7163_v34, %v989_v44  ;;  %v5774_v16 = vsel %vm1680_vm5, %v7157_v51, %v1698_v49  ;;  %v1700_v55 = vsel %vm1574_vm15, %v7166_v31, %v7148_v48  ;;  %v5787_v4 = vadd.f32 %v5765_v60, %v7148_v48  ;;  %v7170_v49 = vld [vmem:[#allocation68_spill] sm:$0xff]  ;;  %v7173_v31 = vld [vmem:[#allocation71_spill] sm:$0xff] }
 0x206   : >> { %2442 = vrcp.f32 %v1633_v29  ;;  %v5783_v37 = vsel %vm1680_vm5, %v7165_v53, %v1700_v55  ;;  %v1712_v44 = vsub.f32 %v5752_v20, %v7150_v26  ;;  %v7172_v58 = vsub.f32 %v7170_v49, %v7171_v57  ;;  %v7176_v55 = vld [vmem:[#allocation11_spill] sm:$0xff] }
 0x207   : >> { %v1043_v3 = vadd.f32 %v7169_v9, %v993_v40  ;;  %v1605_v40 = vmin.f32 %v1604_v36, 1.0  ;;  %v5798_v1 = vadd.f32 %v5783_v37, %v7148_v48  ;;  %vm1703_vm15 = vcmp.ge.f32.partialorder %v5787_v4, 0.0 }
 0x208   : >> { %v1705_v50 = vsub.f32 %v5681_v46, %v5787_v4  ;;  %v7175_v12 = vsub.f32 %v7173_v31, %v7174_v35  ;;  %vm7177_vm12 = vcmp.ge.f32.partialorder %v7176_v55, 0.0  ;;  %vm5819_vm6 = vmxor %vm1628_vm0, %vm1703_vm15 }
 0x209   : >> { %v1047_v34 = vadd.f32 %v7172_v58, %v1043_v3  ;;  %v1607_v3 = vmul.f32 %v1606_v59, %v1605_v40  ;;  %v1610_v36 = vmul.f32 %v1609_v17, %v1605_v40  ;;  %v5813_v49 = vsel %vm7177_vm12, %v7151_v7, %v1677_v56  ;;  %v7180_v17 = vld [vmem:[#allocation73_spill] sm:$0xff]  ;;  %v7181_v58 = vld [vmem:[#allocation72_spill] sm:$0xff] }
 0x20a   : >> { %vm1706_vm13 = vcmp.ge.f32.partialorder %v1705_v50, 0.0  ;;  %vm1734_vm8 = vcmp.ge.f32.partialorder %v5798_v1, 0.0  ;;  %v1736_v59 = vsub.f32 %v5787_v4, %v5798_v1 }
 0x20b   : >> { %v1074_v9 = vadd.f32 %v7175_v12, %v1047_v34  ;;  %v7182_v34 = vsub.f32 %v7180_v17, %v7181_v58  ;;  %v1608_v7 = vadd.f32 %v1607_v3, %v7138_v47  ;;  %v1611_v56 = vadd.f32 %v1610_v36, %v7144_v18  ;;  %vm5836_vm7 = vmxor %vm1703_vm15, %vm1734_vm8  ;;  %v7185_v18 = vld [vmem:[#allocation74_spill] sm:$0xff]  ;;  %v7186_v3 = vld [vmem:[#allocation75_spill] sm:$0xff] }
 0x20c   : >> { %v1707_v31 = vsel %vm1706_vm13, 1e-09, %v7164_v2  ;;  %v1613_v12 = vsel %vm1597_vm14, %v7145_v8, %v3014_v5  ;;  %vm1737_vm10 = vcmp.ge.f32.partialorder %v1736_v59, 0.0  ;;  %v5846_v47 = vsub.f32 %v7148_v48, %v5813_v49 }
 0x20d   : >> { %v1078_v40 = vadd.f32 %v7182_v34, %v1074_v9  ;;  %v1708_v9 = vadd.f32 %v1707_v31, %v1705_v50  ;;  %v7187_v36 = vsub.f32 %v7185_v18, %v7186_v3  ;;  %v1612_v58 = vsel %vm5667_vm3, %v1608_v7, %v7139_v10 }
 0x20e   : >> { %v1614_v34 = vsel %vm5667_vm3, %v1611_v56, %v1613_v12  ;;  %v1615_v50 = vsel %vm1543_vm4, %v1608_v7, %v7139_v10  ;;  %v1617_v18 = vsel %vm1543_vm4, %v1611_v56, %v3014_v5  ;;  %v5867_v3 = vmul.f32 %v1612_v58, %v1564_v0 }
 0x20f   : >> { %v1151_v17 = vadd.f32 %v7187_v36, %v1078_v40  ;;  %v1616_v31 = vsel %vm1597_vm14, %v7139_v10, %v1615_v50  ;;  %v5865_v40 = vmul.f32 %v1614_v34, %v1562_v43  ;;  %v7188_v36 = vld [vmem:[#allocation76_spill] sm:$0xff]  ;;  %v1618_v7 = vsel %vm1597_vm14, %v7145_v8, %v1617_v18 }
 0x210   : >> { %v7190_v41 = vsub.f32 %v7188_v36, %v7189_v62  ;;  %v5875_v11 = vmul.f32 %v1616_v31, %v1614_v34  ;;  %2444 = vrcp.f32 %v1708_v9  ;;  %v2443_v50 = vpop.eup %2442  ;;  %v5879_v56 = vmul.f32 %v1618_v7, %v1612_v58  ;;  %v7191_v62 = vld [vmem:[#allocation78_spill] sm:$0xff]  ;;  %v7195_v58 = vld [vmem:[#allocation81_spill] sm:$0xff] }
 0x211   : >> { %v1738_v43 = vsel %vm1737_vm10, 1e-09, %v7164_v2  ;;  %v1767_v0 = vsub.f32 %v7156_v23, %v5846_v47  ;;  %v1635_v34 = vmul.f32 %v2443_v50, %v7136_v54  ;;  %v7196_v38 = vsub.f32 %v7194_v61, %v7195_v58  ;;  %v7201_v61 = vld [vmem:[#allocation10_spill] sm:$0xff]  ;;  %v7205_v58 = vld [vmem:[#allocation84_spill] sm:$0xff] }
 0x212   : >> { %v1155_v12 = vadd.f32 %v7190_v41, %v1151_v17  ;;  %v7192_v17 = vld [vmem:[#allocation79_spill] sm:$0xff]  ;;  %v1739_v18 = vadd.f32 %v1738_v43, %v1736_v59  ;;  %v1625_v9 = vsub.f32 %v5879_v56, %v5875_v11  ;;  %v7233_v54 = vld [vmem:[#allocation96_spill] sm:$0xff] }
 0x213   : >> { %v7193_v36 = vsub.f32 %v7191_v62, %v7192_v17  ;;  %vm1768_vm4 = vcmp.ge.f32.partialorder %v1767_v0, 0.0  ;;  %v1636_v13 = vmin.f32 %v1635_v34, 1.0  ;;  %v1850_v62 = vsub.f32 %v5846_v47, %v7197_v52  ;;  %v7199_v17 = vld [vmem:[#allocation58_spill] sm:$0xff] }
 0x214   : >> { %2446 = vrcp.f32 %v1739_v18  ;;  %v1769_v29 = vsel %vm1768_vm4, 1e-09, %v7164_v2  ;;  %v7204_v18 = vld [vmem:[#allocation17_spill] sm:$0xff] }
 0x215   : >> { %v1182_v41 = vadd.f32 %v7193_v36, %v1155_v12  ;;  %v1770_v14 = vadd.f32 %v1769_v29, %v1767_v0  ;;  %v7198_v12 = vld [vmem:[#allocation35_spill] sm:$0xff]  ;;  %v1638_v43 = vmul.f32 %v1637_v39, %v1636_v13  ;;  %vm1851_vm3 = vcmp.ge.f32.partialorder %v1850_v62, 0.0  ;;  %v7202_v36 = vld [vmem:[#allocation60_spill] sm:$0xff] }
 0x216   : >> { %v7200_v50 = vsub.f32 %v7198_v12, %v7199_v17  ;;  %v7203_v29 = vsub.f32 %v7201_v61, %v7202_v36  ;;  %v1675_v39 = vsel %vm1466_vm11, %v7205_v58, %v7204_v18  ;;  %v7206_v12 = vld [vmem:[#allocation31_spill] sm:$0xff]  ;;  %v7209_v36 = vld [vmem:[#allocation25_spill] sm:$0xff]  ;;  %vm7216_vm11 = vmmov %vm7177_vm12 }
 0x217   : >> { %v1186_v33 = vadd.f32 %v7196_v38, %v1182_v41  ;;  %v1641_v38 = vmul.f32 %v1640_v21, %v1636_v13  ;;  %2448 = vrcp.f32 %v1770_v14  ;;  %v1639_v41 = vadd.f32 %v1638_v43, %v7139_v10  ;;  %v7207_v17 = vld [vmem:[#allocation23_spill] sm:$0xff] }
 0x218   : >> { %v1644_v13 = vsel %vm1628_vm0, %v7149_v15, %v3014_v5  ;;  %v7213_v58 = vld [vmem:[#allocation87_spill] sm:$0xff] }
 0x219   : >> { %v1236_v59 = vadd.f32 %v7200_v50, %v1186_v33  ;;  %v1642_v34 = vadd.f32 %v1641_v38, %v7145_v8  ;;  %v1852_v33 = vsel %vm1851_vm3, 1e-09, %v7164_v2  ;;  %v7208_v50 = vsub.f32 %v7206_v12, %v7207_v17  ;;  %v7215_v17 = vld [vmem:[#allocation9_spill] sm:$0xff] }
 0x21a   : >> { %v1853_v21 = vadd.f32 %v1852_v33, %v1850_v62  ;;  %v2445_v14 = vpop.eup %2444  ;;  %v1643_v8 = vsel %vm5704_vm9, %v1639_v41, %v7150_v26  ;;  %v1646_v24 = vsel %vm1597_vm14, %v1639_v41, %v7150_v26 }
 0x21b   : >> { %v1240_v0 = vadd.f32 %v7203_v29, %v1236_v59  ;;  %v1645_v59 = vsel %vm5704_vm9, %v1642_v34, %v1644_v13  ;;  %v1647_v62 = vsel %vm1628_vm0, %v7150_v26, %v1646_v24  ;;  %v1648_v43 = vsel %vm1597_vm14, %v1642_v34, %v3014_v5  ;;  %v7210_v29 = vld [vmem:[#allocation22_spill] sm:$0xff]  ;;  %v7217_v24 = vld [vmem:[#allocation88_spill] sm:$0xff] }
 0x21c   : >> { %v5937_v38 = vmul.f32 %v1645_v59, %v1616_v31  ;;  %v5939_v61 = vmul.f32 %v1643_v8, %v1618_v7  ;;  %v7211_v22 = vsub.f32 %v7209_v36, %v7210_v29  ;;  %v1649_v41 = vsel %vm1628_vm0, %v7149_v15, %v1648_v43  ;;  %v7212_v7 = vld [vmem:[#allocation86_spill] sm:$0xff] }
 0x21d   : >> { %v1267_v10 = vadd.f32 %v7208_v50, %v1240_v0  ;;  %v5947_v33 = vmul.f32 %v1647_v62, %v1645_v59  ;;  %v1710_v18 = vmul.f32 %v2445_v14, %v5681_v46  ;;  %v5952_v34 = vmul.f32 %v1649_v41, %v1643_v8  ;;  %v7218_v8 = vld [vmem:[#allocation89_spill] sm:$0xff] }
 0x21e   : >> { %2450 = vrcp.f32 %v1853_v21  ;;  %v2447_v31 = vpop.eup %2446  ;;  %v7214_v13 = vsub.f32 %v7212_v7, %v7213_v58  ;;  %v5960_v50 = vsel %vm7216_vm11, %v7215_v17, %v1675_v39  ;;  %v7219_v43 = vsub.f32 %v7217_v24, %v7218_v8  ;;  %v7222_v7 = vld [vmem:[#allocation91_spill] sm:$0xff] }
 0x21f   : >> { %v1271_v0 = vadd.f32 %v7211_v22, %v1267_v10  ;;  %v1711_v10 = vmin.f32 %v1710_v18, 1.0  ;;  %v1741_v59 = vmul.f32 %v2447_v31, %v5787_v4  ;;  %v7220_v29 = vsub.f32 %v5765_v60, %v7149_v15 }
 0x220   : >> { %v1719_v22 = vsel %vm1703_vm15, %v5765_v60, %v3014_v5  ;;  %v1750_v18 = vsel %vm1734_vm8, %v5783_v37, %v3014_v5  ;;  %v1774_v31 = vsub.f32 %v5960_v50, %v7157_v51  ;;  %v7225_v8 = vsub.f32 %v5783_v37, %v5765_v60 }
 0x221   : >> { %v1344_v12 = vadd.f32 %v7214_v13, %v1271_v0  ;;  %v1713_v36 = vmul.f32 %v1712_v44, %v1711_v10  ;;  %v1716_v55 = vmul.f32 %v7220_v29, %v1711_v10  ;;  %v2449_v39 = vpop.eup %2448  ;;  %v1742_v0 = vmin.f32 %v1741_v59, 1.0  ;;  %v7221_v44 = vld [vmem:[#allocation90_spill] sm:$0xff] }
 0x222   : >> { %v7223_v58 = vsub.f32 %v7221_v44, %v7222_v7  ;;  %v1777_v10 = vsub.f32 %v5813_v49, %v7165_v53  ;;  %v7224_v59 = vsub.f32 %v5774_v16, %v5752_v20  ;;  %vm1765_vm14 = vcmp.ge.f32.partialorder %v5846_v47, 0.0 }
 0x223   : >> { %v1348_v21 = vadd.f32 %v7219_v43, %v1344_v12  ;;  %v1714_v12 = vadd.f32 %v1713_v36, %v7150_v26  ;;  %v1717_v17 = vadd.f32 %v1716_v55, %v7149_v15  ;;  %v1747_v43 = vmul.f32 %v7225_v8, %v1742_v0  ;;  %v7227_v36 = vld [vmem:[#allocation92_spill] sm:$0xff]  ;;  %v7228_v15 = vld [vmem:[#allocation93_spill] sm:$0xff]  ;;  %vm1849_vm12 = vmxor %vm1765_vm14, %vm448_vm1 }
 0x224   : >> { %v1744_v24 = vmul.f32 %v7224_v59, %v1742_v0  ;;  %v1772_v29 = vmul.f32 %v2449_v39, %v7156_v23  ;;  %v7229_v55 = vsub.f32 %v7227_v36, %v7228_v15  ;;  %v7230_v36 = vld [vmem:[#allocation94_spill] sm:$0xff]  ;;  %v7231_v15 = vld [vmem:[#allocation95_spill] sm:$0xff]  ;;  %v7249_v56 = vsub.f32 %v5952_v34, %v5947_v33 }
 0x225   : >> { %v1375_v13 = vadd.f32 %v7223_v58, %v1348_v21  ;;  %v7226_v21 = vld [vmem:[#allocation57_spill] sm:$0xff]  ;;  %v1718_v7 = vsel %vm5819_vm6, %v1714_v12, %v5752_v20  ;;  %v1720_v58 = vsel %vm5819_vm6, %v1717_v17, %v1719_v22  ;;  %v1721_v0 = vsel %vm1628_vm0, %v1714_v12, %v5752_v20 }
 0x226   : >> { %v1857_v26 = vsub.f32 %v7226_v21, %v5960_v50  ;;  %v1722_v39 = vsel %vm1703_vm15, %v5752_v20, %v1721_v0  ;;  %v1723_v59 = vsel %vm1628_vm0, %v1717_v17, %v3014_v5  ;;  %v6020_v8 = vmul.f32 %v1718_v7, %v1649_v41  ;;  %vm1766_vm0 = vmxor %vm1680_vm5, %vm1765_vm14 }
 0x227   : >> { %v1379_v44 = vadd.f32 %v7229_v55, %v1375_v13  ;;  %v6018_v13 = vmul.f32 %v1720_v58, %v1647_v62  ;;  %v7232_v57 = vsub.f32 %v7230_v36, %v7231_v15  ;;  %v1724_v12 = vsel %vm1703_vm15, %v5765_v60, %v1723_v59  ;;  %v7234_v36 = vld [vmem:[#allocation97_spill] sm:$0xff]  ;;  %v7237_v59 = vld [vmem:[#allocation100_spill] sm:$0xff] }
 0x228   : >> { %v6028_v55 = vmul.f32 %v1722_v39, %v1720_v58  ;;  %v1745_v0 = vadd.f32 %v1744_v24, %v5752_v20  ;;  %v2451_v14 = vpop.eup %2450  ;;  %v6033_v62 = vmul.f32 %v1724_v12, %v1718_v7  ;;  %v1748_v41 = vadd.f32 %v1747_v43, %v5765_v60 }
 0x229   : >> { %v1429_v22 = vadd.f32 %v7232_v57, %v1379_v44  ;;  %v1727_v46 = vsub.f32 %v6018_v13, %v6020_v8  ;;  %v1773_v17 = vmin.f32 %v1772_v29, 1.0  ;;  %v7235_v44 = vsub.f32 %v7233_v54, %v7234_v36  ;;  %v7236_v29 = vld [vmem:[#allocation99_spill] sm:$0xff] }
 0x22a   : >> { %v1749_v58 = vsel %vm5836_vm7, %v1745_v0, %v5774_v16  ;;  %v1752_v20 = vsel %vm1703_vm15, %v1745_v0, %v5774_v16  ;;  %v1855_v24 = vmul.f32 %v2451_v14, %v5846_v47  ;;  %v1731_v7 = vsub.f32 %v6033_v62, %v6028_v55 }
 0x22b   : >> { %v1433_v15 = vadd.f32 %v7235_v44, %v1429_v22  ;;  %v1751_v60 = vsel %vm5836_vm7, %v1748_v41, %v1750_v18  ;;  %v6053_v54 = vsel %vm1734_vm8, %v5774_v16, %v1752_v20  ;;  %v1754_v43 = vsel %vm1703_vm15, %v1748_v41, %v3014_v5 }
 0x22c   : >> { %v7238_v57 = vsub.f32 %v7236_v29, %v7237_v59  ;;  %v6064_v14 = vsel %vm1734_vm8, %v5783_v37, %v1754_v43  ;;  %v6066_v35 = vmul.f32 %v1751_v60, %v1722_v39  ;;  %v6068_v18 = vmul.f32 %v1749_v58, %v1724_v12  ;;  %v7240_v39 = vld [vmem:[#allocation18_spill] sm:$0xff] }
 0x22d   : >> { %v6071_v0 = vmul.f32 %v6064_v14, %v1749_v58  ;;  %v6074_v36 = vmul.f32 %v6053_v54, %v1751_v60  ;;  %v1775_v4 = vmul.f32 %v1774_v31, %v1773_v17  ;;  %v1778_v41 = vmul.f32 %v1777_v10, %v1773_v17 }
 0x22e   : >> { %v1460_v22 = vadd.f32 %v7238_v57, %v1433_v15  ;;  %v7239_v44 = vsub.f32 %v7123_v28, %v7122_v25  ;;  %v1758_v20 = vsub.f32 %v6066_v35, %v6068_v18  ;;  %v1856_v43 = vmin.f32 %v1855_v24, 1.0 }
 0x22f   : >> { %v1860_v12 = vsub.f32 %v7240_v39, %v5813_v49  ;;  %v1762_v58 = vsub.f32 %v6071_v0, %v6074_v36  ;;  %v1776_v29 = vadd.f32 %v1775_v4, %v7157_v51  ;;  %v1779_v60 = vadd.f32 %v1778_v41, %v7165_v53 }
 0x230   : >> { %v1464_v15 = vadd.f32 %v7239_v44, %v1460_v22  ;;  %v7241_v31 = vsub.f32 %v5630_v45, %v5633_v63  ;;  %v1781_v25 = vsel %vm1765_vm14, %v5813_v49, %v7148_v48  ;;  %v1858_v28 = vmul.f32 %v1857_v26, %v1856_v43 }
 0x231   : >> { %v1861_v17 = vmul.f32 %v1860_v12, %v1856_v43  ;;  %v6099_v51 = vsel %vm1766_vm0, %v1776_v29, %v5960_v50  ;;  %v6101_v53 = vsel %vm1766_vm0, %v1779_v60, %v1781_v25  ;;  %v1783_v45 = vsel %vm1680_vm5, %v1776_v29, %v5960_v50 }
 0x232   : >> { %v1537_v10 = vadd.f32 %v7241_v31, %v1464_v15  ;;  %v1785_v63 = vsel %vm1680_vm5, %v1779_v60, %v7148_v48  ;;  %v7242_v24 = vsub.f32 %v5645_v6, %v5638_v30  ;;  %v6115_v26 = vsel %vm1765_vm14, %v5960_v50, %v1783_v45 }
 0x233   : >> { %v6120_v57 = vsel %vm1765_vm14, %v5813_v49, %v1785_v63  ;;  %v6124_v22 = vadd.f32 %v6101_v53, %v7148_v48  ;;  %v1797_v23 = vsub.f32 %v6099_v51, %v5774_v16  ;;  %v1800_v30 = vsub.f32 %v6101_v53, %v5783_v37 }
 0x234   : >> { %v1541_v59 = vadd.f32 %v7242_v24, %v1537_v10  ;;  %v6132_v6 = vadd.f32 %v6120_v57, %v7148_v48  ;;  %v1828_v4 = vsub.f32 %v6115_v26, %v6099_v51  ;;  %v7243_v41 = vsub.f32 %v5737_v27, %v5739_v42 }
 0x235   : >> { %vm1788_vm9 = vcmp.ge.f32.partialorder %v6124_v22, 0.0  ;;  %v1790_v15 = vsub.f32 %v5798_v1, %v6124_v22  ;;  %v1859_v29 = vadd.f32 %v1858_v28, %v5960_v50  ;;  %v7246_v27 = vsub.f32 %v5741_v19, %v5743_v32 }
 0x236   : >> { %v1568_v44 = vadd.f32 %v7243_v41, %v1541_v59  ;;  %vm6146_vm5 = vmxor %vm1734_vm8, %vm1788_vm9  ;;  %v1821_v12 = vsub.f32 %v6124_v22, %v6132_v6  ;;  %v1862_v60 = vadd.f32 %v1861_v17, %v5813_v49  ;;  %v1864_v31 = vsel %vm448_vm1, %v7240_v39, %v7148_v48 }
 0x237   : >> { %vm1791_vm15 = vcmp.ge.f32.partialorder %v1790_v15, 0.0  ;;  %v6167_v50 = vsel %vm1849_vm12, %v1859_v29, %v7226_v21  ;;  %v1866_v19 = vsel %vm1765_vm14, %v1859_v29, %v7226_v21  ;;  %v7247_v32 = vsub.f32 %v5865_v40, %v5867_v3 }
 0x238   : >> { %v1572_v42 = vadd.f32 %v7246_v27, %v1568_v44  ;;  %v1792_v10 = vsel %vm1791_vm15, 1e-09, %v7164_v2  ;;  %vm1822_vm6 = vcmp.ge.f32.partialorder %v1821_v12, 0.0  ;;  %v6176_v17 = vsel %vm1849_vm12, %v1862_v60, %v1864_v31  ;;  %v7251_v31 = vld [vmem:[#allocation8_spill] sm:$0xff] }
 0x239   : >> { %v1793_v49 = vadd.f32 %v1792_v10, %v1790_v15  ;;  %v1823_v28 = vsel %vm1822_vm6, 1e-09, %v7164_v2  ;;  %v6181_v63 = vsel %vm448_vm1, %v7226_v21, %v1866_v19  ;;  %v1868_v24 = vsel %vm1765_vm14, %v1862_v60, %v7148_v48 }
 0x23a   : >> { %v1622_v25 = vadd.f32 %v7247_v32, %v1572_v42  ;;  %v1824_v45 = vadd.f32 %v1823_v28, %v1821_v12  ;;  %v6188_v59 = vadd.f32 %v6176_v17, %v7148_v48  ;;  %v6196_v3 = vsel %vm448_vm1, %v7240_v39, %v1868_v24  ;;  %v7252_v32 = vld [vmem:[#allocation48_spill] sm:$0xff] }
 0x23b   : >> { %2452 = vrcp.f32 %v1793_v49  ;;  %v1880_v21 = vsub.f32 %v6167_v50, %v6115_v26  ;;  %v7248_v41 = vsub.f32 %v5937_v38, %v5939_v61  ;;  %v6207_v11 = vadd.f32 %v6196_v3, %v7148_v48  ;;  %v7250_v38 = vld [vmem:[#allocation27_spill] sm:$0xff] }
 0x23c   : >> { %v1626_v40 = vadd.f32 %v1625_v9, %v1622_v25  ;;  %2454 = vrcp.f32 %v1824_v45  ;;  %v1873_v47 = vsub.f32 %v6132_v6, %v6188_v59  ;;  %v1911_v52 = vsub.f32 %v6181_v63, %v6167_v50 }
 0x23d   : >> { %v1904_v15 = vsub.f32 %v6188_v59, %v6207_v11  ;;  %v1933_v61 = vsub.f32 %v6207_v11, %v7250_v38  ;;  %v1978_v10 = vsub.s32 4, %v7251_v31  ;;  %vm1819_vm10 = vcmp.ge.f32.partialorder %v6132_v6, 0.0 }
 0x23e   : >> { %v1653_v44 = vadd.f32 %v7248_v41, %v1626_v40  ;;  %vm1874_vm1 = vcmp.ge.f32.partialorder %v1873_v47, 0.0  ;;  %vm1871_vm4 = vcmp.ge.f32.partialorder %v6188_v59, 0.0  ;;  %v6260_v25 = vsel %vm473_vm2, %v7252_v32, %v3014_v5  ;;  %vm1820_vm3 = vmxor %vm1788_vm9, %vm1819_vm10 }
 0x23f   : >> { %v1875_v39 = vsel %vm1874_vm1, 1e-09, %v7164_v2  ;;  %vm1905_vm13 = vcmp.ge.f32.partialorder %v1904_v15, 0.0  ;;  %vm1934_vm7 = vcmp.ge.f32.partialorder %v1933_v61, 0.0  ;;  %v1804_v49 = vsel %vm1788_vm9, %v6101_v53, %v3014_v5  ;;  %vm1872_vm11 = vmxor %vm1819_vm10, %vm1871_vm4 }
 0x240   : >> { %v1657_v9 = vadd.f32 %v7249_v56, %v1653_v44  ;;  %v1876_v12 = vadd.f32 %v1875_v39, %v1873_v47  ;;  %v1906_v29 = vsel %vm1905_vm13, 1e-09, %v7164_v2  ;;  %v1935_v27 = vsel %vm1934_vm7, 1e-09, %v7164_v2 }
 0x241   : >> { %v1907_v34 = vadd.f32 %v1906_v29, %v1904_v15  ;;  %v1936_v42 = vadd.f32 %v1935_v27, %v1933_v61  ;;  %v1883_v47 = vsub.f32 %v6176_v17, %v6120_v57  ;;  %v1887_v41 = vsel %vm1871_vm4, %v6176_v17, %v3014_v5 }
 0x242   : >> { %v1728_v48 = vadd.f32 %v1727_v46, %v1657_v9  ;;  %2456 = vrcp.f32 %v1876_v12  ;;  %v1969_v46 = vsub.s32 5, %v7251_v31  ;;  %v1914_v9 = vsub.f32 %v6196_v3, %v6176_v17 }
 0x243   : >> { %2458 = vrcp.f32 %v1907_v34 }
 0x244   : >> { %v1732_v33 = vadd.f32 %v1731_v7, %v1728_v48  ;;  %2460 = vrcp.f32 %v1936_v42  ;;  %v6239_v7 = vld [vmem:[%s2721_s21] sm:$0xff] }
 0x245   : >> { %v2453_v60 = vpop.eup %2452  ;;  %v6242_v35 = vrot.slane %v6239_v7, %v1978_v10  ;;  %v6248_v0 = vrot.slane %v6239_v7, %v1969_v46 }
 0x246   : >> { %v1759_v13 = vadd.f32 %v1758_v20, %v1732_v33  ;;  %v2455_v8 = vpop.eup %2454  ;;  %v1795_v19 = vmul.f32 %v2453_v60, %v5798_v1  ;;  %v1831_v20 = vsub.f32 %v6120_v57, %v6101_v53 }
 0x247   : >> { %v1826_v2 = vmul.f32 %v2455_v8, %v6124_v22 }
 0x248   : >> { %v1763_v55 = vadd.f32 %v1762_v58, %v1759_v13  ;;  %v1796_v62 = vmin.f32 %v1795_v19, 1.0 }
 0x249   : >> { %v1827_v18 = vmin.f32 %v1826_v2, 1.0 }
 0x24a   : >> { %v1798_v36 = vmul.f32 %v1797_v23, %v1796_v62  ;;  %v1801_v58 = vmul.f32 %v1800_v30, %v1796_v62  ;;  %v1835_v30 = vsel %vm1819_vm10, %v6120_v57, %v3014_v5 }
 0x24b   : >> { %v1829_v28 = vmul.f32 %v1828_v4, %v1827_v18  ;;  %v1832_v23 = vmul.f32 %v1831_v20, %v1827_v18 }
 0x24c   : >> { %v2457_v45 = vpop.eup %2456  ;;  %v1799_v24 = vadd.f32 %v1798_v36, %v5774_v16  ;;  %v1802_v40 = vadd.f32 %v1801_v58, %v5783_v37 }
 0x24d   : >> { %v1830_v4 = vadd.f32 %v1829_v28, %v6099_v51  ;;  %v1833_v44 = vadd.f32 %v1832_v23, %v6101_v53  ;;  %v1878_v56 = vmul.f32 %v2457_v45, %v6132_v6  ;;  %v2459_v29 = vpop.eup %2458 }
 0x24e   : >> { %v1803_v16 = vsel %vm6146_vm5, %v1799_v24, %v6099_v51  ;;  %v1805_v37 = vsel %vm6146_vm5, %v1802_v40, %v1804_v49  ;;  %v1806_v39 = vsel %vm1734_vm8, %v1799_v24, %v6099_v51  ;;  %v1808_v15 = vsel %vm1734_vm8, %v1802_v40, %v3014_v5 }
 0x24f   : >> { %v1807_v12 = vsel %vm1788_vm9, %v6099_v51, %v1806_v39  ;;  %v1809_v61 = vsel %vm1788_vm9, %v6101_v53, %v1808_v15  ;;  %v1810_v48 = vmul.f32 %v1805_v37, %v6053_v54  ;;  %v1811_v43 = vmul.f32 %v1803_v16, %v6064_v14  ;;  %v2461_v51 = vpop.eup %2460 }
 0x250   : >> { %v1814_v1 = vmul.f32 %v1809_v61, %v1803_v16  ;;  %v1815_v33 = vmul.f32 %v1807_v12, %v1805_v37  ;;  %v1834_v34 = vsel %vm1820_vm3, %v1830_v4, %v6115_v26  ;;  %v1836_v27 = vsel %vm1820_vm3, %v1833_v44, %v1835_v30 }
 0x251   : >> { %v1812_v42 = vsub.f32 %v1810_v48, %v1811_v43  ;;  %v1837_v53 = vsel %vm1788_vm9, %v1830_v4, %v6115_v26  ;;  %v1839_v54 = vsel %vm1788_vm9, %v1833_v44, %v3014_v5  ;;  %v1841_v14 = vmul.f32 %v1836_v27, %v1807_v12 }
 0x252   : >> { %v1816_v60 = vsub.f32 %v1814_v1, %v1815_v33  ;;  %v1838_v10 = vsel %vm1819_vm10, %v6115_v26, %v1837_v53  ;;  %v1840_v13 = vsel %vm1819_vm10, %v6120_v57, %v1839_v54  ;;  %v1842_v8 = vmul.f32 %v1834_v34, %v1809_v61 }
 0x253   : >> { %v1813_v46 = vadd.f32 %v1812_v42, %v1763_v55  ;;  %v1845_v19 = vmul.f32 %v1840_v13, %v1834_v34  ;;  %v1846_v2 = vmul.f32 %v1838_v10, %v1836_v27  ;;  %v1879_v62 = vmin.f32 %v1878_v56, 1.0  ;;  %v7253_v55 = vld [vmem:[#allocation34_spill] sm:$0xff] }
 0x254   : >> { %v1843_v18 = vsub.f32 %v1841_v14, %v1842_v8  ;;  %vm1902_vm8 = vcmp.ge.f32.partialorder %v6207_v11, 0.0  ;;  %v1909_v22 = vmul.f32 %v2459_v29, %v6188_v59  ;;  %v1938_v20 = vmul.f32 %v2461_v51, %v6207_v11 }
 0x255   : >> { %v1817_v36 = vadd.f32 %v1816_v60, %v1813_v46  ;;  %v1847_v58 = vsub.f32 %v1845_v19, %v1846_v2  ;;  %v1881_v49 = vmul.f32 %v1880_v21, %v1879_v62  ;;  %v1884_v28 = vmul.f32 %v1883_v47, %v1879_v62  ;;  %vm1903_vm14 = vmxor %vm1871_vm4, %vm1902_vm8  ;;  %v1982_v2 = vpop.permute.xlu1 %1981 }
 0x256   : >> { %v1910_v23 = vmin.f32 %v1909_v22, 1.0  ;;  %v1939_v30 = vmin.f32 %v1938_v20, 1.0  ;;  %v1940_v45 = vsub.f32 %v7253_v55, %v6181_v63  ;;  %v1943_v24 = vsub.f32 %v7252_v32, %v6196_v3  ;;  %vm1932_vm0 = vmxor %vm1902_vm8, %vm473_vm2  ;;  %v1973_v20 = vpop.permute.xlu0 %1972 }
 0x257   : >> { %v1844_v40 = vadd.f32 %v1843_v18, %v1817_v36  ;;  %v1882_v4 = vadd.f32 %v1881_v49, %v6115_v26  ;;  %v1885_v44 = vadd.f32 %v1884_v28, %v6120_v57  ;;  %v1918_v56 = vsel %vm1902_vm8, %v6196_v3, %v3014_v5 }
 0x258   : >> { %v1912_v21 = vmul.f32 %v1911_v52, %v1910_v23  ;;  %v1915_v47 = vmul.f32 %v1914_v9, %v1910_v23  ;;  %v1941_v16 = vmul.f32 %v1940_v45, %v1939_v30  ;;  %v1944_v37 = vmul.f32 %v1943_v24, %v1939_v30  ;;  %v7254_v30 = vld [vmem:[#allocation83_spill] sm:$0xff]  ;;  %v7255_v24 = vld [vmem:[#allocation30_spill] sm:$0xff] }
 0x259   : >> { %v1848_v26 = vadd.f32 %v1847_v58, %v1844_v40  ;;  %v1886_v57 = vsel %vm1872_vm11, %v1882_v4, %v6167_v50  ;;  %v1888_v39 = vsel %vm1872_vm11, %v1885_v44, %v1887_v41  ;;  %v1889_v15 = vsel %vm1819_vm10, %v1882_v4, %v6167_v50 }
 0x25a   : >> { %v1890_v12 = vsel %vm1871_vm4, %v6167_v50, %v1889_v15  ;;  %v1891_v61 = vsel %vm1819_vm10, %v1885_v44, %v3014_v5  ;;  %v1893_v52 = vmul.f32 %v1888_v39, %v1838_v10  ;;  %v1894_v9 = vmul.f32 %v1886_v57, %v1840_v13 }
 0x25b   : >> { %v1892_v48 = vsel %vm1871_vm4, %v6176_v17, %v1891_v61  ;;  %v1898_v43 = vmul.f32 %v1890_v12, %v1888_v39  ;;  %v1913_v41 = vadd.f32 %v1912_v21, %v6167_v50  ;;  %v1916_v29 = vadd.f32 %v1915_v47, %v6176_v17 }
 0x25c   : >> { %v1895_v1 = vsub.f32 %v1893_v52, %v1894_v9  ;;  %v1897_v33 = vmul.f32 %v1892_v48, %v1886_v57  ;;  %v1942_v6 = vadd.f32 %v1941_v16, %v6181_v63  ;;  %v1945_v34 = vadd.f32 %v1944_v37, %v6196_v3  ;;  %v2466_v52 = vld [vmem:[%s2721_s21 + $0x8] sm:$0x3] }
 0x25d   : >> { %v1917_v27 = vsel %vm1903_vm14, %v1913_v41, %v6181_v63  ;;  %v1919_v51 = vsel %vm1903_vm14, %v1916_v29, %v1918_v56  ;;  %v1920_v50 = vsel %vm1871_vm4, %v1913_v41, %v6181_v63  ;;  %v1922_v17 = vsel %vm1871_vm4, %v1916_v29, %v3014_v5 }
 0x25e   : >> { %v1896_v42 = vadd.f32 %v1895_v1, %v1848_v26  ;;  %v1899_v53 = vsub.f32 %v1897_v33, %v1898_v43  ;;  %v1921_v54 = vsel %vm1902_vm8, %v6181_v63, %v1920_v50  ;;  %v1923_v14 = vsel %vm1902_vm8, %v6196_v3, %v1922_v17  ;;  %v1994_v26 = vpop.permute.xlu1 %1993  ;;  %v2004_v43 = vpop.permute.xlu0 %2003 }
 0x25f   : >> { %v1924_v60 = vmul.f32 %v1919_v51, %v1890_v12  ;;  %v1925_v10 = vmul.f32 %v1917_v27, %v1892_v48  ;;  %v1928_v13 = vmul.f32 %v1923_v14, %v1917_v27  ;;  %v1929_v8 = vmul.f32 %v1921_v54, %v1919_v51 }
 0x260   : >> { %v1900_v59 = vadd.f32 %v1899_v53, %v1896_v42  ;;  %v1946_v46 = vsel %vm1932_vm0, %v1942_v6, %v7253_v55  ;;  %v1948_v19 = vsel %vm1932_vm0, %v1945_v34, %v6260_v25  ;;  %v1949_v63 = vsel %vm1902_vm8, %v1942_v6, %v7253_v55 }
 0x261   : >> { %v1926_v3 = vsub.f32 %v1924_v60, %v1925_v10  ;;  %v1930_v62 = vsub.f32 %v1928_v13, %v1929_v8  ;;  %v1950_v18 = vsel %vm473_vm2, %v7253_v55, %v1949_v63  ;;  %v1951_v22 = vsel %vm1902_vm8, %v1945_v34, %v3014_v5 }
 0x262   : >> { %v1952_v25 = vsel %vm473_vm2, %v7252_v32, %v1951_v22  ;;  %v1953_v36 = vmul.f32 %v1948_v19, %v1921_v54  ;;  %v1954_v58 = vmul.f32 %v1946_v46, %v1923_v14  ;;  %v1958_v49 = vmul.f32 %v1950_v18, %v1948_v19  ;;  %v2014_v41 = vpop.permute.xlu1 %2013 }
 0x263   : >> { %v1927_v28 = vadd.f32 %v1926_v3, %v1900_v59  ;;  %v1957_v23 = vmul.f32 %v1952_v25, %v1946_v46  ;;  %v1961_v45 = vmul.f32 %v1950_v18, %v7254_v30  ;;  %v1962_v40 = vmul.f32 %v1952_v25, %v7255_v24 }
 0x264   : >> { %v1984_v55 = vmax.f32 %v6242_v35, %v1982_v2  ;;  %v1955_v4 = vsub.f32 %v1953_v36, %v1954_v58  ;;  %v1975_v11 = vmin.f32 %v6248_v0, %v1973_v20  ;;  %v1990_v32 = vsub.s32 6, %v7251_v31 }
 0x265   : >> { %v1931_v5 = vadd.f32 %v1930_v62, %v1927_v28  ;;  %v1959_v44 = vsub.f32 %v1957_v23, %v1958_v49  ;;  %v1963_v56 = vsub.f32 %v1961_v45, %v1962_v40  ;;  %v7256_v9 = vsub.s32 1, %v7251_v31 }
 0x266   : >> { %v1985_v21 = vsub.f32 %v1975_v11, %v1984_v55  ;;  %v1991_v37 = vrot.slane %v6239_v7, %v1990_v32  ;;  %vm2015_vm9 = vcmp.eq.s32.totalorder %v2014_v41, 1 }
 0x267   : >> { %v1956_v38 = vadd.f32 %v1955_v4, %v1931_v5  ;;  %v2009_v48 = vrot.slane %v2466_v52, %v7256_v9 }
 0x268   : >> { %v1986_v57 = vmax.f32 %v1985_v21, 0.0  ;;  %v1996_v35 = vadd.f32 %v1994_v26, %v1991_v37 }
 0x269   : >> { %v1960_v47 = vadd.f32 %v1959_v44, %v1956_v38  ;;  %vm2010_vm2 = vcmp.eq.f32.partialorder %v2004_v43, %v2009_v48 }
 0x26a   : >> { %vm2016_vm5 = vmand %vm2015_vm9, %vm2010_vm2 }
 0x26b   : >> { %v1964_v16 = vadd.f32 %v1963_v56, %v1960_v47 }
 0x26d   : >> { %v1965_v39 = vmul.f32 0.5, %v1964_v16 }
 0x26f   : >> { %v1966_v15 = vmax.f32 %v1965_v39, 0.0 }
 0x271   : >> { %v1987_v12 = vmul.f32 %v1986_v57, %v1966_v15 }
 0x273   : >> { %v1997_v61 = vsub.f32 %v1996_v35, %v1987_v12 }
 0x275   : >> { %v1998_v0 = vmax.f32 %v1997_v61, 1e-06 }
 0x277   : >> { %2462 = vrcp.f32 %v1998_v0 }
 0x281   : >> { %v2463_v7 = vpop.eup %2462 }
 0x282   : >> { %v2000_v29 = vmul.f32 %v2463_v7, %v1987_v12 }
 0x284   : >> { %v2017_v1 = vsel %vm2016_vm5, %v2000_v29, -1.0 }
 0x285   : >> { %v2018_v33 = vrot.slane %v2017_v1, 4 }
 0x287   : >> { %v2019_v6 = vmax.f32 %v2017_v1, %v2018_v33 }
 0x289   : >> { %v2020_v34 = vrot.slane %v2019_v6, 2 }
 0x28b   : >> { %v2021_v27 = vmax.f32 %v2019_v6, %v2020_v34 }
 0x28d   : >> { %v2022_v51 = vrot.slane %v2021_v27, 1 }
 0x28f   : >> { %v2023_v50 = vmax.f32 %v2021_v27, %v2022_v51 }
 0x291   : >> { %vm2026_vm15 = vcmp.ge.f32.partialorder %v2017_v1, %v2023_v50  ;;  %v2038_v17 = vmax.f32 %v2023_v50, -1.0  ;;  %vm2037_vm13 = vcmp.gt.f32.partialorder %v2023_v50, -1.0 }
 0x292   : >> { %v2027_v42 = vsel %vm2026_vm15, %v7251_v31, 8 }
 0x293   : >> { %v2028_v53 = vrot.slane %v2027_v42, 4  ;;  %v2040_v54 = vmax.f32 %v2038_v17, 0.0 }
 0x295   : >> { %vm2029_vm12 = vcmp.lt.s32.totalorder %v2027_v42, %v2028_v53  ;;  %2042 = vst [vmem:[%s2041_s23] sm:$0x1] %v2040_v54 }
 0x296   : >> { %v2030_v14 = vsel %vm2029_vm12, %v2027_v42, %v2028_v53 }
 0x297   : >> { %v2031_v60 = vrot.slane %v2030_v14, 2 }
 0x299   : >> { %vm2032_vm6 = vcmp.lt.s32.totalorder %v2030_v14, %v2031_v60 }
 0x29a   : >> { %v2033_v10 = vsel %vm2032_vm6, %v2030_v14, %v2031_v60  ;;  %231 = sbr.rel (!%p229_p12) target bundleno = 28 (0x1c), region = 93 }
 0x29b   : >> { %v2034_v13 = vrot.slane %v2033_v10, 1 }
 0x29d   : >> { %vm2035_vm1 = vcmp.lt.s32.totalorder %v2033_v10, %v2034_v13 }
 0x29e   : >> { %v2036_v8 = vsel %vm2035_vm1, %v2033_v10, %v2034_v13 }
 0x29f   : >> { %v2039_v59 = vsel %vm2037_vm13, %v2036_v8, 0 }
 0x2a0   : >> { %2044 = vst [vmem:[%s2043_s27] sm:$0x1] %v2039_v59 }
 0x2a1   : > { %2480 = shalt.err (!%p2477_p6)
}
 0x2a2   : > { %s2481_s10 = scalar_lea.hbm %s6420_s4, 32  ;;  %s2485_s23 = scalar_lea.hbm %s6513_s2, 64 }
 0x2a3   : > { %p2482_p7 = scmp.ne.s32.totalorder %s6420_s4, %s2481_s10  ;;  %p2486_p11 = scmp.lt.u32.totalorder %s6420_s4, %s6513_s2 }
 0x2a4   : > { %p2487_p12 = scmp.lt.u32.totalorder %s2485_s23, %s2481_s10  ;;  %p2489_p0 = scmp.lt.u32.totalorder %s2481_s10, %s6420_s4 }
 0x2a5   : > { %p2483_p9 = pnand %p2482_p7, %p2665_p4 }
 0x2a6   : > { %p2488_p13 = por %p2487_p12, %p2486_p11 }
 0x2a7   : > { %p2484_p10 = pneg %p2483_p9 }
 0x2a8   : > { %p2490_p1 = por %p2489_p0, %p2488_p13 }
 0x2aa   : > { %p2491_p2 = pnand %p2490_p1, %p2484_p10 }
 0x2ac   : > { %2494 = shalt.err (!%p2491_p2)
}
 0x2ad   : > { %s2602_s30 = smov 16   ;;  %s2603_s8 = smov 1  }
 0x2ae   : > { %2244 = dma.vmem_to_hbm [thread:$0]  (%p2665_p4), %s6423_s5, 32, %s6420_s4, %s2046_s7, %s2602_s30, %s2602_s30, %s2603_s8  }
 0x2af   : > { %s6457_s18 = scalar_lea.hbm %s6514_s3, %s2242_s28  ;;  %s2084_s10 = sshll.u32 %s2698_s11, 4  ;;  %s6460_s10 = int_to_ptr.vmem [resolvable:$true] %s2084_s10 }
 0x2b0   : > { %s2051_s19 = scalar_lea.sflag [#allocation5], %s2681_s26  ;;  %s2495_s21 = scalar_lea.vmem %s6460_s10, 32 }
 0x2b1   : > { %p2496_p3 = scmp.ne.s32.totalorder %s6460_s10, %s2495_s21  ;;  %s2604_s23 = smov [#allocation4]  }
 0x2b2   : > { %s2499_s4 = sshll.u32 %s2604_s23, 4  ;;  %s2500_s4 = int_to_ptr.vmem [resolvable:$false] %s2499_s4 }
 0x2b3   : > { %p2497_p5 = pnand %p2496_p3, %p2665_p4  ;;  %s2501_s15 = scalar_lea.vmem %s2500_s4, 64 }
 0x2b4   : > { %p2502_p7 = scmp.lt.s32.totalorder %s6460_s10, %s2500_s4  ;;  %p2503_p9 = scmp.lt.s32.totalorder %s2501_s15, %s2495_s21 }
 0x2b5   : > { %p2498_p6 = pneg %p2497_p5 }
 0x2b6   : > { %p2504_p10 = por %p2503_p9, %p2502_p7 }
 0x2b8   : > { %p2505_p11 = pnand %p2504_p10, %p2498_p6 }
 0x2ba   : > { %2508 = shalt.err (!%p2505_p11)
}
 0x2bb   : > { %s2509_s11 = scalar_lea.hbm %s6457_s18, 32  ;;  %s2513_s7 = scalar_lea.hbm %s6514_s3, 64 }
 0x2bc   : > { %p2510_p12 = scmp.ne.s32.totalorder %s6457_s18, %s2509_s11  ;;  %p2514_p1 = scmp.lt.u32.totalorder %s6457_s18, %s6514_s3 }
 0x2bd   : > { %p2515_p2 = scmp.lt.u32.totalorder %s2513_s7, %s2509_s11  ;;  %p2517_p5 = scmp.lt.u32.totalorder %s2509_s11, %s6457_s18 }
 0x2be   : > { %p2511_p13 = pnand %p2510_p12, %p2665_p4 }
 0x2bf   : > { %p2516_p3 = por %p2515_p2, %p2514_p1 }
 0x2c0   : > { %p2512_p0 = pneg %p2511_p13 }
 0x2c1   : > { %p2518_p6 = por %p2517_p5, %p2516_p3 }
 0x2c3   : > { %p2519_p7 = pnand %p2518_p6, %p2512_p0 }
 0x2c5   : > { %2522 = shalt.err (!%p2519_p7)
}
 0x2c6   : > { %2245 = dma.vmem_to_hbm [thread:$0]  (%p2665_p4), %s6460_s10, 32, %s6457_s18, %s2051_s19, %s2602_s30, %s2602_s30, %s2603_s8  }
 0x2c7 PF: > { %p2255_p9 = scmp.ge.s32.totalorder %s2581_s17, 2  ;;  %s2099_s6 = sand.u32 1, %s2561_s12  }
 0x2c8   : > { %s2100_s9 = scalar_lea.sflag [#allocation3], %s2099_s6 }
 0x2c9   : > { %p2249_p10 = pnand %p2255_p9, %p2672_p8 }
 0x2cb   : > { %2552 = dma.done.wait (!%p2249_p10), %s2100_s9, 32  }
 0x2cc   : > { %2554 = vsyncadd (!%p2249_p10), %s2100_s9, 4294967264  ;;  %s2109_s22 = scalar_lea.sflag [#allocation5], %s2099_s6 }
 0x2cd   : > { %2556 = dma.done.wait (!%p2249_p10), %s2109_s22, 32  }
 0x2ce   : > { %2558 = vsyncadd (!%p2249_p10), %s2109_s22, 4294967264  ;;  %s20_s17 = sadd.s32 1, %s2581_s17   ;;  %s7257_s12 = smov %s2565_s13 }
 0x2cf   : > { %p17_p11 = scmp.ge.s32.totalorder %s20_s17, 4   ;;  %s7258_s13 = smov %s2569_s14 }
 0x2d0   : > { %s7259_s14 = smov %s2678_s25  ;;  %s7260_s15 = smov %s2577_s16 }
 0x2d1   : > { %s7261_s16 = smov %s7263_s20  ;;  %19 = sbr.rel (!%p17_p11) target bundleno = 6 (0x6), region = 104 }
 0x2d8   :  { %2114 = vsyncpa [#allocation3], 1 }
 0x2d9   :  { %2116 = vsyncpa [#allocation3 + $0x1], 1 }
 0x2da   :  { %2117 = vsyncpa [#allocation5], 1 }
 0x2db   :  { %2119 = vsyncpa [#allocation5 + $0x1], 1 }

</bundles_post_ra>
